<compile_context>
chip_gen: v7x
topology: tpu7x:2x2x1
jax: 0.10.0
libtpu: 0.0.40
codegen_flags: <defaults>
</compile_context>

<pallas_src>
import functools

import jax
import jax.numpy as jnp
from jax.experimental import pallas as pl
from jax.experimental.pallas import tpu as pltpu


def _fused_convnet_kernel(x_ref,
                          w1_ref, s1_ref, w2_ref, s2_ref,
                          w3_ref, s3_ref, w4_ref, s4_ref,
                          o_ref,
                          xp1, xp2, xp3, xp4,
                          *, bb, H, W, cin, hid):
    """All four conv blocks for a block of `bb` images, fully VMEM-resident."""

    def stage(xp_ref, act, hc, wc):
        # Zero-padded (pad=1) copy of `act` into VMEM scratch; halo stays zero.
        xp_ref[...] = jnp.zeros_like(xp_ref)
        xp_ref[:, 1:hc + 1, 1:wc + 1, :] = act.astype(xp_ref.dtype)

    def conv_pool(xp_ref, w_ref, s_ref, hc, wc, c, im2col):
        # conv3x3 (bf16 MXU, f32 acc) + fused BN shift + ReLU + 2x2 maxpool.
        cout = s_ref.shape[-1]
        m = bb * hc * wc
        if im2col:
            # One big contraction: K = 9*c fills the MXU and pops one result
            # instead of 9 FIFO pops + VPU accumulation adds.
            patches = [xp_ref[:, ky:ky + hc, kx:kx + wc, :]
                       for ky in range(3) for kx in range(3)]
            slab = jnp.concatenate(patches, axis=-1)           # (bb,hc,wc,9c) bf16
            slab = slab.reshape(m, 9 * c)                      # M on sublanes
            y = jnp.dot(slab, w_ref[...],
                        preferred_element_type=jnp.float32)
        else:
            # Tiny-Cin first layer: 9 accumulated taps, spatial flattened to M.
            y = jnp.zeros((m, cout), jnp.float32)
            for ky in range(3):
                for kx in range(3):
                    patch = xp_ref[:, ky:ky + hc, kx:kx + wc, :].reshape(m, c)
                    y = y + jnp.dot(patch, w_ref[ky * 3 + kx],
                                    preferred_element_type=jnp.float32)
        y = y + s_ref[...]                                     # fused BN shift (f32)
        y = jnp.maximum(y, 0.0)                                # ReLU
        # 2x2 max-pool (row pairs never straddle images since hc is even).
        y = y.reshape(bb * hc // 2, 2, wc // 2, 2, cout)
        y = jnp.max(y, axis=3)
        y = jnp.max(y, axis=1)
        return y.reshape(bb, hc // 2, wc // 2, cout)           # f32

    h, w = H, W
    stage(xp1, x_ref[...], h, w)
    a = conv_pool(xp1, w1_ref, s1_ref, h, w, cin, im2col=False)

    h, w = h // 2, w // 2
    stage(xp2, a, h, w)
    a = conv_pool(xp2, w2_ref, s2_ref, h, w, hid, im2col=True)

    h, w = h // 2, w // 2
    stage(xp3, a, h, w)
    a = conv_pool(xp3, w3_ref, s3_ref, h, w, hid, im2col=True)

    h, w = h // 2, w // 2
    stage(xp4, a, h, w)
    a = conv_pool(xp4, w4_ref, s4_ref, h, w, hid, im2col=True)

    o_ref[...] = a.astype(o_ref.dtype)                         # (bb, H/16, W/16, hid)


def convnet_forward(x_nchw, params, images_per_block=None):
    """Matches Convnet.forward: 4x [conv+BN+ReLU+pool] then x.view(N, -1)."""
    N, cin, H, W = x_nchw.shape
    hid = params[0][0].shape[-1]
    assert len(params) == 4
    if H % 16 or W % 16:
        raise ValueError("spatial dims must be divisible by 16 (four 2x2 pools)")

    # Images per grid step: amortize the ~0.35us/step overhead, keep >=2 grid steps
    # so both v7x TensorCores get work, cap so large batches stay well inside VMEM.
    bb = images_per_block
    if bb is None:
        bb = min(16, max(1, N // 2))
        while N % bb:
            bb -= 1
    assert N % bb == 0

    # Host-side prep (once): NCHW->NHWC, bf16 cast, fold the BN scale into the conv
    # weights so the kernel only adds a per-channel shift.
    x = jnp.transpose(x_nchw, (0, 2, 3, 1)).astype(jnp.bfloat16)
    w_list, s_list = [], []
    for idx, (w, scale, shift) in enumerate(params):
        ci = w.shape[2]
        wf = (w * scale[None, None, None, :]).astype(jnp.bfloat16)
        if idx == 0:
            wf = wf.reshape(9, ci, hid)       # tap-indexed (layer-1 path, K=ci per tap)
        else:
            wf = wf.reshape(9 * ci, hid)      # im2col layout (single K=9*ci matmul)
        w_list.append(wf)
        s_list.append(shift.reshape(1, hid).astype(jnp.float32))

    hf, wf2 = H // 16, W // 16
    kernel = functools.partial(_fused_convnet_kernel,
                               bb=bb, H=H, W=W, cin=cin, hid=hid)

    in_specs = [pl.BlockSpec((bb, H, W, cin), lambda i: (i, 0, 0, 0))]
    wspecs = [
        pl.BlockSpec((9, cin, hid), lambda i: (0, 0, 0)),
        pl.BlockSpec((9 * hid, hid), lambda i: (0, 0)),
        pl.BlockSpec((9 * hid, hid), lambda i: (0, 0)),
        pl.BlockSpec((9 * hid, hid), lambda i: (0, 0)),
    ]
    sspec = pl.BlockSpec((1, hid), lambda i: (0, 0))
    for k in range(4):
        in_specs += [wspecs[k], sspec]

    out = pl.pallas_call(
        kernel,
        out_shape=jax.ShapeDtypeStruct((N, hf, wf2, hid), jnp.float32),
        grid_spec=pltpu.PrefetchScalarGridSpec(
            num_scalar_prefetch=0,
            grid=(N // bb,),
            in_specs=in_specs,
            out_specs=pl.BlockSpec((bb, hf, wf2, hid), lambda i: (i, 0, 0, 0)),
            scratch_shapes=[
                pltpu.VMEM((bb, H + 2, W + 2, cin), jnp.bfloat16),
                pltpu.VMEM((bb, H // 2 + 2, W // 2 + 2, hid), jnp.bfloat16),
                pltpu.VMEM((bb, H // 4 + 2, W // 4 + 2, hid), jnp.bfloat16),
                pltpu.VMEM((bb, H // 8 + 2, W // 8 + 2, hid), jnp.bfloat16),
            ],
        ),
        compiler_params=pltpu.CompilerParams(
            dimension_semantics=("parallel",)),
    )(x, w_list[0], s_list[0], w_list[1], s_list[1],
      w_list[2], s_list[2], w_list[3], s_list[3])

    out = jnp.transpose(out, (0, 3, 1, 2))    # NHWC -> NCHW
    return out.reshape(N, -1)                 # x.view(N, -1)


def init_params(key, x_dim=3, hid_dim=64, num_blocks=4):
    """Deterministic synthetic parameters for the 4 conv blocks (inference-mode BN)."""
    params = []
    cin = x_dim
    for _ in range(num_blocks):
        k_w, k_b, k_g, k_bt, key = jax.random.split(key, 5)
        fan_in = cin * 9
        w = jax.random.normal(k_w, (3, 3, cin, hid_dim), jnp.float32)
        w = w * (2.0 / fan_in) ** 0.5
        conv_bias = 0.1 * jax.random.normal(k_b, (hid_dim,), jnp.float32)
        gamma = jax.random.uniform(k_g, (hid_dim,), jnp.float32)
        beta = 0.1 * jax.random.normal(k_bt, (hid_dim,), jnp.float32)
        running_mean = jnp.zeros((hid_dim,), jnp.float32)
        running_var = jnp.ones((hid_dim,), jnp.float32)
        eps = 1e-5
        eff_scale = gamma / jnp.sqrt(running_var + eps)     # fold BN + conv bias
        eff_shift = beta + eff_scale * (conv_bias - running_mean)
        params.append((w, eff_scale, eff_shift))
        cin = hid_dim
    return params


def _reference_forward(x_nchw, params):
    """Pure-JAX f32 reference (lax conv) for a correctness sanity check."""
    x = x_nchw
    for (w, scale, shift) in params:
        w_oihw = jnp.transpose(w, (3, 2, 0, 1))             # HWIO -> OIHW
        y = jax.lax.conv_general_dilated(
            x, w_oihw, window_strides=(1, 1), padding=((1, 1), (1, 1)),
            dimension_numbers=("NCHW", "OIHW", "NCHW"))
        y = y * scale[None, :, None, None] + shift[None, :, None, None]
        y = jnp.maximum(y, 0.0)
        y = jax.lax.reduce_window(y, -jnp.inf, jax.lax.max,
                                  (1, 1, 2, 2), (1, 1, 2, 2), "VALID")
        x = y
    return x.reshape(x.shape[0], -1)


if __name__ == "__main__":
    key = jax.random.PRNGKey(0)
    k_x, k_p = jax.random.split(key)

    N, C, HW = 2, 3, 16                                     # small synthetic shapes
    x = jax.random.normal(k_x, (N, C, HW, HW), jnp.float32)
    params = init_params(k_p, x_dim=C, hid_dim=64, num_blocks=4)

    out = jax.block_until_ready(convnet_forward(x, params))  # (2, 64) after 4 pools
    ref = jax.block_until_ready(_reference_forward(x, params))

    assert out.shape == ref.shape, (out.shape, ref.shape)
    # Tolerance loosened vs pure-f32: MXU operands and inter-layer activations are bf16
    # (f32 accumulation / affine / pooling), reference is f32 end-to-end.
    assert jnp.allclose(out, ref, rtol=5e-2, atol=5e-2), float(
        jnp.max(jnp.abs(out - ref)))

    print("KERNEL_OK")
</pallas_src>

<mosaic_0001>
module attributes {stable_mosaic.version = 11 : i64} {
  func.func @_fused_convnet_kernel(%arg0: i32, %arg1: memref<1x16x16x3xbf16, #tpu.memory_space<vmem>>, %arg2: memref<9x3x64xbf16, #tpu.memory_space<vmem>>, %arg3: memref<1x64xf32, #tpu.memory_space<vmem>>, %arg4: memref<576x64xbf16, #tpu.memory_space<vmem>>, %arg5: memref<1x64xf32, #tpu.memory_space<vmem>>, %arg6: memref<576x64xbf16, #tpu.memory_space<vmem>>, %arg7: memref<1x64xf32, #tpu.memory_space<vmem>>, %arg8: memref<576x64xbf16, #tpu.memory_space<vmem>>, %arg9: memref<1x64xf32, #tpu.memory_space<vmem>>, %arg10: memref<1x1x1x64xf32, #tpu.memory_space<vmem>>, %arg11: memref<1x18x18x3xbf16, #tpu.memory_space<vmem>>, %arg12: memref<1x10x10x64xbf16, #tpu.memory_space<vmem>>, %arg13: memref<1x6x6x64xbf16, #tpu.memory_space<vmem>>, %arg14: memref<1x4x4x64xbf16, #tpu.memory_space<vmem>>) attributes {dimension_semantics = [#tpu.dimension_semantics<parallel>], iteration_bounds = array<i64: 2>, scalar_prefetch = 0 : i64, scratch_operands = 4 : i64, tpu.core_type = #tpu.core_type<tc>, window_params = [{transform_indices = @transform_0, window_bounds = array<i64: 1, 16, 16, 3>}, {pipeline_mode = #tpu.pipeline_mode<synchronous>, transform_indices = @transform_1, window_bounds = array<i64: 9, 3, 64>}, {pipeline_mode = #tpu.pipeline_mode<synchronous>, transform_indices = @transform_2, window_bounds = array<i64: 1, 64>}, {pipeline_mode = #tpu.pipeline_mode<synchronous>, transform_indices = @transform_3, window_bounds = array<i64: 576, 64>}, {pipeline_mode = #tpu.pipeline_mode<synchronous>, transform_indices = @transform_4, window_bounds = array<i64: 1, 64>}, {pipeline_mode = #tpu.pipeline_mode<synchronous>, transform_indices = @transform_5, window_bounds = array<i64: 576, 64>}, {pipeline_mode = #tpu.pipeline_mode<synchronous>, transform_indices = @transform_6, window_bounds = array<i64: 1, 64>}, {pipeline_mode = #tpu.pipeline_mode<synchronous>, transform_indices = @transform_7, window_bounds = array<i64: 576, 64>}, {pipeline_mode = #tpu.pipeline_mode<synchronous>, transform_indices = @transform_8, window_bounds = array<i64: 1, 64>}, {transform_indices = @transform_9, window_bounds = array<i64: 1, 1, 1, 64>}]} {
    %c0 = arith.constant 0 : index
    %c0_0 = arith.constant 0 : index
    %c0_1 = arith.constant 0 : index
    %c0_2 = arith.constant 0 : index
    %0 = vector.load %arg1[%c0, %c0_0, %c0_1, %c0_2] : memref<1x16x16x3xbf16, #tpu.memory_space<vmem>>, vector<1x16x16x3xbf16>
    %cst = arith.constant 0.000000e+00 : bf16
    %1 = vector.broadcast %cst : bf16 to vector<1x18x18x3xbf16>
    %c0_3 = arith.constant 0 : index
    %c0_4 = arith.constant 0 : index
    %c0_5 = arith.constant 0 : index
    %c0_6 = arith.constant 0 : index
    %2 = vector.load %arg11[%c0_3, %c0_4, %c0_5, %c0_6] : memref<1x18x18x3xbf16, #tpu.memory_space<vmem>>, vector<1x18x18x3xbf16>
    tpu.vector_store %arg11[%c0_3, %c0_4, %c0_5, %c0_6], %1 {strides = array<i32>} : memref<1x18x18x3xbf16, #tpu.memory_space<vmem>>, vector<1x18x18x3xbf16>,
    %c0_7 = arith.constant 0 : index
    %c1 = arith.constant 1 : index
    %c1_8 = arith.constant 1 : index
    %c0_9 = arith.constant 0 : index
    %3 = vector.load %arg11[%c0_7, %c1, %c1_8, %c0_9] : memref<1x18x18x3xbf16, #tpu.memory_space<vmem>>, vector<1x16x16x3xbf16>
    tpu.vector_store %arg11[%c0_7, %c1, %c1_8, %c0_9], %0 {strides = array<i32>} : memref<1x18x18x3xbf16, #tpu.memory_space<vmem>>, vector<1x16x16x3xbf16>,
    %cst_10 = arith.constant 0.000000e+00 : f32
    %4 = vector.broadcast %cst_10 : f32 to vector<256x64xf32>
    %c0_11 = arith.constant 0 : index
    %c0_12 = arith.constant 0 : index
    %c0_13 = arith.constant 0 : index
    %c0_14 = arith.constant 0 : index
    %5 = vector.load %arg11[%c0_11, %c0_12, %c0_13, %c0_14] : memref<1x18x18x3xbf16, #tpu.memory_space<vmem>>, vector<1x16x16x3xbf16>
    %6 = vector.shape_cast %5 : vector<1x16x16x3xbf16> to vector<256x3xbf16>
    %c0_15 = arith.constant 0 : index
    %c0_16 = arith.constant 0 : index
    %c0_17 = arith.constant 0 : index
    %7 = vector.load %arg2[%c0_15, %c0_16, %c0_17] : memref<9x3x64xbf16, #tpu.memory_space<vmem>>, vector<1x3x64xbf16>
    %8 = vector.shape_cast %7 : vector<1x3x64xbf16> to vector<3x64xbf16>
    %cst_18 = arith.constant dense<0.000000e+00> : vector<256x64xf32>
    %9 = tpu.matmul %6, %8, %cst_18 {dimension_numbers = #tpu.dot_dimension_numbers<[1], [0], [0], [1], [0, 0, 1, 1], [], []>} : vector<256x3xbf16>, vector<3x64xbf16>, vector<256x64xf32> -> vector<256x64xf32>
    %10 = arith.addf %4, %9 : vector<256x64xf32>
    %c0_19 = arith.constant 0 : index
    %c0_20 = arith.constant 0 : index
    %c1_21 = arith.constant 1 : index
    %c0_22 = arith.constant 0 : index
    %11 = vector.load %arg11[%c0_19, %c0_20, %c1_21, %c0_22] : memref<1x18x18x3xbf16, #tpu.memory_space<vmem>>, vector<1x16x16x3xbf16>
    %12 = vector.shape_cast %11 : vector<1x16x16x3xbf16> to vector<256x3xbf16>
    %c1_23 = arith.constant 1 : index
    %c0_24 = arith.constant 0 : index
    %c0_25 = arith.constant 0 : index
    %13 = vector.load %arg2[%c1_23, %c0_24, %c0_25] : memref<9x3x64xbf16, #tpu.memory_space<vmem>>, vector<1x3x64xbf16>
    %14 = vector.shape_cast %13 : vector<1x3x64xbf16> to vector<3x64xbf16>
    %cst_26 = arith.constant dense<0.000000e+00> : vector<256x64xf32>
    %15 = tpu.matmul %12, %14, %cst_26 {dimension_numbers = #tpu.dot_dimension_numbers<[1], [0], [0], [1], [0, 0, 1, 1], [], []>} : vector<256x3xbf16>, vector<3x64xbf16>, vector<256x64xf32> -> vector<256x64xf32>
    %16 = arith.addf %10, %15 : vector<256x64xf32>
    %c0_27 = arith.constant 0 : index
    %c0_28 = arith.constant 0 : index
    %c2 = arith.constant 2 : index
    %c0_29 = arith.constant 0 : index
    %17 = vector.load %arg11[%c0_27, %c0_28, %c2, %c0_29] : memref<1x18x18x3xbf16, #tpu.memory_space<vmem>>, vector<1x16x16x3xbf16>
    %18 = vector.shape_cast %17 : vector<1x16x16x3xbf16> to vector<256x3xbf16>
    %c2_30 = arith.constant 2 : index
    %c0_31 = arith.constant 0 : index
    %c0_32 = arith.constant 0 : index
    %19 = vector.load %arg2[%c2_30, %c0_31, %c0_32] : memref<9x3x64xbf16, #tpu.memory_space<vmem>>, vector<1x3x64xbf16>
    %20 = vector.shape_cast %19 : vector<1x3x64xbf16> to vector<3x64xbf16>
    %cst_33 = arith.constant dense<0.000000e+00> : vector<256x64xf32>
    %21 = tpu.matmul %18, %20, %cst_33 {dimension_numbers = #tpu.dot_dimension_numbers<[1], [0], [0], [1], [0, 0, 1, 1], [], []>} : vector<256x3xbf16>, vector<3x64xbf16>, vector<256x64xf32> -> vector<256x64xf32>
    %22 = arith.addf %16, %21 : vector<256x64xf32>
    %c0_34 = arith.constant 0 : index
    %c1_35 = arith.constant 1 : index
    %c0_36 = arith.constant 0 : index
    %c0_37 = arith.constant 0 : index
    %23 = vector.load %arg11[%c0_34, %c1_35, %c0_36, %c0_37] : memref<1x18x18x3xbf16, #tpu.memory_space<vmem>>, vector<1x16x16x3xbf16>
    %24 = vector.shape_cast %23 : vector<1x16x16x3xbf16> to vector<256x3xbf16>
    %c3 = arith.constant 3 : index
    %c0_38 = arith.constant 0 : index
    %c0_39 = arith.constant 0 : index
    %25 = vector.load %arg2[%c3, %c0_38, %c0_39] : memref<9x3x64xbf16, #tpu.memory_space<vmem>>, vector<1x3x64xbf16>
    %26 = vector.shape_cast %25 : vector<1x3x64xbf16> to vector<3x64xbf16>
    %cst_40 = arith.constant dense<0.000000e+00> : vector<256x64xf32>
    %27 = tpu.matmul %24, %26, %cst_40 {dimension_numbers = #tpu.dot_dimension_numbers<[1], [0], [0], [1], [0, 0, 1, 1], [], []>} : vector<256x3xbf16>, vector<3x64xbf16>, vector<256x64xf32> -> vector<256x64xf32>
    %28 = arith.addf %22, %27 : vector<256x64xf32>
    %c0_41 = arith.constant 0 : index
    %c1_42 = arith.constant 1 : index
    %c1_43 = arith.constant 1 : index
    %c0_44 = arith.constant 0 : index
    %29 = vector.load %arg11[%c0_41, %c1_42, %c1_43, %c0_44] : memref<1x18x18x3xbf16, #tpu.memory_space<vmem>>, vector<1x16x16x3xbf16>
    %30 = vector.shape_cast %29 : vector<1x16x16x3xbf16> to vector<256x3xbf16>
    %c4 = arith.constant 4 : index
    %c0_45 = arith.constant 0 : index
    %c0_46 = arith.constant 0 : index
    %31 = vector.load %arg2[%c4, %c0_45, %c0_46] : memref<9x3x64xbf16, #tpu.memory_space<vmem>>, vector<1x3x64xbf16>
    %32 = vector.shape_cast %31 : vector<1x3x64xbf16> to vector<3x64xbf16>
    %cst_47 = arith.constant dense<0.000000e+00> : vector<256x64xf32>
    %33 = tpu.matmul %30, %32, %cst_47 {dimension_numbers = #tpu.dot_dimension_numbers<[1], [0], [0], [1], [0, 0, 1, 1], [], []>} : vector<256x3xbf16>, vector<3x64xbf16>, vector<256x64xf32> -> vector<256x64xf32>
    %34 = arith.addf %28, %33 : vector<256x64xf32>
    %c0_48 = arith.constant 0 : index
    %c1_49 = arith.constant 1 : index
    %c2_50 = arith.constant 2 : index
    %c0_51 = arith.constant 0 : index
    %35 = vector.load %arg11[%c0_48, %c1_49, %c2_50, %c0_51] : memref<1x18x18x3xbf16, #tpu.memory_space<vmem>>, vector<1x16x16x3xbf16>
    %36 = vector.shape_cast %35 : vector<1x16x16x3xbf16> to vector<256x3xbf16>
    %c5 = arith.constant 5 : index
    %c0_52 = arith.constant 0 : index
    %c0_53 = arith.constant 0 : index
    %37 = vector.load %arg2[%c5, %c0_52, %c0_53] : memref<9x3x64xbf16, #tpu.memory_space<vmem>>, vector<1x3x64xbf16>
    %38 = vector.shape_cast %37 : vector<1x3x64xbf16> to vector<3x64xbf16>
    %cst_54 = arith.constant dense<0.000000e+00> : vector<256x64xf32>
    %39 = tpu.matmul %36, %38, %cst_54 {dimension_numbers = #tpu.dot_dimension_numbers<[1], [0], [0], [1], [0, 0, 1, 1], [], []>} : vector<256x3xbf16>, vector<3x64xbf16>, vector<256x64xf32> -> vector<256x64xf32>
    %40 = arith.addf %34, %39 : vector<256x64xf32>
    %c0_55 = arith.constant 0 : index
    %c2_56 = arith.constant 2 : index
    %c0_57 = arith.constant 0 : index
    %c0_58 = arith.constant 0 : index
    %41 = vector.load %arg11[%c0_55, %c2_56, %c0_57, %c0_58] : memref<1x18x18x3xbf16, #tpu.memory_space<vmem>>, vector<1x16x16x3xbf16>
    %42 = vector.shape_cast %41 : vector<1x16x16x3xbf16> to vector<256x3xbf16>
    %c6 = arith.constant 6 : index
    %c0_59 = arith.constant 0 : index
    %c0_60 = arith.constant 0 : index
    %43 = vector.load %arg2[%c6, %c0_59, %c0_60] : memref<9x3x64xbf16, #tpu.memory_space<vmem>>, vector<1x3x64xbf16>
    %44 = vector.shape_cast %43 : vector<1x3x64xbf16> to vector<3x64xbf16>
    %cst_61 = arith.constant dense<0.000000e+00> : vector<256x64xf32>
    %45 = tpu.matmul %42, %44, %cst_61 {dimension_numbers = #tpu.dot_dimension_numbers<[1], [0], [0], [1], [0, 0, 1, 1], [], []>} : vector<256x3xbf16>, vector<3x64xbf16>, vector<256x64xf32> -> vector<256x64xf32>
    %46 = arith.addf %40, %45 : vector<256x64xf32>
    %c0_62 = arith.constant 0 : index
    %c2_63 = arith.constant 2 : index
    %c1_64 = arith.constant 1 : index
    %c0_65 = arith.constant 0 : index
    %47 = vector.load %arg11[%c0_62, %c2_63, %c1_64, %c0_65] : memref<1x18x18x3xbf16, #tpu.memory_space<vmem>>, vector<1x16x16x3xbf16>
    %48 = vector.shape_cast %47 : vector<1x16x16x3xbf16> to vector<256x3xbf16>
    %c7 = arith.constant 7 : index
    %c0_66 = arith.constant 0 : index
    %c0_67 = arith.constant 0 : index
    %49 = vector.load %arg2[%c7, %c0_66, %c0_67] : memref<9x3x64xbf16, #tpu.memory_space<vmem>>, vector<1x3x64xbf16>
    %50 = vector.shape_cast %49 : vector<1x3x64xbf16> to vector<3x64xbf16>
    %cst_68 = arith.constant dense<0.000000e+00> : vector<256x64xf32>
    %51 = tpu.matmul %48, %50, %cst_68 {dimension_numbers = #tpu.dot_dimension_numbers<[1], [0], [0], [1], [0, 0, 1, 1], [], []>} : vector<256x3xbf16>, vector<3x64xbf16>, vector<256x64xf32> -> vector<256x64xf32>
    %52 = arith.addf %46, %51 : vector<256x64xf32>
    %c0_69 = arith.constant 0 : index
    %c2_70 = arith.constant 2 : index
    %c2_71 = arith.constant 2 : index
    %c0_72 = arith.constant 0 : index
    %53 = vector.load %arg11[%c0_69, %c2_70, %c2_71, %c0_72] : memref<1x18x18x3xbf16, #tpu.memory_space<vmem>>, vector<1x16x16x3xbf16>
    %54 = vector.shape_cast %53 : vector<1x16x16x3xbf16> to vector<256x3xbf16>
    %c8 = arith.constant 8 : index
    %c0_73 = arith.constant 0 : index
    %c0_74 = arith.constant 0 : index
    %55 = vector.load %arg2[%c8, %c0_73, %c0_74] : memref<9x3x64xbf16, #tpu.memory_space<vmem>>, vector<1x3x64xbf16>
    %56 = vector.shape_cast %55 : vector<1x3x64xbf16> to vector<3x64xbf16>
    %cst_75 = arith.constant dense<0.000000e+00> : vector<256x64xf32>
    %57 = tpu.matmul %54, %56, %cst_75 {dimension_numbers = #tpu.dot_dimension_numbers<[1], [0], [0], [1], [0, 0, 1, 1], [], []>} : vector<256x3xbf16>, vector<3x64xbf16>, vector<256x64xf32> -> vector<256x64xf32>
    %58 = arith.addf %52, %57 : vector<256x64xf32>
    %c0_76 = arith.constant 0 : index
    %c0_77 = arith.constant 0 : index
    %59 = vector.load %arg3[%c0_76, %c0_77] : memref<1x64xf32, #tpu.memory_space<vmem>>, vector<1x64xf32>
    %60 = vector.broadcast %59 : vector<1x64xf32> to vector<256x64xf32>
    %61 = arith.addf %58, %60 : vector<256x64xf32>
    %cst_78 = arith.constant 0.000000e+00 : f32
    %62 = vector.broadcast %cst_78 : f32 to vector<256x64xf32>
    %63 = arith.maximumf %61, %62 : vector<256x64xf32>
    %64 = vector.shape_cast %63 : vector<256x64xf32> to vector<8x2x8x2x64xf32>
    %cst_79 = arith.constant dense<0xFF800000> : vector<8x2x8x64xf32>
    %65 = vector.multi_reduction <maximumf>, %64, %cst_79 [3] : vector<8x2x8x2x64xf32> to vector<8x2x8x64xf32>
    %cst_80 = arith.constant dense<0xFF800000> : vector<8x8x64xf32>
    %66 = vector.multi_reduction <maximumf>, %65, %cst_80 [1] : vector<8x2x8x64xf32> to vector<8x8x64xf32>
    %67 = vector.shape_cast %66 : vector<8x8x64xf32> to vector<1x8x8x64xf32>
    %cst_81 = arith.constant 0.000000e+00 : bf16
    %68 = vector.broadcast %cst_81 : bf16 to vector<1x10x10x64xbf16>
    %c0_82 = arith.constant 0 : index
    %c0_83 = arith.constant 0 : index
    %c0_84 = arith.constant 0 : index
    %c0_85 = arith.constant 0 : index
    %69 = vector.load %arg12[%c0_82, %c0_83, %c0_84, %c0_85] : memref<1x10x10x64xbf16, #tpu.memory_space<vmem>>, vector<1x10x10x64xbf16>
    tpu.vector_store %arg12[%c0_82, %c0_83, %c0_84, %c0_85], %68 {strides = array<i32>} : memref<1x10x10x64xbf16, #tpu.memory_space<vmem>>, vector<1x10x10x64xbf16>,
    %70 = arith.truncf %67 : vector<1x8x8x64xf32> to vector<1x8x8x64xbf16>
    %c0_86 = arith.constant 0 : index
    %c1_87 = arith.constant 1 : index
    %c1_88 = arith.constant 1 : index
    %c0_89 = arith.constant 0 : index
    %71 = vector.load %arg12[%c0_86, %c1_87, %c1_88, %c0_89] : memref<1x10x10x64xbf16, #tpu.memory_space<vmem>>, vector<1x8x8x64xbf16>
    tpu.vector_store %arg12[%c0_86, %c1_87, %c1_88, %c0_89], %70 {strides = array<i32>} : memref<1x10x10x64xbf16, #tpu.memory_space<vmem>>, vector<1x8x8x64xbf16>,
    %c0_90 = arith.constant 0 : index
    %c0_91 = arith.constant 0 : index
    %c0_92 = arith.constant 0 : index
    %c0_93 = arith.constant 0 : index
    %72 = vector.load %arg12[%c0_90, %c0_91, %c0_92, %c0_93] : memref<1x10x10x64xbf16, #tpu.memory_space<vmem>>, vector<1x8x8x64xbf16>
    %c0_94 = arith.constant 0 : index
    %c0_95 = arith.constant 0 : index
    %c1_96 = arith.constant 1 : index
    %c0_97 = arith.constant 0 : index
    %73 = vector.load %arg12[%c0_94, %c0_95, %c1_96, %c0_97] : memref<1x10x10x64xbf16, #tpu.memory_space<vmem>>, vector<1x8x8x64xbf16>
    %c0_98 = arith.constant 0 : index
    %c0_99 = arith.constant 0 : index
    %c2_100 = arith.constant 2 : index
    %c0_101 = arith.constant 0 : index
    %74 = vector.load %arg12[%c0_98, %c0_99, %c2_100, %c0_101] : memref<1x10x10x64xbf16, #tpu.memory_space<vmem>>, vector<1x8x8x64xbf16>
    %c0_102 = arith.constant 0 : index
    %c1_103 = arith.constant 1 : index
    %c0_104 = arith.constant 0 : index
    %c0_105 = arith.constant 0 : index
    %75 = vector.load %arg12[%c0_102, %c1_103, %c0_104, %c0_105] : memref<1x10x10x64xbf16, #tpu.memory_space<vmem>>, vector<1x8x8x64xbf16>
    %c0_106 = arith.constant 0 : index
    %c1_107 = arith.constant 1 : index
    %c1_108 = arith.constant 1 : index
    %c0_109 = arith.constant 0 : index
    %76 = vector.load %arg12[%c0_106, %c1_107, %c1_108, %c0_109] : memref<1x10x10x64xbf16, #tpu.memory_space<vmem>>, vector<1x8x8x64xbf16>
    %c0_110 = arith.constant 0 : index
    %c1_111 = arith.constant 1 : index
    %c2_112 = arith.constant 2 : index
    %c0_113 = arith.constant 0 : index
    %77 = vector.load %arg12[%c0_110, %c1_111, %c2_112, %c0_113] : memref<1x10x10x64xbf16, #tpu.memory_space<vmem>>, vector<1x8x8x64xbf16>
    %c0_114 = arith.constant 0 : index
    %c2_115 = arith.constant 2 : index
    %c0_116 = arith.constant 0 : index
    %c0_117 = arith.constant 0 : index
    %78 = vector.load %arg12[%c0_114, %c2_115, %c0_116, %c0_117] : memref<1x10x10x64xbf16, #tpu.memory_space<vmem>>, vector<1x8x8x64xbf16>
    %c0_118 = arith.constant 0 : index
    %c2_119 = arith.constant 2 : index
    %c1_120 = arith.constant 1 : index
    %c0_121 = arith.constant 0 : index
    %79 = vector.load %arg12[%c0_118, %c2_119, %c1_120, %c0_121] : memref<1x10x10x64xbf16, #tpu.memory_space<vmem>>, vector<1x8x8x64xbf16>
    %c0_122 = arith.constant 0 : index
    %c2_123 = arith.constant 2 : index
    %c2_124 = arith.constant 2 : index
    %c0_125 = arith.constant 0 : index
    %80 = vector.load %arg12[%c0_122, %c2_123, %c2_124, %c0_125] : memref<1x10x10x64xbf16, #tpu.memory_space<vmem>>, vector<1x8x8x64xbf16>
    %81 = tpu.concatenate %72, %73, %74, %75, %76, %77, %78, %79, %80 in 3 : vector<1x8x8x64xbf16>, vector<1x8x8x64xbf16>, vector<1x8x8x64xbf16>, vector<1x8x8x64xbf16>, vector<1x8x8x64xbf16>, vector<1x8x8x64xbf16>, vector<1x8x8x64xbf16>, vector<1x8x8x64xbf16>, vector<1x8x8x64xbf16> -> vector<1x8x8x576xbf16>
    %82 = vector.shape_cast %81 : vector<1x8x8x576xbf16> to vector<64x576xbf16>
    %c0_126 = arith.constant 0 : index
    %c0_127 = arith.constant 0 : index
    %83 = vector.load %arg4[%c0_126, %c0_127] : memref<576x64xbf16, #tpu.memory_space<vmem>>, vector<576x64xbf16>
    %cst_128 = arith.constant dense<0.000000e+00> : vector<64x64xf32>
    %84 = tpu.matmul %82, %83, %cst_128 {dimension_numbers = #tpu.dot_dimension_numbers<[1], [0], [0], [1], [0, 0, 1, 1], [], []>} : vector<64x576xbf16>, vector<576x64xbf16>, vector<64x64xf32> -> vector<64x64xf32>
    %c0_129 = arith.constant 0 : index
    %c0_130 = arith.constant 0 : index
    %85 = vector.load %arg5[%c0_129, %c0_130] : memref<1x64xf32, #tpu.memory_space<vmem>>, vector<1x64xf32>
    %86 = vector.broadcast %85 : vector<1x64xf32> to vector<64x64xf32>
    %87 = arith.addf %84, %86 : vector<64x64xf32>
    %cst_131 = arith.constant 0.000000e+00 : f32
    %88 = vector.broadcast %cst_131 : f32 to vector<64x64xf32>
    %89 = arith.maximumf %87, %88 : vector<64x64xf32>
    %90 = vector.shape_cast %89 : vector<64x64xf32> to vector<4x2x4x2x64xf32>
    %cst_132 = arith.constant dense<0xFF800000> : vector<4x2x4x64xf32>
    %91 = vector.multi_reduction <maximumf>, %90, %cst_132 [3] : vector<4x2x4x2x64xf32> to vector<4x2x4x64xf32>
    %cst_133 = arith.constant dense<0xFF800000> : vector<4x4x64xf32>
    %92 = vector.multi_reduction <maximumf>, %91, %cst_133 [1] : vector<4x2x4x64xf32> to vector<4x4x64xf32>
    %93 = vector.shape_cast %92 : vector<4x4x64xf32> to vector<1x4x4x64xf32>
    %cst_134 = arith.constant 0.000000e+00 : bf16
    %94 = vector.broadcast %cst_134 : bf16 to vector<1x6x6x64xbf16>
    %c0_135 = arith.constant 0 : index
    %c0_136 = arith.constant 0 : index
    %c0_137 = arith.constant 0 : index
    %c0_138 = arith.constant 0 : index
    %95 = vector.load %arg13[%c0_135, %c0_136, %c0_137, %c0_138] : memref<1x6x6x64xbf16, #tpu.memory_space<vmem>>, vector<1x6x6x64xbf16>
    tpu.vector_store %arg13[%c0_135, %c0_136, %c0_137, %c0_138], %94 {strides = array<i32>} : memref<1x6x6x64xbf16, #tpu.memory_space<vmem>>, vector<1x6x6x64xbf16>,
    %96 = arith.truncf %93 : vector<1x4x4x64xf32> to vector<1x4x4x64xbf16>
    %c0_139 = arith.constant 0 : index
    %c1_140 = arith.constant 1 : index
    %c1_141 = arith.constant 1 : index
    %c0_142 = arith.constant 0 : index
    %97 = vector.load %arg13[%c0_139, %c1_140, %c1_141, %c0_142] : memref<1x6x6x64xbf16, #tpu.memory_space<vmem>>, vector<1x4x4x64xbf16>
    tpu.vector_store %arg13[%c0_139, %c1_140, %c1_141, %c0_142], %96 {strides = array<i32>} : memref<1x6x6x64xbf16, #tpu.memory_space<vmem>>, vector<1x4x4x64xbf16>,
    %c0_143 = arith.constant 0 : index
    %c0_144 = arith.constant 0 : index
    %c0_145 = arith.constant 0 : index
    %c0_146 = arith.constant 0 : index
    %98 = vector.load %arg13[%c0_143, %c0_144, %c0_145, %c0_146] : memref<1x6x6x64xbf16, #tpu.memory_space<vmem>>, vector<1x4x4x64xbf16>
    %c0_147 = arith.constant 0 : index
    %c0_148 = arith.constant 0 : index
    %c1_149 = arith.constant 1 : index
    %c0_150 = arith.constant 0 : index
    %99 = vector.load %arg13[%c0_147, %c0_148, %c1_149, %c0_150] : memref<1x6x6x64xbf16, #tpu.memory_space<vmem>>, vector<1x4x4x64xbf16>
    %c0_151 = arith.constant 0 : index
    %c0_152 = arith.constant 0 : index
    %c2_153 = arith.constant 2 : index
    %c0_154 = arith.constant 0 : index
    %100 = vector.load %arg13[%c0_151, %c0_152, %c2_153, %c0_154] : memref<1x6x6x64xbf16, #tpu.memory_space<vmem>>, vector<1x4x4x64xbf16>
    %c0_155 = arith.constant 0 : index
    %c1_156 = arith.constant 1 : index
    %c0_157 = arith.constant 0 : index
    %c0_158 = arith.constant 0 : index
    %101 = vector.load %arg13[%c0_155, %c1_156, %c0_157, %c0_158] : memref<1x6x6x64xbf16, #tpu.memory_space<vmem>>, vector<1x4x4x64xbf16>
    %c0_159 = arith.constant 0 : index
    %c1_160 = arith.constant 1 : index
    %c1_161 = arith.constant 1 : index
    %c0_162 = arith.constant 0 : index
    %102 = vector.load %arg13[%c0_159, %c1_160, %c1_161, %c0_162] : memref<1x6x6x64xbf16, #tpu.memory_space<vmem>>, vector<1x4x4x64xbf16>
    %c0_163 = arith.constant 0 : index
    %c1_164 = arith.constant 1 : index
    %c2_165 = arith.constant 2 : index
    %c0_166 = arith.constant 0 : index
    %103 = vector.load %arg13[%c0_163, %c1_164, %c2_165, %c0_166] : memref<1x6x6x64xbf16, #tpu.memory_space<vmem>>, vector<1x4x4x64xbf16>
    %c0_167 = arith.constant 0 : index
    %c2_168 = arith.constant 2 : index
    %c0_169 = arith.constant 0 : index
    %c0_170 = arith.constant 0 : index
    %104 = vector.load %arg13[%c0_167, %c2_168, %c0_169, %c0_170] : memref<1x6x6x64xbf16, #tpu.memory_space<vmem>>, vector<1x4x4x64xbf16>
    %c0_171 = arith.constant 0 : index
    %c2_172 = arith.constant 2 : index
    %c1_173 = arith.constant 1 : index
    %c0_174 = arith.constant 0 : index
    %105 = vector.load %arg13[%c0_171, %c2_172, %c1_173, %c0_174] : memref<1x6x6x64xbf16, #tpu.memory_space<vmem>>, vector<1x4x4x64xbf16>
    %c0_175 = arith.constant 0 : index
    %c2_176 = arith.constant 2 : index
    %c2_177 = arith.constant 2 : index
    %c0_178 = arith.constant 0 : index
    %106 = vector.load %arg13[%c0_175, %c2_176, %c2_177, %c0_178] : memref<1x6x6x64xbf16, #tpu.memory_space<vmem>>, vector<1x4x4x64xbf16>
    %107 = tpu.concatenate %98, %99, %100, %101, %102, %103, %104, %105, %106 in 3 : vector<1x4x4x64xbf16>, vector<1x4x4x64xbf16>, vector<1x4x4x64xbf16>, vector<1x4x4x64xbf16>, vector<1x4x4x64xbf16>, vector<1x4x4x64xbf16>, vector<1x4x4x64xbf16>, vector<1x4x4x64xbf16>, vector<1x4x4x64xbf16> -> vector<1x4x4x576xbf16>
    %108 = vector.shape_cast %107 : vector<1x4x4x576xbf16> to vector<16x576xbf16>
    %c0_179 = arith.constant 0 : index
    %c0_180 = arith.constant 0 : index
    %109 = vector.load %arg6[%c0_179, %c0_180] : memref<576x64xbf16, #tpu.memory_space<vmem>>, vector<576x64xbf16>
    %cst_181 = arith.constant dense<0.000000e+00> : vector<16x64xf32>
    %110 = tpu.matmul %108, %109, %cst_181 {dimension_numbers = #tpu.dot_dimension_numbers<[1], [0], [0], [1], [0, 0, 1, 1], [], []>} : vector<16x576xbf16>, vector<576x64xbf16>, vector<16x64xf32> -> vector<16x64xf32>
    %c0_182 = arith.constant 0 : index
    %c0_183 = arith.constant 0 : index
    %111 = vector.load %arg7[%c0_182, %c0_183] : memref<1x64xf32, #tpu.memory_space<vmem>>, vector<1x64xf32>
    %112 = vector.broadcast %111 : vector<1x64xf32> to vector<16x64xf32>
    %113 = arith.addf %110, %112 : vector<16x64xf32>
    %cst_184 = arith.constant 0.000000e+00 : f32
    %114 = vector.broadcast %cst_184 : f32 to vector<16x64xf32>
    %115 = arith.maximumf %113, %114 : vector<16x64xf32>
    %116 = vector.shape_cast %115 : vector<16x64xf32> to vector<2x2x2x2x64xf32>
    %cst_185 = arith.constant dense<0xFF800000> : vector<2x2x2x64xf32>
    %117 = vector.multi_reduction <maximumf>, %116, %cst_185 [3] : vector<2x2x2x2x64xf32> to vector<2x2x2x64xf32>
    %cst_186 = arith.constant dense<0xFF800000> : vector<2x2x64xf32>
    %118 = vector.multi_reduction <maximumf>, %117, %cst_186 [1] : vector<2x2x2x64xf32> to vector<2x2x64xf32>
    %119 = vector.shape_cast %118 : vector<2x2x64xf32> to vector<1x2x2x64xf32>
    %cst_187 = arith.constant 0.000000e+00 : bf16
    %120 = vector.broadcast %cst_187 : bf16 to vector<1x4x4x64xbf16>
    %c0_188 = arith.constant 0 : index
    %c0_189 = arith.constant 0 : index
    %c0_190 = arith.constant 0 : index
    %c0_191 = arith.constant 0 : index
    %121 = vector.load %arg14[%c0_188, %c0_189, %c0_190, %c0_191] : memref<1x4x4x64xbf16, #tpu.memory_space<vmem>>, vector<1x4x4x64xbf16>
    tpu.vector_store %arg14[%c0_188, %c0_189, %c0_190, %c0_191], %120 {strides = array<i32>} : memref<1x4x4x64xbf16, #tpu.memory_space<vmem>>, vector<1x4x4x64xbf16>,
    %122 = arith.truncf %119 : vector<1x2x2x64xf32> to vector<1x2x2x64xbf16>
    %c0_192 = arith.constant 0 : index
    %c1_193 = arith.constant 1 : index
    %c1_194 = arith.constant 1 : index
    %c0_195 = arith.constant 0 : index
    %123 = vector.load %arg14[%c0_192, %c1_193, %c1_194, %c0_195] : memref<1x4x4x64xbf16, #tpu.memory_space<vmem>>, vector<1x2x2x64xbf16>
    tpu.vector_store %arg14[%c0_192, %c1_193, %c1_194, %c0_195], %122 {strides = array<i32>} : memref<1x4x4x64xbf16, #tpu.memory_space<vmem>>, vector<1x2x2x64xbf16>,
    %c0_196 = arith.constant 0 : index
    %c0_197 = arith.constant 0 : index
    %c0_198 = arith.constant 0 : index
    %c0_199 = arith.constant 0 : index
    %124 = vector.load %arg14[%c0_196, %c0_197, %c0_198, %c0_199] : memref<1x4x4x64xbf16, #tpu.memory_space<vmem>>, vector<1x2x2x64xbf16>
    %c0_200 = arith.constant 0 : index
    %c0_201 = arith.constant 0 : index
    %c1_202 = arith.constant 1 : index
    %c0_203 = arith.constant 0 : index
    %125 = vector.load %arg14[%c0_200, %c0_201, %c1_202, %c0_203] : memref<1x4x4x64xbf16, #tpu.memory_space<vmem>>, vector<1x2x2x64xbf16>
    %c0_204 = arith.constant 0 : index
    %c0_205 = arith.constant 0 : index
    %c2_206 = arith.constant 2 : index
    %c0_207 = arith.constant 0 : index
    %126 = vector.load %arg14[%c0_204, %c0_205, %c2_206, %c0_207] : memref<1x4x4x64xbf16, #tpu.memory_space<vmem>>, vector<1x2x2x64xbf16>
    %c0_208 = arith.constant 0 : index
    %c1_209 = arith.constant 1 : index
    %c0_210 = arith.constant 0 : index
    %c0_211 = arith.constant 0 : index
    %127 = vector.load %arg14[%c0_208, %c1_209, %c0_210, %c0_211] : memref<1x4x4x64xbf16, #tpu.memory_space<vmem>>, vector<1x2x2x64xbf16>
    %c0_212 = arith.constant 0 : index
    %c1_213 = arith.constant 1 : index
    %c1_214 = arith.constant 1 : index
    %c0_215 = arith.constant 0 : index
    %128 = vector.load %arg14[%c0_212, %c1_213, %c1_214, %c0_215] : memref<1x4x4x64xbf16, #tpu.memory_space<vmem>>, vector<1x2x2x64xbf16>
    %c0_216 = arith.constant 0 : index
    %c1_217 = arith.constant 1 : index
    %c2_218 = arith.constant 2 : index
    %c0_219 = arith.constant 0 : index
    %129 = vector.load %arg14[%c0_216, %c1_217, %c2_218, %c0_219] : memref<1x4x4x64xbf16, #tpu.memory_space<vmem>>, vector<1x2x2x64xbf16>
    %c0_220 = arith.constant 0 : index
    %c2_221 = arith.constant 2 : index
    %c0_222 = arith.constant 0 : index
    %c0_223 = arith.constant 0 : index
    %130 = vector.load %arg14[%c0_220, %c2_221, %c0_222, %c0_223] : memref<1x4x4x64xbf16, #tpu.memory_space<vmem>>, vector<1x2x2x64xbf16>
    %c0_224 = arith.constant 0 : index
    %c2_225 = arith.constant 2 : index
    %c1_226 = arith.constant 1 : index
    %c0_227 = arith.constant 0 : index
    %131 = vector.load %arg14[%c0_224, %c2_225, %c1_226, %c0_227] : memref<1x4x4x64xbf16, #tpu.memory_space<vmem>>, vector<1x2x2x64xbf16>
    %c0_228 = arith.constant 0 : index
    %c2_229 = arith.constant 2 : index
    %c2_230 = arith.constant 2 : index
    %c0_231 = arith.constant 0 : index
    %132 = vector.load %arg14[%c0_228, %c2_229, %c2_230, %c0_231] : memref<1x4x4x64xbf16, #tpu.memory_space<vmem>>, vector<1x2x2x64xbf16>
    %133 = tpu.concatenate %124, %125, %126, %127, %128, %129, %130, %131, %132 in 3 : vector<1x2x2x64xbf16>, vector<1x2x2x64xbf16>, vector<1x2x2x64xbf16>, vector<1x2x2x64xbf16>, vector<1x2x2x64xbf16>, vector<1x2x2x64xbf16>, vector<1x2x2x64xbf16>, vector<1x2x2x64xbf16>, vector<1x2x2x64xbf16> -> vector<1x2x2x576xbf16>
    %134 = vector.shape_cast %133 : vector<1x2x2x576xbf16> to vector<4x576xbf16>
    %c0_232 = arith.constant 0 : index
    %c0_233 = arith.constant 0 : index
    %135 = vector.load %arg8[%c0_232, %c0_233] : memref<576x64xbf16, #tpu.memory_space<vmem>>, vector<576x64xbf16>
    %cst_234 = arith.constant dense<0.000000e+00> : vector<4x64xf32>
    %136 = tpu.matmul %134, %135, %cst_234 {dimension_numbers = #tpu.dot_dimension_numbers<[1], [0], [0], [1], [0, 0, 1, 1], [], []>} : vector<4x576xbf16>, vector<576x64xbf16>, vector<4x64xf32> -> vector<4x64xf32>
    %c0_235 = arith.constant 0 : index
    %c0_236 = arith.constant 0 : index
    %137 = vector.load %arg9[%c0_235, %c0_236] : memref<1x64xf32, #tpu.memory_space<vmem>>, vector<1x64xf32>
    %138 = vector.broadcast %137 : vector<1x64xf32> to vector<4x64xf32>
    %139 = arith.addf %136, %138 : vector<4x64xf32>
    %cst_237 = arith.constant 0.000000e+00 : f32
    %140 = vector.broadcast %cst_237 : f32 to vector<4x64xf32>
    %141 = arith.maximumf %139, %140 : vector<4x64xf32>
    %142 = vector.shape_cast %141 : vector<4x64xf32> to vector<1x2x1x2x64xf32>
    %cst_238 = arith.constant dense<0xFF800000> : vector<1x2x1x64xf32>
    %143 = vector.multi_reduction <maximumf>, %142, %cst_238 [3] : vector<1x2x1x2x64xf32> to vector<1x2x1x64xf32>
    %cst_239 = arith.constant dense<0xFF800000> : vector<1x1x64xf32>
    %144 = vector.multi_reduction <maximumf>, %143, %cst_239 [1] : vector<1x2x1x64xf32> to vector<1x1x64xf32>
    %145 = vector.shape_cast %144 : vector<1x1x64xf32> to vector<1x1x1x64xf32>
    %c0_240 = arith.constant 0 : index
    %c0_241 = arith.constant 0 : index
    %c0_242 = arith.constant 0 : index
    %c0_243 = arith.constant 0 : index
    %146 = vector.load %arg10[%c0_240, %c0_241, %c0_242, %c0_243] : memref<1x1x1x64xf32, #tpu.memory_space<vmem>>, vector<1x1x1x64xf32>
    tpu.vector_store %arg10[%c0_240, %c0_241, %c0_242, %c0_243], %145 {strides = array<i32>} : memref<1x1x1x64xf32, #tpu.memory_space<vmem>>, vector<1x1x1x64xf32>,
    return
  }
  func.func @transform_0(%arg0: i32) -> (i32, i32, i32, i32) {
    %c0_i32 = arith.constant 0 : i32
    %c0_i32_0 = arith.constant 0 : i32
    %c0_i32_1 = arith.constant 0 : i32
    %c0_i32_2 = arith.constant 0 : i32
    return %arg0, %c0_i32, %c0_i32_0, %c0_i32_1 : i32, i32, i32, i32
  }
  func.func @transform_1(%arg0: i32) -> (i32, i32, i32) {
    %c0_i32 = arith.constant 0 : i32
    %c0_i32_0 = arith.constant 0 : i32
    %c0_i32_1 = arith.constant 0 : i32
    %c0_i32_2 = arith.constant 0 : i32
    return %c0_i32, %c0_i32_0, %c0_i32_1 : i32, i32, i32
  }
  func.func @transform_2(%arg0: i32) -> (i32, i32) {
    %c0_i32 = arith.constant 0 : i32
    %c0_i32_0 = arith.constant 0 : i32
    %c0_i32_1 = arith.constant 0 : i32
    return %c0_i32, %c0_i32_0 : i32, i32
  }
  func.func @transform_3(%arg0: i32) -> (i32, i32) {
    %c0_i32 = arith.constant 0 : i32
    %c0_i32_0 = arith.constant 0 : i32
    %c0_i32_1 = arith.constant 0 : i32
    return %c0_i32, %c0_i32_0 : i32, i32
  }
  func.func @transform_4(%arg0: i32) -> (i32, i32) {
    %c0_i32 = arith.constant 0 : i32
    %c0_i32_0 = arith.constant 0 : i32
    %c0_i32_1 = arith.constant 0 : i32
    return %c0_i32, %c0_i32_0 : i32, i32
  }
  func.func @transform_5(%arg0: i32) -> (i32, i32) {
    %c0_i32 = arith.constant 0 : i32
    %c0_i32_0 = arith.constant 0 : i32
    %c0_i32_1 = arith.constant 0 : i32
    return %c0_i32, %c0_i32_0 : i32, i32
  }
  func.func @transform_6(%arg0: i32) -> (i32, i32) {
    %c0_i32 = arith.constant 0 : i32
    %c0_i32_0 = arith.constant 0 : i32
    %c0_i32_1 = arith.constant 0 : i32
    return %c0_i32, %c0_i32_0 : i32, i32
  }
  func.func @transform_7(%arg0: i32) -> (i32, i32) {
    %c0_i32 = arith.constant 0 : i32
    %c0_i32_0 = arith.constant 0 : i32
    %c0_i32_1 = arith.constant 0 : i32
    return %c0_i32, %c0_i32_0 : i32, i32
  }
  func.func @transform_8(%arg0: i32) -> (i32, i32) {
    %c0_i32 = arith.constant 0 : i32
    %c0_i32_0 = arith.constant 0 : i32
    %c0_i32_1 = arith.constant 0 : i32
    return %c0_i32, %c0_i32_0 : i32, i32
  }
  func.func @transform_9(%arg0: i32) -> (i32, i32, i32, i32) {
    %c0_i32 = arith.constant 0 : i32
    %c0_i32_0 = arith.constant 0 : i32
    %c0_i32_1 = arith.constant 0 : i32
    %c0_i32_2 = arith.constant 0 : i32
    return %arg0, %c0_i32, %c0_i32_0, %c0_i32_1 : i32, i32, i32, i32
  }
}

</mosaic_0001>

<bundles_post_ra>
// kernel: tpu_custom_call.1
= control target key start
LH: loop header
LB: loop body
LE: loop exit
PB: predicated region body
PF: predicated region fallthrough
CT: control target
= control target key end

     0   :  { %14 = vsyncpa [#allocation7], 0  ;;  %s17450_s0 = inlined_call_operand.vmem [shape: bf16[2,16,16,3], index: 0, kind: input, shape index: {}]   ;;  %s17451_s1 = inlined_call_operand.vmem [shape: bf16[9,3,64], index: 1, kind: input, shape index: {}]   ;;  %s17452_s2 = inlined_call_operand.vmem [shape: f32[1,64], index: 2, kind: input, shape index: {}]   ;;  %s17453_s3 = inlined_call_operand.vmem [shape: bf16[576,64], index: 3, kind: input, shape index: {}]   ;;  %s17454_s4 = inlined_call_operand.vmem [shape: f32[1,64], index: 4, kind: input, shape index: {}]   ;;  %s17455_s5 = inlined_call_operand.vmem [shape: bf16[576,64], index: 5, kind: input, shape index: {}]   ;;  %s17456_s6 = inlined_call_operand.vmem [shape: f32[1,64], index: 6, kind: input, shape index: {}]   ;;  %s17457_s7 = inlined_call_operand.vmem [shape: bf16[576,64], index: 7, kind: input, shape index: {}]   ;;  %s17458_s8 = inlined_call_operand.vmem [shape: f32[1,64], index: 8, kind: input, shape index: {}]   ;;  %s17459_s9 = inlined_call_operand.hbm [shape: f32[2,1,1,64], index: 9, kind: output, shape index: {}]  }
   0x1   :  { %16 = vsyncpa [#allocation7 + $0x1], 0  ;;  %s13739_s30 = smov 0   ;;  %s13741_s10 = smov 0  }
   0x2   :  { %s13743_s11 = smov 0   ;;  %s13745_s12 = smov 0  }
   0x3 LB: > { %s13760_s13 = sadd.s32 4294967295, %s13679_s12   ;;  %s11553_s14 = sadd.s32 4294967294, %s13679_s12   ;;  %s13679_s12 = sphi %s13745_s12, %s17620_s12   ;;  %s13675_s11 = sphi %s13743_s11, %s17619_s11   ;;  %s13671_s10 = sphi %s13741_s10, %s17618_s10   ;;  %s13667_s30 = sphi %s13739_s30, %s17617_s30  }
   0x4   : > { %s13764_s15 = sadd.s32 1, %s13679_s12   ;;  %s223_s16 = sadd.s32 1, %s13675_s11 }
   0x5   : > { %s220_s17 = ssub.s32 %s13679_s12, %s13764_s15  ;;  %p233_p0 = scmp.ne.s32.totalorder %s13675_s11, %s13671_s10 }
   0x6   : > { %p221_p1 = scmp.eq.s32.totalorder %s220_s17, 0  ;;  %p234_p2 = scmp.eq.s32.totalorder %s13760_s13, 1 }
   0x7   : > { %p239_p3 = scmp.ne.s32.totalorder %s13671_s10, %s13667_s30  ;;  %p240_p4 = scmp.eq.s32.totalorder %s11553_s14, 1 }
   0x8   : > { %s13775_s18 = scalar_select %p221_p1, %s13675_s11, %s223_s16  }
   0x9   : > { %p13777_p5 = por %p234_p2, %p233_p0  ;;  %p13781_p6 = por %p240_p4, %p239_p3 }
   0xa   : > { %p11556_p7 = scmp.ge.s32.totalorder %s13679_s12, 1  ;;  %p290_p8 = scmp.lt.s32.totalorder %s13679_s12, 3 }
   0xc   : > { %p291_p9 = pnand %p11556_p7, %p290_p8 }
   0xe   : > { %294 = sbr.rel (%p291_p9) target bundleno = 2437 (0x985), region = 56 }
  0x15   : > { %vm1395_vm0 = vcmask 1040384   ;;  %vm1396_vm1 = vcmask 1041408   ;;  %v13790_v0 = vld [vmem:[%s17451_s1 + $0x4] sm:$0x3]  ;;  %vm363_vm2 = vcmask 19456   ;;  %v13681_v1 = vmov 65535  }
  0x16   : > { %v1397_v2 = vsel %vm1395_vm0, 4294967295, %v13681_v1  ;;  %vm366_vm3 = vcmask 16384   ;;  %v11673_v3 = vld [vmem:[%s17451_s1 + $0x6] sm:$0x3]  ;;  %v17460_v5 = vmov 0   ;;  %p325_p10 = scmp.lt.s32.totalorder %s13760_s13, 1 }
  0x17   : > { %v13795_v4 = vsel %vm1396_vm1, %v1397_v2, 0  ;;  %364 = vst.msk [vmem:[#allocation2] sm:$0xf] %vm363_vm2, %v17460_v5  ;;  %365 = vst.msk [vmem:[#allocation2 + $0x4] sm:$0xf] %vm363_vm2, %v17460_v5  ;;  %vm1903_vm4 = vcmask 1042432  }
  0x18   : > { %367 = vst.msk [vmem:[#allocation2 + $0x8] sm:$0x1] %vm366_vm3, %v17460_v5  ;;  %370 = vst.msk [vmem:[#allocation2 + $0x14] sm:$0x1] %vm366_vm3, %v17460_v5  ;;  %v13908_v6 = vand.u32 %v13790_v0, %v13795_v4  ;;  %v13911_v7 = vand.u32 %v11673_v3, %v13795_v4  ;;  %vm1904_vm5 = vcmask 1046532   ;;  %s326_s25 = scalar_select %p325_p10, %s13760_s13, 1 }
  0x19   : > { %368 = vst.msk [vmem:[#allocation2 + $0xc] sm:$0xf] %vm363_vm2, %v17460_v5  ;;  %369 = vst.msk [vmem:[#allocation2 + $0x10] sm:$0xf] %vm363_vm2, %v17460_v5  ;;  %vm419_vm6 = vsmask.f32 256 }
  0x1a   : > { %371 = vst.msk [vmem:[#allocation2 + $0x18] sm:$0xf] %vm363_vm2, %v17460_v5  ;;  %372 = vst.msk [vmem:[#allocation2 + $0x1c] sm:$0xf] %vm363_vm2, %v17460_v5  ;;  %12732 = vmatprep.subr.bf16.mxu0 %v13908_v6  ;;  %vm420_vm7 = vsmask.f32 4368 }
  0x1b   : > { %373 = vst.msk [vmem:[#allocation2 + $0x20] sm:$0x1] %vm366_vm3, %v17460_v5  ;;  %376 = vst.msk [vmem:[#allocation2 + $0x2c] sm:$0x1] %vm366_vm3, %v17460_v5  ;;  %12733 = vmatpush3.bf16.msra.mxu0 %v13908_v6  ;;  %s12236_s26 = sshll.u32 %s326_s25, 7  ;;  %vm1346_vm11 = vcmask 23552  }
  0x1c   : > { %374 = vst.msk [vmem:[#allocation2 + $0x24] sm:$0xf] %vm363_vm2, %v17460_v5  ;;  %375 = vst.msk [vmem:[#allocation2 + $0x28] sm:$0xf] %vm363_vm2, %v17460_v5  ;;  %12766 = vmatprep.subr.bf16.mxu0 %v13911_v7  ;;  %s13924_s29 = scalar_lea.vmem %s17450_s0, %s12236_s26  ;;  %vm744_vm9 = vsmask.f32 7938 }
  0x1d   : > { %377 = vst.msk [vmem:[#allocation2 + $0x30] sm:$0xf] %vm363_vm2, %v17460_v5  ;;  %378 = vst.msk [vmem:[#allocation2 + $0x34] sm:$0xf] %vm363_vm2, %v17460_v5  ;;  %v331_v9 = vld [vmem:[%s13924_s29] sm:$0xf] }
  0x1e   : > { %379 = vst.msk [vmem:[#allocation2 + $0x38] sm:$0x1] %vm366_vm3, %v17460_v5  ;;  %382 = vst.msk [vmem:[#allocation2 + $0x44] sm:$0x1] %vm366_vm3, %v17460_v5  ;;  %v332_v10 = vld [vmem:[%s13924_s29 + $0x4] sm:$0xf] }
  0x1f   : > { %380 = vst.msk [vmem:[#allocation2 + $0x3c] sm:$0xf] %vm363_vm2, %v17460_v5  ;;  %381 = vst.msk [vmem:[#allocation2 + $0x40] sm:$0xf] %vm363_vm2, %v17460_v5  ;;  %v333_v11 = vld [vmem:[%s13924_s29 + $0x8] sm:$0xf] }
  0x20   : > { %383 = vst.msk [vmem:[#allocation2 + $0x48] sm:$0xf] %vm363_vm2, %v17460_v5  ;;  %384 = vst.msk [vmem:[#allocation2 + $0x4c] sm:$0xf] %vm363_vm2, %v17460_v5  ;;  %v861_v12 = vld [vmem:[#allocation2 + $0x4] sm:$0xf] }
  0x21   : > { %385 = vst.msk [vmem:[#allocation2 + $0x50] sm:$0x1] %vm366_vm3, %v17460_v5  ;;  %388 = vst.msk [vmem:[#allocation2 + $0x5c] sm:$0x1] %vm366_vm3, %v17460_v5  ;;  %v893_v13 = vld [vmem:[#allocation2 + $0x8] sm:$0x1] }
  0x22   : > { %386 = vst.msk [vmem:[#allocation2 + $0x54] sm:$0xf] %vm363_vm2, %v17460_v5  ;;  %387 = vst.msk [vmem:[#allocation2 + $0x58] sm:$0xf] %vm363_vm2, %v17460_v5  ;;  %v1855_v14 = vld [vmem:[#allocation2] sm:$0xe] }
  0x23   : > { %389 = vst.msk [vmem:[#allocation2 + $0x60] sm:$0xf] %vm363_vm2, %v17460_v5  ;;  %390 = vst.msk [vmem:[#allocation2 + $0x64] sm:$0xf] %vm363_vm2, %v17460_v5  ;;  %v11624_v15 = vrot.slane %v1855_v14, 9  ;;  %v1908_v16 = vrot.slane %v861_v12, 5 }
  0x24   : > { %391 = vst.msk [vmem:[#allocation2 + $0x68] sm:$0x1] %vm366_vm3, %v17460_v5  ;;  %394 = vst.msk [vmem:[#allocation2 + $0x74] sm:$0x1] %vm366_vm3, %v17460_v5  ;;  %v1911_v17 = vrot.slane %v893_v13, 5  ;;  %v423_v18 = vshrl.u32 %v331_v9, 16 }
  0x25   : > { %392 = vst.msk [vmem:[#allocation2 + $0x6c] sm:$0xf] %vm363_vm2, %v17460_v5  ;;  %393 = vst.msk [vmem:[#allocation2 + $0x70] sm:$0xf] %vm363_vm2, %v17460_v5  ;;  %v426_v19 = vshll.u32 %v331_v9, 16  ;;  %v431_v20 = vshrl.u32 %v332_v10, 16 }
  0x26   : > { %395 = vst.msk [vmem:[#allocation2 + $0x78] sm:$0xf] %vm363_vm2, %v17460_v5  ;;  %396 = vst.msk [vmem:[#allocation2 + $0x7c] sm:$0xf] %vm363_vm2, %v17460_v5  ;;  %v434_v21 = vshll.u32 %v332_v10, 16  ;;  %v440_v23 = vshrl.u32 %v333_v11, 16 }
  0x27   : > { %397 = vst.msk [vmem:[#allocation2 + $0x80] sm:$0x1] %vm366_vm3, %v17460_v5  ;;  %400 = vst.msk [vmem:[#allocation2 + $0x8c] sm:$0x1] %vm366_vm3, %v17460_v5  ;;  %v746_v22 = vld [vmem:[#allocation2 + $0xc] sm:$0xf] }
  0x28   : > { %398 = vst.msk [vmem:[#allocation2 + $0x84] sm:$0xf] %vm363_vm2, %v17460_v5  ;;  %399 = vst.msk [vmem:[#allocation2 + $0x88] sm:$0xf] %vm363_vm2, %v17460_v5  ;;  %v1910_v25 = vrot.slane %v1908_v16, 4  ;;  %v425_v27 = vrot.slane %v423_v18, 7 }
  0x29   : > { %401 = vst.msk [vmem:[#allocation2 + $0x90] sm:$0xf] %vm363_vm2, %v17460_v5  ;;  %402 = vst.msk [vmem:[#allocation2 + $0x94] sm:$0xf] %vm363_vm2, %v17460_v5  ;;  %v334_v28 = vld [vmem:[%s13924_s29 + $0xc] sm:$0xf] }
  0x2a   : > { %403 = vst.msk [vmem:[#allocation2 + $0x98] sm:$0x1] %vm366_vm3, %v17460_v5  ;;  %406 = vst.msk [vmem:[#allocation2 + $0xa4] sm:$0x1] %vm366_vm3, %v17460_v5  ;;  %v443_v29 = vshll.u32 %v333_v11, 16  ;;  %v433_v30 = vrot.slane %v431_v20, 7  ;;  %v428_v36 = vor.u32 %v426_v19, %v425_v27 }
  0x2b   : > { %404 = vst.msk [vmem:[#allocation2 + $0x9c] sm:$0xf] %vm363_vm2, %v17460_v5  ;;  %405 = vst.msk [vmem:[#allocation2 + $0xa0] sm:$0xf] %vm363_vm2, %v17460_v5  ;;  %v752_v32 = vld [vmem:[#allocation2 + $0x14] sm:$0x1] }
  0x2c   : > { %407 = vst.msk [vmem:[#allocation2 + $0xa8] sm:$0xf] %vm363_vm2, %v17460_v5  ;;  %408 = vst.msk [vmem:[#allocation2 + $0xac] sm:$0xf] %vm363_vm2, %v17460_v5  ;;  %v442_v33 = vrot.slane %v440_v23, 7  ;;  %v448_v34 = vshrl.u32 %v334_v28, 16  ;;  %v436_v43 = vor.u32 %v434_v21, %v433_v30 }
  0x2d   : > { %409 = vst.msk [vmem:[#allocation2 + $0xb0] sm:$0x1] %vm366_vm3, %v17460_v5  ;;  %412 = vst.msk [vmem:[#allocation2 + $0xbc] sm:$0x1] %vm366_vm3, %v17460_v5  ;;  %v429_v37 = vrot.slane %v425_v27, 4  ;;  %v451_v39 = vshll.u32 %v334_v28, 16 }
  0x2e   : > { %410 = vst.msk [vmem:[#allocation2 + $0xb4] sm:$0xf] %vm363_vm2, %v17460_v5  ;;  %411 = vst.msk [vmem:[#allocation2 + $0xb8] sm:$0xf] %vm363_vm2, %v17460_v5  ;;  %v755_v40 = vld [vmem:[#allocation2 + $0x18] sm:$0xf]  ;;  %v445_v45 = vor.u32 %v443_v29, %v442_v33 }
  0x2f   : > { %413 = vst.msk [vmem:[#allocation2 + $0xc0] sm:$0xf] %vm363_vm2, %v17460_v5  ;;  %414 = vst.msk [vmem:[#allocation2 + $0xc4] sm:$0xf] %vm363_vm2, %v17460_v5  ;;  %v335_v41 = vld [vmem:[%s13924_s29 + $0x10] sm:$0xf] }
  0x30   : > { %415 = vst.msk [vmem:[#allocation2 + $0xc8] sm:$0x1] %vm366_vm3, %v17460_v5  ;;  %418 = vst.msk [vmem:[#allocation2 + $0xd4] sm:$0x1] %vm366_vm3, %v17460_v5  ;;  %v438_v44 = vrot.slane %v433_v30, 4  ;;  %v446_v48 = vrot.slane %v442_v33, 4 }
  0x31   : > { %416 = vst.msk [vmem:[#allocation2 + $0xcc] sm:$0xf] %vm363_vm2, %v17460_v5  ;;  %417 = vst.msk [vmem:[#allocation2 + $0xd0] sm:$0xf] %vm363_vm2, %v17460_v5  ;;  %v336_v46 = vld [vmem:[%s13924_s29 + $0x14] sm:$0xf] }
  0x32   : > { %vm13916_vm8 = vmor %vm1903_vm4, %vm1904_vm5  ;;  %v450_v49 = vrot.slane %v448_v34, 7  ;;  %v759_v50 = vld [vmem:[#allocation2 + $0x20] sm:$0x1]  ;;  %v457_v51 = vshrl.u32 %v335_v41, 16  ;;  %v460_v55 = vshll.u32 %v335_v41, 16  ;;  %v465_v61 = vshrl.u32 %v336_v46, 16 }
  0x33   : > { %v1909_v24 = vsel %vm13916_vm8, %v11624_v15, %v1908_v16  ;;  %vm13933_vm10 = vmor %vm419_vm6, %vm420_vm7  ;;  %v1912_v35 = vsel %vm13916_vm8, %v1910_v25, %v1911_v17  ;;  %v337_v56 = vld [vmem:[%s13924_s29 + $0x18] sm:$0xf]  ;;  %v338_v57 = vld [vmem:[%s13924_s29 + $0x1c] sm:$0xf]  ;;  %v468_v62 = vshll.u32 %v336_v46, 16  ;;  %vm6196_vm1 = vcmask 517120  }
  0x34   : > { %vm13940_vm12 = vmand %vm363_vm2, %vm744_vm9  ;;  %v11641_v42 = vcombine.low %v1909_v24, %v1912_v35  ;;  %v437_v52 = vsel %vm13933_vm10, %v429_v37, %v436_v43  ;;  %v453_v58 = vor.u32 %v451_v39, %v450_v49  ;;  %v455_v59 = vrot.slane %v450_v49, 4  ;;  %v762_v63 = vld [vmem:[#allocation2 + $0x24] sm:$0xf]  ;;  %v339_v12 = vld [vmem:[%s13924_s29 + $0x20] sm:$0xf]  ;;  %s13684_s24 = smov 64  }
  0x35   : > { %vm13948_vm13 = vmand %vm366_vm3, %vm419_vm6  ;;  %v747_v47 = vsel %vm13940_vm12, %v428_v36, %v746_v22  ;;  %v756_v54 = vsel %vm13940_vm12, %v445_v45, %v755_v40  ;;  %749 = vst.msk [vmem:[#allocation2 + $0x10] sm:$0xf] %vm363_vm2, %v437_v52  ;;  %v459_v60 = vrot.slane %v457_v51, 7  ;;  %v474_v0 = vshrl.u32 %v337_v56, 16  ;;  %v340_v13 = vld [vmem:[%s13924_s29 + $0x24] sm:$0xf] }
  0x36   : > { %12734 = vmatprep.mubr.msk.bf16.mxu0 %vm1346_vm11, %v11641_v42  ;;  %748 = vst [vmem:[#allocation2 + $0xc] sm:$0xf] %v747_v47  ;;  %v753_v53 = vsel %vm13948_vm13, %v438_v44, %v752_v32  ;;  %757 = vst [vmem:[#allocation2 + $0x18] sm:$0xf] %v756_v54  ;;  %v477_v1 = vshll.u32 %v337_v56, 16  ;;  %v482_v2 = vshrl.u32 %v338_v57, 16  ;;  %v454_v3 = vsel %vm13933_vm10, %v446_v48, %v453_v58 }
  0x37   : > { %754 = vst [vmem:[#allocation2 + $0x14] sm:$0x1] %v753_v53  ;;  %v760_v9 = vsel %vm13948_vm13, %v455_v59, %v759_v50  ;;  %v462_v10 = vor.u32 %v460_v55, %v459_v60  ;;  %v463_v11 = vrot.slane %v459_v60, 4  ;;  %758 = vst.msk [vmem:[#allocation2 + $0x1c] sm:$0xf] %vm363_vm2, %v454_v3  ;;  %v467_v14 = vrot.slane %v465_v61, 7 }
  0x38   : > { %761 = vst [vmem:[#allocation2 + $0x20] sm:$0x1] %v760_v9  ;;  %v766_v15 = vld [vmem:[#allocation2 + $0x2c] sm:$0x1]  ;;  %v476_v16 = vrot.slane %v474_v0, 7  ;;  %v484_v17 = vrot.slane %v482_v2, 7 }
  0x39   : > { %v485_v18 = vshll.u32 %v338_v57, 16  ;;  %v763_v19 = vsel %vm13940_vm12, %v462_v10, %v762_v63  ;;  %v769_v20 = vld [vmem:[#allocation2 + $0x30] sm:$0xf]  ;;  %v491_v21 = vshrl.u32 %v339_v12, 16  ;;  %v494_v22 = vshll.u32 %v339_v12, 16  ;;  %s323_s23 = sand.u32 1, %s13671_s10  }
  0x3a   : > { %v499_v23 = vshrl.u32 %v340_v13, 16  ;;  %v470_v24 = vor.u32 %v468_v62, %v467_v14  ;;  %v472_v25 = vrot.slane %v467_v14, 4  ;;  %764 = vst [vmem:[#allocation2 + $0x24] sm:$0xf] %v763_v19  ;;  %v479_v27 = vor.u32 %v477_v1, %v476_v16  ;;  %v773_v29 = vld [vmem:[#allocation2 + $0x38] sm:$0x1] }
  0x3b   : > { %v480_v28 = vrot.slane %v476_v16, 4  ;;  %v487_v32 = vor.u32 %v485_v18, %v484_v17  ;;  %v489_v33 = vrot.slane %v484_v17, 4  ;;  %v493_v34 = vrot.slane %v491_v21, 7  ;;  %v776_v36 = vld [vmem:[#allocation2 + $0x3c] sm:$0xf]  ;;  %s12233_s25 = sshll.u32 %s13760_s13, 4 }
  0x3c   : > { %v501_v35 = vrot.slane %v499_v23, 7  ;;  %v863_v37 = vld [vmem:[#allocation2 + $0x10] sm:$0xf]  ;;  %v471_v41 = vsel %vm13933_vm10, %v463_v11, %v470_v24  ;;  %v767_v42 = vsel %vm13948_vm13, %v472_v25, %v766_v15  ;;  %v770_v43 = vsel %vm13940_vm12, %v479_v27, %v769_v20  ;;  %v780_v44 = vld [vmem:[#allocation2 + $0x44] sm:$0x1]  ;;  %s324_s26 = scalar_lea.vmem [#allocation6], %s323_s23  ;;  %s17407_s14 = scalar_lea.hbm %s17459_s9, %s12233_s25 }
  0x3d   : > { %v1856_v30 = vld [vmem:[#allocation2 + $0xc] sm:$0xe]  ;;  %v11706_v45 = vld [vmem:[%s17451_s1 + $0x8] sm:$0x3]  ;;  %v1915_v47 = vrot.slane %v863_v37, 5  ;;  %v488_v50 = vsel %vm13933_vm10, %v480_v28, %v487_v32  ;;  %v774_v51 = vsel %vm13948_vm13, %v489_v33, %v773_v29  ;;  %v496_v53 = vor.u32 %v494_v22, %v493_v34  ;;  %s11498_s27 = sshll.u32 %s324_s26, 4  ;;  %s17409_s27 = int_to_ptr.vmem [resolvable:$true] %s11498_s27 }
  0x3e   : > { %v894_v39 = vld [vmem:[#allocation2 + $0x14] sm:$0x1]  ;;  %v11625_v40 = vrot.slane %v1856_v30, 9  ;;  %v341_v46 = vld [vmem:[%s13924_s29 + $0x28] sm:$0xf]  ;;  %v497_v54 = vrot.slane %v493_v34, 4  ;;  %v14003_v10 = vand.u32 %v11706_v45, %v13795_v4 }
  0x3f   : > { %v1918_v48 = vrot.slane %v894_v39, 5  ;;  %v1857_v49 = vld [vmem:[#allocation2 + $0x18] sm:$0xe]  ;;  %765 = vst.msk [vmem:[#allocation2 + $0x28] sm:$0xf] %vm363_vm2, %v471_v41  ;;  %v502_v55 = vshll.u32 %v340_v13, 16  ;;  %v777_v1 = vsel %vm13940_vm12, %v496_v53, %v776_v36 }
  0x40   : > { %768 = vst [vmem:[#allocation2 + $0x2c] sm:$0x1] %v767_v42  ;;  %771 = vst [vmem:[#allocation2 + $0x30] sm:$0xf] %v770_v43  ;;  %v11626_v52 = vrot.slane %v1857_v49, 9  ;;  %v1916_v57 = vsel %vm13916_vm8, %v11625_v40, %v1915_v47  ;;  %v1917_v58 = vrot.slane %v1915_v47, 4 }
  0x41   : > { %772 = vst.msk [vmem:[#allocation2 + $0x34] sm:$0xf] %vm363_vm2, %v488_v50  ;;  %775 = vst [vmem:[#allocation2 + $0x38] sm:$0x1] %v774_v51  ;;  %v13992_v56 = vld [vmem:[%s13924_s29 + $0x2c] sm:$0xf]  ;;  %v504_v0 = vor.u32 %v502_v55, %v501_v35 }
  0x42   : > { %v865_v59 = vld [vmem:[#allocation2 + $0x1c] sm:$0xf]  ;;  %v895_v60 = vld [vmem:[#allocation2 + $0x20] sm:$0x1]  ;;  %v506_v61 = vrot.slane %v501_v35, 4  ;;  %v1919_v2 = vsel %vm13916_vm8, %v1917_v58, %v1918_v48  ;;  %v508_v11 = vshrl.u32 %v341_v46, 16 }
  0x43   : > { %v1922_v62 = vrot.slane %v865_v59, 5  ;;  %v1925_v63 = vrot.slane %v895_v60, 5  ;;  %v1858_v3 = vld [vmem:[#allocation2 + $0x24] sm:$0xe]  ;;  %778 = vst [vmem:[#allocation2 + $0x3c] sm:$0xf] %v777_v1  ;;  %v11642_v12 = vcombine.low %v1916_v57, %v1919_v2  ;;  %v505_v16 = vsel %vm13933_vm10, %v497_v54, %v504_v0 }
  0x44   : > { %v781_v9 = vsel %vm13948_vm13, %v506_v61, %v780_v44  ;;  %v11627_v15 = vrot.slane %v1858_v3, 9  ;;  %v510_v17 = vrot.slane %v508_v11, 7  ;;  %v511_v18 = vshll.u32 %v341_v46, 16  ;;  %v783_v20 = vld [vmem:[#allocation2 + $0x48] sm:$0xf]  ;;  %s11486_s13 = scalar_lea.sflag [#allocation7], %s323_s23 }
  0x45   : > { %v1923_v13 = vsel %vm13916_vm8, %v11626_v52, %v1922_v62  ;;  %v1924_v14 = vrot.slane %v1922_v62, 4  ;;  %782 = vst [vmem:[#allocation2 + $0x44] sm:$0x1] %v781_v9  ;;  %v516_v19 = vshrl.u32 %v13992_v56, 16  ;;  %12735 = vmatmul.mubr.msk.bf16.vlgmr.msra.gmra.mrb[0].mxu0 %vm1346_vm11, %v11642_v12  ;;  %779 = vst.msk [vmem:[#allocation2 + $0x40] sm:$0xf] %vm363_vm2, %v505_v16 }
  0x46   : > { %v867_v22 = vld [vmem:[#allocation2 + $0x28] sm:$0xf]  ;;  %12767 = vmatpush3.bf16.msra.mxu0 %v13911_v7  ;;  %v513_v32 = vor.u32 %v511_v18, %v510_v17  ;;  %v343_v33 = vld [vmem:[%s13924_s29 + $0x30] sm:$0xf]  ;;  %v344_v40 = vld [vmem:[%s13924_s29 + $0x34] sm:$0xf] }
  0x47   : > { %v1926_v21 = vsel %vm13916_vm8, %v1924_v14, %v1925_v63  ;;  %v896_v23 = vld [vmem:[#allocation2 + $0x2c] sm:$0x1]  ;;  %v1859_v24 = vld [vmem:[#allocation2 + $0x30] sm:$0xe]  ;;  %v1929_v27 = vrot.slane %v867_v22, 5  ;;  %12800 = vmatprep.subr.bf16.mxu0 %v14003_v10  ;;  %v514_v46 = vrot.slane %v510_v17, 4 }
  0x48   : > { %v11643_v25 = vcombine.low %v1923_v13, %v1926_v21  ;;  %v1932_v28 = vrot.slane %v896_v23, 5  ;;  %v869_v29 = vld [vmem:[#allocation2 + $0x34] sm:$0xf]  ;;  %v897_v30 = vld [vmem:[#allocation2 + $0x38] sm:$0x1]  ;;  %v11628_v34 = vrot.slane %v1859_v24, 9  ;;  %v784_v7 = vsel %vm13940_vm12, %v513_v32, %v783_v20 }
  0x49   : > { %v1936_v35 = vrot.slane %v869_v29, 5  ;;  %v1939_v36 = vrot.slane %v897_v30, 5  ;;  %v1930_v37 = vsel %vm13916_vm8, %v11627_v15, %v1929_v27  ;;  %v1931_v39 = vrot.slane %v1929_v27, 4  ;;  %785 = vst [vmem:[#allocation2 + $0x48] sm:$0xf] %v784_v7  ;;  %s13617_s16 = scalar_lea.vmem %s17409_s27, 16 }
  0x4a   : > { %12738 = vmatprep.mubr.msk.bf16.mxu0 %vm1346_vm11, %v11643_v25  ;;  %v1860_v43 = vld [vmem:[#allocation2 + $0x3c] sm:$0xe]  ;;  %v14027_v47 = vrot.slane %v516_v19, 7  ;;  %v519_v48 = vshll.u32 %v13992_v56, 16  ;;  %v525_v52 = vshrl.u32 %v343_v33, 16  ;;  %v528_v61 = vshll.u32 %v343_v33, 16  ;;  %p13618_p11 = scmp.ne.s32.totalorder %s17409_s27, %s13617_s16 }
  0x4b   : > { %v1937_v41 = vsel %vm13916_vm8, %v11628_v34, %v1936_v35  ;;  %v1938_v42 = vrot.slane %v1936_v35, 4  ;;  %v1933_v44 = vsel %vm13916_vm8, %v1931_v39, %v1932_v28  ;;  %v11629_v51 = vrot.slane %v1860_v43, 9  ;;  %v345_v53 = vld [vmem:[%s13924_s29 + $0x38] sm:$0xf]  ;;  %v346_v62 = vld [vmem:[%s13924_s29 + $0x3c] sm:$0xf] }
  0x4c   : > { %v898_v45 = vld [vmem:[#allocation2 + $0x44] sm:$0x1]  ;;  %v11644_v49 = vcombine.low %v1930_v37, %v1933_v44  ;;  %v871_v55 = vld [vmem:[#allocation2 + $0x40] sm:$0xf]  ;;  %v521_v58 = vor.u32 %v519_v48, %v14027_v47  ;;  %v527_v60 = vrot.slane %v525_v52, 7  ;;  %v533_v56 = vshrl.u32 %v344_v40, 16  ;;  %p13619_p12 = pnand %p13618_p11, %p13777_p5 }
  0x4d   : > { %v1940_v50 = vsel %vm13916_vm8, %v1938_v42, %v1939_v36  ;;  %v1946_v57 = vrot.slane %v898_v45, 5  ;;  %v1943_v59 = vrot.slane %v871_v55, 5  ;;  %v536_v0 = vshll.u32 %v344_v40, 16  ;;  %v790_v1 = vld [vmem:[#allocation2 + $0x54] sm:$0xf]  ;;  %v13314_v28 = vld [vmem:[#allocation2 + $0xc] sm:$0xff]  }
  0x4e   : > { %v11645_v54 = vcombine.low %v1937_v41, %v1940_v50  ;;  %12739 = vmatmul.mubr.msk.bf16.gmra.mrb[4].mxu0 %vm1346_vm11, %v11644_v49  ;;  %v522_v63 = vsel %vm13933_vm10, %v514_v46, %v521_v58  ;;  %v542_v2 = vshrl.u32 %v345_v53, 16  ;;  %v545_v3 = vshll.u32 %v345_v53, 16  ;;  %v347_v14 = vld [vmem:[%s13924_s29 + $0x40] sm:$0xf]  ;;  %v348_v15 = vld [vmem:[%s13924_s29 + $0x44] sm:$0xf]  ;;  %p13620_p13 = pneg %p13619_p12 }
  0x4f   : > { %v1944_v9 = vsel %vm13916_vm8, %v11629_v51, %v1943_v59  ;;  %v1945_v11 = vrot.slane %v1943_v59, 4  ;;  %786 = vst.msk [vmem:[#allocation2 + $0x4c] sm:$0xf] %vm363_vm2, %v522_v63  ;;  %v530_v12 = vor.u32 %v528_v61, %v527_v60  ;;  %v531_v13 = vrot.slane %v527_v60, 4  ;;  %v797_v22 = vld [vmem:[#allocation2 + $0x60] sm:$0xf] }
  0x50   : > { %12742 = vmatprep.mubr.msk.bf16.mxu0 %vm1346_vm11, %v11645_v54  ;;  %v14044_v16 = vrot.slane %v533_v56, 7  ;;  %v544_v17 = vrot.slane %v542_v2, 7  ;;  %v550_v18 = vshrl.u32 %v346_v62, 16  ;;  %v553_v19 = vshll.u32 %v346_v62, 16  ;;  %v349_v25 = vld [vmem:[%s13924_s29 + $0x48] sm:$0xf] }
  0x51   : > { %v1947_v20 = vsel %vm13916_vm8, %v1945_v11, %v1946_v57  ;;  %v791_v21 = vsel %vm13940_vm12, %v530_v12, %v790_v1  ;;  %v559_v23 = vshrl.u32 %v347_v14, 16  ;;  %v562_v24 = vshll.u32 %v347_v14, 16  ;;  %v804_v7 = vld [vmem:[#allocation2 + $0x6c] sm:$0xf]  ;;  %v351_v44 = vld [vmem:[%s13924_s29 + $0x50] sm:$0xf] }
  0x52   : > { %v11646_v27 = vcombine.low %v1944_v9, %v1947_v20  ;;  %v538_v29 = vor.u32 %v536_v0, %v14044_v16  ;;  %792 = vst [vmem:[#allocation2 + $0x54] sm:$0xf] %v791_v21  ;;  %v547_v30 = vor.u32 %v545_v3, %v544_v17  ;;  %v548_v32 = vrot.slane %v544_v17, 4  ;;  %v350_v40 = vld [vmem:[%s13924_s29 + $0x4c] sm:$0xf]  ;;  %v13315_v58 = vld [vmem:[#allocation2 + $0x18] sm:$0xff]  }
  0x53   : > { %v14052_v33 = vrot.slane %v550_v18, 7  ;;  %v561_v34 = vrot.slane %v559_v23, 7  ;;  %v567_v35 = vshrl.u32 %v348_v15, 16  ;;  %v570_v39 = vshll.u32 %v348_v15, 16  ;;  %v352_v45 = vld [vmem:[%s13924_s29 + $0x54] sm:$0xf] }
  0x54   : > { %v539_v36 = vsel %vm13933_vm10, %v531_v13, %v538_v29  ;;  %v798_v37 = vsel %vm13940_vm12, %v547_v30, %v797_v22  ;;  %v576_v41 = vshrl.u32 %v349_v25, 16  ;;  %v579_v50 = vshll.u32 %v349_v25, 16  ;;  %v811_v55 = vld [vmem:[#allocation2 + $0x78] sm:$0xf]  ;;  %v11755_v56 = vld [vmem:[%s17451_s1 + $0xa] sm:$0x3] }
  0x55   : > { %793 = vst.msk [vmem:[#allocation2 + $0x58] sm:$0xf] %vm363_vm2, %v539_v36  ;;  %v555_v42 = vor.u32 %v553_v19, %v14052_v33  ;;  %799 = vst [vmem:[#allocation2 + $0x60] sm:$0xf] %v798_v37  ;;  %v564_v43 = vor.u32 %v562_v24, %v561_v34  ;;  %v565_v46 = vrot.slane %v561_v34, 4  ;;  %v14065_v48 = vrot.slane %v567_v35, 7 }
  0x56   : > { %12743 = vmatmul.mubr.msk.bf16.gmra.mrb[8].mxu0 %vm1346_vm11, %v11646_v27  ;;  %v578_v49 = vrot.slane %v576_v41, 7  ;;  %v584_v53 = vshrl.u32 %v350_v40, 16  ;;  %v587_v54 = vshll.u32 %v350_v40, 16  ;;  %v353_v57 = vld [vmem:[%s13924_s29 + $0x58] sm:$0xf]  ;;  %v593_v63 = vshrl.u32 %v351_v44, 16 }
  0x57   : > { %12768 = vmatprep.mubr.msk.bf16.mxu0 %vm1346_vm11, %v13314_v28  ;;  %v556_v51 = vsel %vm13933_vm10, %v548_v32, %v555_v42  ;;  %v805_v52 = vsel %vm13940_vm12, %v564_v43, %v804_v7  ;;  %v572_v59 = vor.u32 %v570_v39, %v14065_v48  ;;  %v596_v0 = vshll.u32 %v351_v44, 16  ;;  %v13316_v2 = vld [vmem:[#allocation2 + $0x24] sm:$0xff]   ;;  %v354_v18 = vld [vmem:[%s13924_s29 + $0x5c] sm:$0xf]  ;;  %v825_v27 = vld [vmem:[#allocation2 + $0x90] sm:$0xf] }
  0x58   : > { %800 = vst.msk [vmem:[#allocation2 + $0x64] sm:$0xf] %vm363_vm2, %v556_v51  ;;  %806 = vst [vmem:[#allocation2 + $0x6c] sm:$0xf] %v805_v52  ;;  %v581_v60 = vor.u32 %v579_v50, %v578_v49  ;;  %v582_v61 = vrot.slane %v578_v49, 4  ;;  %v14077_v62 = vrot.slane %v584_v53, 7  ;;  %v14089_v19 = vand.u32 %v11755_v56, %v13795_v4 }
  0x59   : > { %v601_v1 = vshrl.u32 %v352_v45, 16  ;;  %v573_v3 = vsel %vm13933_vm10, %v565_v46, %v572_v59  ;;  %v604_v11 = vshll.u32 %v352_v45, 16  ;;  %v610_v12 = vshrl.u32 %v353_v57, 16  ;;  %v818_v17 = vld [vmem:[#allocation2 + $0x84] sm:$0xf]  ;;  %v13317_v35 = vld [vmem:[#allocation2 + $0x30] sm:$0xff]  }
  0x5a   : > { %v812_v9 = vsel %vm13940_vm12, %v581_v60, %v811_v55  ;;  %807 = vst.msk [vmem:[#allocation2 + $0x70] sm:$0xf] %vm363_vm2, %v573_v3  ;;  %v589_v13 = vor.u32 %v587_v54, %v14077_v62  ;;  %v595_v14 = vrot.slane %v593_v63, 7  ;;  %v523_v20 = vrot.slane %v14027_v47, 4  ;;  %v355_v28 = vld [vmem:[%s13924_s29 + $0x60] sm:$0xf] }
  0x5b   : > { %813 = vst [vmem:[#allocation2 + $0x78] sm:$0xf] %v812_v9  ;;  %v14085_v15 = vrot.slane %v601_v1, 7  ;;  %v612_v21 = vrot.slane %v610_v12, 7  ;;  %v613_v29 = vshll.u32 %v353_v57, 16  ;;  %v618_v30 = vshrl.u32 %v354_v18, 16 }
  0x5c   : > { %v590_v22 = vsel %vm13933_vm10, %v582_v61, %v589_v13  ;;  %v598_v23 = vor.u32 %v596_v0, %v595_v14  ;;  %v599_v24 = vrot.slane %v595_v14, 4  ;;  %v356_v32 = vld [vmem:[%s13924_s29 + $0x64] sm:$0xf]  ;;  %v357_v34 = vld [vmem:[%s13924_s29 + $0x68] sm:$0xf]  ;;  %v540_v36 = vrot.slane %v14044_v16, 4 }
  0x5d   : > { %v606_v25 = vor.u32 %v604_v11, %v14085_v15  ;;  %814 = vst.msk [vmem:[#allocation2 + $0x7c] sm:$0xf] %vm363_vm2, %v590_v22  ;;  %v13318_v7 = vld [vmem:[#allocation2 + $0x3c] sm:$0xff]   ;;  %v615_v40 = vor.u32 %v613_v29, %v612_v21  ;;  %v616_v41 = vrot.slane %v612_v21, 4  ;;  %v14109_v42 = vrot.slane %v618_v30, 7  ;;  %v13319_v30 = vld [vmem:[#allocation2 + $0x48] sm:$0xff]  }
  0x5e   : > { %12769 = vmatmul.mubr.msk.bf16.vlgmr.msra.gmra.mrb[0].mxu0 %vm1346_vm11, %v13315_v58  ;;  %v819_v39 = vsel %vm13940_vm12, %v598_v23, %v818_v17  ;;  %v627_v43 = vshrl.u32 %v355_v28, 16  ;;  %v358_v44 = vld [vmem:[%s13924_s29 + $0x6c] sm:$0xf]  ;;  %v630_v45 = vshll.u32 %v355_v28, 16  ;;  %v635_v46 = vshrl.u32 %v356_v32, 16 }
  0x5f   : > { %12801 = vmatpush3.bf16.msra.mxu0 %v14003_v10  ;;  %12772 = vmatprep.mubr.msk.bf16.mxu0 %vm1346_vm11, %v13316_v2  ;;  %v607_v37 = vsel %vm13933_vm10, %v599_v24, %v606_v25  ;;  %v621_v10 = vshll.u32 %v354_v18, 16  ;;  %820 = vst [vmem:[#allocation2 + $0x84] sm:$0xf] %v819_v39  ;;  %v638_v49 = vshll.u32 %v356_v32, 16  ;;  %v644_v50 = vshrl.u32 %v357_v34, 16  ;;  %v13320_v32 = vld [vmem:[#allocation2 + $0x54] sm:$0xff]  }
  0x60   : > { %12834 = vmatprep.subr.bf16.mxu0 %v14089_v19  ;;  %821 = vst.msk [vmem:[#allocation2 + $0x88] sm:$0xf] %vm363_vm2, %v607_v37  ;;  %v359_v51 = vld [vmem:[%s13924_s29 + $0x70] sm:$0xf]  ;;  %v557_v52 = vrot.slane %v14052_v33, 4  ;;  %v826_v54 = vsel %vm13940_vm12, %v615_v40, %v825_v27  ;;  %v647_v57 = vshll.u32 %v357_v34, 16 }
  0x61   : > { %v623_v53 = vor.u32 %v621_v10, %v14109_v42  ;;  %v832_v55 = vld [vmem:[#allocation2 + $0x9c] sm:$0xf]  ;;  %827 = vst [vmem:[#allocation2 + $0x90] sm:$0xf] %v826_v54  ;;  %v629_v58 = vrot.slane %v627_v43, 7  ;;  %v14117_v59 = vrot.slane %v635_v46, 7 }
  0x62   : > { %v646_v60 = vrot.slane %v644_v50, 7  ;;  %v652_v61 = vshrl.u32 %v358_v44, 16  ;;  %v839_v56 = vld [vmem:[#allocation2 + $0xa8] sm:$0xf]  ;;  %v655_v0 = vshll.u32 %v358_v44, 16  ;;  %v661_v2 = vshrl.u32 %v359_v51, 16 }
  0x63   : > { %v624_v63 = vsel %vm13933_vm10, %v616_v41, %v623_v53  ;;  %v360_v1 = vld [vmem:[%s13924_s29 + $0x74] sm:$0xf]  ;;  %v664_v3 = vshll.u32 %v359_v51, 16  ;;  %v574_v9 = vrot.slane %v14065_v48, 4  ;;  %v632_v11 = vor.u32 %v630_v45, %v629_v58  ;;  %v361_v17 = vld [vmem:[%s13924_s29 + $0x78] sm:$0xf] }
  0x64   : > { %828 = vst.msk [vmem:[#allocation2 + $0x94] sm:$0xf] %vm363_vm2, %v624_v63  ;;  %v633_v12 = vrot.slane %v629_v58, 4  ;;  %v640_v13 = vor.u32 %v638_v49, %v14117_v59  ;;  %v846_v14 = vld [vmem:[#allocation2 + $0xb4] sm:$0xf]  ;;  %v649_v18 = vor.u32 %v647_v57, %v646_v60  ;;  %v650_v21 = vrot.slane %v646_v60, 4 }
  0x65   : > { %v14128_v22 = vrot.slane %v652_v61, 7  ;;  %v663_v23 = vrot.slane %v661_v2, 7  ;;  %v362_v24 = vld [vmem:[%s13924_s29 + $0x7c] sm:$0xf]  ;;  %vm909_vm14 = vsmask.f32 3328  ;;  %v833_v28 = vsel %vm13940_vm12, %v632_v11, %v832_v55 }
  0x66   : > { %12773 = vmatmul.mubr.msk.bf16.gmra.mrb[4].mxu0 %vm1346_vm11, %v13317_v35  ;;  %vm910_vm15 = vsmask.f32 7440  ;;  %v591_v25 = vrot.slane %v14077_v62, 4  ;;  %v641_v27 = vsel %vm13933_vm10, %v633_v12, %v640_v13  ;;  %v669_v29 = vshrl.u32 %v360_v1, 16  ;;  %834 = vst [vmem:[#allocation2 + $0x9c] sm:$0xf] %v833_v28 }
  0x67   : > { %12776 = vmatprep.mubr.msk.bf16.mxu0 %vm1346_vm11, %v13318_v7  ;;  %v608_v34 = vrot.slane %v14085_v15, 4  ;;  %835 = vst.msk [vmem:[#allocation2 + $0xa0] sm:$0xf] %vm363_vm2, %v641_v27  ;;  %v657_v35 = vor.u32 %v655_v0, %v14128_v22  ;;  %v840_v37 = vsel %vm13940_vm12, %v649_v18, %v839_v56  ;;  %v666_v39 = vor.u32 %v664_v3, %v663_v23  ;;  %v2670_v43 = vld [vmem:[#allocation2 + $0xc] sm:$0xf]  ;;  %v13321_v18 = vld [vmem:[#allocation2 + $0x60] sm:$0xff]   ;;  %vm14167_vm0 = vmor %vm909_vm14, %vm910_vm15 }
  0x68   : > { %841 = vst [vmem:[#allocation2 + $0xa8] sm:$0xf] %v840_v37  ;;  %v667_v10 = vrot.slane %v663_v23, 4  ;;  %v14141_v7 = vrot.slane %v669_v29, 7  ;;  %v672_v40 = vshll.u32 %v360_v1, 16  ;;  %v678_v41 = vshrl.u32 %v361_v17, 16 }
  0x69   : > { %v658_v44 = vsel %vm13933_vm10, %v650_v21, %v657_v35  ;;  %v847_v45 = vsel %vm13940_vm12, %v666_v39, %v846_v14  ;;  %v681_v46 = vshll.u32 %v361_v17, 16  ;;  %v686_v49 = vshrl.u32 %v362_v24, 16  ;;  %v2671_v50 = vld [vmem:[#allocation2 + $0x10] sm:$0xf]  ;;  %v853_v57 = vld [vmem:[#allocation2 + $0xc0] sm:$0xf] }
  0x6a   : > { %v625_v51 = vrot.slane %v14109_v42, 4  ;;  %842 = vst.msk [vmem:[#allocation2 + $0xac] sm:$0xf] %vm363_vm2, %v658_v44  ;;  %v674_v53 = vor.u32 %v672_v40, %v14141_v7  ;;  %848 = vst [vmem:[#allocation2 + $0xb4] sm:$0xf] %v847_v45  ;;  %v680_v54 = vrot.slane %v678_v41, 7 }
  0x6b   : > { %v689_v55 = vshll.u32 %v362_v24, 16  ;;  %v642_v58 = vrot.slane %v14117_v59, 4  ;;  %v14151_v60 = vrot.slane %v686_v49, 7  ;;  %v2719_v61 = vshrl.u32 %v2670_v43, 16  ;;  %v2672_v2 = vld [vmem:[#allocation2 + $0x14] sm:$0x1] }
  0x6c   : > { %v2722_v56 = vshll.u32 %v2670_v43, 16  ;;  %v675_v63 = vsel %vm13933_vm10, %v667_v10, %v674_v53  ;;  %v683_v0 = vor.u32 %v681_v46, %v680_v54  ;;  %v684_v1 = vrot.slane %v680_v54, 4  ;;  %v2673_v14 = vld [vmem:[#allocation2 + $0x18] sm:$0xf]  ;;  %v2674_v17 = vld [vmem:[#allocation2 + $0x1c] sm:$0xf] }
  0x6d   : > { %v2728_v3 = vshll.u32 %v2671_v50, 16  ;;  %849 = vst.msk [vmem:[#allocation2 + $0xb8] sm:$0xf] %vm363_vm2, %v675_v63  ;;  %v691_v11 = vor.u32 %v689_v55, %v14151_v60  ;;  %v2721_v12 = vrot.slane %v2719_v61, 4  ;;  %v659_v21 = vrot.slane %v14128_v22, 4  ;;  %v13322_v27 = vld [vmem:[#allocation2 + $0x6c] sm:$0xff]  }
  0x6e   : > { %12777 = vmatmul.mubr.msk.bf16.gmra.mrb[8].mxu0 %vm1346_vm11, %v13319_v30  ;;  %v2724_v13 = vrot.slane %v2722_v56, 5  ;;  %v854_v23 = vsel %vm13940_vm12, %v683_v0, %v853_v57  ;;  %v2732_v30 = vshrl.u32 %v2671_v50, 16  ;;  %v2675_v35 = vld [vmem:[#allocation2 + $0x20] sm:$0x1]  ;;  %v2743_v31 = vshrl.u32 %v2673_v14, 16 }
  0x6f   : > { %12780 = vmatprep.mubr.msk.bf16.mxu0 %vm1346_vm11, %v13320_v32  ;;  %v2730_v24 = vrot.slane %v2728_v3, 5  ;;  %v692_v28 = vsel %vm13933_vm10, %v684_v1, %v691_v11  ;;  %855 = vst [vmem:[#allocation2 + $0xc0] sm:$0xf] %v854_v23  ;;  %v2738_v32 = vshll.u32 %v2672_v2, 16  ;;  %v2746_v39 = vshll.u32 %v2673_v14, 16 }
  0x70   : > { %v2725_v29 = vor.u32 %v2724_v13, %v2721_v12  ;;  %856 = vst.msk [vmem:[#allocation2 + $0xc4] sm:$0xf] %vm363_vm2, %v692_v28  ;;  %v2752_v10 = vshll.u32 %v2674_v17, 16  ;;  %v2756_v40 = vshrl.u32 %v2674_v17, 16  ;;  %v2676_v41 = vld [vmem:[#allocation2 + $0x24] sm:$0xf] }
  0x71   : > { %v676_v26 = vrot.slane %v14141_v7, 4  ;;  %v2734_v44 = vrot.slane %v2732_v30, 4  ;;  %v2740_v45 = vrot.slane %v2738_v32, 5  ;;  %v2745_v46 = vrot.slane %v2743_v31, 4  ;;  %v2677_v50 = vld [vmem:[#allocation2 + $0x28] sm:$0xf] }
  0x72   : > { %v2726_v43 = vrot.slane %v2725_v29, 4  ;;  %v2748_v49 = vrot.slane %v2746_v39, 5  ;;  %v2754_v54 = vrot.slane %v2752_v10, 5  ;;  %v2758_v55 = vrot.slane %v2756_v40, 4  ;;  %v2678_v63 = vld [vmem:[#allocation2 + $0x2c] sm:$0x1] }
  0x73   : > { %v2762_v57 = vshll.u32 %v2675_v35, 16  ;;  %v2735_v61 = vor.u32 %v2734_v44, %v2730_v24  ;;  %v2767_v0 = vshrl.u32 %v2676_v41, 16  ;;  %v2770_v1 = vshll.u32 %v2676_v41, 16  ;;  %v2679_v13 = vld [vmem:[#allocation2 + $0x30] sm:$0xf]  ;;  %v13323_v32 = vld [vmem:[#allocation2 + $0x78] sm:$0xff]  }
  0x74   : > { %v2731_v53 = vsel %vm14167_vm0, %v2726_v43, %v2730_v24  ;;  %v2749_v56 = vor.u32 %v2748_v49, %v2745_v46  ;;  %v2759_v2 = vor.u32 %v2758_v55, %v2754_v54  ;;  %v2776_v11 = vshll.u32 %v2677_v50, 16  ;;  %v2680_v10 = vld [vmem:[#allocation2 + $0x34] sm:$0xf]  ;;  %v13324_v40 = vld [vmem:[#allocation2 + $0x84] sm:$0xff]   ;;  %v2681_v46 = vld [vmem:[#allocation2 + $0x38] sm:$0x1] }
  0x75   : > { %v2764_v3 = vrot.slane %v2762_v57, 5  ;;  %v2780_v12 = vshrl.u32 %v2677_v50, 16  ;;  %v2736_v14 = vrot.slane %v2735_v61, 4  ;;  %v2769_v23 = vrot.slane %v2767_v0, 4  ;;  %v2682_v50 = vld [vmem:[#allocation2 + $0x3c] sm:$0xf] }
  0x76   : > { %12781 = vmatmul.mubr.msk.bf16.gmra.mrb[12].mxu0 %vm1346_vm11, %v13321_v18  ;;  %v2750_v17 = vrot.slane %v2749_v56, 4  ;;  %v2772_v28 = vrot.slane %v2770_v1, 5  ;;  %v693_v29 = vrot.slane %v14151_v60, 4  ;;  %v2760_v30 = vrot.slane %v2759_v2, 4  ;;  %v2683_v56 = vld [vmem:[#allocation2 + $0x40] sm:$0xf] }
  0x77   : > { %12784 = vmatprep.mubr.msk.bf16.mxu0 %vm1346_vm11, %v13322_v27  ;;  %v2778_v18 = vrot.slane %v2776_v11, 5  ;;  %v2782_v24 = vrot.slane %v2780_v12, 4  ;;  %v2741_v35 = vsel %vm14167_vm0, %v2736_v14, %v2740_v45  ;;  %v2786_v39 = vshll.u32 %v2678_v63, 16  ;;  %v2684_v2 = vld [vmem:[#allocation2 + $0x44] sm:$0x1]  ;;  %v13328_v16 = vld [vmem:[#allocation2 + $0xb4] sm:$0xff]  }
  0x78   : > { %v2755_v27 = vsel %vm14167_vm0, %v2750_v17, %v2754_v54  ;;  %v2773_v31 = vor.u32 %v2772_v28, %v2769_v23  ;;  %v14181_v41 = vcombine.low %v2731_v53, %v2741_v35  ;;  %v2765_v43 = vsel %vm14167_vm0, %v2760_v30, %v2764_v3  ;;  %v787_v14 = vld [vmem:[#allocation2 + $0x50] sm:$0x1]  ;;  %v2685_v30 = vld [vmem:[#allocation2 + $0x48] sm:$0xf]  ;;  %v815_v48 = vld [vmem:[#allocation2 + $0x80] sm:$0x1] }
  0x79   : > { %v2783_v44 = vor.u32 %v2782_v24, %v2778_v18  ;;  %v2791_v49 = vshrl.u32 %v2679_v13, 16  ;;  %v14185_v55 = vcombine.low %v2755_v27, %v2765_v43  ;;  %v2788_v45 = vrot.slane %v2786_v39, 5  ;;  %v13325_v43 = vld [vmem:[#allocation2 + $0x90] sm:$0xff]   ;;  %v14744_v5 = vld [vmem:[#allocation2 + $0x48] sm:$0xe] }
  0x7a   : > { %v2774_v57 = vrot.slane %v2773_v31, 4  ;;  %v2794_v61 = vshll.u32 %v2679_v13, 16  ;;  %v2800_v63 = vshll.u32 %v2680_v10, 16  ;;  %v2804_v1 = vshrl.u32 %v2680_v10, 16  ;;  %v2704_v15 = vld [vmem:[#allocation2 + $0x94] sm:$0xf] }
  0x7b   : > { %v2784_v54 = vrot.slane %v2783_v44, 4  ;;  %v2793_v0 = vrot.slane %v2791_v49, 4  ;;  %v2810_v11 = vshll.u32 %v2681_v46, 16  ;;  %v2815_v12 = vshrl.u32 %v2682_v50, 16  ;;  %v2686_v49 = vld [vmem:[#allocation2 + $0x4c] sm:$0xf] }
  0x7c   : > { %v2779_v53 = vsel %vm14167_vm0, %v2774_v57, %v2778_v18  ;;  %v2796_v3 = vrot.slane %v2794_v61, 5  ;;  %v2802_v17 = vrot.slane %v2800_v63, 5  ;;  %v2806_v23 = vrot.slane %v2804_v1, 4  ;;  %v13326_v57 = vld [vmem:[#allocation2 + $0x9c] sm:$0xff]  }
  0x7d   : > { %v2789_v13 = vsel %vm14167_vm0, %v2784_v54, %v2788_v45  ;;  %v2818_v28 = vshll.u32 %v2682_v50, 16  ;;  %v2817_v27 = vrot.slane %v2815_v12, 4  ;;  %v2824_v39 = vshll.u32 %v2683_v56, 16  ;;  %v794_v63 = vld [vmem:[#allocation2 + $0x5c] sm:$0x1] }
  0x7e   : > { %12785 = vmatmul.mubr.msk.bf16.gmra.mrb[16].mxu0 %vm1346_vm11, %v13323_v32  ;;  %v14193_v24 = vcombine.low %v2779_v53, %v2789_v13  ;;  %v2797_v35 = vor.u32 %v2796_v3, %v2793_v0  ;;  %v2812_v32 = vrot.slane %v2810_v11, 5  ;;  %v2807_v31 = vor.u32 %v2806_v23, %v2802_v17  ;;  %v2688_v3 = vld [vmem:[#allocation2 + $0x54] sm:$0xf] }
  0x7f   : > { %12788 = vmatprep.mubr.msk.bf16.mxu0 %vm1346_vm11, %v13324_v40  ;;  %v2820_v18 = vrot.slane %v2818_v28, 5  ;;  %v2828_v10 = vshrl.u32 %v2683_v56, 16  ;;  %v2834_v46 = vshll.u32 %v2684_v2, 16  ;;  %v788_v40 = vsel %vm13948_vm13, %v523_v20, %v787_v14  ;;  %v2689_v14 = vld [vmem:[#allocation2 + $0x58] sm:$0xf] }
  0x80   : > { %v2798_v44 = vrot.slane %v2797_v35, 4  ;;  %v2839_v50 = vshrl.u32 %v2685_v30, 16  ;;  %v2808_v45 = vrot.slane %v2807_v31, 4  ;;  %v2826_v54 = vrot.slane %v2824_v39, 5  ;;  %789 = vst [vmem:[#allocation2 + $0x50] sm:$0x1] %v788_v40 }
  0x81   : > { %v2821_v61 = vor.u32 %v2820_v18, %v2817_v27  ;;  %v2830_v0 = vrot.slane %v2828_v10, 4  ;;  %v2836_v1 = vrot.slane %v2834_v46, 5  ;;  %v2842_v2 = vshll.u32 %v2685_v30, 16  ;;  %v801_v30 = vld [vmem:[#allocation2 + $0x68] sm:$0x1] }
  0x82   : > { %v2803_v56 = vsel %vm14167_vm0, %v2798_v44, %v2802_v17  ;;  %v2841_v53 = vrot.slane %v2839_v50, 4  ;;  %v2813_v47 = vsel %vm14167_vm0, %v2808_v45, %v2812_v32  ;;  %v2848_v12 = vshll.u32 %v2686_v49, 16  ;;  %v2691_v44 = vld [vmem:[#allocation2 + $0x60] sm:$0xf]  ;;  %v13327_v46 = vld [vmem:[#allocation2 + $0xa8] sm:$0xff]  }
  0x83   : > { %v2822_v20 = vrot.slane %v2821_v61, 4  ;;  %v2831_v11 = vor.u32 %v2830_v0, %v2826_v54  ;;  %v14204_v13 = vcombine.low %v2803_v56, %v2813_v47  ;;  %v2844_v23 = vrot.slane %v2842_v2, 5 }
  0x84   : > { %v2852_v28 = vshrl.u32 %v2686_v49, 16  ;;  %v795_v17 = vsel %vm13948_vm13, %v540_v36, %v794_v63  ;;  %v2850_v27 = vrot.slane %v2848_v12, 5  ;;  %v2863_v31 = vshrl.u32 %v2688_v3, 16  ;;  %v2692_v63 = vld [vmem:[#allocation2 + $0x64] sm:$0xf] }
  0x85   : > { %v2827_v35 = vsel %vm14167_vm0, %v2822_v20, %v2826_v54  ;;  %v2832_v32 = vrot.slane %v2831_v11, 4  ;;  %796 = vst [vmem:[#allocation2 + $0x5c] sm:$0x1] %v795_v17  ;;  %v2845_v18 = vor.u32 %v2844_v23, %v2841_v53  ;;  %v2866_v10 = vshll.u32 %v2688_v3, 16  ;;  %v2695_v17 = vld [vmem:[#allocation2 + $0x70] sm:$0xf] }
  0x86   : > { %12789 = vmatmul.mubr.msk.bf16.gmra.mrb[20].mxu0 %vm1346_vm11, %v13325_v43  ;;  %v2854_v39 = vrot.slane %v2852_v28, 4  ;;  %v2872_v43 = vshll.u32 %v2689_v14, 16  ;;  %v2865_v40 = vrot.slane %v2863_v31, 4  ;;  %v2876_v49 = vshrl.u32 %v2689_v14, 16 }
  0x87   : > { %12792 = vmatprep.mubr.msk.bf16.mxu0 %vm1346_vm11, %v13326_v57  ;;  %v2837_v36 = vsel %vm14167_vm0, %v2832_v32, %v2836_v1  ;;  %v802_v50 = vsel %vm13948_vm13, %v557_v52, %v801_v30  ;;  %v2687_v45 = vld [vmem:[#allocation2 + $0x50] sm:$0x1]  ;;  %v2846_v61 = vrot.slane %v2845_v18, 4  ;;  %v2868_v0 = vrot.slane %v2866_v10, 5  ;;  %v808_v1 = vld [vmem:[#allocation2 + $0x74] sm:$0x1] }
  0x88   : > { %v14219_v57 = vcombine.low %v2827_v35, %v2837_v36  ;;  %v2855_v54 = vor.u32 %v2854_v39, %v2850_v27  ;;  %803 = vst [vmem:[#allocation2 + $0x68] sm:$0x1] %v802_v50  ;;  %v2858_v56 = vshll.u32 %v2687_v45, 16  ;;  %v2874_v53 = vrot.slane %v2872_v43, 5  ;;  %v2694_v52 = vld [vmem:[#allocation2 + $0x6c] sm:$0xf] }
  0x89   : > { %v2878_v2 = vrot.slane %v2876_v49, 4  ;;  %v2887_v3 = vshrl.u32 %v2691_v44, 16  ;;  %v2851_v47 = vsel %vm14167_vm0, %v2846_v61, %v2850_v27  ;;  %v2869_v20 = vor.u32 %v2868_v0, %v2865_v40  ;;  %v13329_v61 = vld [vmem:[#allocation2 + $0xc0] sm:$0xff]  }
  0x8a   : > { %v2856_v33 = vrot.slane %v2855_v54, 4  ;;  %v2890_v11 = vshll.u32 %v2691_v44, 16  ;;  %v2860_v12 = vrot.slane %v2858_v56, 5  ;;  %v2896_v28 = vshll.u32 %v2692_v63, 16 }
  0x8b   : > { %v2879_v14 = vor.u32 %v2878_v2, %v2874_v53  ;;  %v2889_v23 = vrot.slane %v2887_v3, 4  ;;  %v2870_v35 = vrot.slane %v2869_v20, 4  ;;  %v2900_v31 = vshrl.u32 %v2692_v63, 16  ;;  %v2697_v2 = vld [vmem:[#allocation2 + $0x78] sm:$0xf] }
  0x8c   : > { %v2690_v30 = vld [vmem:[#allocation2 + $0x5c] sm:$0x1]  ;;  %v2892_v32 = vrot.slane %v2890_v11, 5  ;;  %v809_v27 = vsel %vm13948_vm13, %v574_v9, %v808_v1  ;;  %v2861_v18 = vsel %vm14167_vm0, %v2856_v33, %v2860_v12  ;;  %v2898_v43 = vrot.slane %v2896_v28, 5 }
  0x8d   : > { %v2880_v39 = vrot.slane %v2879_v14, 4  ;;  %v2882_v10 = vshll.u32 %v2690_v30, 16  ;;  %810 = vst [vmem:[#allocation2 + $0x74] sm:$0x1] %v809_v27  ;;  %v14231_v44 = vcombine.low %v2851_v47, %v2861_v18  ;;  %v2902_v40 = vrot.slane %v2900_v31, 4 }
  0x8e   : > { %12793 = vmatmul.mubr.msk.bf16.gmra.mrb[24].mxu0 %vm1346_vm11, %v13327_v46  ;;  %v2875_v46 = vsel %vm14167_vm0, %v2870_v35, %v2874_v53  ;;  %v2893_v36 = vor.u32 %v2892_v32, %v2889_v23  ;;  %v2911_v9 = vshrl.u32 %v2694_v52, 16  ;;  %v2914_v45 = vshll.u32 %v2694_v52, 16  ;;  %v2698_v33 = vld [vmem:[#allocation2 + $0x7c] sm:$0xf]  ;;  %v822_v30 = vld [vmem:[#allocation2 + $0x8c] sm:$0x1] }
  0x8f   : > { %12796 = vmatprep.mubr.msk.bf16.mxu0 %vm1346_vm11, %v13328_v16  ;;  %v2884_v49 = vrot.slane %v2882_v10, 5  ;;  %v2693_v50 = vld [vmem:[#allocation2 + $0x68] sm:$0x1]  ;;  %v2920_v16 = vshll.u32 %v2695_v17, 16  ;;  %v2903_v0 = vor.u32 %v2902_v40, %v2898_v43  ;;  %v2924_v56 = vshrl.u32 %v2695_v17, 16 }
  0x90   : > { %v2894_v54 = vrot.slane %v2893_v36, 4  ;;  %v2906_v63 = vshll.u32 %v2693_v50, 16  ;;  %v2913_v1 = vrot.slane %v2911_v9, 4  ;;  %v2916_v47 = vrot.slane %v2914_v45, 5  ;;  %v829_v50 = vld [vmem:[#allocation2 + $0x98] sm:$0x1] }
  0x91   : > { %v2885_v3 = vsel %vm14167_vm0, %v2880_v39, %v2884_v49  ;;  %v2922_v53 = vrot.slane %v2920_v16, 5  ;;  %v2904_v52 = vrot.slane %v2903_v0, 4  ;;  %v2926_v23 = vrot.slane %v2924_v56, 4  ;;  %v2703_v56 = vld [vmem:[#allocation2 + $0x90] sm:$0xf] }
  0x92   : > { %v14237_v20 = vcombine.low %v2875_v46, %v2885_v3  ;;  %v2899_v11 = vsel %vm14167_vm0, %v2894_v54, %v2898_v43  ;;  %v2908_v12 = vrot.slane %v2906_v63, 5  ;;  %v2917_v14 = vor.u32 %v2916_v47, %v2913_v1  ;;  %v2700_v43 = vld [vmem:[#allocation2 + $0x84] sm:$0xf]  ;;  %v2701_v46 = vld [vmem:[#allocation2 + $0x88] sm:$0xf] }
  0x93   : > { %v816_v28 = vsel %vm13948_vm13, %v591_v25, %v815_v48  ;;  %v2935_v17 = vshrl.u32 %v2697_v2, 16  ;;  %v2938_v31 = vshll.u32 %v2697_v2, 16  ;;  %v2944_v27 = vshll.u32 %v2698_v33, 16 }
  0x94   : > { %v2909_v35 = vsel %vm14167_vm0, %v2904_v52, %v2908_v12  ;;  %v2696_v32 = vld [vmem:[#allocation2 + $0x74] sm:$0x1]  ;;  %817 = vst [vmem:[#allocation2 + $0x80] sm:$0x1] %v816_v28  ;;  %v2948_v18 = vshrl.u32 %v2698_v33, 16  ;;  %v2918_v62 = vrot.slane %v2917_v14, 4  ;;  %v2927_v10 = vor.u32 %v2926_v23, %v2922_v53 }
  0x95   : > { %v14250_v39 = vcombine.low %v2899_v11, %v2909_v35  ;;  %v2930_v25 = vshll.u32 %v2696_v32, 16  ;;  %v2937_v36 = vrot.slane %v2935_v17, 4  ;;  %v2940_v40 = vrot.slane %v2938_v31, 5  ;;  %v11559_v52 = vld [vmem:[%s17451_s1 + $0x2] sm:$0x3] }
  0x96   : > { %12797 = vmatmul.mubr.msk.bf16.gmra.mrb[28].mxu0 %vm1346_vm11, %v13329_v61  ;;  %v2946_v48 = vrot.slane %v2944_v27, 5  ;;  %v2950_v49 = vrot.slane %v2948_v18, 4  ;;  %v2923_v9 = vsel %vm14167_vm0, %v2918_v62, %v2922_v53  ;;  %v2928_v45 = vrot.slane %v2927_v10, 4  ;;  %v860_v32 = vld [vmem:[#allocation2] sm:$0xf] }
  0x97   : > { %12802 = vmatprep.mubr.msk.bf16.mxu0 %vm1346_vm11, %v14181_v41  ;;  %v2932_v16 = vrot.slane %v2930_v25, 5  ;;  %v823_v41 = vsel %vm13948_vm13, %v608_v34, %v822_v30  ;;  %v2941_v61 = vor.u32 %v2940_v40, %v2937_v36  ;;  %v2959_v0 = vshrl.u32 %v2700_v43, 16 }
  0x98   : > { %v2951_v54 = vor.u32 %v2950_v49, %v2946_v48  ;;  %824 = vst [vmem:[#allocation2 + $0x8c] sm:$0x1] %v823_v41  ;;  %v2962_v63 = vshll.u32 %v2700_v43, 16  ;;  %v2968_v3 = vshll.u32 %v2701_v46, 16  ;;  %v2972_v1 = vshrl.u32 %v2701_v46, 16 }
  0x99   : > { %v2933_v2 = vsel %vm14167_vm0, %v2928_v45, %v2932_v16  ;;  %v830_v47 = vsel %vm13948_vm13, %v625_v51, %v829_v50  ;;  %v2942_v34 = vrot.slane %v2941_v61, 4  ;;  %v2961_v11 = vrot.slane %v2959_v0, 4 }
  0x9a   : > { %v14264_v53 = vcombine.low %v2923_v9, %v2933_v2  ;;  %v2952_v33 = vrot.slane %v2951_v54, 4  ;;  %831 = vst [vmem:[#allocation2 + $0x98] sm:$0x1] %v830_v47  ;;  %v2964_v14 = vrot.slane %v2962_v63, 5  ;;  %v2970_v23 = vrot.slane %v2968_v3, 5 }
  0x9b   : > { %v2699_v12 = vld [vmem:[#allocation2 + $0x80] sm:$0x1]  ;;  %v2974_v28 = vrot.slane %v2972_v1, 4  ;;  %v2983_v17 = vshrl.u32 %v2703_v56, 16  ;;  %v2947_v42 = vsel %vm14167_vm0, %v2942_v34, %v2946_v48  ;;  %v2986_v30 = vshll.u32 %v2703_v56, 16 }
  0x9c   : > { %v2954_v51 = vshll.u32 %v2699_v12, 16  ;;  %v2992_v35 = vshll.u32 %v2704_v15, 16  ;;  %v2965_v31 = vor.u32 %v2964_v14, %v2961_v11  ;;  %v2996_v62 = vshrl.u32 %v2704_v15, 16  ;;  %v13548_v1 = vld [vmem:[#allocation2 + $0x4] sm:$0xf] }
  0x9d   : > { %v2975_v27 = vor.u32 %v2974_v28, %v2970_v23  ;;  %v2985_v18 = vrot.slane %v2983_v17, 4  ;;  %v2988_v25 = vrot.slane %v2986_v30, 5  ;;  %v913_v49 = vshrl.u32 %v860_v32, 16  ;;  %v13549_v34 = vld [vmem:[#allocation2 + $0x8] sm:$0x1] }
  0x9e   : > { %12803 = vmatmul.mubr.msk.bf16.vlgmr.msra.gmra.mrb[0].mxu0 %vm1346_vm11, %v14185_v55  ;;  %v2956_v10 = vrot.slane %v2954_v51, 5  ;;  %v2994_v43 = vrot.slane %v2992_v35, 5  ;;  %v1400_v55 = vand.u32 %v11559_v52, %v13795_v4  ;;  %v2966_v36 = vrot.slane %v2965_v31, 4  ;;  %v862_v11 = vld [vmem:[#allocation2 + $0xc] sm:$0xf] }
  0x9f   : > { %12835 = vmatpush3.bf16.msra.mxu0 %v14089_v19  ;;  %12806 = vmatprep.mubr.msk.bf16.mxu0 %vm1346_vm11, %v14193_v24  ;;  %v2702_v46 = vld [vmem:[#allocation2 + $0x8c] sm:$0x1]  ;;  %v2976_v40 = vrot.slane %v2975_v27, 4  ;;  %v2998_v48 = vrot.slane %v2996_v62, 4  ;;  %v2989_v9 = vor.u32 %v2988_v25, %v2985_v18  ;;  %v916_v24 = vshll.u32 %v860_v32, 16 }
  0xa0   : > { %v2957_v19 = vsel %vm14167_vm0, %v2952_v33, %v2956_v10  ;;  %v2978_v50 = vshll.u32 %v2702_v46, 16  ;;  %12664 = vmatprep.subr.bf16.mxu1 %v1400_v55  ;;  %v2971_v16 = vsel %vm14167_vm0, %v2966_v36, %v2970_v23  ;;  %v915_v54 = vrot.slane %v913_v49, 4  ;;  %v836_v31 = vld [vmem:[#allocation2 + $0xa4] sm:$0x1]  ;;  %v13550_v62 = vld [vmem:[#allocation2 + $0x10] sm:$0xf] }
  0xa1   : > { %v14279_v45 = vcombine.low %v2947_v42, %v2957_v19  ;;  %v2705_v41 = vld [vmem:[#allocation2 + $0x98] sm:$0x1]  ;;  %v2999_v61 = vor.u32 %v2998_v48, %v2994_v43  ;;  %12665 = vmatpush3.bf16.msra.mxu1 %v1400_v55  ;;  %v2990_v63 = vrot.slane %v2989_v9, 4  ;;  %v918_v2 = vrot.slane %v916_v24, 5  ;;  %v13551_v36 = vld [vmem:[#allocation2 + $0x14] sm:$0x1] }
  0xa2   : > { %v2980_v0 = vrot.slane %v2978_v50, 5  ;;  %v3002_v56 = vshll.u32 %v2705_v41, 16  ;;  %v922_v47 = vshll.u32 %v13548_v1, 16  ;;  %v926_v15 = vshrl.u32 %v13548_v1, 16  ;;  %v2707_v48 = vld [vmem:[#allocation2 + $0xa0] sm:$0xf] }
  0xa3   : > { %v3000_v3 = vrot.slane %v2999_v61, 4  ;;  %v932_v33 = vshll.u32 %v13549_v34, 16  ;;  %v2995_v12 = vsel %vm14167_vm0, %v2990_v63, %v2994_v43  ;;  %v919_v23 = vor.u32 %v918_v2, %v915_v54  ;;  %v2706_v43 = vld [vmem:[#allocation2 + $0x9c] sm:$0xf]  ;;  %v843_v54 = vld [vmem:[#allocation2 + $0xb0] sm:$0x1] }
  0xa4   : > { %v2981_v52 = vsel %vm14167_vm0, %v2976_v40, %v2980_v0  ;;  %v3004_v14 = vrot.slane %v3002_v56, 5  ;;  %v924_v17 = vrot.slane %v922_v47, 5  ;;  %v928_v42 = vrot.slane %v926_v15, 4  ;;  %v2710_v15 = vld [vmem:[#allocation2 + $0xac] sm:$0xf] }
  0xa5   : > { %v14291_v28 = vcombine.low %v2971_v16, %v2981_v52  ;;  %v934_v51 = vrot.slane %v932_v33, 5  ;;  %v937_v35 = vshrl.u32 %v862_v11, 16  ;;  %v940_v32 = vshll.u32 %v862_v11, 16 }
  0xa6   : > { %12807 = vmatmul.mubr.msk.bf16.gmra.mrb[4].mxu0 %vm1346_vm11, %v14204_v13  ;;  %v3005_v30 = vsel %vm14167_vm0, %v3000_v3, %v3004_v14  ;;  %v920_v13 = vrot.slane %v919_v23, 4  ;;  %v929_v18 = vor.u32 %v928_v42, %v924_v17  ;;  %v946_v10 = vshll.u32 %v13550_v62, 16  ;;  %v2709_v3 = vld [vmem:[#allocation2 + $0xa8] sm:$0xf] }
  0xa7   : > { %12810 = vmatprep.mubr.msk.bf16.mxu0 %vm1346_vm11, %v14219_v57  ;;  %v14295_v27 = vcombine.low %v2995_v12, %v3005_v30  ;;  %v950_v25 = vshrl.u32 %v13550_v62, 16  ;;  %v939_v55 = vrot.slane %v937_v35, 4  ;;  %v942_v46 = vrot.slane %v940_v32, 5 }
  0xa8   : > { %v925_v57 = vsel %vm14167_vm0, %v920_v13, %v924_v17  ;;  %v956_v40 = vshll.u32 %v13551_v36, 16  ;;  %v930_v49 = vrot.slane %v929_v18, 4  ;;  %v948_v19 = vrot.slane %v946_v10, 5  ;;  %v864_v17 = vld [vmem:[#allocation2 + $0x18] sm:$0xf] }
  0xa9   : > { %v952_v50 = vrot.slane %v950_v25, 4  ;;  %v837_v9 = vsel %vm13948_vm13, %v642_v58, %v836_v31  ;;  %v943_v24 = vor.u32 %v942_v46, %v939_v55  ;;  %v3007_v41 = vshrl.u32 %v2706_v43, 16  ;;  %v866_v46 = vld [vmem:[#allocation2 + $0x24] sm:$0xf] }
  0xaa   : > { %v958_v16 = vrot.slane %v956_v40, 5  ;;  %838 = vst [vmem:[#allocation2 + $0xa4] sm:$0x1] %v837_v9  ;;  %v3010_v61 = vshll.u32 %v2706_v43, 16  ;;  %v935_v0 = vsel %vm14167_vm0, %v930_v49, %v934_v51  ;;  %v3016_v56 = vshll.u32 %v2707_v48, 16 }
  0xab   : > { %v953_v63 = vor.u32 %v952_v50, %v948_v19  ;;  %v3020_v2 = vshrl.u32 %v2707_v48, 16  ;;  %v11560_v59 = vcombine.low %v925_v57, %v935_v0  ;;  %v944_v1 = vrot.slane %v943_v24, 4  ;;  %v13552_v48 = vld [vmem:[#allocation2 + $0x1c] sm:$0xf] }
  0xac   : > { %v3009_v47 = vrot.slane %v3007_v41, 4  ;;  %v3012_v58 = vrot.slane %v3010_v61, 5  ;;  %v3018_v33 = vrot.slane %v3016_v56, 5  ;;  %v844_v52 = vsel %vm13948_vm13, %v659_v21, %v843_v54 }
  0xad   : > { %v954_v34 = vrot.slane %v953_v63, 4  ;;  %v3022_v11 = vrot.slane %v3020_v2, 4  ;;  %12666 = vmatprep.mubr.msk.bf16.mxu1 %vm1346_vm11, %v11560_v59  ;;  %845 = vst [vmem:[#allocation2 + $0xb0] sm:$0x1] %v844_v52  ;;  %v3031_v14 = vshrl.u32 %v2709_v3, 16  ;;  %v3034_v23 = vshll.u32 %v2709_v3, 16 }
  0xae   : > { %12811 = vmatmul.mubr.msk.bf16.gmra.mrb[8].mxu0 %vm1346_vm11, %v14231_v44  ;;  %v949_v44 = vsel %vm14167_vm0, %v944_v1, %v948_v19  ;;  %v3013_v12 = vor.u32 %v3012_v58, %v3009_v47  ;;  %v3040_v51 = vshll.u32 %v2710_v15, 16  ;;  %v3044_v30 = vshrl.u32 %v2710_v15, 16  ;;  %v850_v1 = vld [vmem:[#allocation2 + $0xbc] sm:$0x1]  ;;  %v13554_v52 = vld [vmem:[#allocation2 + $0x28] sm:$0xf] }
  0xaf   : > { %12814 = vmatprep.mubr.msk.bf16.mxu0 %vm1346_vm11, %v14237_v20  ;;  %v959_v20 = vsel %vm14167_vm0, %v954_v34, %v958_v16  ;;  %v3023_v42 = vor.u32 %v3022_v11, %v3018_v33  ;;  %v3033_v35 = vrot.slane %v3031_v14, 4  ;;  %v3036_v21 = vrot.slane %v3034_v23, 5  ;;  %v13553_v16 = vld [vmem:[#allocation2 + $0x20] sm:$0x1]  ;;  %v13555_v23 = vld [vmem:[#allocation2 + $0x2c] sm:$0x1] }
  0xb0   : > { %v11561_v22 = vcombine.low %v949_v44, %v959_v20  ;;  %v3014_v13 = vrot.slane %v3013_v12, 4  ;;  %v3042_v18 = vrot.slane %v3040_v51, 5  ;;  %v3046_v62 = vrot.slane %v3044_v30, 4 }
  0xb1   : > { %v2708_v32 = vld [vmem:[#allocation2 + $0xa4] sm:$0x1]  ;;  %v3024_v31 = vrot.slane %v3023_v42, 4  ;;  %v961_v10 = vshrl.u32 %v864_v17, 16  ;;  %v3037_v57 = vor.u32 %v3036_v21, %v3033_v35  ;;  %v964_v55 = vshll.u32 %v864_v17, 16 }
  0xb2   : > { %12667 = vmatmul.mubr.msk.bf16.vlgmr.msra.gmra.mrb[0].mxu1 %vm1346_vm11, %v11561_v22  ;;  %v3019_v25 = vsel %vm14167_vm0, %v3014_v13, %v3018_v33  ;;  %v3026_v43 = vshll.u32 %v2708_v32, 16  ;;  %v3047_v36 = vor.u32 %v3046_v62, %v3042_v18  ;;  %v970_v49 = vshll.u32 %v13552_v48, 16  ;;  %v2712_v42 = vld [vmem:[#allocation2 + $0xb4] sm:$0xf]  ;;  %v14339_v35 = vld [vmem:[#allocation2 + $0xb8] sm:$0xf] }
  0xb3   : > { %v963_v40 = vrot.slane %v961_v10, 4  ;;  %v974_v19 = vshrl.u32 %v13552_v48, 16  ;;  %v3038_v9 = vrot.slane %v3037_v57, 4  ;;  %v966_v24 = vrot.slane %v964_v55, 5  ;;  %v857_v21 = vld [vmem:[#allocation2 + $0xc8] sm:$0x1] }
  0xb4   : > { %v3028_v50 = vrot.slane %v3026_v43, 5  ;;  %v980_v41 = vshll.u32 %v13553_v16, 16  ;;  %v2711_v61 = vld [vmem:[#allocation2 + $0xb0] sm:$0x1]  ;;  %v3048_v54 = vrot.slane %v3047_v36, 4  ;;  %v972_v0 = vrot.slane %v970_v49, 5 }
  0xb5   : > { %v976_v63 = vrot.slane %v974_v19, 4  ;;  %v985_v56 = vshrl.u32 %v866_v46, 16  ;;  %v3043_v3 = vsel %vm14167_vm0, %v3038_v9, %v3042_v18  ;;  %v967_v59 = vor.u32 %v966_v24, %v963_v40  ;;  %v2715_v18 = vld [vmem:[#allocation2 + $0xc0] sm:$0xf]  ;;  %v14355_v40 = vld [vmem:[#allocation2 + $0xc4] sm:$0xf] }
  0xb6   : > { %12815 = vmatmul.mubr.msk.bf16.gmra.mrb[12].mxu0 %vm1346_vm11, %v14250_v39  ;;  %v3029_v2 = vsel %vm14167_vm0, %v3024_v31, %v3028_v50  ;;  %v3050_v39 = vshll.u32 %v2711_v61, 16  ;;  %v982_v15 = vrot.slane %v980_v41, 5  ;;  %v988_v11 = vshll.u32 %v866_v46, 16 }
  0xb7   : > { %12818 = vmatprep.mubr.msk.bf16.mxu0 %vm1346_vm11, %v14264_v53  ;;  %v14329_v47 = vcombine.low %v3019_v25, %v3029_v2  ;;  %v977_v58 = vor.u32 %v976_v63, %v972_v0  ;;  %v987_v34 = vrot.slane %v985_v56, 4  ;;  %v968_v33 = vrot.slane %v967_v59, 4 }
  0xb8   : > { %v3052_v53 = vrot.slane %v3050_v39, 5  ;;  %v994_v44 = vshll.u32 %v13554_v52, 16  ;;  %v998_v14 = vshrl.u32 %v13554_v52, 16  ;;  %v1004_v17 = vshll.u32 %v13555_v23, 16 }
  0xb9   : > { %v978_v12 = vrot.slane %v977_v58, 4  ;;  %v851_v20 = vsel %vm13948_vm13, %v676_v26, %v850_v1  ;;  %v973_v30 = vsel %vm14167_vm0, %v968_v33, %v972_v0  ;;  %v990_v22 = vrot.slane %v988_v11, 5 }
  0xba   : > { %v3053_v51 = vsel %vm14167_vm0, %v3048_v54, %v3052_v53  ;;  %v996_v13 = vrot.slane %v994_v44, 5  ;;  %852 = vst [vmem:[#allocation2 + $0xbc] sm:$0x1] %v851_v20  ;;  %v1000_v31 = vrot.slane %v998_v14, 4  ;;  %v1006_v26 = vrot.slane %v1004_v17, 5 }
  0xbb   : > { %v14341_v32 = vcombine.low %v3043_v3, %v3053_v51  ;;  %v983_v7 = vsel %vm14167_vm0, %v978_v12, %v982_v15  ;;  %v991_v10 = vor.u32 %v990_v22, %v987_v34  ;;  %v3055_v25 = vshrl.u32 %v2712_v42, 16  ;;  %v870_v53 = vld [vmem:[#allocation2 + $0x3c] sm:$0xf]  ;;  %v13556_v44 = vld [vmem:[#allocation2 + $0x34] sm:$0xf] }
  0xbc   : > { %v11562_v62 = vcombine.low %v973_v30, %v983_v7  ;;  %v3058_v43 = vshll.u32 %v2712_v42, 16  ;;  %v1001_v57 = vor.u32 %v1000_v31, %v996_v13  ;;  %v3064_v55 = vshll.u32 %v14339_v35, 16 }
  0xbd   : > { %v3068_v46 = vshrl.u32 %v14339_v35, 16  ;;  %v858_v36 = vsel %vm13948_vm13, %v693_v29, %v857_v21  ;;  %v3057_v48 = vrot.slane %v3055_v25, 4  ;;  %v3079_v19 = vshrl.u32 %v2715_v18, 16 }
  0xbe   : > { %12819 = vmatmul.mubr.msk.bf16.gmra.mrb[16].mxu0 %vm1346_vm11, %v14279_v45  ;;  %12670 = vmatprep.mubr.msk.bf16.mxu1 %vm1346_vm11, %v11562_v62  ;;  %v992_v45 = vrot.slane %v991_v10, 4  ;;  %v3060_v49 = vrot.slane %v3058_v43, 5  ;;  %859 = vst [vmem:[#allocation2 + $0xc8] sm:$0x1] %v858_v36  ;;  %v1002_v50 = vrot.slane %v1001_v57, 4  ;;  %v3066_v9 = vrot.slane %v3064_v55, 5 }
  0xbf   : > { %12822 = vmatprep.mubr.msk.bf16.mxu0 %vm1346_vm11, %v14291_v28  ;;  %v868_v28 = vld [vmem:[#allocation2 + $0x30] sm:$0xf]  ;;  %v3070_v24 = vrot.slane %v3068_v46, 4  ;;  %v3082_v16 = vshll.u32 %v2715_v18, 16  ;;  %v3081_v38 = vrot.slane %v3079_v19, 4  ;;  %v3088_v29 = vshll.u32 %v14355_v40, 16 }
  0xc0   : > { %v997_v60 = vsel %vm14167_vm0, %v992_v45, %v996_v13  ;;  %v3061_v41 = vor.u32 %v3060_v49, %v3057_v48  ;;  %v1007_v61 = vsel %vm14167_vm0, %v1002_v50, %v1006_v26  ;;  %v3092_v56 = vshrl.u32 %v14355_v40, 16  ;;  %v13557_v62 = vld [vmem:[#allocation2 + $0x38] sm:$0x1]  ;;  %v13558_v55 = vld [vmem:[#allocation2 + $0x40] sm:$0xf] }
  0xc1   : > { %v14363_v54 = vld [vmem:[#allocation2 + $0xbc] sm:$0x1]  ;;  %v3071_v0 = vor.u32 %v3070_v24, %v3066_v9  ;;  %v3084_v63 = vrot.slane %v3082_v16, 5  ;;  %v11563_v2 = vcombine.low %v997_v60, %v1007_v61  ;;  %v3090_v59 = vrot.slane %v3088_v29, 5  ;;  %v11788_v45 = vld [vmem:[%s17451_s1 + $0xc] sm:$0x3] }
  0xc2   : > { %v3062_v3 = vrot.slane %v3061_v41, 4  ;;  %v3074_v39 = vshll.u32 %v14363_v54, 16  ;;  %v3094_v15 = vrot.slane %v3092_v56, 4  ;;  %v1009_v34 = vshrl.u32 %v868_v28, 16  ;;  %v3397_v50 = vld [vmem:[#allocation2 + $0x18] sm:$0xe] }
  0xc3   : > { %v3072_v1 = vrot.slane %v3071_v0, 4  ;;  %v3085_v58 = vor.u32 %v3084_v63, %v3081_v38  ;;  %12671 = vmatmul.mubr.msk.bf16.gmra.mrb[4].mxu1 %vm1346_vm11, %v11563_v2  ;;  %v1012_v52 = vshll.u32 %v868_v28, 16  ;;  %v1018_v12 = vshll.u32 %v13556_v44, 16  ;;  %v872_v41 = vld [vmem:[#allocation2 + $0x48] sm:$0xf] }
  0xc4   : > { %v3067_v33 = vsel %vm14167_vm0, %v3062_v3, %v3066_v9  ;;  %v3076_v11 = vrot.slane %v3074_v39, 5  ;;  %v3095_v17 = vor.u32 %v3094_v15, %v3090_v59  ;;  %v1011_v20 = vrot.slane %v1009_v34, 4  ;;  %v13559_v61 = vld [vmem:[#allocation2 + $0x44] sm:$0x1]  ;;  %v14390_v56 = vld [vmem:[#allocation2 + $0x4c] sm:$0xf] }
  0xc5   : > { %v14374_v14 = vld [vmem:[#allocation2 + $0xc8] sm:$0x1]  ;;  %v3086_v23 = vrot.slane %v3085_v58, 4  ;;  %v1022_v42 = vshrl.u32 %v13556_v44, 16  ;;  %v1014_v30 = vrot.slane %v1012_v52, 5  ;;  %v1020_v22 = vrot.slane %v1018_v12, 5 }
  0xc6   : > { %12823 = vmatmul.mubr.msk.bf16.gmra.mrb[20].mxu0 %vm1346_vm11, %v14295_v27  ;;  %v3077_v27 = vsel %vm14167_vm0, %v3072_v1, %v3076_v11  ;;  %v3098_v51 = vshll.u32 %v14374_v14, 16  ;;  %v3096_v7 = vrot.slane %v3095_v17, 4  ;;  %v1028_v10 = vshll.u32 %v13557_v62, 16  ;;  %v13560_v39 = vld [vmem:[#allocation2 + $0x10] sm:$0xf] }
  0xc7   : > { %12826 = vmatprep.mubr.msk.bf16.mxu0 %vm1346_vm11, %v14329_v47  ;;  %v11721_v13 = vcombine.low %v3067_v33, %v3077_v27  ;;  %v3091_v21 = vsel %vm14167_vm0, %v3086_v23, %v3090_v59  ;;  %v1024_v31 = vrot.slane %v1022_v42, 4  ;;  %v3396_v47 = vld [vmem:[#allocation2 + $0xc] sm:$0xe]  ;;  %v1015_v18 = vor.u32 %v1014_v30, %v1011_v20  ;;  %v13561_v1 = vld [vmem:[#allocation2 + $0x14] sm:$0x1] }
  0xc8   : > { %v3100_v26 = vrot.slane %v3098_v51, 5  ;;  %v1033_v25 = vshrl.u32 %v870_v53, 16  ;;  %v1036_v57 = vshll.u32 %v870_v53, 16  ;;  %v1042_v46 = vshll.u32 %v13558_v55, 16  ;;  %v899_v12 = vld [vmem:[#allocation2 + $0x50] sm:$0x1] }
  0xc9   : > { %v1025_v43 = vor.u32 %v1024_v31, %v1020_v22  ;;  %v1046_v36 = vshrl.u32 %v13558_v55, 16  ;;  %v1016_v49 = vrot.slane %v1015_v18, 4  ;;  %v1030_v19 = vrot.slane %v1028_v10, 5  ;;  %v874_v23 = vld [vmem:[#allocation2 + $0x54] sm:$0xf] }
  0xca   : > { %v3101_v48 = vsel %vm14167_vm0, %v3096_v7, %v3100_v26  ;;  %v1035_v28 = vrot.slane %v1033_v25, 4  ;;  %v1038_v16 = vrot.slane %v1036_v57, 5  ;;  %v1044_v60 = vrot.slane %v1042_v46, 5  ;;  %v13562_v20 = vld [vmem:[#allocation2 + $0x1c] sm:$0xf] }
  0xcb   : > { %v11722_v9 = vcombine.low %v3091_v21, %v3101_v48  ;;  %v1026_v24 = vrot.slane %v1025_v43, 4  ;;  %v1021_v38 = vsel %vm14167_vm0, %v1016_v49, %v1020_v22  ;;  %v1048_v29 = vrot.slane %v1046_v36, 4  ;;  %v13563_v27 = vld [vmem:[#allocation2 + $0x20] sm:$0x1]  ;;  %v14409_v18 = vld [vmem:[#allocation2 + $0x58] sm:$0xf] }
  0xcc   : > { %v1052_v0 = vshll.u32 %v13559_v61, 16  ;;  %v11739_v63 = vrot.slane %v3396_v47, 9  ;;  %v1039_v3 = vor.u32 %v1038_v16, %v1035_v28  ;;  %v3462_v59 = vrot.slane %v13560_v39, 5  ;;  %v14413_v57 = vld [vmem:[#allocation2 + $0x5c] sm:$0x1] }
  0xcd   : > { %v1031_v2 = vsel %vm14167_vm0, %v1026_v24, %v1030_v19  ;;  %v3465_v58 = vrot.slane %v13561_v1, 5  ;;  %v1049_v15 = vor.u32 %v1048_v29, %v1044_v60  ;;  %v14396_v53 = vand.u32 %v11788_v45, %v13795_v4  ;;  %v3398_v48 = vld [vmem:[#allocation2 + $0x24] sm:$0xe] }
  0xce   : > { %12827 = vmatmul.mubr.msk.bf16.gmra.mrb[24].mxu0 %vm1346_vm11, %v14341_v32  ;;  %v11564_v32 = vcombine.low %v1021_v38, %v1031_v2  ;;  %v1054_v34 = vrot.slane %v1052_v0, 5  ;;  %v1040_v33 = vrot.slane %v1039_v3, 4  ;;  %v3463_v11 = vsel %vm13916_vm8, %v11739_v63, %v3462_v59  ;;  %v3399_v3 = vld [vmem:[#allocation2 + $0x30] sm:$0xe] }
  0xcf   : > { %12830 = vmatprep.mubr.msk.bf16.mxu0 %vm1346_vm11, %v11721_v13  ;;  %v3464_v52 = vrot.slane %v3462_v59, 4  ;;  %v11740_v44 = vrot.slane %v3397_v50, 9  ;;  %v1050_v17 = vrot.slane %v1049_v15, 4  ;;  %12868 = vmatprep.subr.bf16.mxu0 %v14396_v53  ;;  %v3469_v42 = vrot.slane %v13562_v20, 5 }
  0xd0   : > { %12674 = vmatprep.mubr.msk.bf16.mxu1 %vm1346_vm11, %v11564_v32  ;;  %v3472_v51 = vrot.slane %v13563_v27, 5  ;;  %v1057_v30 = vshrl.u32 %v872_v41, 16  ;;  %v1045_v22 = vsel %vm14167_vm0, %v1040_v33, %v1044_v60  ;;  %v1060_v21 = vshll.u32 %v872_v41, 16 }
  0xd1   : > { %v3466_v13 = vsel %vm13916_vm8, %v3464_v52, %v3465_v58  ;;  %v1066_v7 = vshll.u32 %v14390_v56, 16  ;;  %v1055_v31 = vsel %vm14167_vm0, %v1050_v17, %v1054_v34  ;;  %v3471_v26 = vrot.slane %v3469_v42, 4  ;;  %v13564_v34 = vld [vmem:[#allocation2 + $0x28] sm:$0xf]  ;;  %v13566_v17 = vld [vmem:[#allocation2 + $0x34] sm:$0xf] }
  0xd2   : > { %v11756_v47 = vcombine.low %v3463_v11, %v3466_v13  ;;  %v11565_v62 = vcombine.low %v1045_v22, %v1055_v31  ;;  %v3470_v10 = vsel %vm13916_vm8, %v11740_v44, %v3469_v42  ;;  %v1059_v25 = vrot.slane %v1057_v30, 4  ;;  %v13565_v11 = vld [vmem:[#allocation2 + $0x2c] sm:$0x1]  ;;  %v14426_v44 = vld [vmem:[#allocation2 + $0x60] sm:$0xf] }
  0xd3   : > { %v1062_v43 = vrot.slane %v1060_v21, 5  ;;  %v1068_v55 = vrot.slane %v1066_v7, 5  ;;  %v1070_v46 = vshrl.u32 %v14390_v56, 16  ;;  %v1076_v36 = vshll.u32 %v899_v12, 16  ;;  %v13567_v42 = vld [vmem:[#allocation2 + $0x38] sm:$0x1] }
  0xd4   : > { %v1081_v45 = vshrl.u32 %v874_v23, 16  ;;  %12675 = vmatmul.mubr.msk.bf16.gmra.mrb[8].mxu1 %vm1346_vm11, %v11565_v62  ;;  %v3473_v49 = vsel %vm13916_vm8, %v3471_v26, %v3472_v51  ;;  %v1084_v28 = vshll.u32 %v874_v23, 16  ;;  %v1090_v50 = vshll.u32 %v14409_v18, 16  ;;  %v14428_v51 = vld [vmem:[#allocation2 + $0x64] sm:$0xf] }
  0xd5   : > { %v1063_v19 = vor.u32 %v1062_v43, %v1059_v25  ;;  %v1072_v24 = vrot.slane %v1070_v46, 4  ;;  %v1100_v29 = vshll.u32 %v14413_v57, 16  ;;  %v11757_v61 = vcombine.low %v3470_v10, %v3473_v49  ;;  %v14435_v7 = vld [vmem:[#allocation2 + $0x68] sm:$0x1]  ;;  %v14437_v31 = vld [vmem:[#allocation2 + $0x6c] sm:$0xf] }
  0xd6   : > { %12831 = vmatmul.mubr.msk.bf16.gmra.mrb[28].mxu0 %vm1346_vm11, %v11722_v9  ;;  %v1083_v16 = vrot.slane %v1081_v45, 4  ;;  %v1094_v9 = vshrl.u32 %v14409_v18, 16  ;;  %v1086_v41 = vrot.slane %v1084_v28, 5  ;;  %v1092_v38 = vrot.slane %v1090_v50, 5  ;;  %v14444_v25 = vld [vmem:[#allocation2 + $0x70] sm:$0xf] }
  0xd7   : > { %12836 = vmatprep.mubr.msk.bf16.mxu0 %vm1346_vm11, %v11756_v47  ;;  %v1064_v60 = vrot.slane %v1063_v19, 4  ;;  %v1073_v0 = vor.u32 %v1072_v24, %v1068_v55  ;;  %v1078_v63 = vrot.slane %v1076_v36, 5  ;;  %v1102_v1 = vrot.slane %v1100_v29, 5 }
  0xd8   : > { %v1096_v2 = vrot.slane %v1094_v9, 4  ;;  %v1087_v59 = vor.u32 %v1086_v41, %v1083_v16  ;;  %v11741_v58 = vrot.slane %v3398_v48, 9  ;;  %v3476_v33 = vrot.slane %v13564_v34, 5  ;;  %v14457_v16 = vld [vmem:[#allocation2 + $0x74] sm:$0x1] }
  0xd9   : > { %v1069_v39 = vsel %vm14167_vm0, %v1064_v60, %v1068_v55  ;;  %v1074_v32 = vrot.slane %v1073_v0, 4  ;;  %v3479_v52 = vrot.slane %v13565_v11, 5  ;;  %v11742_v23 = vrot.slane %v3399_v3, 9 }
  0xda   : > { %v1097_v15 = vor.u32 %v1096_v2, %v1092_v38  ;;  %v1088_v12 = vrot.slane %v1087_v59, 4  ;;  %v3483_v20 = vrot.slane %v13566_v17, 5  ;;  %v3486_v27 = vrot.slane %v13567_v42, 5  ;;  %v3400_v2 = vld [vmem:[#allocation2 + $0x3c] sm:$0xe] }
  0xdb   : > { %v1079_v30 = vsel %vm14167_vm0, %v1074_v32, %v1078_v63  ;;  %v3477_v13 = vsel %vm13916_vm8, %v11741_v58, %v3476_v33  ;;  %v3478_v21 = vrot.slane %v3476_v33, 4  ;;  %v1105_v46 = vshrl.u32 %v14426_v44, 16  ;;  %v3401_v33 = vld [vmem:[#allocation2 + $0x48] sm:$0xe] }
  0xdc   : > { %v1098_v22 = vrot.slane %v1097_v15, 4  ;;  %v11566_v47 = vcombine.low %v1069_v39, %v1079_v30  ;;  %v1093_v26 = vsel %vm14167_vm0, %v1088_v12, %v1092_v38  ;;  %v3484_v62 = vsel %vm13916_vm8, %v11742_v23, %v3483_v20  ;;  %v13568_v23 = vld [vmem:[#allocation2 + $0x40] sm:$0xf]  ;;  %v13569_v30 = vld [vmem:[#allocation2 + $0x44] sm:$0x1] }
  0xdd   : > { %v3485_v10 = vrot.slane %v3483_v20, 4  ;;  %v3480_v55 = vsel %vm13916_vm8, %v3478_v21, %v3479_v52  ;;  %v1114_v49 = vshll.u32 %v14428_v51, 16  ;;  %v1107_v28 = vrot.slane %v1105_v46, 4 }
  0xde   : > { %12837 = vmatmul.mubr.msk.bf16.vlgmr.msra.gmra.mrb[0].mxu0 %vm1346_vm11, %v11757_v61  ;;  %v1103_v43 = vsel %vm14167_vm0, %v1098_v22, %v1102_v1  ;;  %12678 = vmatprep.mubr.msk.bf16.mxu1 %vm1346_vm11, %v11566_v47  ;;  %v11758_v45 = vcombine.low %v3477_v13, %v3480_v55  ;;  %v1118_v24 = vshrl.u32 %v14428_v51, 16  ;;  %v1124_v60 = vshll.u32 %v14435_v7, 16  ;;  %v14470_v13 = vld [vmem:[#allocation2 + $0x78] sm:$0xf]  ;;  %v13570_v55 = vld [vmem:[#allocation2 + $0x4c] sm:$0xf] }
  0xdf   : > { %12869 = vmatpush3.bf16.msra.mxu0 %v14396_v53  ;;  %v1108_v53 = vshll.u32 %v14426_v44, 16  ;;  %v11567_v36 = vcombine.low %v1093_v26, %v1103_v43  ;;  %v3487_v48 = vsel %vm13916_vm8, %v3485_v10, %v3486_v27  ;;  %v1116_v9 = vrot.slane %v1114_v49, 5 }
  0xe0   : > { %v11759_v19 = vcombine.low %v3484_v62, %v3487_v48  ;;  %12840 = vmatprep.mubr.msk.bf16.mxu0 %vm1346_vm11, %v11758_v45  ;;  %v1129_v41 = vshrl.u32 %v14437_v31, 16  ;;  %v1132_v38 = vshll.u32 %v14437_v31, 16  ;;  %v1120_v61 = vrot.slane %v1118_v24, 4  ;;  %v14476_v45 = vld [vmem:[#allocation2 + $0x7c] sm:$0xf] }
  0xe1   : > { %v1110_v50 = vrot.slane %v1108_v53, 5  ;;  %12679 = vmatmul.mubr.msk.bf16.gmra.mrb[12].mxu1 %vm1346_vm11, %v11567_v36  ;;  %v1138_v0 = vshll.u32 %v14444_v25, 16  ;;  %v1142_v63 = vshrl.u32 %v14444_v25, 16  ;;  %v1126_v3 = vrot.slane %v1124_v60, 5  ;;  %v13571_v53 = vld [vmem:[#allocation2 + $0x50] sm:$0x1] }
  0xe2   : > { %v1131_v39 = vrot.slane %v1129_v41, 4  ;;  %v1134_v59 = vrot.slane %v1132_v38, 5  ;;  %v1148_v1 = vshll.u32 %v14457_v16, 16  ;;  %v1121_v32 = vor.u32 %v1120_v61, %v1116_v9  ;;  %v14485_v24 = vld [vmem:[#allocation2 + $0x84] sm:$0xf] }
  0xe3   : > { %v1111_v29 = vor.u32 %v1110_v50, %v1107_v28  ;;  %v1140_v15 = vrot.slane %v1138_v0, 5  ;;  %v1144_v34 = vrot.slane %v1142_v63, 4  ;;  %v11743_v12 = vrot.slane %v3400_v2, 9  ;;  %v14482_v28 = vld [vmem:[#allocation2 + $0x80] sm:$0x1] }
  0xe4   : > { %v1135_v11 = vor.u32 %v1134_v59, %v1131_v39  ;;  %v1150_v52 = vrot.slane %v1148_v1, 5  ;;  %v3490_v17 = vrot.slane %v13568_v23, 5  ;;  %v1122_v42 = vrot.slane %v1121_v32, 4  ;;  %v14494_v2 = vld [vmem:[#allocation2 + $0x88] sm:$0xf] }
  0xe5   : > { %v1112_v58 = vrot.slane %v1111_v29, 4  ;;  %v1145_v27 = vor.u32 %v1144_v34, %v1140_v15  ;;  %v3493_v22 = vrot.slane %v13569_v30, 5  ;;  %v11744_v62 = vrot.slane %v3401_v33, 9  ;;  %v14501_v1 = vld [vmem:[#allocation2 + $0x8c] sm:$0x1] }
  0xe6   : > { %12841 = vmatmul.mubr.msk.bf16.gmra.mrb[4].mxu0 %vm1346_vm11, %v11759_v19  ;;  %v1136_v21 = vrot.slane %v1135_v11, 4  ;;  %v3491_v47 = vsel %vm13916_vm8, %v11743_v12, %v3490_v17  ;;  %v3492_v26 = vrot.slane %v3490_v17, 4  ;;  %v1127_v10 = vsel %vm14167_vm0, %v1122_v42, %v1126_v3  ;;  %v3402_v11 = vld [vmem:[#allocation2 + $0x54] sm:$0xe] }
  0xe7   : > { %v1117_v20 = vsel %vm14167_vm0, %v1112_v58, %v1116_v9  ;;  %v1146_v43 = vrot.slane %v1145_v27, 4  ;;  %v3497_v46 = vrot.slane %v13570_v55, 5  ;;  %v3500_v36 = vrot.slane %v13571_v53, 5 }
  0xe8   : > { %v11568_v48 = vcombine.low %v1117_v20, %v1127_v10  ;;  %v1141_v49 = vsel %vm14167_vm0, %v1136_v21, %v1140_v15  ;;  %v3494_v19 = vsel %vm13916_vm8, %v3492_v26, %v3493_v22  ;;  %v1153_v50 = vshrl.u32 %v14470_v13, 16  ;;  %v13572_v26 = vld [vmem:[#allocation2 + $0x58] sm:$0xf]  ;;  %v3403_v10 = vld [vmem:[#allocation2 + $0x60] sm:$0xe] }
  0xe9   : > { %v1151_v9 = vsel %vm14167_vm0, %v1146_v43, %v1150_v52  ;;  %v11760_v60 = vcombine.low %v3491_v47, %v3494_v19  ;;  %v3498_v41 = vsel %vm13916_vm8, %v11744_v62, %v3497_v46  ;;  %v3499_v38 = vrot.slane %v3497_v46, 4  ;;  %v13573_v19 = vld [vmem:[#allocation2 + $0x5c] sm:$0x1] }
  0xea   : > { %12682 = vmatprep.mubr.msk.bf16.mxu1 %vm1346_vm11, %v11568_v48  ;;  %v11569_v29 = vcombine.low %v1141_v49, %v1151_v9  ;;  %v1155_v61 = vrot.slane %v1153_v50, 4  ;;  %v1156_v0 = vshll.u32 %v14470_v13, 16  ;;  %v1162_v63 = vshll.u32 %v14476_v45, 16 }
  0xeb   : > { %12844 = vmatprep.mubr.msk.bf16.mxu0 %vm1346_vm11, %v11760_v60  ;;  %v3501_v3 = vsel %vm13916_vm8, %v3499_v38, %v3500_v36  ;;  %v1166_v39 = vshrl.u32 %v14476_v45, 16  ;;  %v1172_v59 = vshll.u32 %v14482_v28, 16  ;;  %v1177_v58 = vshrl.u32 %v14485_v24, 16 }
  0xec   : > { %12683 = vmatmul.mubr.msk.bf16.gmra.mrb[16].mxu1 %vm1346_vm11, %v11569_v29  ;;  %v11761_v32 = vcombine.low %v3498_v41, %v3501_v3  ;;  %v1158_v15 = vrot.slane %v1156_v0, 5  ;;  %v1164_v34 = vrot.slane %v1162_v63, 5  ;;  %v1180_v33 = vshll.u32 %v14485_v24, 16  ;;  %v14514_v29 = vld [vmem:[#allocation2 + $0x90] sm:$0xf] }
  0xed   : > { %v1168_v52 = vrot.slane %v1166_v39, 4  ;;  %v1174_v12 = vrot.slane %v1172_v59, 5  ;;  %v1179_v23 = vrot.slane %v1177_v58, 4  ;;  %v1186_v17 = vshll.u32 %v14494_v2, 16  ;;  %v13574_v63 = vld [vmem:[#allocation2 + $0x64] sm:$0xf] }
  0xee   : > { %12845 = vmatmul.mubr.msk.bf16.gmra.mrb[8].mxu0 %vm1346_vm11, %v11761_v32  ;;  %v1159_v20 = vor.u32 %v1158_v15, %v1155_v61  ;;  %v1182_v42 = vrot.slane %v1180_v33, 5  ;;  %v1190_v27 = vshrl.u32 %v14494_v2, 16  ;;  %v1196_v30 = vshll.u32 %v14501_v1, 16  ;;  %v13575_v39 = vld [vmem:[#allocation2 + $0x68] sm:$0x1] }
  0xef   : > { %v1169_v22 = vor.u32 %v1168_v52, %v1164_v34  ;;  %v1188_v21 = vrot.slane %v1186_v17, 5  ;;  %v11745_v47 = vrot.slane %v3402_v11, 9  ;;  %v3504_v62 = vrot.slane %v13572_v26, 5  ;;  %v14520_v58 = vld [vmem:[#allocation2 + $0x94] sm:$0xf] }
  0xf0   : > { %v1160_v43 = vrot.slane %v1159_v20, 4  ;;  %v1183_v55 = vor.u32 %v1182_v42, %v1179_v23  ;;  %v1192_v46 = vrot.slane %v1190_v27, 4  ;;  %v1198_v53 = vrot.slane %v1196_v30, 5  ;;  %v14522_v32 = vld [vmem:[#allocation2 + $0x98] sm:$0x1] }
  0xf1   : > { %v1170_v36 = vrot.slane %v1169_v22, 4  ;;  %v3505_v48 = vsel %vm13916_vm8, %v11745_v47, %v3504_v62  ;;  %v3506_v49 = vrot.slane %v3504_v62, 4  ;;  %v3507_v50 = vrot.slane %v13573_v19, 5  ;;  %v14526_v52 = vld [vmem:[#allocation2 + $0x9c] sm:$0xf] }
  0xf2   : > { %v1165_v9 = vsel %vm14167_vm0, %v1160_v43, %v1164_v34  ;;  %v1184_v60 = vrot.slane %v1183_v55, 4  ;;  %v1193_v41 = vor.u32 %v1192_v46, %v1188_v21  ;;  %v11746_v38 = vrot.slane %v3403_v10, 9  ;;  %v14543_v43 = vld [vmem:[#allocation2 + $0xa4] sm:$0x1]  ;;  %v3404_v55 = vld [vmem:[#allocation2 + $0x6c] sm:$0xe] }
  0xf3   : > { %v1175_v61 = vsel %vm14167_vm0, %v1170_v36, %v1174_v12  ;;  %v3508_v0 = vsel %vm13916_vm8, %v3506_v49, %v3507_v50  ;;  %v3511_v3 = vrot.slane %v13574_v63, 5  ;;  %v3514_v59 = vrot.slane %v13575_v39, 5  ;;  %v14528_v12 = vld [vmem:[#allocation2 + $0xa0] sm:$0xf] }
  0xf4   : > { %v11570_v15 = vcombine.low %v1165_v9, %v1175_v61  ;;  %v1189_v34 = vsel %vm14167_vm0, %v1184_v60, %v1188_v21  ;;  %v1194_v33 = vrot.slane %v1193_v41, 4  ;;  %v11762_v11 = vcombine.low %v3505_v48, %v3508_v0  ;;  %v3405_v0 = vld [vmem:[#allocation2 + $0x78] sm:$0xe] }
  0xf5   : > { %v3512_v23 = vsel %vm13916_vm8, %v11746_v38, %v3511_v3  ;;  %v3513_v17 = vrot.slane %v3511_v3, 4  ;;  %v1201_v20 = vshrl.u32 %v14514_v29, 16  ;;  %v1204_v42 = vshll.u32 %v14514_v29, 16 }
  0xf6   : > { %12686 = vmatprep.mubr.msk.bf16.mxu1 %vm1346_vm11, %v11570_v15  ;;  %v1199_v27 = vsel %vm14167_vm0, %v1194_v33, %v1198_v53  ;;  %12848 = vmatprep.mubr.msk.bf16.mxu0 %vm1346_vm11, %v11762_v11  ;;  %v1210_v30 = vshll.u32 %v14520_v58, 16  ;;  %v1214_v22 = vshrl.u32 %v14520_v58, 16  ;;  %v1220_v21 = vshll.u32 %v14522_v32, 16  ;;  %v14552_v15 = vld [vmem:[#allocation2 + $0xa8] sm:$0xf] }
  0xf7   : > { %v11571_v47 = vcombine.low %v1189_v34, %v1199_v27  ;;  %v3515_v26 = vsel %vm13916_vm8, %v3513_v17, %v3514_v59  ;;  %v1203_v62 = vrot.slane %v1201_v20, 4  ;;  %v1206_v10 = vrot.slane %v1204_v42, 5  ;;  %v13577_v27 = vld [vmem:[#allocation2 + $0x74] sm:$0x1] }
  0xf8   : > { %v11763_v46 = vcombine.low %v3512_v23, %v3515_v26  ;;  %v1212_v36 = vrot.slane %v1210_v30, 5  ;;  %v1216_v53 = vrot.slane %v1214_v22, 4  ;;  %v1222_v48 = vrot.slane %v1220_v21, 5  ;;  %v13576_v23 = vld [vmem:[#allocation2 + $0x70] sm:$0xf] }
  0xf9   : > { %12687 = vmatmul.mubr.msk.bf16.gmra.mrb[20].mxu1 %vm1346_vm11, %v11571_v47  ;;  %v1207_v49 = vor.u32 %v1206_v10, %v1203_v62  ;;  %v1225_v19 = vshrl.u32 %v14526_v52, 16  ;;  %v1228_v50 = vshll.u32 %v14526_v52, 16  ;;  %v1234_v9 = vshll.u32 %v14528_v12, 16 }
  0xfa   : > { %12849 = vmatmul.mubr.msk.bf16.gmra.mrb[12].mxu0 %vm1346_vm11, %v11763_v46  ;;  %v1217_v60 = vor.u32 %v1216_v53, %v1212_v36  ;;  %v1238_v41 = vshrl.u32 %v14528_v12, 16  ;;  %v1244_v38 = vshll.u32 %v14543_v43, 16  ;;  %v11747_v61 = vrot.slane %v3404_v55, 9  ;;  %v13578_v46 = vld [vmem:[#allocation2 + $0x7c] sm:$0xf] }
  0xfb   : > { %v1208_v63 = vrot.slane %v1207_v49, 4  ;;  %v1227_v3 = vrot.slane %v1225_v19, 4  ;;  %v1230_v39 = vrot.slane %v1228_v50, 5  ;;  %v1236_v59 = vrot.slane %v1234_v9, 5  ;;  %v13579_v49 = vld [vmem:[#allocation2 + $0x80] sm:$0x1] }
  0xfc   : > { %v1218_v34 = vrot.slane %v1217_v60, 4  ;;  %v1240_v33 = vrot.slane %v1238_v41, 4  ;;  %v1246_v11 = vrot.slane %v1244_v38, 5  ;;  %v3518_v17 = vrot.slane %v13576_v23, 5  ;;  %v14560_v50 = vld [vmem:[#allocation2 + $0xac] sm:$0xf] }
  0xfd   : > { %v1213_v20 = vsel %vm14167_vm0, %v1208_v63, %v1212_v36  ;;  %v1231_v42 = vor.u32 %v1230_v39, %v1227_v3  ;;  %v3521_v30 = vrot.slane %v13577_v27, 5  ;;  %v11748_v22 = vrot.slane %v3405_v0, 9  ;;  %v14564_v60 = vld [vmem:[#allocation2 + $0xb0] sm:$0x1]  ;;  %v14573_v3 = vld [vmem:[#allocation2 + $0xb4] sm:$0xf] }
  0xfe   : > { %v1223_v21 = vsel %vm14167_vm0, %v1218_v34, %v1222_v48  ;;  %v1241_v47 = vor.u32 %v1240_v33, %v1236_v59  ;;  %v3519_v26 = vsel %vm13916_vm8, %v11747_v61, %v3518_v17  ;;  %v3520_v62 = vrot.slane %v3518_v17, 4  ;;  %v14575_v39 = vld [vmem:[#allocation2 + $0xb8] sm:$0xf] }
  0xff   : > { %v11572_v10 = vcombine.low %v1213_v20, %v1223_v21  ;;  %v1232_v55 = vrot.slane %v1231_v42, 4  ;;  %v3525_v53 = vrot.slane %v13578_v46, 5  ;;  %v3528_v19 = vrot.slane %v13579_v49, 5  ;;  %v3406_v20 = vld [vmem:[#allocation2 + $0x84] sm:$0xe] }
 0x100   : > { %v1242_v36 = vrot.slane %v1241_v47, 4  ;;  %v3522_v9 = vsel %vm13916_vm8, %v3520_v62, %v3521_v30  ;;  %v1249_v48 = vshrl.u32 %v14552_v15, 16  ;;  %v1252_v41 = vshll.u32 %v14552_v15, 16  ;;  %v3407_v62 = vld [vmem:[#allocation2 + $0x90] sm:$0xe] }
 0x101   : > { %12690 = vmatprep.mubr.msk.bf16.mxu1 %vm1346_vm11, %v11572_v10  ;;  %v1237_v38 = vsel %vm14167_vm0, %v1232_v55, %v1236_v59  ;;  %v11764_v61 = vcombine.low %v3519_v26, %v3522_v9  ;;  %v3526_v0 = vsel %vm13916_vm8, %v11748_v22, %v3525_v53  ;;  %v3527_v63 = vrot.slane %v3525_v53, 4  ;;  %v14585_v22 = vld [vmem:[#allocation2 + $0xbc] sm:$0x1] }
 0x102   : > { %v1247_v34 = vsel %vm14167_vm0, %v1242_v36, %v1246_v11  ;;  %v1251_v33 = vrot.slane %v1249_v48, 4  ;;  %v1254_v23 = vrot.slane %v1252_v41, 5  ;;  %v1258_v17 = vshll.u32 %v14560_v50, 16 }
 0x103   : > { %v11573_v42 = vcombine.low %v1237_v38, %v1247_v34  ;;  %12852 = vmatprep.mubr.msk.bf16.mxu0 %vm1346_vm11, %v11764_v61  ;;  %v3529_v59 = vsel %vm13916_vm8, %v3527_v63, %v3528_v19  ;;  %v1262_v27 = vshrl.u32 %v14560_v50, 16  ;;  %v1268_v30 = vshll.u32 %v14564_v60, 16 }
 0x104   : > { %v11765_v21 = vcombine.low %v3526_v0, %v3529_v59  ;;  %v1255_v47 = vor.u32 %v1254_v23, %v1251_v33  ;;  %v1260_v11 = vrot.slane %v1258_v17, 5  ;;  %v1273_v26 = vshrl.u32 %v14573_v3, 16  ;;  %v13580_v33 = vld [vmem:[#allocation2 + $0x88] sm:$0xf]  ;;  %v892_v17 = vld [vmem:[%s17451_s1] sm:$0x3] }
 0x105   : > { %12691 = vmatmul.mubr.msk.bf16.gmra.mrb[24].mxu1 %vm1346_vm11, %v11573_v42  ;;  %v1264_v10 = vrot.slane %v1262_v27, 4  ;;  %v1270_v55 = vrot.slane %v1268_v30, 5  ;;  %v1276_v46 = vshll.u32 %v14573_v3, 16  ;;  %v1282_v53 = vshll.u32 %v14575_v39, 16  ;;  %v13581_v27 = vld [vmem:[#allocation2 + $0x8c] sm:$0x1] }
 0x106   : > { %12853 = vmatmul.mubr.msk.bf16.gmra.mrb[16].mxu0 %vm1346_vm11, %v11765_v21  ;;  %v1256_v49 = vrot.slane %v1255_v47, 4  ;;  %v1275_v19 = vrot.slane %v1273_v26, 4  ;;  %v1286_v36 = vshrl.u32 %v14575_v39, 16  ;;  %v1292_v9 = vshll.u32 %v14585_v22, 16 }
 0x107   : > { %v1265_v48 = vor.u32 %v1264_v10, %v1260_v11  ;;  %v1278_v41 = vrot.slane %v1276_v46, 5  ;;  %v1284_v38 = vrot.slane %v1282_v53, 5  ;;  %v11749_v61 = vrot.slane %v3406_v20, 9  ;;  %v13582_v10 = vld [vmem:[#allocation2 + $0x94] sm:$0xf] }
 0x108   : > { %v1261_v0 = vsel %vm14167_vm0, %v1256_v49, %v1260_v11  ;;  %v1288_v63 = vrot.slane %v1286_v36, 4  ;;  %v1294_v34 = vrot.slane %v1292_v9, 5  ;;  %v3532_v23 = vrot.slane %v13580_v33, 5  ;;  %v3408_v46 = vld [vmem:[#allocation2 + $0x9c] sm:$0xe] }
 0x109   : > { %v1266_v42 = vrot.slane %v1265_v48, 4  ;;  %v1279_v59 = vor.u32 %v1278_v41, %v1275_v19  ;;  %v3535_v30 = vrot.slane %v13581_v27, 5  ;;  %v11750_v21 = vrot.slane %v3407_v62, 9  ;;  %v13583_v36 = vld [vmem:[#allocation2 + $0x98] sm:$0x1] }
 0x10a   : > { %v1289_v47 = vor.u32 %v1288_v63, %v1284_v38  ;;  %v3533_v20 = vsel %vm13916_vm8, %v11749_v61, %v3532_v23  ;;  %v3534_v26 = vrot.slane %v3532_v23, 4  ;;  %v3539_v11 = vrot.slane %v13582_v10, 5  ;;  %v3409_v19 = vld [vmem:[#allocation2 + $0xa8] sm:$0xe]  ;;  %v3410_v63 = vld [vmem:[#allocation2 + $0xb4] sm:$0xe] }
 0x10b   : > { %v1271_v53 = vsel %vm14167_vm0, %v1266_v42, %v1270_v55  ;;  %v1280_v49 = vrot.slane %v1279_v59, 4  ;;  %v3542_v9 = vrot.slane %v13583_v36, 5  ;;  %v1692_v48 = vand.u32 %v13795_v4, %v892_v17  ;;  %v13585_v42 = vld [vmem:[#allocation2] sm:$0xf]  ;;  %v13588_v36 = vld [vmem:[#allocation2 + $0xac] sm:$0xf] }
 0x10c   : > { %v11574_v41 = vcombine.low %v1261_v0, %v1271_v53  ;;  %v1290_v33 = vrot.slane %v1289_v47, 4  ;;  %v3536_v62 = vsel %vm13916_vm8, %v3534_v26, %v3535_v30  ;;  %v3540_v27 = vsel %vm13916_vm8, %v11750_v21, %v3539_v11  ;;  %v13584_v0 = vld [vmem:[#allocation2 + $0x4] sm:$0xf]  ;;  %v13586_v47 = vld [vmem:[#allocation2 + $0xa0] sm:$0xf] }
 0x10d   : > { %v1285_v61 = vsel %vm14167_vm0, %v1280_v49, %v1284_v38  ;;  %v11766_v23 = vcombine.low %v3533_v20, %v3536_v62  ;;  %v3541_v55 = vrot.slane %v3539_v11, 4  ;;  %12698 = vmatprep.subr.bf16.mxu1 %v1692_v48  ;;  %v11592_v59 = vcombine.low %v13585_v42, %v13584_v0  ;;  %v13587_v21 = vld [vmem:[#allocation2 + $0xa4] sm:$0x1] }
 0x10e   : > { %12694 = vmatprep.mubr.msk.bf16.mxu1 %vm1346_vm11, %v11574_v41  ;;  %v1295_v17 = vsel %vm14167_vm0, %v1290_v33, %v1294_v34  ;;  %12699 = vmatpush3.bf16.msra.mxu1 %v1692_v48  ;;  %v11751_v30 = vrot.slane %v3408_v46, 9  ;;  %v3546_v26 = vrot.slane %v13586_v47, 5  ;;  %v3549_v20 = vrot.slane %v13587_v21, 5  ;;  %v13589_v48 = vld [vmem:[#allocation2 + $0xb0] sm:$0x1] }
 0x10f   : > { %v11575_v10 = vcombine.low %v1285_v61, %v1295_v17  ;;  %12856 = vmatprep.mubr.msk.bf16.mxu0 %vm1346_vm11, %v11766_v23  ;;  %v3543_v38 = vsel %vm13916_vm8, %v3541_v55, %v3542_v9  ;;  %v11752_v11 = vrot.slane %v3409_v19, 9  ;;  %13010 = vmatprep.subr.bf16.mxu1 %v13908_v6  ;;  %v3553_v46 = vrot.slane %v13588_v36, 5  ;;  %v3411_v61 = vld [vmem:[#allocation2 + $0xc0] sm:$0xe] }
 0x110   : > { %v11767_v53 = vcombine.low %v3540_v27, %v3543_v38  ;;  %v3547_v34 = vsel %vm13916_vm8, %v11751_v30, %v3546_v26  ;;  %v3548_v49 = vrot.slane %v3546_v26, 4  ;;  %v3556_v41 = vrot.slane %v13589_v48, 5  ;;  %v13591_v30 = vld [vmem:[#allocation2 + $0xc] sm:$0xf] }
 0x111   : > { %12695 = vmatmul.mubr.msk.bf16.gmra.mrb[28].mxu1 %vm1346_vm11, %v11575_v10  ;;  %v11753_v33 = vrot.slane %v3410_v63, 9  ;;  %v3555_v19 = vrot.slane %v3553_v46, 4  ;;  %v3560_v62 = vrot.slane %v14339_v35, 5  ;;  %v3554_v27 = vsel %vm13916_vm8, %v11752_v11, %v3553_v46  ;;  %v11821_v63 = vld [vmem:[%s17451_s1 + $0xe] sm:$0x3] }
 0x112   : > { %12857 = vmatmul.mubr.msk.bf16.gmra.mrb[20].mxu0 %vm1346_vm11, %v11767_v53  ;;  %12700 = vmatprep.mubr.msk.bf16.mxu1 %vm1346_vm11, %v11592_v59  ;;  %v3550_v9 = vsel %vm13916_vm8, %v3548_v49, %v3549_v20  ;;  %v3563_v55 = vrot.slane %v14363_v54, 5  ;;  %v3567_v17 = vrot.slane %v14355_v40, 5  ;;  %v13590_v59 = vld [vmem:[#allocation2 + $0x10] sm:$0xf]  ;;  %v11754_v26 = vrot.slane %v3411_v61, 9 }
 0x113   : > { %v11768_v23 = vcombine.low %v3547_v34, %v3550_v9  ;;  %v3557_v0 = vsel %vm13916_vm8, %v3555_v19, %v3556_v41  ;;  %v3561_v42 = vsel %vm13916_vm8, %v11753_v33, %v3560_v62  ;;  %v3562_v35 = vrot.slane %v3560_v62, 4  ;;  %v13592_v10 = vld [vmem:[#allocation2 + $0x1c] sm:$0xf]  ;;  %v13593_v40 = vld [vmem:[#allocation2 + $0x18] sm:$0xf] }
 0x114   : > { %v11593_v47 = vcombine.low %v13591_v30, %v13590_v59  ;;  %v11769_v54 = vcombine.low %v3554_v27, %v3557_v0  ;;  %v11594_v38 = vcombine.low %v13593_v40, %v13592_v10  ;;  %v14640_v20 = vand.u32 %v11821_v63, %v13795_v4  ;;  %v1863_v41 = vld [vmem:[#allocation2 + $0x60] sm:$0xe]  ;;  %v1864_v33 = vld [vmem:[#allocation2 + $0x6c] sm:$0xe]  ;;  %v13594_v59 = vld [vmem:[#allocation2 + $0x28] sm:$0xf] }
 0x115   : > { %12860 = vmatprep.mubr.msk.bf16.mxu0 %vm1346_vm11, %v11768_v23  ;;  %v3564_v21 = vsel %vm13916_vm8, %v3562_v35, %v3563_v55  ;;  %v3569_v53 = vrot.slane %v3567_v17, 4  ;;  %v3570_v34 = vrot.slane %v14374_v14, 5  ;;  %v11600_v49 = vcombine.low %v14426_v44, %v14428_v51  ;;  %v1865_v23 = vld [vmem:[#allocation2 + $0x78] sm:$0xe]  ;;  %v13595_v30 = vld [vmem:[#allocation2 + $0x24] sm:$0xf] }
 0x116   : > { %v11770_v11 = vcombine.low %v3561_v42, %v3564_v21  ;;  %12902 = vmatprep.subr.bf16.mxu0 %v14640_v20  ;;  %v3568_v61 = vsel %vm13916_vm8, %v11754_v26, %v3567_v17  ;;  %v11632_v55 = vrot.slane %v1863_v41, 9  ;;  %v1964_v63 = vrot.slane %v14428_v51, 5  ;;  %v1866_v42 = vld [vmem:[#allocation2 + $0x84] sm:$0xe]  ;;  %v13596_v40 = vld [vmem:[#allocation2 + $0x34] sm:$0xf] }
 0x117   : > { %v3571_v27 = vsel %vm13916_vm8, %v3569_v53, %v3570_v34  ;;  %v1967_v0 = vrot.slane %v14435_v7, 5  ;;  %v11633_v35 = vrot.slane %v1864_v33, 9  ;;  %v1974_v21 = vrot.slane %v14457_v16, 5  ;;  %v13330_v7 = vld [vmem:[#allocation2 + $0x18] sm:$0xff]   ;;  %v4231_v9 = vld [vmem:[#allocation2 + $0x30] sm:$0xf] }
 0x118   : > { %v14673_v17 = vsel %vm13916_vm8, %v11632_v55, %v1964_v63  ;;  %v1966_v26 = vrot.slane %v1964_v63, 4  ;;  %v11771_v10 = vcombine.low %v3568_v61, %v3571_v27  ;;  %v1978_v61 = vrot.slane %v14476_v45, 5  ;;  %v13339_v19 = vld [vmem:[#allocation2 + $0x54] sm:$0xff]  }
 0x119   : > { %12701 = vmatmul.mubr.msk.bf16.vlgmr.msra.gmra.mrb[0].mxu1 %vm1346_vm11, %v11593_v47  ;;  %v11595_v47 = vcombine.low %v13595_v30, %v13594_v59  ;;  %v1981_v27 = vrot.slane %v14482_v28, 5  ;;  %v11635_v55 = vrot.slane %v1866_v42, 9  ;;  %v1988_v63 = vrot.slane %v14501_v1, 5  ;;  %v11870_v30 = vld [vmem:[%s17451_s1 + $0x10] sm:$0x3] }
 0x11a   : > { %12861 = vmatmul.mubr.msk.bf16.gmra.mrb[24].mxu0 %vm1346_vm11, %v11769_v54  ;;  %12704 = vmatprep.mubr.msk.bf16.mxu1 %vm1346_vm11, %v11594_v38  ;;  %v1971_v54 = vrot.slane %v14444_v25, 5  ;;  %v14679_v53 = vsel %vm13916_vm8, %v1966_v26, %v1967_v0  ;;  %v1980_v42 = vrot.slane %v1978_v61, 4  ;;  %v13599_v26 = vld [vmem:[#allocation2 + $0x3c] sm:$0xf]  ;;  %vm7288_vm2 = vcmask 516096  }
 0x11b   : > { %12864 = vmatprep.mubr.msk.bf16.mxu0 %vm1346_vm11, %v11770_v11  ;;  %13011 = vmatpush3.bf16.msra.mxu1 %v13908_v6  ;;  %v13597_v6 = vld [vmem:[#allocation2 + $0x30] sm:$0xf]  ;;  %v11634_v11 = vrot.slane %v1865_v23, 9  ;;  %v1985_v23 = vrot.slane %v14494_v2, 5  ;;  %vm7286_vm3 = vcmask 519168   ;;  %vm7093_vm4 = vcmask 523264   ;;  %vm15763_vm13 = vmand %vm7288_vm2, %vm419_vm6 }
 0x11c   : > { %v11596_v38 = vcombine.low %v13597_v6, %v13596_v40  ;;  %v14683_v34 = vsel %vm13916_vm8, %v11633_v35, %v1971_v54  ;;  %v1973_v41 = vrot.slane %v1971_v54, 4  ;;  %v14711_v1 = vsel %vm13916_vm8, %v1980_v42, %v1981_v27  ;;  %v1867_v6 = vld [vmem:[#allocation2 + $0x90] sm:$0xe]  ;;  %v4226_v42 = vld [vmem:[#allocation2 + $0x1c] sm:$0xf]  ;;  %vm15781_vm6 = vmand %vm7286_vm3, %vm744_vm9 }
 0x11d   : > { %v14702_v28 = vsel %vm13916_vm8, %v11634_v11, %v1978_v61  ;;  %v14707_v35 = vsel %vm13916_vm8, %v11635_v55, %v1985_v23  ;;  %v1987_v59 = vrot.slane %v1985_v23, 4  ;;  %v14726_v61 = vand.u32 %v11870_v30, %v13795_v4  ;;  %v1868_v55 = vld [vmem:[#allocation2 + $0x9c] sm:$0xe]  ;;  %v4228_v4 = vld [vmem:[#allocation2 + $0x24] sm:$0xf] }
 0x11e   : > { %v14692_v16 = vsel %vm13916_vm8, %v1973_v41, %v1974_v21  ;;  %17503 = vst [vmem:[#allocation9_spill] sm:$0xff] %v14707_v35  ;;  %v13600_v21 = vld [vmem:[#allocation2 + $0x48] sm:$0xf]  ;;  %v13334_v41 = vld [vmem:[#allocation2 + $0x30] sm:$0xff]   ;;  %v11636_v27 = vrot.slane %v1867_v6, 9  ;;  %v17463_v23 = vrot.slane %v14409_v18, 5 }
 0x11f   : > { %v14720_v40 = vsel %vm13916_vm8, %v1987_v59, %v1988_v63  ;;  %v11598_v11 = vcombine.low %v13600_v21, %v14390_v56  ;;  %17505 = vst [vmem:[#allocation11_spill] sm:$0xff] %v14726_v61  ;;  %v4225_v56 = vld [vmem:[#allocation2 + $0x18] sm:$0xf]  ;;  %v1992_v59 = vrot.slane %v14520_v58, 5  ;;  %v1995_v30 = vrot.slane %v14522_v32, 5 }
 0x120   : > { %17504 = vst [vmem:[#allocation10_spill] sm:$0xff] %v14720_v40  ;;  %v13601_v21 = vld [vmem:[#allocation2 + $0x54] sm:$0xf]  ;;  %v4277_v33 = vshll.u32 %v4225_v56, 16  ;;  %v4283_v62 = vshll.u32 %v4226_v42, 16  ;;  %v4287_v63 = vshrl.u32 %v4226_v42, 16 }
 0x121   : > { %12705 = vmatmul.mubr.msk.bf16.gmra.mrb[4].mxu1 %vm1346_vm11, %v11595_v47  ;;  %v13598_v47 = vld [vmem:[#allocation2 + $0x40] sm:$0xf]  ;;  %v1994_v6 = vrot.slane %v1992_v59, 4  ;;  %v4298_v14 = vshrl.u32 %v4228_v4, 16  ;;  %v14775_v42 = vld [vmem:[#allocation2 + $0x50] sm:$0x1] }
 0x122   : > { %12865 = vmatmul.mubr.msk.bf16.gmra.mrb[28].mxu0 %vm1346_vm11, %v11771_v10  ;;  %12708 = vmatprep.mubr.msk.bf16.mxu1 %vm1346_vm11, %v11596_v38  ;;  %v11597_v54 = vcombine.low %v13599_v26, %v13598_v47  ;;  %v13331_v38 = vld [vmem:[#allocation2 + $0x24] sm:$0xff]   ;;  %v11637_v47 = vrot.slane %v1868_v55, 9  ;;  %v13335_v26 = vld [vmem:[#allocation2 + $0x3c] sm:$0xff]   ;;  %v14749_v55 = vld [vmem:[#allocation2 + $0x54] sm:$0xe]  ;;  %v2002_v10 = vrot.slane %v14543_v43, 5 }
 0x123   : > { %12870 = vmatprep.mubr.msk.bf16.mxu0 %vm1346_vm11, %v13330_v7  ;;  %v4229_v7 = vld [vmem:[#allocation2 + $0x28] sm:$0xf]  ;;  %v14786_v44 = vrot.slane %v17463_v23, 4  ;;  %v4325_v23 = vshll.u32 %v4231_v9, 16  ;;  %vm7628_vm5 = vcmask 1042434   ;;  %vm7630_vm7 = vcmask 1043459  }
 0x124   : > { %vm7634_vm10 = vcmask 1045509   ;;  %vm7638_vm12 = vcmask 1047559   ;;  %vm9458_vm9 = vcmask 518144   ;;  %vm9567_vm14 = vsmask.f32 2306 }
 0x125   : > { %vm16942_vm15 = vmand %vm9458_vm9, %vm9567_vm14 }
 0x129   : > { %12709 = vmatmul.mubr.msk.bf16.gmra.mrb[8].mxu1 %vm1346_vm11, %v11597_v54  ;;  %v14740_v54 = vsel %vm13916_vm8, %v11636_v27, %v1992_v59  ;;  %v4274_v27 = vshrl.u32 %v4225_v56, 16  ;;  %v14754_v59 = vsel %vm13916_vm8, %v1994_v6, %v1995_v30  ;;  %v4301_v30 = vshll.u32 %v4228_v4, 16  ;;  %v4234_v56 = vld [vmem:[#allocation2 + $0x3c] sm:$0xf] }
 0x12a   : > { %12871 = vmatmul.mubr.msk.bf16.vlgmr.msra.gmra.mrb[0].mxu0 %vm1346_vm11, %v13331_v38  ;;  %12712 = vmatprep.mubr.msk.bf16.mxu1 %vm1346_vm11, %v11598_v11  ;;  %17506 = vst [vmem:[#allocation12_spill] sm:$0xff] %v14740_v54  ;;  %v1999_v38 = vrot.slane %v14528_v12, 5  ;;  %v11599_v11 = vcombine.low %v13601_v21, %v14409_v18  ;;  %17507 = vst [vmem:[#allocation13_spill] sm:$0xff] %v14754_v59  ;;  %v4307_v6 = vshll.u32 %v4229_v7, 16  ;;  %v4311_v4 = vshrl.u32 %v4229_v7, 16 }
 0x12b   : > { %12903 = vmatpush3.bf16.msra.mxu0 %v14640_v20  ;;  %12874 = vmatprep.mubr.msk.bf16.mxu0 %vm1346_vm11, %v13334_v41  ;;  %v13338_v20 = vld [vmem:[#allocation2 + $0x48] sm:$0xff]   ;;  %v14788_v51 = vrot.slane %v4274_v27, 4  ;;  %v14794_v7 = vrot.slane %v4287_v63, 4  ;;  %v14798_v48 = vrot.slane %v4301_v30, 5  ;;  %v4235_v27 = vld [vmem:[#allocation2 + $0x40] sm:$0xf] }
 0x12c   : > { %12936 = vmatprep.subr.bf16.mxu0 %v14726_v61  ;;  %v14746_v41 = vld [vmem:[#allocation2 + $0x4c] sm:$0xf]  ;;  %v14758_v21 = vsel %vm13916_vm8, %v11637_v47, %v1999_v38  ;;  %v2001_v0 = vrot.slane %v1999_v38, 4  ;;  %v4232_v38 = vld [vmem:[#allocation2 + $0x34] sm:$0xf]  ;;  %v14800_v46 = vrot.slane %v4307_v6, 5 }
 0x12d   : > { %v17462_v32 = vrot.slane %v14746_v41, 5  ;;  %17508 = vst [vmem:[#allocation14_spill] sm:$0xff] %v14758_v21  ;;  %v1870_v47 = vld [vmem:[#allocation2 + $0xb4] sm:$0xe]  ;;  %v2009_v63 = vrot.slane %v14564_v60, 5  ;;  %v4346_v40 = vshrl.u32 %v4234_v56, 16 }
 0x12e   : > { %v14764_v43 = vsel %vm13916_vm8, %v2001_v0, %v2002_v10  ;;  %v14792_v0 = vrot.slane %v4283_v62, 5  ;;  %v14796_v10 = vrot.slane %v4298_v14, 4  ;;  %v2006_v62 = vrot.slane %v14560_v50, 5  ;;  %v4227_v21 = vld [vmem:[#allocation2 + $0x20] sm:$0x1] }
 0x12f   : > { %17509 = vst [vmem:[#allocation15_spill] sm:$0xff] %v14764_v43  ;;  %v4331_v43 = vshll.u32 %v4232_v38, 16  ;;  %v4335_v14 = vshrl.u32 %v4232_v38, 16  ;;  %v11639_v61 = vrot.slane %v1870_v47, 9  ;;  %v4230_v59 = vld [vmem:[#allocation2 + $0x2c] sm:$0x1]  ;;  %v17512_v47 = vcombine.low %v14470_v13, %v14476_v45 }
 0x130   : > { %v2008_v6 = vrot.slane %v2006_v62, 4  ;;  %v4349_v60 = vshll.u32 %v4234_v56, 16  ;;  %v2016_v38 = vrot.slane %v14585_v22, 5  ;;  %v4359_v35 = vshrl.u32 %v4235_v27, 16  ;;  %v4237_v45 = vld [vmem:[#allocation2 + $0x48] sm:$0xf] }
 0x131   : > { %12713 = vmatmul.mubr.msk.bf16.gmra.mrb[12].mxu1 %vm1346_vm11, %v11599_v11  ;;  %v1869_v11 = vld [vmem:[#allocation2 + $0xa8] sm:$0xe]  ;;  %v4337_v22 = vrot.slane %v4335_v14, 4  ;;  %v13343_v56 = vld [vmem:[#allocation2 + $0x6c] sm:$0xff]   ;;  %v4304_v14 = vor.u32 %v14798_v48, %v14796_v10  ;;  %v4240_v48 = vld [vmem:[#allocation2 + $0x54] sm:$0xf] }
 0x132   : > { %12875 = vmatmul.mubr.msk.bf16.gmra.mrb[4].mxu0 %vm1346_vm11, %v13335_v26  ;;  %12716 = vmatprep.mubr.msk.bf16.mxu1 %vm1346_vm11, %v11600_v49  ;;  %v14782_v26 = vrot.slane %v17462_v32, 4  ;;  %v14790_v49 = vrot.slane %v4277_v33, 5  ;;  %v13342_v32 = vld [vmem:[#allocation2 + $0x60] sm:$0xff]   ;;  %v11638_v36 = vrot.slane %v1869_v11, 9  ;;  %v14802_v33 = vrot.slane %v4311_v4, 4 }
 0x133   : > { %12878 = vmatprep.mubr.msk.bf16.mxu0 %vm1346_vm11, %v13338_v20  ;;  %v4322_v20 = vshrl.u32 %v4231_v9, 16  ;;  %v2013_v9 = vrot.slane %v14575_v39, 5  ;;  %v17511_v4 = vcombine.low %v14437_v31, %v14444_v25  ;;  %v4327_v11 = vrot.slane %v4325_v23, 5 }
 0x134   : > { %v14808_v30 = vsel %vm13916_vm8, %v11638_v36, %v2006_v62  ;;  %v4233_v36 = vld [vmem:[#allocation2 + $0x38] sm:$0x1]  ;;  %v4355_v62 = vshll.u32 %v4235_v27, 16  ;;  %v14823_v31 = vsel %vm13916_vm8, %v2008_v6, %v2009_v63  ;;  %v14826_v23 = vrot.slane %v4331_v43, 5 }
 0x135   : > { %v4324_v54 = vrot.slane %v4322_v20, 4  ;;  %17510 = vst [vmem:[#allocation16_spill] sm:$0xff] %v14808_v30  ;;  %v4236_v20 = vld [vmem:[#allocation2 + $0x44] sm:$0x1]  ;;  %17513 = vst [vmem:[#allocation17_spill] sm:$0xff] %v14823_v31  ;;  %v2015_v25 = vrot.slane %v2013_v9, 4  ;;  %v14832_v13 = vsel %vm13916_vm8, %v11639_v61, %v2013_v9  ;;  %v4280_v27 = vor.u32 %v14790_v49, %v14788_v51 }
 0x136   : > { %v4290_v63 = vor.u32 %v14794_v7, %v14792_v0  ;;  %v4293_v6 = vshll.u32 %v4227_v21, 16  ;;  %v13346_v43 = vld [vmem:[#allocation2 + $0x78] sm:$0xff]   ;;  %v4314_v61 = vor.u32 %v14802_v33, %v14800_v46  ;;  %v4317_v9 = vshll.u32 %v4230_v59, 16  ;;  %v14848_v51 = vld [vmem:[#allocation2 + $0x4c] sm:$0xf] }
 0x137   : > { %v4348_v49 = vrot.slane %v4346_v40, 4  ;;  %v4351_v7 = vrot.slane %v4349_v60, 5  ;;  %v14850_v21 = vrot.slane %v4355_v62, 5  ;;  %v4365_v31 = vshll.u32 %v4236_v20, 16 }
 0x138   : > { %v14853_v10 = vrot.slane %v4293_v6, 5  ;;  %v4370_v33 = vshrl.u32 %v4237_v45, 16  ;;  %v4373_v59 = vshll.u32 %v4237_v45, 16  ;;  %v4379_v30 = vshll.u32 %v14848_v51, 16 }
 0x139   : > { %12717 = vmatmul.mubr.msk.bf16.gmra.mrb[16].mxu1 %vm1346_vm11, %v17511_v4  ;;  %v17514_v4 = vcombine.low %v14485_v24, %v14494_v2  ;;  %v14860_v40 = vrot.slane %v4280_v27, 4  ;;  %v17515_v60 = vcombine.low %v14514_v29, %v14520_v58  ;;  %v14874_v24 = vrot.slane %v4314_v61, 4  ;;  %v13347_v29 = vld [vmem:[#allocation2 + $0x84] sm:$0xff]  }
 0x13a   : > { %12879 = vmatmul.mubr.msk.bf16.gmra.mrb[8].mxu0 %vm1346_vm11, %v13339_v19  ;;  %12720 = vmatprep.mubr.msk.bf16.mxu1 %vm1346_vm11, %v17512_v47  ;;  %v4361_v47 = vrot.slane %v4359_v35, 4  ;;  %v4341_v19 = vshll.u32 %v4233_v36, 16  ;;  %v14862_v35 = vrot.slane %v4290_v63, 4  ;;  %v14872_v36 = vrot.slane %v4304_v14, 4  ;;  %v14882_v63 = vld [vmem:[#allocation2 + $0x58] sm:$0xf] }
 0x13b   : > { %12882 = vmatprep.mubr.msk.bf16.mxu0 %vm1346_vm11, %v13342_v32  ;;  %v14840_v32 = vsel %vm13916_vm8, %v2015_v25, %v2016_v38  ;;  %v4328_v38 = vor.u32 %v4327_v11, %v4324_v54  ;;  %v4338_v25 = vor.u32 %v4337_v22, %v14826_v23  ;;  %v14864_v54 = vrot.slane %v4317_v9, 5  ;;  %v13350_v9 = vld [vmem:[#allocation2 + $0x90] sm:$0xff]  }
 0x13c   : > { %v4383_v11 = vshrl.u32 %v14848_v51, 16  ;;  %v4352_v2 = vor.u32 %v4351_v7, %v4348_v49  ;;  %v4362_v20 = vor.u32 %v4361_v47, %v14850_v21  ;;  %v4343_v45 = vrot.slane %v4341_v19, 5 }
 0x13d   : > { %v4329_v62 = vrot.slane %v4328_v38, 4  ;;  %v4339_v22 = vrot.slane %v4338_v25, 4  ;;  %v14878_v27 = vrot.slane %v4365_v31, 5  ;;  %v4372_v58 = vrot.slane %v4370_v33, 4  ;;  %v14916_v33 = vld [vmem:[#allocation2 + $0x5c] sm:$0x1] }
 0x13e   : > { %v4375_v6 = vrot.slane %v4373_v59, 5  ;;  %v14884_v14 = vrot.slane %v4379_v30, 5  ;;  %v4394_v61 = vshrl.u32 %v4240_v48, 16  ;;  %v17518_v31 = vrot.slane %v14409_v18, 5 }
 0x13f   : > { %v17519_v49 = vrot.slane %v14749_v55, 9  ;;  %v4385_v30 = vrot.slane %v4383_v11, 4  ;;  %v4397_v47 = vshll.u32 %v4240_v48, 16  ;;  %v17520_v38 = vrot.slane %v14775_v42, 5 }
 0x140   : > { %v4353_v55 = vrot.slane %v4352_v2, 4  ;;  %v4363_v25 = vrot.slane %v4362_v20, 4  ;;  %v4286_v42 = vsel %vm14167_vm0, %v14860_v40, %v14792_v0  ;;  %v4407_v48 = vshrl.u32 %v14882_v63, 16  ;;  %v14945_v2 = vld [vmem:[#allocation2 + $0x64] sm:$0xf] }
 0x141   : > { %12721 = vmatmul.mubr.msk.bf16.gmra.mrb[20].mxu1 %vm1346_vm11, %v17514_v4  ;;  %v17516_v4 = vrot.slane %v14746_v41, 5  ;;  %v14900_v7 = vsel %vm13916_vm8, %v17519_v49, %v17518_v31  ;;  %v17521_v41 = vrot.slane %v14413_v57, 5  ;;  %v4403_v57 = vshll.u32 %v14882_v63, 16 }
 0x142   : > { %12883 = vmatmul.mubr.msk.bf16.gmra.mrb[12].mxu0 %vm1346_vm11, %v13343_v56  ;;  %12724 = vmatprep.mubr.msk.bf16.mxu1 %vm1346_vm11, %v17515_v60  ;;  %v14880_v56 = vld [vmem:[#allocation2 + $0x50] sm:$0x1]  ;;  %v4310_v59 = vsel %vm14167_vm0, %v14872_v36, %v14800_v46  ;;  %v4320_v0 = vsel %vm14167_vm0, %v14874_v24, %v14864_v54  ;;  %v4376_v40 = vor.u32 %v4375_v6, %v4372_v58  ;;  %v4396_v46 = vrot.slane %v4394_v61, 4  ;;  %v13352_v61 = vld [vmem:[#allocation2 + $0xa8] sm:$0xff]  }
 0x143   : > { %12886 = vmatprep.mubr.msk.bf16.mxu0 %vm1346_vm11, %v13346_v43  ;;  %v17517_v43 = vrot.slane %v14744_v5, 9  ;;  %v14907_v5 = vsel %vm13916_vm8, %v14782_v26, %v17520_v38  ;;  %v14914_v18 = vsel %vm13916_vm8, %v14786_v44, %v17521_v41  ;;  %v4296_v26 = vsel %vm14167_vm0, %v14862_v35, %v14853_v10  ;;  %v4243_v44 = vld [vmem:[#allocation2 + $0x60] sm:$0xf]  ;;  %v14978_v38 = vld [vmem:[#allocation2 + $0x68] sm:$0x1] }
 0x144   : > { %v4389_v11 = vshll.u32 %v14880_v56, 16  ;;  %v17522_v10 = vcombine.low %v14526_v52, %v14528_v12  ;;  %v4334_v35 = vsel %vm14167_vm0, %v4329_v62, %v14826_v23  ;;  %v4386_v60 = vor.u32 %v4385_v30, %v14884_v14  ;;  %v4246_v62 = vld [vmem:[#allocation2 + $0x6c] sm:$0xf]  ;;  %v4249_v41 = vld [vmem:[#allocation2 + $0x78] sm:$0xf] }
 0x145   : > { %v14892_v19 = vsel %vm13916_vm8, %v17517_v43, %v17516_v4  ;;  %v4399_v36 = vrot.slane %v4397_v47, 5  ;;  %v17523_v54 = vcombine.low %v14552_v15, %v14560_v50  ;;  %v4344_v52 = vsel %vm14167_vm0, %v4339_v22, %v4343_v45  ;;  %v14968_v43 = vld [vmem:[#allocation2 + $0x70] sm:$0xf] }
 0x146   : > { %v4358_v12 = vsel %vm14167_vm0, %v4353_v55, %v14850_v21  ;;  %v4368_v23 = vsel %vm14167_vm0, %v4363_v25, %v14878_v27  ;;  %v14961_v24 = vrot.slane %v4403_v57, 5  ;;  %v4409_v20 = vrot.slane %v4407_v48, 4  ;;  %v14980_v55 = vld [vmem:[#allocation2 + $0x7c] sm:$0xf] }
 0x147   : > { %v4413_v15 = vshll.u32 %v14916_v33, 16  ;;  %v4418_v50 = vshrl.u32 %v4243_v44, 16  ;;  %v4377_v58 = vrot.slane %v4376_v40, 4  ;;  %v4391_v22 = vrot.slane %v4389_v11, 5  ;;  %17524 = vst [vmem:[#allocation18_spill] sm:$0xff] %v14980_v55 }
 0x148   : > { %v4421_v45 = vshll.u32 %v4243_v44, 16  ;;  %v4427_v6 = vshll.u32 %v14945_v2, 16  ;;  %v11648_v21 = vcombine.low %v14900_v7, %v14914_v18  ;;  %v4387_v27 = vrot.slane %v4386_v60, 4  ;;  %v4252_v40 = vld [vmem:[#allocation2 + $0x84] sm:$0xf] }
 0x149   : > { %12725 = vmatmul.mubr.msk.bf16.gmra.mrb[24].mxu1 %vm1346_vm11, %v17522_v10  ;;  %v4400_v4 = vor.u32 %v4399_v36, %v4396_v46  ;;  %v11647_v31 = vcombine.low %v14892_v19, %v14907_v5  ;;  %v14972_v49 = vcombine.low %v4286_v42, %v4296_v26  ;;  %v14974_v30 = vcombine.low %v4310_v59, %v4320_v0  ;;  %v14990_v59 = vld [vmem:[#allocation2 + $0x88] sm:$0xf]  ;;  %v15042_v7 = vld [vmem:[#allocation2 + $0x94] sm:$0xf] }
 0x14a   : > { %12887 = vmatmul.mubr.msk.bf16.gmra.mrb[16].mxu0 %vm1346_vm11, %v13347_v29  ;;  %12728 = vmatprep.mubr.msk.bf16.mxu1 %vm1346_vm11, %v17523_v54  ;;  %v13351_v29 = vld [vmem:[#allocation2 + $0x9c] sm:$0xff]   ;;  %v14976_v47 = vcombine.low %v4334_v35, %v4344_v52  ;;  %v14982_v25 = vcombine.low %v4358_v12, %v4368_v23  ;;  %v4410_v57 = vor.u32 %v4409_v20, %v14961_v24  ;;  %v14985_v48 = vrot.slane %v4413_v15, 5  ;;  %v15006_v52 = vld [vmem:[#allocation2 + $0x74] sm:$0x1] }
 0x14b   : > { %12890 = vmatprep.mubr.msk.bf16.mxu0 %vm1346_vm11, %v13350_v9  ;;  %v4431_v9 = vshrl.u32 %v14945_v2, 16  ;;  %v4420_v44 = vrot.slane %v4418_v50, 4  ;;  %v4382_v19 = vsel %vm14167_vm0, %v4377_v58, %v14884_v14  ;;  %v4423_v5 = vrot.slane %v4421_v45, 5  ;;  %17525 = vst [vmem:[#allocation19_spill] sm:$0xff] %v14990_v59  ;;  %v13353_v20 = vld [vmem:[#allocation2 + $0xb4] sm:$0xff]   ;;  %17530 = vst [vmem:[#allocation22_spill] sm:$0xff] %v15042_v7 }
 0x14c   : > { %v4442_v42 = vshrl.u32 %v4246_v62, 16  ;;  %v4445_v26 = vshll.u32 %v4246_v62, 16  ;;  %v17526_v0 = vcombine.low %v14573_v3, %v14575_v39  ;;  %v4392_v11 = vsel %vm14167_vm0, %v4387_v27, %v4391_v22 }
 0x14d   : > { %v4401_v10 = vrot.slane %v4400_v4, 4  ;;  %v14998_v35 = vrot.slane %v4427_v6, 5  ;;  %v4433_v60 = vrot.slane %v4431_v9, 4  ;;  %v4451_v14 = vshll.u32 %v14968_v43, 16  ;;  %v15015_v4 = vld [vmem:[#allocation2 + $0x80] sm:$0x1] }
 0x14e   : > { %v4455_v46 = vshrl.u32 %v14968_v43, 16  ;;  %v4466_v36 = vshrl.u32 %v4249_v41, 16  ;;  %v4469_v54 = vshll.u32 %v4249_v41, 16  ;;  %v4411_v3 = vrot.slane %v4410_v57, 4  ;;  %17527 = vst [vmem:[#allocation20_spill] sm:$0xff] %v15015_v4  ;;  %v13354_v57 = vld [vmem:[#allocation2 + $0xc0] sm:$0xff]  }
 0x14f   : > { %v4437_v39 = vshll.u32 %v14978_v38, 16  ;;  %v4475_v12 = vshll.u32 %v14980_v55, 16  ;;  %v4479_v23 = vshrl.u32 %v14980_v55, 16  ;;  %v4444_v15 = vrot.slane %v4442_v42, 4  ;;  %v15017_v41 = vld [vmem:[#allocation2 + $0x8c] sm:$0x1] }
 0x150   : > { %v4447_v50 = vrot.slane %v4445_v26, 5  ;;  %v4490_v62 = vshrl.u32 %v4252_v40, 16  ;;  %v4424_v58 = vor.u32 %v4423_v5, %v4420_v44  ;;  %v4434_v22 = vor.u32 %v4433_v60, %v14998_v35  ;;  %17528 = vst [vmem:[#allocation21_spill] sm:$0xff] %v15017_v41  ;;  %v4255_v26 = vld [vmem:[#allocation2 + $0x90] sm:$0xf] }
 0x151   : > { %12729 = vmatmul.mubr.msk.bf16.gmra.mrb[28].mxu1 %vm1346_vm11, %v17526_v0  ;;  %v4499_v45 = vshll.u32 %v14990_v59, 16  ;;  %v4503_v6 = vshrl.u32 %v14990_v59, 16  ;;  %v4457_v27 = vrot.slane %v4455_v46, 4  ;;  %v4468_v9 = vrot.slane %v4466_v36, 4 }
 0x152   : > { %12891 = vmatmul.mubr.msk.bf16.gmra.mrb[20].mxu0 %vm1346_vm11, %v13351_v29  ;;  %12746 = vmatprep.mubr.msk.bf16.mxu1 %vm1346_vm11, %v11647_v31  ;;  %v4493_v29 = vshll.u32 %v4252_v40, 16  ;;  %v4471_v31 = vrot.slane %v4469_v54, 5  ;;  %v15019_v42 = vcombine.low %v4382_v19, %v4392_v11  ;;  %v4461_v44 = vshll.u32 %v15006_v52, 16 }
 0x153   : > { %12894 = vmatprep.mubr.msk.bf16.mxu0 %vm1346_vm11, %v13352_v61  ;;  %v15013_v61 = vrot.slane %v4451_v14, 5  ;;  %v15022_v40 = vrot.slane %v4475_v12, 5  ;;  %v4481_v5 = vrot.slane %v4479_v23, 4  ;;  %v4406_v0 = vsel %vm14167_vm0, %v4401_v10, %v14961_v24 }
 0x154   : > { %v4416_v60 = vsel %vm14167_vm0, %v4411_v3, %v14985_v48  ;;  %v4492_v14 = vrot.slane %v4490_v62, 4  ;;  %v4495_v46 = vrot.slane %v4493_v29, 5  ;;  %v4425_v19 = vrot.slane %v4424_v58, 4 }
 0x155   : > { %v4439_v11 = vrot.slane %v4437_v39, 5  ;;  %v15034_v36 = vrot.slane %v4499_v45, 5  ;;  %v4505_v54 = vrot.slane %v4503_v6, 4  ;;  %v17529_v24 = vcombine.low %v14673_v17, %v14679_v53  ;;  %v4258_v17 = vld [vmem:[#allocation2 + $0x9c] sm:$0xf] }
 0x156   : > { %v4435_v48 = vrot.slane %v4434_v22, 4  ;;  %v4448_v10 = vor.u32 %v4447_v50, %v4444_v15  ;;  %v4458_v3 = vor.u32 %v4457_v27, %v15013_v61  ;;  %v4472_v12 = vor.u32 %v4471_v31, %v4468_v9  ;;  %v15052_v15 = vld [vmem:[#allocation2 + $0x98] sm:$0x1]  ;;  %v15060_v6 = vld [vmem:[#allocation2 + $0xa0] sm:$0xf]  ;;  %v13355_v27 = vld [vmem:[#allocation2 + $0xcc] sm:$0xff]  }
 0x157   : > { %v15045_v18 = vrot.slane %v4461_v44, 5  ;;  %v4485_v39 = vshll.u32 %v15015_v4, 16  ;;  %v4509_v23 = vshll.u32 %v15017_v41, 16  ;;  %v15050_v53 = vcombine.low %v4406_v0, %v4416_v60  ;;  %17531 = vst [vmem:[#allocation23_spill] sm:$0xff] %v15052_v15  ;;  %17532 = vst [vmem:[#allocation24_spill] sm:$0xff] %v15060_v6  ;;  %v17539_v41 = vld [vmem:[#allocation10_spill] sm:$0xff] }
 0x158   : > { %v4514_v50 = vshrl.u32 %v4255_v26, 16  ;;  %v4517_v62 = vshll.u32 %v4255_v26, 16  ;;  %v4430_v29 = vsel %vm14167_vm0, %v4425_v19, %v14998_v35  ;;  %v4506_v58 = vor.u32 %v4505_v54, %v15034_v36 }
 0x159   : > { %12747 = vmatmul.mubr.msk.bf16.vlgmr.msra.gmra.mrb[12].mxu1 %vm1346_vm11, %v11648_v21  ;;  %v4482_v21 = vor.u32 %v4481_v5, %v15022_v40  ;;  %v4523_v22 = vshll.u32 %v15042_v7, 16  ;;  %v4527_v45 = vshrl.u32 %v15042_v7, 16  ;;  %v4440_v9 = vsel %vm14167_vm0, %v4435_v48, %v4439_v11  ;;  %v4261_v5 = vld [vmem:[#allocation2 + $0xa8] sm:$0xf]  ;;  %v15080_v48 = vld [vmem:[#allocation2 + $0xb8] sm:$0xf] }
 0x15a   : > { %12895 = vmatmul.mubr.msk.bf16.gmra.mrb[24].mxu0 %vm1346_vm11, %v13353_v20  ;;  %12750 = vmatprep.mubr.msk.bf16.mxu1 %vm1346_vm11, %v17529_v24  ;;  %v4496_v20 = vor.u32 %v4495_v46, %v4492_v14  ;;  %v15064_v31 = vrot.slane %v4448_v10, 4  ;;  %v15068_v44 = vrot.slane %v4472_v12, 4  ;;  %v15072_v26 = vrot.slane %v4485_v39, 5  ;;  %v15074_v14 = vld [vmem:[#allocation2 + $0xac] sm:$0xf]  ;;  %17534 = vst [vmem:[#allocation26_spill] sm:$0xff] %v15080_v48 }
 0x15b   : > { %12898 = vmatprep.mubr.msk.bf16.mxu0 %vm1346_vm11, %v13354_v57  ;;  %v15066_v57 = vrot.slane %v4458_v3, 4  ;;  %v15070_v35 = vrot.slane %v4482_v21, 4  ;;  %v4538_v0 = vshrl.u32 %v4258_v17, 16  ;;  %v4541_v60 = vshll.u32 %v4258_v17, 16  ;;  %17533 = vst [vmem:[#allocation25_spill] sm:$0xff] %v15074_v14 }
 0x15c   : > { %v15076_v46 = vrot.slane %v4496_v20, 4  ;;  %v15078_v19 = vrot.slane %v4509_v23, 5  ;;  %v4516_v11 = vrot.slane %v4514_v50, 4  ;;  %v4519_v54 = vrot.slane %v4517_v62, 5  ;;  %v4264_v24 = vld [vmem:[#allocation2 + $0xb4] sm:$0xf] }
 0x15d   : > { %v17535_v10 = vcombine.low %v14683_v34, %v14692_v16  ;;  %v15086_v3 = vrot.slane %v4506_v58, 4  ;;  %v15088_v12 = vrot.slane %v4523_v22, 5  ;;  %v4529_v21 = vrot.slane %v4527_v45, 4  ;;  %v4267_v50 = vld [vmem:[#allocation2 + $0xc0] sm:$0xf] }
 0x15e   : > { %v4533_v39 = vshll.u32 %v15052_v15, 16  ;;  %v17536_v23 = vcombine.low %v14702_v28, %v14711_v1  ;;  %v15096_v17 = vcombine.low %v4430_v29, %v4440_v9  ;;  %v4547_v16 = vshll.u32 %v15060_v6, 16  ;;  %v15112_v9 = vld [vmem:[#allocation2 + $0xc4] sm:$0xf] }
 0x15f   : > { %v4551_v20 = vshrl.u32 %v15060_v6, 16  ;;  %v4540_v62 = vrot.slane %v4538_v0, 4  ;;  %v4543_v58 = vrot.slane %v4541_v60, 5  ;;  %v4562_v28 = vshrl.u32 %v4261_v5, 16 }
 0x160   : > { %v4565_v1 = vshll.u32 %v4261_v5, 16  ;;  %v4520_v22 = vor.u32 %v4519_v54, %v4516_v11  ;;  %v4571_v45 = vshll.u32 %v15074_v14, 16  ;;  %v4595_v0 = vshll.u32 %v15080_v48, 16  ;;  %v15121_v11 = vld [vmem:[#allocation2 + $0xa4] sm:$0x1] }
 0x161   : > { %12751 = vmatmul.mubr.msk.bf16.gmra.mrb[16].mxu1 %vm1346_vm11, %v17535_v10  ;;  %v4530_v10 = vor.u32 %v4529_v21, %v15088_v12  ;;  %v15116_v60 = vrot.slane %v4533_v39, 5  ;;  %v15118_v5 = vrot.slane %v4547_v16, 5  ;;  %v4553_v34 = vrot.slane %v4551_v20, 4  ;;  %v15123_v54 = vld [vmem:[#allocation2 + $0xb0] sm:$0x1] }
 0x162   : > { %12899 = vmatmul.mubr.msk.bf16.gmra.mrb[28].mxu0 %vm1346_vm11, %v13355_v27  ;;  %12754 = vmatprep.mubr.msk.bf16.mxu1 %vm1346_vm11, %v17536_v23  ;;  %v4575_v27 = vshrl.u32 %v15074_v14, 16  ;;  %v4586_v23 = vshrl.u32 %v4264_v24, 16  ;;  %v4599_v29 = vshrl.u32 %v15080_v48, 16  ;;  %v4564_v14 = vrot.slane %v4562_v28, 4  ;;  %v15131_v20 = vld [vmem:[#allocation2 + $0xbc] sm:$0x1] }
 0x163   : > { %12904 = vmatprep.mubr.msk.bf16.mxu0 %vm1346_vm11, %v14972_v49  ;;  %v4589_v49 = vshll.u32 %v4264_v24, 16  ;;  %v4567_v6 = vrot.slane %v4565_v1, 5  ;;  %v4610_v15 = vshrl.u32 %v4267_v50, 16  ;;  %v4613_v7 = vshll.u32 %v4267_v50, 16  ;;  %v17538_v48 = vld [vmem:[#allocation9_spill] sm:$0xff] }
 0x164   : > { %v4544_v21 = vor.u32 %v4543_v58, %v4540_v62  ;;  %v15129_v39 = vrot.slane %v4571_v45, 5  ;;  %v4577_v16 = vrot.slane %v4575_v27, 4  ;;  %v17540_v59 = vcombine.low %v17538_v48, %v17539_v41  ;;  %v15139_v50 = vld [vmem:[#allocation2 + $0xc8] sm:$0x1]  ;;  %v17543_v58 = vld [vmem:[#allocation13_spill] sm:$0xff] }
 0x165   : > { %v4588_v28 = vrot.slane %v4586_v23, 4  ;;  %v4591_v1 = vrot.slane %v4589_v49, 5  ;;  %v15137_v4 = vrot.slane %v4595_v0, 5  ;;  %v4619_v55 = vshll.u32 %v15112_v9, 16  ;;  %v17542_v62 = vld [vmem:[#allocation12_spill] sm:$0xff] }
 0x166   : > { %17537 = vst [vmem:[#allocation27_spill] sm:$0xff] %v15129_v39  ;;  %v17544_v45 = vcombine.low %v17542_v62, %v17543_v58  ;;  %v4502_v41 = vsel %vm14167_vm0, %v15076_v46, %v15034_v36  ;;  %v4601_v48 = vrot.slane %v4599_v29, 4  ;;  %v4623_v27 = vshrl.u32 %v15112_v9, 16  ;;  %v4270_v23 = vld [vmem:[#allocation2 + $0xcc] sm:$0xf] }
 0x167   : > { %17541 = vst [vmem:[#allocation9_spill] sm:$0xff] %v15137_v4  ;;  %v4521_v49 = vrot.slane %v4520_v22, 4  ;;  %v4531_v0 = vrot.slane %v4530_v10, 4  ;;  %v4612_v62 = vrot.slane %v4610_v15, 4  ;;  %v4615_v58 = vrot.slane %v4613_v7, 5 }
 0x168   : > { %v4581_v36 = vshll.u32 %v15123_v54, 16  ;;  %v15163_v46 = vld [vmem:[#allocation2 + $0xd0] sm:$0xf]  ;;  %v15165_v29 = vrot.slane %v4544_v21, 4  ;;  %v4605_v24 = vshll.u32 %v15131_v20, 16  ;;  %v4592_v22 = vor.u32 %v4591_v1, %v4588_v28 }
 0x169   : > { %12755 = vmatmul.mubr.msk.bf16.gmra.mrb[20].mxu1 %vm1346_vm11, %v17540_v59  ;;  %v4488_v59 = vsel %vm14167_vm0, %v15070_v35, %v15072_v26  ;;  %v4554_v35 = vor.u32 %v4553_v34, %v15118_v5  ;;  %v4557_v26 = vshll.u32 %v15121_v11, 16  ;;  %v4602_v7 = vor.u32 %v4601_v48, %v15137_v4  ;;  %v15185_v1 = vld [vmem:[#allocation2 + $0xd4] sm:$0x1] }
 0x16a   : > { %12905 = vmatmul.mubr.msk.bf16.vlgmr.msra.gmra.mrb[0].mxu0 %vm1346_vm11, %v14974_v30  ;;  %12758 = vmatprep.mubr.msk.bf16.mxu1 %vm1346_vm11, %v17544_v45  ;;  %v17545_v30 = vld [vmem:[#allocation11_spill] sm:$0xff]  ;;  %v4568_v45 = vor.u32 %v4567_v6, %v4564_v14  ;;  %17546 = vst [vmem:[#allocation10_spill] sm:$0xff] %v15165_v29  ;;  %v4625_v15 = vrot.slane %v4623_v27, 4  ;;  %v4629_v34 = vshll.u32 %v15139_v50, 16  ;;  %v4512_v6 = vsel %vm14167_vm0, %v15086_v3, %v15078_v19  ;;  %v4955_v29 = vld [vmem:[#allocation2 + $0x48] sm:$0xe] }
 0x16b   : > { %12937 = vmatpush3.bf16.msra.mxu0 %v17545_v30  ;;  %12908 = vmatprep.mubr.msk.bf16.mxu0 %vm1346_vm11, %v14976_v47  ;;  %v4578_v30 = vor.u32 %v4577_v16, %v15129_v39  ;;  %v15169_v47 = vrot.slane %v4619_v55, 5  ;;  %v4616_v14 = vor.u32 %v4615_v58, %v4612_v62  ;;  %v4634_v10 = vshrl.u32 %v4270_v23, 16  ;;  %v17547_v48 = vld [vmem:[#allocation14_spill] sm:$0xff]  ;;  %v17548_v27 = vld [vmem:[#allocation15_spill] sm:$0xff] }
 0x16c   : > { %v4637_v21 = vshll.u32 %v4270_v23, 16  ;;  %v15177_v16 = vrot.slane %v4554_v35, 4  ;;  %v15179_v39 = vrot.slane %v4557_v26, 5  ;;  %v15181_v55 = vrot.slane %v4568_v45, 4  ;;  %v4956_v58 = vld [vmem:[#allocation2 + $0x54] sm:$0xe] }
 0x16d   : > { %v15183_v28 = vrot.slane %v4581_v36, 5  ;;  %v17549_v4 = vcombine.low %v17547_v48, %v17548_v27  ;;  %v4526_v19 = vsel %vm14167_vm0, %v4521_v49, %v15088_v12  ;;  %v4536_v3 = vsel %vm14167_vm0, %v4531_v0, %v15116_v60  ;;  %v17550_v35 = vld [vmem:[#allocation16_spill] sm:$0xff]  ;;  %v17551_v26 = vld [vmem:[#allocation17_spill] sm:$0xff] }
 0x16e   : > { %v15197_v23 = vrot.slane %v4578_v30, 4  ;;  %v4643_v62 = vshll.u32 %v15163_v46, 16  ;;  %v17552_v45 = vcombine.low %v17550_v35, %v17551_v26  ;;  %v15208_v12 = vrot.slane %v4602_v7, 4  ;;  %v4957_v0 = vld [vmem:[#allocation2 + $0x60] sm:$0xe] }
 0x16f   : > { %v15210_v49 = vrot.slane %v4605_v24, 5  ;;  %v15212_v60 = vrot.slane %v4629_v34, 5  ;;  %v15216_v36 = vrot.slane %v4616_v14, 4  ;;  %v15219_v30 = vrot.slane %v4634_v10, 4 }
 0x170   : > { %v15221_v48 = vrot.slane %v4637_v21, 5  ;;  %v17553_v24 = vsel %vm14167_vm0, %v15066_v57, %v15045_v18  ;;  %v4647_v34 = vshrl.u32 %v15163_v46, 16  ;;  %v11858_v14 = vrot.slane %v4955_v29, 9 }
 0x171   : > { %12759 = vmatmul.mubr.msk.bf16.gmra.mrb[24].mxu1 %vm1346_vm11, %v17549_v4  ;;  %v15206_v4 = vrot.slane %v4592_v22, 4  ;;  %v17554_v22 = vsel %vm14167_vm0, %v15064_v31, %v15013_v61  ;;  %v15243_v10 = vcombine.low %v4502_v41, %v4512_v6  ;;  %v15245_v18 = vcombine.low %v4526_v19, %v4536_v3  ;;  %v4958_v31 = vld [vmem:[#allocation2 + $0x6c] sm:$0xe] }
 0x172   : > { %12909 = vmatmul.mubr.msk.bf16.gmra.mrb[4].mxu0 %vm1346_vm11, %v14982_v25  ;;  %12762 = vmatprep.mubr.msk.bf16.mxu1 %vm1346_vm11, %v17552_v45  ;;  %v4626_v25 = vor.u32 %v4625_v15, %v15169_v47  ;;  %v15233_v7 = vcombine.low %v17554_v22, %v17553_v24  ;;  %v15247_v57 = vrot.slane %v4643_v62, 5  ;;  %v4653_v61 = vshll.u32 %v15185_v1, 16  ;;  %v4961_v45 = vld [vmem:[#allocation2 + $0x90] sm:$0xe] }
 0x173   : > { %12912 = vmatprep.mubr.msk.bf16.mxu0 %vm1346_vm11, %v15019_v42  ;;  %v17555_v42 = vsel %vm14167_vm0, %v15068_v44, %v15022_v40  ;;  %v5045_v21 = vrot.slane %v14848_v51, 5  ;;  %v5048_v27 = vrot.slane %v14880_v56, 5  ;;  %v11859_v35 = vrot.slane %v4956_v58, 9  ;;  %v4959_v44 = vld [vmem:[#allocation2 + $0x78] sm:$0xe] }
 0x174   : > { %v15240_v15 = vcombine.low %v17555_v42, %v4488_v59  ;;  %v5052_v40 = vrot.slane %v14882_v63, 5  ;;  %v15253_v59 = vrot.slane %v4626_v25, 4  ;;  %v5055_v41 = vrot.slane %v14916_v33, 5  ;;  %v4960_v63 = vld [vmem:[#allocation2 + $0x84] sm:$0xe] }
 0x175   : > { %v11860_v29 = vrot.slane %v4957_v0, 9  ;;  %v5059_v6 = vrot.slane %v14945_v2, 5  ;;  %v15257_v19 = vrot.slane %v4647_v34, 4  ;;  %v15261_v3 = vsel %vm13916_vm8, %v11858_v14, %v5045_v21  ;;  %v4962_v34 = vld [vmem:[#allocation2 + $0x9c] sm:$0xe]  ;;  %v17557_v14 = vld [vmem:[#allocation18_spill] sm:$0xff] }
 0x176   : > { %v5047_v51 = vrot.slane %v5045_v21, 4  ;;  %v15265_v56 = vsel %vm13916_vm8, %v11859_v35, %v5052_v40  ;;  %v17556_v62 = vcombine.low %v14832_v13, %v14840_v32  ;;  %v5054_v33 = vrot.slane %v5052_v40, 4  ;;  %v17558_v21 = vld [vmem:[#allocation20_spill] sm:$0xff]  ;;  %v17559_v40 = vld [vmem:[#allocation19_spill] sm:$0xff] }
 0x177   : > { %v15273_v2 = vsel %vm13916_vm8, %v11860_v29, %v5059_v6  ;;  %v5061_v58 = vrot.slane %v5059_v6, 4  ;;  %v5062_v26 = vrot.slane %v14978_v38, 5  ;;  %v11861_v25 = vrot.slane %v4958_v31, 9  ;;  %v17560_v6 = vld [vmem:[#allocation21_spill] sm:$0xff] }
 0x178   : > { %v15280_v0 = vsel %vm13916_vm8, %v5047_v51, %v5048_v27  ;;  %v5066_v13 = vrot.slane %v14968_v43, 5  ;;  %v5069_v32 = vrot.slane %v15006_v52, 5  ;;  %v15290_v38 = vsel %vm13916_vm8, %v5054_v33, %v5055_v41  ;;  %v17561_v33 = vld [vmem:[#allocation22_spill] sm:$0xff] }
 0x179   : > { %12763 = vmatmul.mubr.msk.bf16.gmra.mrb[28].mxu1 %vm1346_vm11, %v17556_v62  ;;  %v11875_v24 = vcombine.low %v15261_v3, %v15280_v0  ;;  %v11862_v22 = vrot.slane %v4959_v44, 9  ;;  %v11876_v43 = vcombine.low %v15265_v56, %v15290_v38  ;;  %v5073_v31 = vrot.slane %v17557_v14, 5  ;;  %v4963_v44 = vld [vmem:[#allocation2 + $0xa8] sm:$0xe]  ;;  %v4964_v14 = vld [vmem:[#allocation2 + $0xb4] sm:$0xe] }
 0x17a   : > { %12913 = vmatmul.mubr.msk.bf16.gmra.mrb[8].mxu0 %vm1346_vm11, %v15050_v53  ;;  %v15294_v53 = vsel %vm13916_vm8, %v5061_v58, %v5062_v26  ;;  %v5068_v42 = vrot.slane %v5066_v13, 4  ;;  %v5076_v27 = vrot.slane %v17558_v21, 5  ;;  %v11863_v35 = vrot.slane %v4960_v63, 9  ;;  %v17562_v21 = vld [vmem:[#allocation23_spill] sm:$0xff] }
 0x17b   : > { %12916 = vmatprep.mubr.msk.bf16.mxu0 %vm1346_vm11, %v15096_v17  ;;  %v11877_v52 = vcombine.low %v15273_v2, %v15294_v53  ;;  %v15302_v17 = vsel %vm13916_vm8, %v11861_v25, %v5066_v13  ;;  %v5080_v41 = vrot.slane %v17559_v40, 5  ;;  %v5083_v51 = vrot.slane %v17560_v6, 5  ;;  %v4965_v6 = vld [vmem:[#allocation2 + $0xc0] sm:$0xe] }
 0x17c   : > { %v15309_v29 = vsel %vm13916_vm8, %v5068_v42, %v5069_v32  ;;  %v11864_v62 = vrot.slane %v4961_v45, 9  ;;  %v5087_v58 = vrot.slane %v17561_v33, 5  ;;  %v15317_v25 = vsel %vm13916_vm8, %v11862_v22, %v5073_v31 }
 0x17d   : > { %v5075_v63 = vrot.slane %v5073_v31, 4  ;;  %v15321_v13 = vsel %vm13916_vm8, %v11863_v35, %v5080_v41  ;;  %v5082_v32 = vrot.slane %v5080_v41, 4  ;;  %v5090_v40 = vrot.slane %v17562_v21, 5  ;;  %v17563_v31 = vld [vmem:[#allocation24_spill] sm:$0xff] }
 0x17e   : > { %v15325_v42 = vsel %vm13916_vm8, %v11864_v62, %v5087_v58  ;;  %v5089_v45 = vrot.slane %v5087_v58, 4  ;;  %v11865_v22 = vrot.slane %v4962_v34, 9  ;;  %v5094_v26 = vrot.slane %v17563_v31, 5 }
 0x17f   : > { %v15330_v33 = vsel %vm13916_vm8, %v5075_v63, %v5076_v27  ;;  %v5097_v35 = vrot.slane %v15121_v11, 5  ;;  %v15340_v62 = vsel %vm13916_vm8, %v5082_v32, %v5083_v51  ;;  %v11866_v27 = vrot.slane %v4963_v44, 9  ;;  %v4966_v63 = vld [vmem:[#allocation2 + $0xcc] sm:$0xe] }
 0x180   : > { %v15344_v58 = vsel %vm13916_vm8, %v5089_v45, %v5090_v40  ;;  %v15354_v34 = vsel %vm13916_vm8, %v11865_v22, %v5094_v26  ;;  %v5096_v51 = vrot.slane %v5094_v26, 4  ;;  %v17564_v32 = vld [vmem:[#allocation25_spill] sm:$0xff]  ;;  %v5104_v45 = vrot.slane %v15123_v54, 5  ;;  %v17565_v40 = vld [vmem:[#allocation26_spill] sm:$0xff] }
 0x181   : > { %v5101_v21 = vrot.slane %v17564_v32, 5  ;;  %v11867_v44 = vrot.slane %v4964_v14, 9  ;;  %v5108_v31 = vrot.slane %v17565_v40, 5  ;;  %v5111_v11 = vrot.slane %v15131_v20, 5 }
 0x182   : > { %12917 = vmatmul.mubr.msk.bf16.gmra.mrb[12].mxu0 %vm1346_vm11, %v15233_v7  ;;  %v11868_v7 = vrot.slane %v4965_v6, 9  ;;  %v5115_v41 = vrot.slane %v15112_v9, 5  ;;  %v5118_v9 = vrot.slane %v15139_v50, 5  ;;  %v17569_v8 = vcombine.low %v15302_v17, %v15309_v29 }
 0x183   : > { %12920 = vmatprep.mubr.msk.bf16.mxu0 %vm1346_vm11, %v15240_v15  ;;  %v15361_v15 = vsel %vm13916_vm8, %v5096_v51, %v5097_v35  ;;  %v15369_v22 = vsel %vm13916_vm8, %v11866_v27, %v5101_v21  ;;  %v5103_v54 = vrot.slane %v5101_v21, 4  ;;  %v15373_v14 = vsel %vm13916_vm8, %v11867_v44, %v5108_v31 }
 0x184   : > { %v11882_v26 = vcombine.low %v15354_v34, %v15361_v15  ;;  %v5110_v32 = vrot.slane %v5108_v31, 4  ;;  %v15377_v35 = vsel %vm13916_vm8, %v11868_v7, %v5115_v41  ;;  %v5117_v20 = vrot.slane %v5115_v41, 4  ;;  %v17567_v31 = vld [vmem:[#allocation27_spill] sm:$0xff] }
 0x185   : > { %v15382_v6 = vsel %vm13916_vm8, %v5103_v54, %v5104_v45  ;;  %v11869_v51 = vrot.slane %v4966_v63, 9  ;;  %v5122_v27 = vrot.slane %v15163_v46, 5  ;;  %v5125_v21 = vrot.slane %v15185_v1, 5 }
 0x186   : > { %v11883_v44 = vcombine.low %v15369_v22, %v15382_v6  ;;  %v15390_v40 = vsel %vm13916_vm8, %v5110_v32, %v5111_v11  ;;  %v15394_v41 = vsel %vm13916_vm8, %v5117_v20, %v5118_v9  ;;  %v17566_v11 = vld [vmem:[#allocation10_spill] sm:$0xff]  ;;  %v4574_v54 = vsel %vm14167_vm0, %v15181_v55, %v17567_v31 }
 0x187   : > { %v11884_v50 = vcombine.low %v15373_v14, %v15390_v40  ;;  %v11885_v46 = vcombine.low %v15377_v35, %v15394_v41  ;;  %v15404_v7 = vsel %vm13916_vm8, %v11869_v51, %v5122_v27  ;;  %v5124_v63 = vrot.slane %v5122_v27, 4  ;;  %v13604_v27 = vld [vmem:[#allocation2 + $0x1c] sm:$0xf] }
 0x188   : > { %v4550_v45 = vsel %vm14167_vm0, %v17566_v11, %v15118_v5  ;;  %v4608_v55 = vsel %vm14167_vm0, %v15208_v12, %v15210_v49  ;;  %v4622_v51 = vsel %vm14167_vm0, %v15216_v36, %v15169_v47  ;;  %v13606_v36 = vld [vmem:[#allocation2 + $0x28] sm:$0xf]  ;;  %v17570_v3 = vcombine.low %v15317_v25, %v15330_v33 }
 0x189   : > { %v15426_v32 = vsel %vm13916_vm8, %v5124_v63, %v5125_v21  ;;  %v5017_v21 = vrot.slane %v13604_v27, 5  ;;  %v4951_v63 = vld [vmem:[#allocation2 + $0x18] sm:$0xe]  ;;  %v17571_v56 = vcombine.low %v15321_v13, %v15340_v62  ;;  %v17572_v2 = vcombine.low %v15325_v42, %v15344_v58 }
 0x18a   : > { %12921 = vmatmul.mubr.msk.bf16.gmra.mrb[16].mxu0 %vm1346_vm11, %v15243_v10  ;;  %v4560_v10 = vsel %vm14167_vm0, %v15177_v16, %v15179_v39  ;;  %v11886_v5 = vcombine.low %v15404_v7, %v15426_v32  ;;  %v17568_v39 = vld [vmem:[#allocation9_spill] sm:$0xff]  ;;  %v17573_v62 = vmov 0  }
 0x18b   : > { %12924 = vmatprep.mubr.msk.bf16.mxu0 %vm1346_vm11, %v15245_v18  ;;  %v4584_v18 = vsel %vm14167_vm0, %v15197_v23, %v15183_v28  ;;  %v11833_v20 = vcombine.low %v4550_v45, %v4560_v10  ;;  %v4598_v16 = vsel %vm14167_vm0, %v15206_v4, %v17568_v39  ;;  %v4640_v28 = vor.u32 %v15221_v48, %v15219_v30  ;;  %v13605_v10 = vld [vmem:[#allocation2 + $0x20] sm:$0x1] }
 0x18c   : > { %v11834_v9 = vcombine.low %v4574_v54, %v4584_v18  ;;  %v4650_v23 = vor.u32 %v15257_v19, %v15247_v57  ;;  %v4632_v4 = vsel %vm14167_vm0, %v15253_v59, %v15212_v60  ;;  %v11835_v12 = vcombine.low %v4598_v16, %v4608_v55  ;;  %v4952_v54 = vld [vmem:[#allocation2 + $0x24] sm:$0xe]  ;;  %v13607_v18 = vld [vmem:[#allocation2 + $0x34] sm:$0xf]  ;;  %10582 = vst.msk [vmem:[#allocation5] sm:$0x3] %vm6196_vm1, %v17573_v62 }
 0x18d   : > { %v11836_v49 = vcombine.low %v4622_v51, %v4632_v4  ;;  %v4641_v11 = vrot.slane %v4640_v28, 4  ;;  %v4655_v48 = vrot.slane %v4653_v61, 5  ;;  %v11854_v19 = vrot.slane %v4951_v63, 9  ;;  %v13609_v4 = vld [vmem:[#allocation2 + $0x38] sm:$0x1] }
 0x18e   : > { %v4651_v30 = vrot.slane %v4650_v23, 4  ;;  %v5019_v45 = vrot.slane %v5017_v21, 4  ;;  %v5020_v31 = vrot.slane %v13605_v10, 5  ;;  %v5024_v59 = vrot.slane %v13606_v36, 5  ;;  %10583 = vst.msk [vmem:[#allocation5 + $0x2] sm:$0x3] %vm6196_vm1, %v17573_v62 }
 0x18f   : > { %v4646_v47 = vsel %vm14167_vm0, %v4641_v11, %v15247_v57  ;;  %v5018_v1 = vsel %vm13916_vm8, %v11854_v19, %v5017_v21  ;;  %v11855_v55 = vrot.slane %v4952_v54, 9  ;;  %v13608_v57 = vld [vmem:[#allocation2 + $0x2c] sm:$0x1]  ;;  %v5034_v27 = vrot.slane %v13609_v4, 5  ;;  %10584 = vst.msk [vmem:[#allocation5 + $0x4] sm:$0x3] %vm6196_vm1, %v17573_v62 }
 0x190   : > { %v4656_v60 = vsel %vm14167_vm0, %v4651_v30, %v4655_v48  ;;  %v5021_v61 = vsel %vm13916_vm8, %v5019_v45, %v5020_v31  ;;  %v5026_v28 = vrot.slane %v5024_v59, 4  ;;  %v5027_v23 = vrot.slane %v13608_v57, 5  ;;  %v4954_v48 = vld [vmem:[#allocation2 + $0x3c] sm:$0xe]  ;;  %10585 = vst.msk [vmem:[#allocation5 + $0x6] sm:$0x3] %vm6196_vm1, %v17573_v62 }
 0x191   : > { %v11837_v39 = vcombine.low %v4646_v47, %v4656_v60  ;;  %v11871_v16 = vcombine.low %v5018_v1, %v5021_v61  ;;  %v5025_v21 = vsel %vm13916_vm8, %v11855_v55, %v5024_v59  ;;  %v11857_v10 = vrot.slane %v4954_v48, 9  ;;  %v13611_v47 = vld [vmem:[#allocation2 + $0x44] sm:$0x1]  ;;  %7291 = vst.msk [vmem:[#allocation3 + $0xc] sm:$0x1] %vm7288_vm2, %v17573_v62 }
 0x192   : > { %12925 = vmatmul.mubr.msk.bf16.gmra.mrb[20].mxu0 %vm1346_vm11, %v11833_v20  ;;  %v5031_v20 = vrot.slane %v13607_v18, 5  ;;  %v5028_v63 = vsel %vm13916_vm8, %v5026_v28, %v5027_v23  ;;  %v5041_v60 = vrot.slane %v13611_v47, 5  ;;  %7289 = vst.msk [vmem:[#allocation3 + $0x4] sm:$0x1] %vm7288_vm2, %v17573_v62  ;;  %7293 = vst.msk [vmem:[#allocation3 + $0x14] sm:$0x1] %vm7288_vm2, %v17573_v62 }
 0x193   : > { %12928 = vmatprep.mubr.msk.bf16.mxu0 %vm1346_vm11, %v11834_v9  ;;  %v4953_v9 = vld [vmem:[#allocation2 + $0x30] sm:$0xe]  ;;  %v11872_v19 = vcombine.low %v5025_v21, %v5028_v63  ;;  %7295 = vst.msk [vmem:[#allocation3 + $0x1c] sm:$0x1] %vm7288_vm2, %v17573_v62  ;;  %7297 = vst.msk [vmem:[#allocation3 + $0x24] sm:$0x1] %vm7288_vm2, %v17573_v62 }
 0x194   : > { %v11856_v37 = vrot.slane %v4953_v9, 9  ;;  %v5033_v51 = vrot.slane %v5031_v20, 4  ;;  %7299 = vst.msk [vmem:[#allocation3 + $0x2c] sm:$0x1] %vm7288_vm2, %v17573_v62  ;;  %7301 = vst.msk [vmem:[#allocation3 + $0x34] sm:$0x1] %vm7288_vm2, %v17573_v62 }
 0x195   : > { %7303 = vst.msk [vmem:[#allocation3 + $0x3c] sm:$0x1] %vm7288_vm2, %v17573_v62  ;;  %7305 = vst.msk [vmem:[#allocation3 + $0x44] sm:$0x1] %vm7288_vm2, %v17573_v62  ;;  %v13683_v9 = vmov 1983009808  }
 0x196   : > { %v5032_v11 = vsel %vm13916_vm8, %v11856_v37, %v5031_v20  ;;  %v5035_v30 = vsel %vm13916_vm8, %v5033_v51, %v5034_v27  ;;  %7307 = vst.msk [vmem:[#allocation3 + $0x4c] sm:$0x1] %vm7288_vm2, %v17573_v62  ;;  %v15647_v23 = vld [vmem:[%s17452_s2] ss:$0 sm:$0xff]  ;;  %vm13686_vm0 = vmmov 0  }
 0x197   : > { %v11873_v45 = vcombine.low %v5032_v11, %v5035_v30  ;;  %7290 = vst.msk [vmem:[#allocation3 + $0x8] sm:$0xf] %vm7286_vm3, %v17573_v62  ;;  %7287 = vst.msk [vmem:[#allocation3] sm:$0xf] %vm7286_vm3, %v17573_v62 }
 0x198   : > { %7292 = vst.msk [vmem:[#allocation3 + $0x10] sm:$0xf] %vm7286_vm3, %v17573_v62  ;;  %7294 = vst.msk [vmem:[#allocation3 + $0x18] sm:$0xf] %vm7286_vm3, %v17573_v62 }
 0x199   : > { %7296 = vst.msk [vmem:[#allocation3 + $0x20] sm:$0xf] %vm7286_vm3, %v17573_v62  ;;  %7298 = vst.msk [vmem:[#allocation3 + $0x28] sm:$0xf] %vm7286_vm3, %v17573_v62 }
 0x19a   : > { %12929 = vmatmul.mubr.msk.bf16.gmra.mrb[24].mxu0 %vm1346_vm11, %v11835_v12  ;;  %v13610_v12 = vld [vmem:[#allocation2 + $0x40] sm:$0xf]  ;;  %7300 = vst.msk [vmem:[#allocation3 + $0x30] sm:$0xf] %vm7286_vm3, %v17573_v62  ;;  %7302 = vst.msk [vmem:[#allocation3 + $0x38] sm:$0xf] %vm7286_vm3, %v17573_v62 }
 0x19b   : > { %12932 = vmatprep.mubr.msk.bf16.mxu0 %vm1346_vm11, %v11836_v49  ;;  %v5038_v49 = vrot.slane %v13610_v12, 5  ;;  %7304 = vst.msk [vmem:[#allocation3 + $0x40] sm:$0xf] %vm7286_vm3, %v17573_v62  ;;  %7306 = vst.msk [vmem:[#allocation3 + $0x48] sm:$0xf] %vm7286_vm3, %v17573_v62 }
 0x19c   : > { %vm10680_vm3 = vsmask.f32 1282 }
 0x19d   : > { %v5040_v31 = vrot.slane %v5038_v49, 4  ;;  %v5039_v36 = vsel %vm13916_vm8, %v11857_v10, %v5038_v49 }
 0x19f   : > { %v5042_v59 = vsel %vm13916_vm8, %v5040_v31, %v5041_v60  ;;  %vm7632_vm8 = vcmask 1044484  }
 0x1a0   : > { %v11874_v1 = vcombine.low %v5039_v36, %v5042_v59 }
 0x1a2   : > { %12933 = vmatmul.mubr.msk.bf16.gmra.mrb[28].mxu0 %vm1346_vm11, %v11837_v39  ;;  %v5526_v39 = vunpack.c.l.s4 %v13683_v9 }
 0x1a3   : > { %12938 = vmatprep.mubr.msk.bf16.mxu0 %vm1346_vm11, %v11871_v16  ;;  %v5528_v16 = vlaneseq }
 0x1a4   : > { %v5527_v55 = vunpack.c.0.s8 %v5526_v39 }
 0x1a5   : > { %v15642_v28 = vshrl.u32 %v5528_v16, 7 }
 0x1a7   : > { %17585 = vst [vmem:[#allocation22_spill] sm:$0xff] %v15642_v28  ;;  %v15653_v63 = vsub.s32 %v5527_v55, %v15642_v28 }
 0x1a9   : > { %17586 = vst [vmem:[#allocation23_spill] sm:$0xff] %v15653_v63 }
 0x1aa   : > { %12939 = vmatmul.mubr.msk.bf16.vlgmr.msra.gmra.mrb[0].mxu0 %vm1346_vm11, %v11872_v19 }
 0x1ab   : > { %12942 = vmatprep.mubr.msk.bf16.mxu0 %vm1346_vm11, %v11873_v45 }
 0x1b2   : > { %12943 = vmatmul.mubr.msk.bf16.gmra.mrb[4].mxu0 %vm1346_vm11, %v11874_v1 }
 0x1b3   : > { %12946 = vmatprep.mubr.msk.bf16.mxu0 %vm1346_vm11, %v11875_v24 }
 0x1ba   : > { %12947 = vmatmul.mubr.msk.bf16.gmra.mrb[8].mxu0 %vm1346_vm11, %v11876_v43 }
 0x1bb   : > { %12950 = vmatprep.mubr.msk.bf16.mxu0 %vm1346_vm11, %v11877_v52 }
 0x1c2   : > { %12951 = vmatmul.mubr.msk.bf16.gmra.mrb[12].mxu0 %vm1346_vm11, %v17569_v8 }
 0x1c3   : > { %12954 = vmatprep.mubr.msk.bf16.mxu0 %vm1346_vm11, %v17570_v3 }
 0x1ca   : > { %12955 = vmatmul.mubr.msk.bf16.gmra.mrb[16].mxu0 %vm1346_vm11, %v17571_v56 }
 0x1cb   : > { %12958 = vmatprep.mubr.msk.bf16.mxu0 %vm1346_vm11, %v17572_v2 }
 0x1d2   : > { %12959 = vmatmul.mubr.msk.bf16.gmra.mrb[20].mxu0 %vm1346_vm11, %v11882_v26 }
 0x1d3   : > { %12962 = vmatprep.mubr.msk.bf16.mxu0 %vm1346_vm11, %v11883_v44 }
 0x1da   : > { %12963 = vmatmul.mubr.msk.bf16.gmra.mrb[24].mxu0 %vm1346_vm11, %v11884_v50 }
 0x1db   : > { %12966 = vmatprep.mubr.msk.bf16.mxu0 %vm1346_vm11, %v11885_v46 }
 0x1e2   : > { %12967 = vmatmul.mubr.msk.bf16.gmra.mrb[28].mxu0 %vm1346_vm11, %v11886_v5  ;;  %vm7636_vm11 = vcmask 1046534  }
 0x1ec   : > { %v15530_v0 = vpop.f32.mrb[0].mxu1 }
 0x1ed   : > { %v15532_v24 = vpop.f32.mrb[1].mxu1 }
 0x1ee   : > { %v15534_v38 = vpop.f32.mrb[2].mxu1 }
 0x1ef   : > { %v15536_v53 = vpop.f32.mrb[3].mxu1 }
 0x1f4   : > { %v15538_v43 = vpop.f32.mrb[4].mxu1 }
 0x1f5   : > { %v15540_v52 = vpop.f32.mrb[5].mxu1 }
 0x1f6   : > { %v15542_v17 = vpop.f32.mrb[6].mxu1 }
 0x1f7   : > { %v15544_v29 = vpop.f32.mrb[7].mxu1 }
 0x1fc   : > { %v15546_v25 = vpop.f32.mrb[8].mxu1 }
 0x1fd   : > { %v15548_v13 = vpop.f32.mrb[9].mxu1 }
 0x1fe   : > { %v15550_v42 = vpop.f32.mrb[10].mxu1 }
 0x1ff   : > { %v15552_v33 = vpop.f32.mrb[11].mxu1 }
 0x22c   : > { %v15562_v58 = vpop.f32.mrb[12].mxu1 }
 0x22d   : > { %v15564_v34 = vpop.f32.mrb[13].mxu1 }
 0x22e   : > { %v15566_v15 = vpop.f32.mrb[14].mxu1 }
 0x22f   : > { %v15568_v26 = vpop.f32.mrb[15].mxu1 }
 0x234   : > { %v15610_v22 = vpop.f32.mrb[16].mxu1 }
 0x235   : > { %v15612_v14 = vpop.f32.mrb[17].mxu1 }
 0x236   : > { %v15614_v35 = vpop.f32.mrb[18].mxu1 }
 0x237   : > { %v15616_v6 = vpop.f32.mrb[19].mxu1 }
 0x23c   : > { %v15618_v44 = vpop.f32.mrb[20].mxu1 }
 0x23d   : > { %v15620_v40 = vpop.f32.mrb[21].mxu1 }
 0x23e   : > { %17574 = vst [vmem:[#allocation12_spill] sm:$0xff] %v15620_v40  ;;  %v15622_v41 = vpop.f32.mrb[22].mxu1 }
 0x23f   : > { %17575 = vst [vmem:[#allocation13_spill] sm:$0xff] %v15622_v41  ;;  %v15624_v50 = vpop.f32.mrb[23].mxu1 }
 0x240   : > { %17576 = vst [vmem:[#allocation11_spill] sm:$0xff] %v15624_v50 }
 0x244   : > { %v15626_v46 = vpop.f32.mrb[24].mxu1 }
 0x245   : > { %17577 = vst [vmem:[#allocation14_spill] sm:$0xff] %v15626_v46  ;;  %v15628_v7 = vpop.f32.mrb[25].mxu1 }
 0x246   : > { %17578 = vst [vmem:[#allocation15_spill] sm:$0xff] %v15628_v7  ;;  %v15630_v32 = vpop.f32.mrb[26].mxu1 }
 0x247   : > { %17579 = vst [vmem:[#allocation16_spill] sm:$0xff] %v15630_v32  ;;  %v15632_v5 = vpop.f32.mrb[27].mxu1 }
 0x248   : > { %17580 = vst [vmem:[#allocation17_spill] sm:$0xff] %v15632_v5 }
 0x24c   : > { %v15634_v61 = vpop.f32.mrb[28].mxu1 }
 0x24d   : > { %17581 = vst [vmem:[#allocation18_spill] sm:$0xff] %v15634_v61  ;;  %v15636_v54 = vpop.f32.mrb[29].mxu1 }
 0x24e   : > { %17582 = vst [vmem:[#allocation20_spill] sm:$0xff] %v15636_v54  ;;  %v15638_v18 = vpop.f32.mrb[30].mxu1 }
 0x24f   : > { %17583 = vst [vmem:[#allocation19_spill] sm:$0xff] %v15638_v18  ;;  %v15640_v20 = vpop.f32.mrb[31].mxu1 }
 0x250   : > { %17584 = vst [vmem:[#allocation21_spill] sm:$0xff] %v15640_v20 }
 0x27d   : > { %v12940_v57 = vpop.f32.mrb[0].mxu0 }
 0x27e   : > { %v13012_v37 = vadd.f32 %v12940_v57, %v15530_v0  ;;  %v5262_v51 = vpop.f32.mrb[1].mxu0 }
 0x27f   : > { %v13013_v4 = vadd.f32 %v5262_v51, %v15532_v24  ;;  %v12941_v27 = vpop.f32.mrb[2].mxu0 }
 0x280   : > { %v5430_v21 = vadd.f32 %v13012_v37, %v15647_v23  ;;  %v13014_v12 = vadd.f32 %v12941_v27, %v15534_v38  ;;  %v5265_v49 = vpop.f32.mrb[3].mxu0 }
 0x281   : > { %v5428_v11 = vadd.f32 %v13013_v4, %v15647_v23  ;;  %v13015_v30 = vadd.f32 %v5265_v49, %v15536_v53 }
 0x282   : > { %v5462_v48 = vmax.f32 %v5430_v21, 0.0  ;;  %v5431_v19 = vadd.f32 %v13014_v12, %v15647_v23 }
 0x283   : > { %v5460_v45 = vmax.f32 %v5428_v11, 0.0  ;;  %v5429_v10 = vadd.f32 %v13015_v30, %v15647_v23 }
 0x284   : > { %v5558_v31 = vcombine.high %v5462_v48, %v5462_v48  ;;  %v5565_v47 = vrot.slane %v5462_v48, %v15653_v63  ;;  %v15661_v60 = vmax.f32 %v5431_v19, 0.0 }
 0x285   : > { %v5524_v36 = vcombine.high %v5460_v45, %v5460_v45  ;;  %v5531_v59 = vrot.slane %v5460_v45, %v15653_v63  ;;  %v15664_v1 = vmax.f32 %v5429_v10, 0.0  ;;  %v15666_v8 = vpop.f32.mrb[4].mxu0 }
 0x286   : > { %v5572_v3 = vrot.slane %v5558_v31, %v15653_v63  ;;  %v5573_v56 = vcombine.high %v5565_v47, %v5565_v47  ;;  %v6253_v2 = vsel %vm6196_vm1, %v5565_v47, -inf  ;;  %v15672_v24 = vpop.f32.mrb[5].mxu0 }
 0x287   : > { %v6254_v38 = vrot.slane %v6253_v2, 4  ;;  %v5538_v53 = vrot.slane %v5524_v36, %v15653_v63  ;;  %v5539_v9 = vcombine.high %v5531_v59, %v5531_v59  ;;  %v6197_v39 = vsel %vm6196_vm1, %v5531_v59, -inf  ;;  %v15676_v16 = vpop.f32.mrb[6].mxu0 }
 0x288   : > { %v5574_v55 = vcombine.high %v5572_v3, %v5572_v3  ;;  %v6260_v57 = vsel %vm6196_vm1, %v5573_v56, -inf  ;;  %v6267_v37 = vsel %vm6196_vm1, %v5572_v3, -inf  ;;  %v6198_v51 = vrot.slane %v6197_v39, 4  ;;  %v15680_v4 = vpop.f32.mrb[7].mxu0 }
 0x289   : > { %v6255_v27 = vmax.f32 %v6253_v2, %v6254_v38  ;;  %v6261_v21 = vrot.slane %v6260_v57, 4  ;;  %v6268_v12 = vrot.slane %v6267_v37, 4  ;;  %v5540_v49 = vcombine.high %v5538_v53, %v5538_v53 }
 0x28a   : > { %v6274_v11 = vsel %vm6196_vm1, %v5574_v55, -inf  ;;  %v6199_v30 = vmax.f32 %v6197_v39, %v6198_v51  ;;  %v6204_v48 = vsel %vm6196_vm1, %v5539_v9, -inf  ;;  %v6211_v19 = vsel %vm6196_vm1, %v5538_v53, -inf }
 0x28b   : > { %v6256_v45 = vrot.slane %v6255_v27, 2  ;;  %v6262_v10 = vmax.f32 %v6260_v57, %v6261_v21  ;;  %v6269_v31 = vmax.f32 %v6267_v37, %v6268_v12  ;;  %v6275_v47 = vrot.slane %v6274_v11, 4 }
 0x28c   : > { %v6200_v36 = vrot.slane %v6199_v30, 2  ;;  %v6205_v59 = vrot.slane %v6204_v48, 4  ;;  %v6212_v3 = vrot.slane %v6211_v19, 4  ;;  %v6218_v56 = vsel %vm6196_vm1, %v5540_v49, -inf }
 0x28d   : > { %v6257_v2 = vmax.f32 %v6255_v27, %v6256_v45  ;;  %v6263_v38 = vrot.slane %v6262_v10, 2  ;;  %v6270_v0 = vrot.slane %v6269_v31, 2  ;;  %v6276_v28 = vmax.f32 %v6274_v11, %v6275_v47  ;;  %v15686_v62 = vpop.f32.mrb[8].mxu0 }
 0x28e   : > { %v6201_v39 = vmax.f32 %v6199_v30, %v6200_v36  ;;  %v6206_v55 = vmax.f32 %v6204_v48, %v6205_v59  ;;  %v6213_v9 = vmax.f32 %v6211_v19, %v6212_v3  ;;  %v6219_v51 = vrot.slane %v6218_v56, 4  ;;  %v15688_v53 = vpop.f32.mrb[9].mxu0 }
 0x28f   : > { %v6258_v57 = vrot.slane %v6257_v2, 1  ;;  %v6264_v37 = vmax.f32 %v6262_v10, %v6263_v38  ;;  %v6271_v21 = vmax.f32 %v6269_v31, %v6270_v0  ;;  %v6277_v12 = vrot.slane %v6276_v28, 2  ;;  %v15690_v20 = vpop.f32.mrb[10].mxu0 }
 0x290   : > { %v6202_v18 = vrot.slane %v6201_v39, 1  ;;  %v6207_v49 = vrot.slane %v6206_v55, 2  ;;  %v6214_v27 = vrot.slane %v6213_v9, 2  ;;  %v6220_v45 = vmax.f32 %v6218_v56, %v6219_v51  ;;  %v15692_v54 = vpop.f32.mrb[11].mxu0 }
 0x291   : > { %v6259_v11 = vmax.f32 %v6257_v2, %v6258_v57  ;;  %v6265_v47 = vrot.slane %v6264_v37, 1  ;;  %v6272_v30 = vrot.slane %v6271_v21, 1  ;;  %v6278_v48 = vmax.f32 %v6276_v28, %v6277_v12 }
 0x292   : > { %v6203_v19 = vmax.f32 %v6201_v39, %v6202_v18  ;;  %v6208_v36 = vmax.f32 %v6206_v55, %v6207_v49  ;;  %v6215_v59 = vmax.f32 %v6213_v9, %v6214_v27  ;;  %v6221_v3 = vrot.slane %v6220_v45, 2 }
 0x293   : > { %v6266_v61 = vmax.f32 %v6264_v37, %v6265_v47  ;;  %v6273_v10 = vmax.f32 %v6271_v21, %v6272_v30  ;;  %v6279_v0 = vrot.slane %v6278_v48, 1  ;;  %v7095_v31 = vsel %vm7093_vm4, %v6259_v11, -inf }
 0x294   : > { %v6209_v38 = vrot.slane %v6208_v36, 1  ;;  %v6216_v5 = vrot.slane %v6215_v59, 1  ;;  %v6222_v32 = vmax.f32 %v6220_v45, %v6221_v3  ;;  %v7094_v56 = vsel %vm7093_vm4, %v6203_v19, -inf }
 0x295   : > { %v6280_v51 = vmax.f32 %v6278_v48, %v6279_v0  ;;  %v7098_v2 = vsel %vm7093_vm4, %v6266_v61, -inf  ;;  %v7101_v28 = vsel %vm7093_vm4, %v6273_v10, -inf  ;;  %v7096_v18 = vmax.f32 %v7094_v56, %v7095_v31  ;;  %v15698_v39 = vpop.f32.mrb[12].mxu0 }
 0x296   : > { %v6210_v55 = vmax.f32 %v6208_v36, %v6209_v38  ;;  %v6217_v9 = vmax.f32 %v6215_v59, %v6216_v5  ;;  %v6223_v57 = vrot.slane %v6222_v32, 1  ;;  %v5582_v37 = vrot.slane %v15661_v60, %v15653_v63  ;;  %v15702_v21 = vpop.f32.mrb[13].mxu0 }
 0x297   : > { %v7104_v12 = vsel %vm7093_vm4, %v6280_v51, -inf  ;;  %v12237_v49 = vpack.c.bf16 %v7096_v18, %v7096_v18  ;;  %v17587_v61 = vcombine.high %v15661_v60, %v15661_v60  ;;  %v5541_v45 = vcombine.high %v15664_v1, %v15664_v1  ;;  %v15711_v11 = vpop.f32.mrb[14].mxu0 }
 0x298   : > { %v6224_v5 = vmax.f32 %v6222_v32, %v6223_v57  ;;  %v7097_v47 = vsel %vm7093_vm4, %v6210_v55, -inf  ;;  %v7100_v30 = vsel %vm7093_vm4, %v6217_v9, -inf  ;;  %v5590_v48 = vcombine.high %v5582_v37, %v5582_v37 }
 0x299   : > { %v5589_v27 = vrot.slane %v17587_v61, %v15653_v63  ;;  %v7099_v19 = vmax.f32 %v7097_v47, %v7098_v2  ;;  %v7102_v36 = vmax.f32 %v7100_v30, %v7101_v28  ;;  %v7564_v59 = vunpack.c.l.b16 %v12237_v49 }
 0x29a   : > { %v7103_v10 = vsel %vm7093_vm4, %v6224_v5, -inf  ;;  %v6281_v60 = vsel %vm6196_vm1, %v5582_v37, -inf  ;;  %v6288_v0 = vsel %vm6196_vm1, %v5590_v48, -inf  ;;  %v5548_v2 = vrot.slane %v15664_v1, %v15653_v63 }
 0x29b   : > { %v5591_v3 = vcombine.high %v5589_v27, %v5589_v27  ;;  %v6295_v31 = vsel %vm6196_vm1, %v5589_v27, -inf  ;;  %v7105_v38 = vmax.f32 %v7103_v10, %v7104_v12  ;;  %v12238_v56 = vpack.c.bf16 %v7099_v19, %v7099_v19 }
 0x29c   : > { %v12239_v32 = vpack.c.bf16 %v7102_v36, %v7102_v36  ;;  %v6282_v51 = vrot.slane %v6281_v60, 4  ;;  %v6289_v18 = vrot.slane %v6288_v0, 4  ;;  %v6296_v55 = vrot.slane %v6295_v31, 4 }
 0x29d   : > { %v6302_v9 = vsel %vm6196_vm1, %v5591_v3, -inf  ;;  %v12240_v28 = vpack.c.bf16 %v7105_v38, %v7105_v38  ;;  %v7565_v57 = vunpack.c.l.b16 %v12238_v56  ;;  %v5555_v27 = vrot.slane %v5541_v45, %v15653_v63 }
 0x29e   : > { %v7566_v49 = vunpack.c.l.b16 %v12239_v32  ;;  %v6283_v61 = vmax.f32 %v6281_v60, %v6282_v51  ;;  %v6290_v37 = vmax.f32 %v6288_v0, %v6289_v18  ;;  %v6297_v5 = vmax.f32 %v6295_v31, %v6296_v55  ;;  %v15727_v31 = vpop.f32.mrb[15].mxu0 }
 0x29f   : > { %v6303_v47 = vrot.slane %v6302_v9, 4  ;;  %v7567_v12 = vunpack.c.l.b16 %v12240_v28  ;;  %v7629_v30 = vsel %vm7628_vm5, %v7565_v57, %v7564_v59  ;;  %v5556_v19 = vcombine.high %v5548_v2, %v5548_v2 }
 0x2a0   : > { %v6284_v48 = vrot.slane %v6283_v61, 2  ;;  %v7631_v36 = vsel %vm7630_vm7, %v7566_v49, %v7629_v30  ;;  %v6291_v3 = vrot.slane %v6290_v37, 2  ;;  %v6298_v10 = vrot.slane %v6297_v5, 2 }
 0x2a1   : > { %v6304_v1 = vmax.f32 %v6302_v9, %v6303_v47  ;;  %v5557_v56 = vcombine.high %v5555_v27, %v5555_v27  ;;  %v6225_v60 = vsel %vm6196_vm1, %v5548_v2, -inf  ;;  %v6232_v0 = vsel %vm6196_vm1, %v5556_v19, -inf }
 0x2a2   : > { %v6285_v38 = vmax.f32 %v6283_v61, %v6284_v48  ;;  %v6292_v45 = vmax.f32 %v6290_v37, %v6291_v3  ;;  %v6299_v32 = vmax.f32 %v6297_v5, %v6298_v10  ;;  %v6226_v18 = vrot.slane %v6225_v60, 4 }
 0x2a3   : > { %v6305_v51 = vrot.slane %v6304_v1, 2  ;;  %v6233_v55 = vrot.slane %v6232_v0, 4  ;;  %v6239_v28 = vsel %vm6196_vm1, %v5555_v27, -inf  ;;  %v6246_v57 = vsel %vm6196_vm1, %v5557_v56, -inf }
 0x2a4   : > { %v6286_v59 = vrot.slane %v6285_v38, 1  ;;  %v6293_v49 = vrot.slane %v6292_v45, 1  ;;  %v6300_v9 = vrot.slane %v6299_v32, 1  ;;  %v6227_v47 = vmax.f32 %v6225_v60, %v6226_v18 }
 0x2a5   : > { %v6306_v61 = vmax.f32 %v6304_v1, %v6305_v51  ;;  %v6234_v2 = vmax.f32 %v6232_v0, %v6233_v55  ;;  %v6240_v48 = vrot.slane %v6239_v28, 4  ;;  %v6247_v19 = vrot.slane %v6246_v57, 4 }
 0x2a6   : > { %v6287_v30 = vmax.f32 %v6285_v38, %v6286_v59  ;;  %v6294_v7 = vmax.f32 %v6292_v45, %v6293_v49  ;;  %v6301_v46 = vmax.f32 %v6299_v32, %v6300_v9  ;;  %v6228_v5 = vrot.slane %v6227_v47, 2 }
 0x2a7   : > { %v6307_v37 = vrot.slane %v6306_v61, 1  ;;  %v6235_v10 = vrot.slane %v6234_v2, 2  ;;  %v6241_v50 = vmax.f32 %v6239_v28, %v6240_v48  ;;  %v6248_v41 = vmax.f32 %v6246_v57, %v6247_v19 }
 0x2a8   : > { %v7107_v3 = vsel %vm7093_vm4, %v6287_v30, -inf  ;;  %v7110_v56 = vsel %vm7093_vm4, %v6294_v7, -inf  ;;  %v7113_v40 = vsel %vm7093_vm4, %v6301_v46, -inf  ;;  %v6229_v1 = vmax.f32 %v6227_v47, %v6228_v5 }
 0x2a9   : > { %v6308_v27 = vmax.f32 %v6306_v61, %v6307_v37  ;;  %v6236_v60 = vmax.f32 %v6234_v2, %v6235_v10  ;;  %v6242_v38 = vrot.slane %v6241_v50, 2  ;;  %v6249_v0 = vrot.slane %v6248_v41, 2 }
 0x2aa   : > { %v7633_v51 = vsel %vm7632_vm8, %v7567_v12, %v7631_v36  ;;  %v6230_v32 = vrot.slane %v6229_v1, 1  ;;  %v13016_v18 = vadd.f32 %v15666_v8, %v15538_v43  ;;  %v13017_v59 = vadd.f32 %v15672_v24, %v15540_v52 }
 0x2ab   : > { %v7116_v45 = vsel %vm7093_vm4, %v6308_v27, -inf  ;;  %v6237_v55 = vrot.slane %v6236_v60, 1  ;;  %v6243_v7 = vmax.f32 %v6241_v50, %v6242_v38  ;;  %v6250_v28 = vmax.f32 %v6248_v41, %v6249_v0 }
 0x2ac   : > { %v13018_v46 = vadd.f32 %v15676_v16, %v15542_v17  ;;  %v6231_v57 = vmax.f32 %v6229_v1, %v6230_v32  ;;  %v5434_v12 = vadd.f32 %v13016_v18, %v15647_v23  ;;  %v5432_v36 = vadd.f32 %v13017_v59, %v15647_v23  ;;  %v7722_v32 = vld [vmem:[#allocation3 + $0xc] sm:$0x1] }
 0x2ad   : > { %v13019_v49 = vadd.f32 %v15680_v4, %v15544_v29  ;;  %v6238_v9 = vmax.f32 %v6236_v60, %v6237_v55  ;;  %v6244_v43 = vrot.slane %v6243_v7, 1  ;;  %v6251_v8 = vrot.slane %v6250_v28, 1 }
 0x2ae   : > { %v15747_v52 = vadd.f32 %v13018_v46, %v15647_v23  ;;  %v7106_v41 = vsel %vm7093_vm4, %v6231_v57, -inf  ;;  %v5466_v50 = vmax.f32 %v5434_v12, 0.0  ;;  %v5464_v24 = vmax.f32 %v5432_v36, 0.0 }
 0x2af   : > { %v15751_v17 = vadd.f32 %v13019_v49, %v15647_v23  ;;  %v6245_v16 = vmax.f32 %v6243_v7, %v6244_v43  ;;  %v6252_v61 = vmax.f32 %v6250_v28, %v6251_v8  ;;  %v7108_v47 = vmax.f32 %v7106_v41, %v7107_v3  ;;  %v15759_v3 = vpop.f32.mrb[16].mxu0 }
 0x2b0   : > { %v7109_v30 = vsel %vm7093_vm4, %v6238_v9, -inf  ;;  %v5626_v4 = vcombine.high %v5466_v50, %v5466_v50  ;;  %v5633_v2 = vrot.slane %v5466_v50, %v15653_v63  ;;  %v5592_v48 = vcombine.high %v5464_v24, %v5464_v24  ;;  %v15775_v41 = vpop.f32.mrb[17].mxu0 }
 0x2b1   : > { %v7111_v29 = vmax.f32 %v7109_v30, %v7110_v56  ;;  %v7112_v19 = vsel %vm7093_vm4, %v6245_v16, -inf  ;;  %v7115_v37 = vsel %vm7093_vm4, %v6252_v61, -inf  ;;  %v12241_v5 = vpack.c.bf16 %v7108_v47, %v7108_v47  ;;  %v7717_v30 = vld [vmem:[#allocation3 + $0x8] sm:$0xf] }
 0x2b2   : > { %v5599_v10 = vrot.slane %v5464_v24, %v15653_v63  ;;  %v7114_v27 = vmax.f32 %v7112_v19, %v7113_v40  ;;  %v7117_v1 = vmax.f32 %v7115_v37, %v7116_v45  ;;  %v5640_v38 = vrot.slane %v5626_v4, %v15653_v63 }
 0x2b3   : > { %v12242_v60 = vpack.c.bf16 %v7111_v29, %v7111_v29  ;;  %v7568_v0 = vunpack.c.l.b16 %v12241_v5  ;;  %v5641_v18 = vcombine.high %v5633_v2, %v5633_v2  ;;  %v6365_v59 = vsel %vm6196_vm1, %v5633_v2, -inf }
 0x2b4   : > { %v5606_v55 = vrot.slane %v5592_v48, %v15653_v63  ;;  %v12243_v40 = vpack.c.bf16 %v7114_v27, %v7114_v27  ;;  %v12301_v7 = vpack.c.bf16 %v7117_v1, %v7117_v1  ;;  %v5642_v28 = vcombine.high %v5640_v38, %v5640_v38 }
 0x2b5   : > { %v7569_v45 = vunpack.c.l.b16 %v12242_v60  ;;  %v7635_v46 = vsel %vm7634_vm10, %v7568_v0, %v7633_v51  ;;  %v6366_v57 = vrot.slane %v6365_v59, 4  ;;  %v6372_v12 = vsel %vm6196_vm1, %v5641_v18, -inf }
 0x2b6   : > { %v6379_v36 = vsel %vm6196_vm1, %v5640_v38, -inf  ;;  %v7570_v49 = vunpack.c.l.b16 %v12243_v40  ;;  %v7723_v43 = vsel %vm15763_vm13, %v12301_v7, %v7722_v32  ;;  %v6373_v8 = vrot.slane %v6372_v12, 4 }
 0x2b7   : > { %v7637_v9 = vsel %vm7636_vm11, %v7569_v45, %v7635_v46  ;;  %7724 = vst [vmem:[#allocation3 + $0xc] sm:$0x1] %v7723_v43  ;;  %v6367_v50 = vmax.f32 %v6365_v59, %v6366_v57  ;;  %v6380_v24 = vrot.slane %v6379_v36, 4  ;;  %v6386_v16 = vsel %vm6196_vm1, %v5642_v28, -inf }
 0x2b8   : > { %v5607_v51 = vcombine.high %v5599_v10, %v5599_v10  ;;  %v7639_v61 = vsel %vm7638_vm12, %v7570_v49, %v7637_v9  ;;  %v6374_v29 = vmax.f32 %v6372_v12, %v6373_v8  ;;  %v6387_v4 = vrot.slane %v6386_v16, 4 }
 0x2b9   : > { %v5608_v2 = vcombine.high %v5606_v55, %v5606_v55  ;;  %v7682_v48 = vpack.c.b16 %v7639_v61, %v7639_v61  ;;  %v6368_v19 = vrot.slane %v6367_v50, 2  ;;  %v6381_v37 = vmax.f32 %v6379_v36, %v6380_v24 }
 0x2ba   : > { %v6309_v5 = vsel %vm6196_vm1, %v5599_v10, -inf  ;;  %v6375_v27 = vrot.slane %v6374_v29, 2  ;;  %v6388_v1 = vmax.f32 %v6386_v16, %v6387_v4  ;;  %v6316_v38 = vsel %vm6196_vm1, %v5607_v51, -inf }
 0x2bb   : > { %v6310_v60 = vrot.slane %v6309_v5, 4  ;;  %v7718_v0 = vsel %vm15781_vm6, %v7682_v48, %v7717_v30  ;;  %v6369_v32 = vmax.f32 %v6367_v50, %v6368_v19  ;;  %v6382_v18 = vrot.slane %v6381_v37, 2 }
 0x2bc   : > { %v6317_v59 = vrot.slane %v6316_v38, 4  ;;  %7719 = vst [vmem:[#allocation3 + $0x8] sm:$0xf] %v7718_v0  ;;  %v6376_v40 = vmax.f32 %v6374_v29, %v6375_v27  ;;  %v6389_v45 = vrot.slane %v6388_v1, 2  ;;  %v6323_v28 = vsel %vm6196_vm1, %v5606_v55, -inf }
 0x2bd   : > { %v6311_v7 = vmax.f32 %v6309_v5, %v6310_v60  ;;  %v6370_v46 = vrot.slane %v6369_v32, 1  ;;  %v6383_v57 = vmax.f32 %v6381_v37, %v6382_v18  ;;  %v6324_v12 = vrot.slane %v6323_v28, 4 }
 0x2be   : > { %v6318_v10 = vmax.f32 %v6316_v38, %v6317_v59  ;;  %v6377_v36 = vrot.slane %v6376_v40, 1  ;;  %v6390_v49 = vmax.f32 %v6388_v1, %v6389_v45  ;;  %v6330_v43 = vsel %vm6196_vm1, %v5608_v2, -inf }
 0x2bf   : > { %v6312_v9 = vrot.slane %v6311_v7, 2  ;;  %v6371_v8 = vmax.f32 %v6369_v32, %v6370_v46  ;;  %v6384_v24 = vrot.slane %v6383_v57, 1  ;;  %v6325_v16 = vmax.f32 %v6323_v28, %v6324_v12 }
 0x2c0   : > { %v6319_v50 = vrot.slane %v6318_v10, 2  ;;  %v6378_v51 = vmax.f32 %v6376_v40, %v6377_v36  ;;  %v6391_v61 = vrot.slane %v6390_v49, 1  ;;  %v6331_v29 = vrot.slane %v6330_v43, 4 }
 0x2c1   : > { %v6313_v30 = vmax.f32 %v6311_v7, %v6312_v9  ;;  %v6385_v4 = vmax.f32 %v6383_v57, %v6384_v24  ;;  %v7119_v55 = vsel %vm7093_vm4, %v6371_v8, -inf  ;;  %v6326_v19 = vrot.slane %v6325_v16, 2 }
 0x2c2   : > { %v6320_v48 = vmax.f32 %v6318_v10, %v6319_v50  ;;  %v6392_v37 = vmax.f32 %v6390_v49, %v6391_v61  ;;  %v7122_v5 = vsel %vm7093_vm4, %v6378_v51, -inf  ;;  %v6332_v1 = vmax.f32 %v6330_v43, %v6331_v29  ;;  %v15800_v49 = vpop.f32.mrb[18].mxu0 }
 0x2c3   : > { %v6314_v27 = vrot.slane %v6313_v30, 1  ;;  %v7125_v2 = vsel %vm7093_vm4, %v6385_v4, -inf  ;;  %v6327_v38 = vmax.f32 %v6325_v16, %v6326_v19  ;;  %v5467_v0 = vmax.f32 %v15747_v52, 0.0  ;;  %v7807_v47 = vld [vmem:[#allocation3 + $0x8] sm:$0xe] }
 0x2c4   : > { %v6321_v60 = vrot.slane %v6320_v48, 1  ;;  %v7128_v32 = vsel %vm7093_vm4, %v6392_v37, -inf  ;;  %v6333_v59 = vrot.slane %v6332_v1, 2  ;;  %v5465_v40 = vmax.f32 %v15751_v17, 0.0 }
 0x2c5   : > { %v6315_v18 = vmax.f32 %v6313_v30, %v6314_v27  ;;  %v6328_v7 = vrot.slane %v6327_v38, 1  ;;  %v5643_v28 = vcombine.high %v5467_v0, %v5467_v0  ;;  %v5650_v46 = vrot.slane %v5467_v0, %v15653_v63 }
 0x2c6   : > { %v6322_v45 = vmax.f32 %v6320_v48, %v6321_v60  ;;  %v6334_v57 = vmax.f32 %v6332_v1, %v6333_v59  ;;  %v5609_v12 = vcombine.high %v5465_v40, %v5465_v40  ;;  %v5616_v36 = vrot.slane %v5465_v40, %v15653_v63 }
 0x2c7   : > { %v7118_v10 = vsel %vm7093_vm4, %v6315_v18, -inf  ;;  %v6329_v52 = vmax.f32 %v6327_v38, %v6328_v7  ;;  %v5657_v8 = vrot.slane %v5643_v28, %v15653_v63  ;;  %v5658_v50 = vcombine.high %v5650_v46, %v5650_v46 }
 0x2c8   : > { %v7120_v9 = vmax.f32 %v7118_v10, %v7119_v55  ;;  %v7121_v43 = vsel %vm7093_vm4, %v6322_v45, -inf  ;;  %v6335_v17 = vrot.slane %v6334_v57, 1  ;;  %v6393_v16 = vsel %vm6196_vm1, %v5650_v46, -inf }
 0x2c9   : > { %v7123_v24 = vmax.f32 %v7121_v43, %v7122_v5  ;;  %v7124_v51 = vsel %vm7093_vm4, %v6329_v52, -inf  ;;  %v5659_v30 = vcombine.high %v5657_v8, %v5657_v8  ;;  %v6394_v29 = vrot.slane %v6393_v16, 4 }
 0x2ca   : > { %v12245_v61 = vpack.c.bf16 %v7120_v9, %v7120_v9  ;;  %v6336_v4 = vmax.f32 %v6334_v57, %v6335_v17  ;;  %v7126_v48 = vmax.f32 %v7124_v51, %v7125_v2  ;;  %v6400_v37 = vsel %vm6196_vm1, %v5658_v50, -inf }
 0x2cb   : > { %v12246_v19 = vpack.c.bf16 %v7123_v24, %v7123_v24  ;;  %v6395_v27 = vmax.f32 %v6393_v16, %v6394_v29  ;;  %v6401_v1 = vrot.slane %v6400_v37, 4  ;;  %v6407_v60 = vsel %vm6196_vm1, %v5657_v8, -inf }
 0x2cc   : > { %v7572_v55 = vunpack.c.l.b16 %v12245_v61  ;;  %v7127_v5 = vsel %vm7093_vm4, %v6336_v4, -inf  ;;  %v12247_v38 = vpack.c.bf16 %v7126_v48, %v7126_v48  ;;  %v6408_v18 = vrot.slane %v6407_v60, 4 }
 0x2cd   : > { %v7573_v0 = vunpack.c.l.b16 %v12246_v19  ;;  %v7129_v59 = vmax.f32 %v7127_v5, %v7128_v32  ;;  %v6396_v40 = vrot.slane %v6395_v27, 2  ;;  %v6402_v45 = vmax.f32 %v6400_v37, %v6401_v1  ;;  %v15813_v32 = vpop.f32.mrb[19].mxu0 }
 0x2ce   : > { %v6414_v7 = vsel %vm6196_vm1, %v5659_v30, -inf  ;;  %v7574_v28 = vunpack.c.l.b16 %v12247_v38  ;;  %v6409_v46 = vmax.f32 %v6407_v60, %v6408_v18  ;;  %v5623_v43 = vrot.slane %v5609_v12, %v15653_v63 }
 0x2cf   : > { %v7640_v2 = vsel %vm7628_vm5, %v7573_v0, %v7572_v55  ;;  %v6415_v57 = vrot.slane %v6414_v7, 4  ;;  %v12248_v10 = vpack.c.bf16 %v7129_v59, %v7129_v59  ;;  %v6397_v52 = vmax.f32 %v6395_v27, %v6396_v40 }
 0x2d0   : > { %v6403_v9 = vrot.slane %v6402_v45, 2  ;;  %v7641_v8 = vsel %vm7630_vm7, %v7574_v28, %v7640_v2  ;;  %v6410_v17 = vrot.slane %v6409_v46, 2  ;;  %v5624_v50 = vcombine.high %v5616_v36, %v5616_v36 }
 0x2d1   : > { %v6416_v24 = vmax.f32 %v6414_v7, %v6415_v57  ;;  %v7575_v16 = vunpack.c.l.b16 %v12248_v10  ;;  %v6398_v51 = vrot.slane %v6397_v52, 1  ;;  %v5625_v30 = vcombine.high %v5623_v43, %v5623_v43 }
 0x2d2   : > { %v6404_v61 = vmax.f32 %v6402_v45, %v6403_v9  ;;  %v6411_v29 = vmax.f32 %v6409_v46, %v6410_v17  ;;  %v6337_v48 = vsel %vm6196_vm1, %v5616_v36, -inf  ;;  %v6344_v19 = vsel %vm6196_vm1, %v5624_v50, -inf }
 0x2d3   : > { %v6417_v4 = vrot.slane %v6416_v24, 2  ;;  %v6399_v37 = vmax.f32 %v6397_v52, %v6398_v51  ;;  %v6338_v12 = vrot.slane %v6337_v48, 4  ;;  %v6345_v27 = vrot.slane %v6344_v19, 4 }
 0x2d4   : > { %v6405_v55 = vrot.slane %v6404_v61, 1  ;;  %v6412_v1 = vrot.slane %v6411_v29, 1  ;;  %v6351_v5 = vsel %vm6196_vm1, %v5623_v43, -inf  ;;  %v6358_v38 = vsel %vm6196_vm1, %v5625_v30, -inf }
 0x2d5   : > { %v6418_v60 = vmax.f32 %v6416_v24, %v6417_v4  ;;  %v7131_v18 = vsel %vm7093_vm4, %v6399_v37, -inf  ;;  %v6339_v59 = vmax.f32 %v6337_v48, %v6338_v12  ;;  %v6346_v40 = vmax.f32 %v6344_v19, %v6345_v27 }
 0x2d6   : > { %v6406_v0 = vmax.f32 %v6404_v61, %v6405_v55  ;;  %v6413_v45 = vmax.f32 %v6411_v29, %v6412_v1  ;;  %v6352_v36 = vrot.slane %v6351_v5, 4  ;;  %v6359_v28 = vrot.slane %v6358_v38, 4 }
 0x2d7   : > { %v6419_v7 = vrot.slane %v6418_v60, 1  ;;  %v6340_v46 = vrot.slane %v6339_v59, 2  ;;  %v6347_v57 = vrot.slane %v6346_v40, 2  ;;  %v7642_v10 = vsel %vm7632_vm8, %v7575_v16, %v7641_v8 }
 0x2d8   : > { %v7134_v2 = vsel %vm7093_vm4, %v6406_v0, -inf  ;;  %v7137_v9 = vsel %vm7093_vm4, %v6413_v45, -inf  ;;  %v6353_v43 = vmax.f32 %v6351_v5, %v6352_v36  ;;  %v6360_v17 = vmax.f32 %v6358_v38, %v6359_v28 }
 0x2d9   : > { %v6420_v52 = vmax.f32 %v6418_v60, %v6419_v7  ;;  %v6341_v24 = vmax.f32 %v6339_v59, %v6340_v46  ;;  %v6348_v50 = vmax.f32 %v6346_v40, %v6347_v57  ;;  %v13020_v51 = vadd.f32 %v15686_v62, %v15546_v25 }
 0x2da   : > { %v13021_v61 = vadd.f32 %v15688_v53, %v15548_v13  ;;  %v6354_v29 = vrot.slane %v6353_v43, 2  ;;  %v6361_v4 = vrot.slane %v6360_v17, 2  ;;  %v13022_v8 = vadd.f32 %v15690_v20, %v15550_v42 }
 0x2db   : > { %v7140_v30 = vsel %vm7093_vm4, %v6420_v52, -inf  ;;  %v6342_v16 = vrot.slane %v6341_v24, 1  ;;  %v6349_v48 = vrot.slane %v6348_v50, 1  ;;  %v5438_v19 = vadd.f32 %v13020_v51, %v15647_v23  ;;  %v15845_v52 = vpop.f32.mrb[20].mxu0 }
 0x2dc   : > { %v5436_v37 = vadd.f32 %v13021_v61, %v15647_v23  ;;  %v6355_v55 = vmax.f32 %v6353_v43, %v6354_v29  ;;  %v6362_v12 = vmax.f32 %v6360_v17, %v6361_v4  ;;  %v5439_v25 = vadd.f32 %v13022_v8, %v15647_v23  ;;  %v7728_v4 = vld [vmem:[#allocation3 + $0x14] sm:$0x1] }
 0x2dd   : > { %v13023_v13 = vadd.f32 %v15692_v54, %v15552_v33  ;;  %v6343_v62 = vmax.f32 %v6341_v24, %v6342_v16  ;;  %v6350_v53 = vmax.f32 %v6348_v50, %v6349_v48  ;;  %v5470_v27 = vmax.f32 %v5438_v19, 0.0 }
 0x2de   : > { %v5468_v1 = vmax.f32 %v5436_v37, 0.0  ;;  %v6356_v60 = vrot.slane %v6355_v55, 1  ;;  %v6363_v5 = vrot.slane %v6362_v12, 1  ;;  %v15835_v42 = vmax.f32 %v5439_v25, 0.0 }
 0x2df   : > { %v15838_v20 = vadd.f32 %v13023_v13, %v15647_v23  ;;  %v7130_v38 = vsel %vm7093_vm4, %v6343_v62, -inf  ;;  %v7133_v0 = vsel %vm7093_vm4, %v6350_v53, -inf  ;;  %v5694_v59 = vcombine.high %v5470_v27, %v5470_v27 }
 0x2e0   : > { %v5701_v40 = vrot.slane %v5470_v27, %v15653_v63  ;;  %v6357_v45 = vmax.f32 %v6355_v55, %v6356_v60  ;;  %v6364_v33 = vmax.f32 %v6362_v12, %v6363_v5  ;;  %v7132_v54 = vmax.f32 %v7130_v38, %v7131_v18 }
 0x2e1   : > { %v7135_v7 = vmax.f32 %v7133_v0, %v7134_v2  ;;  %v5708_v36 = vrot.slane %v5694_v59, %v15653_v63  ;;  %v5660_v57 = vcombine.high %v5468_v1, %v5468_v1 }
 0x2e2   : > { %v5709_v28 = vcombine.high %v5701_v40, %v5701_v40  ;;  %v6477_v46 = vsel %vm6196_vm1, %v5701_v40, -inf  ;;  %v7136_v23 = vsel %vm7093_vm4, %v6357_v45, -inf  ;;  %v7139_v43 = vsel %vm7093_vm4, %v6364_v33, -inf  ;;  %v7725_v40 = vld [vmem:[#allocation3 + $0x10] sm:$0xf] }
 0x2e3   : > { %v12249_v17 = vpack.c.bf16 %v7132_v54, %v7132_v54  ;;  %v12250_v24 = vpack.c.bf16 %v7135_v7, %v7135_v7  ;;  %v7138_v50 = vmax.f32 %v7136_v23, %v7137_v9  ;;  %v7141_v51 = vmax.f32 %v7139_v43, %v7140_v30  ;;  %v15854_v30 = vpop.f32.mrb[21].mxu0 }
 0x2e4   : > { %v5710_v61 = vcombine.high %v5708_v36, %v5708_v36  ;;  %v6478_v29 = vrot.slane %v6477_v46, 4  ;;  %v6484_v8 = vsel %vm6196_vm1, %v5709_v28, -inf  ;;  %v6491_v16 = vsel %vm6196_vm1, %v5708_v36, -inf }
 0x2e5   : > { %v7576_v18 = vunpack.c.l.b16 %v12249_v17  ;;  %v7577_v2 = vunpack.c.l.b16 %v12250_v24  ;;  %v12251_v48 = vpack.c.bf16 %v7138_v50, %v7138_v50  ;;  %v12302_v19 = vpack.c.bf16 %v7141_v51, %v7141_v51 }
 0x2e6   : > { %v6479_v37 = vmax.f32 %v6477_v46, %v6478_v29  ;;  %v6485_v55 = vrot.slane %v6484_v8, 4  ;;  %v6492_v25 = vrot.slane %v6491_v16, 4  ;;  %v6498_v13 = vsel %vm6196_vm1, %v5710_v61, -inf }
 0x2e7   : > { %v7643_v12 = vsel %vm7634_vm10, %v7576_v18, %v7642_v10  ;;  %v5667_v9 = vrot.slane %v5468_v1, %v15653_v63  ;;  %v7578_v62 = vunpack.c.l.b16 %v12251_v48  ;;  %v7729_v27 = vsel %vm15763_vm13, %v12302_v19, %v7728_v4 }
 0x2e8   : > { %v7644_v53 = vsel %vm7636_vm11, %v7577_v2, %v7643_v12  ;;  %v6480_v60 = vrot.slane %v6479_v37, 2  ;;  %7730 = vst [vmem:[#allocation3 + $0x14] sm:$0x1] %v7729_v27  ;;  %v6486_v5 = vmax.f32 %v6484_v8, %v6485_v55  ;;  %v6493_v38 = vmax.f32 %v6491_v16, %v6492_v25 }
 0x2e9   : > { %v6499_v0 = vrot.slane %v6498_v13, 4  ;;  %v5674_v10 = vrot.slane %v5660_v57, %v15653_v63  ;;  %v7645_v59 = vsel %vm7638_vm12, %v7578_v62, %v7644_v53  ;;  %v5675_v1 = vcombine.high %v5667_v9, %v5667_v9 }
 0x2ea   : > { %v6481_v45 = vmax.f32 %v6479_v37, %v6480_v60  ;;  %v6421_v33 = vsel %vm6196_vm1, %v5667_v9, -inf  ;;  %v7684_v54 = vpack.c.b16 %v7645_v59, %v7645_v59  ;;  %v6487_v7 = vrot.slane %v6486_v5, 2 }
 0x2eb   : > { %v6494_v36 = vrot.slane %v6493_v38, 2  ;;  %v6500_v28 = vmax.f32 %v6498_v13, %v6499_v0  ;;  %v5676_v23 = vcombine.high %v5674_v10, %v5674_v10  ;;  %v6422_v43 = vrot.slane %v6421_v33, 4 }
 0x2ec   : > { %v6482_v46 = vrot.slane %v6481_v45, 1  ;;  %v6428_v17 = vsel %vm6196_vm1, %v5675_v1, -inf  ;;  %v7726_v24 = vsel %vm15781_vm6, %v7684_v54, %v7725_v40  ;;  %v6488_v57 = vmax.f32 %v6486_v5, %v6487_v7 }
 0x2ed   : > { %v6495_v50 = vmax.f32 %v6493_v38, %v6494_v36  ;;  %v6501_v51 = vrot.slane %v6500_v28, 2  ;;  %7727 = vst [vmem:[#allocation3 + $0x10] sm:$0xf] %v7726_v24  ;;  %v6423_v29 = vmax.f32 %v6421_v33, %v6422_v43  ;;  %v6429_v18 = vrot.slane %v6428_v17, 4 }
 0x2ee   : > { %v6483_v61 = vmax.f32 %v6481_v45, %v6482_v46  ;;  %v6435_v2 = vsel %vm6196_vm1, %v5674_v10, -inf  ;;  %v6489_v4 = vrot.slane %v6488_v57, 1  ;;  %v6442_v12 = vsel %vm6196_vm1, %v5676_v23, -inf }
 0x2ef   : > { %v6496_v8 = vrot.slane %v6495_v50, 1  ;;  %v6502_v16 = vmax.f32 %v6500_v28, %v6501_v51  ;;  %v6436_v48 = vrot.slane %v6435_v2, 4  ;;  %v6424_v37 = vrot.slane %v6423_v29, 2 }
 0x2f0   : > { %v7143_v19 = vsel %vm7093_vm4, %v6483_v61, -inf  ;;  %v6430_v55 = vmax.f32 %v6428_v17, %v6429_v18  ;;  %v6490_v25 = vmax.f32 %v6488_v57, %v6489_v4  ;;  %v6443_v60 = vrot.slane %v6442_v12, 4 }
 0x2f1   : > { %v6497_v13 = vmax.f32 %v6495_v50, %v6496_v8  ;;  %v6503_v9 = vrot.slane %v6502_v16, 1  ;;  %v6437_v62 = vmax.f32 %v6435_v2, %v6436_v48  ;;  %v6425_v53 = vmax.f32 %v6423_v29, %v6424_v37 }
 0x2f2   : > { %v6431_v27 = vrot.slane %v6430_v55, 2  ;;  %v5711_v5 = vcombine.high %v15835_v42, %v15835_v42  ;;  %v7146_v0 = vsel %vm7093_vm4, %v6490_v25, -inf  ;;  %v6444_v1 = vmax.f32 %v6442_v12, %v6443_v60  ;;  %v15882_v12 = vpop.f32.mrb[22].mxu0 }
 0x2f3   : > { %v6504_v38 = vmax.f32 %v6502_v16, %v6503_v9  ;;  %v7149_v10 = vsel %vm7093_vm4, %v6497_v13, -inf  ;;  %v6438_v59 = vrot.slane %v6437_v62, 2  ;;  %v6426_v40 = vrot.slane %v6425_v53, 1 }
 0x2f4   : > { %v6432_v45 = vmax.f32 %v6430_v55, %v6431_v27  ;;  %v5718_v33 = vrot.slane %v15835_v42, %v15653_v63  ;;  %v5725_v36 = vrot.slane %v5711_v5, %v15653_v63  ;;  %v5469_v28 = vmax.f32 %v15838_v20, 0.0 }
 0x2f5   : > { %v7152_v54 = vsel %vm7093_vm4, %v6504_v38, -inf  ;;  %v6439_v7 = vmax.f32 %v6437_v62, %v6438_v59  ;;  %v6427_v46 = vmax.f32 %v6425_v53, %v6426_v40  ;;  %v6445_v43 = vrot.slane %v6444_v1, 2 }
 0x2f6   : > { %v6433_v23 = vrot.slane %v6432_v45, 1  ;;  %v5726_v17 = vcombine.high %v5718_v33, %v5718_v33  ;;  %v5727_v57 = vcombine.high %v5725_v36, %v5725_v36  ;;  %v6505_v50 = vsel %vm6196_vm1, %v5718_v33, -inf }
 0x2f7   : > { %v6440_v24 = vrot.slane %v6439_v7, 1  ;;  %v6519_v51 = vsel %vm6196_vm1, %v5725_v36, -inf  ;;  %v6446_v29 = vmax.f32 %v6444_v1, %v6445_v43  ;;  %v7142_v42 = vsel %vm7093_vm4, %v6427_v46, -inf  ;;  %v15887_v36 = vpop.f32.mrb[23].mxu0 }
 0x2f8   : > { %v6434_v61 = vmax.f32 %v6432_v45, %v6433_v23  ;;  %v6506_v18 = vrot.slane %v6505_v50, 4  ;;  %v7144_v4 = vmax.f32 %v7142_v42, %v7143_v19  ;;  %v6512_v8 = vsel %vm6196_vm1, %v5726_v17, -inf }
 0x2f9   : > { %v6441_v2 = vmax.f32 %v6439_v7, %v6440_v24  ;;  %v6520_v20 = vrot.slane %v6519_v51, 4  ;;  %v6447_v16 = vrot.slane %v6446_v29, 1  ;;  %v6513_v55 = vrot.slane %v6512_v8, 4 }
 0x2fa   : > { %v7145_v48 = vsel %vm7093_vm4, %v6434_v61, -inf  ;;  %v6507_v37 = vmax.f32 %v6505_v50, %v6506_v18  ;;  %v12253_v9 = vpack.c.bf16 %v7144_v4, %v7144_v4  ;;  %v6526_v40 = vsel %vm6196_vm1, %v5727_v57, -inf }
 0x2fb   : > { %v7147_v25 = vmax.f32 %v7145_v48, %v7146_v0  ;;  %v7148_v13 = vsel %vm7093_vm4, %v6441_v2, -inf  ;;  %v6521_v62 = vmax.f32 %v6519_v51, %v6520_v20  ;;  %v6448_v53 = vmax.f32 %v6446_v29, %v6447_v16 }
 0x2fc   : > { %v7150_v27 = vmax.f32 %v7148_v13, %v7149_v10  ;;  %v6508_v60 = vrot.slane %v6507_v37, 2  ;;  %v6514_v5 = vmax.f32 %v6512_v8, %v6513_v55  ;;  %v7580_v38 = vunpack.c.l.b16 %v12253_v9 }
 0x2fd   : > { %v12254_v19 = vpack.c.bf16 %v7147_v25, %v7147_v25  ;;  %v6522_v59 = vrot.slane %v6521_v62, 2  ;;  %v7151_v45 = vsel %vm7093_vm4, %v6448_v53, -inf  ;;  %v6527_v43 = vrot.slane %v6526_v40, 4 }
 0x2fe   : > { %v12255_v1 = vpack.c.bf16 %v7150_v27, %v7150_v27  ;;  %v6509_v33 = vmax.f32 %v6507_v37, %v6508_v60  ;;  %v6515_v7 = vrot.slane %v6514_v5, 2  ;;  %v7153_v0 = vmax.f32 %v7151_v45, %v7152_v54 }
 0x2ff   : > { %v7581_v46 = vunpack.c.l.b16 %v12254_v19  ;;  %v6523_v23 = vmax.f32 %v6521_v62, %v6522_v59  ;;  %v5677_v50 = vcombine.high %v5469_v28, %v5469_v28  ;;  %v6528_v57 = vmax.f32 %v6526_v40, %v6527_v43 }
 0x300   : > { %v7582_v17 = vunpack.c.l.b16 %v12255_v1  ;;  %v6510_v10 = vrot.slane %v6509_v33, 1  ;;  %v6516_v24 = vmax.f32 %v6514_v5, %v6515_v7  ;;  %v12256_v51 = vpack.c.bf16 %v7153_v0, %v7153_v0 }
 0x301   : > { %v7646_v61 = vsel %vm7628_vm5, %v7581_v46, %v7580_v38  ;;  %v6524_v29 = vrot.slane %v6523_v23, 1  ;;  %v5684_v4 = vrot.slane %v5469_v28, %v15653_v63  ;;  %v6529_v20 = vrot.slane %v6528_v57, 2 }
 0x302   : > { %v7647_v42 = vsel %vm7630_vm7, %v7582_v17, %v7646_v61  ;;  %v6511_v18 = vmax.f32 %v6509_v33, %v6510_v10  ;;  %v6517_v2 = vrot.slane %v6516_v24, 1  ;;  %v7583_v8 = vunpack.c.l.b16 %v12256_v51  ;;  %v15914_v10 = vld [vmem:[%s17452_s2] ss:$0 sm:$0xff] }
 0x303   : > { %v6525_v54 = vmax.f32 %v6523_v23, %v6524_v29  ;;  %v5691_v16 = vrot.slane %v5677_v50, %v15653_v63  ;;  %v5692_v55 = vcombine.high %v5684_v4, %v5684_v4  ;;  %v6449_v25 = vsel %vm6196_vm1, %v5684_v4, -inf }
 0x304   : > { %v6518_v48 = vmax.f32 %v6516_v24, %v6517_v2  ;;  %v7155_v37 = vsel %vm7093_vm4, %v6511_v18, -inf  ;;  %v6530_v13 = vmax.f32 %v6528_v57, %v6529_v20  ;;  %v6450_v53 = vrot.slane %v6449_v25, 4 }
 0x305   : > { %v15896_v9 = vsel %vm7093_vm4, %v6525_v54, -inf  ;;  %v5693_v62 = vcombine.high %v5691_v16, %v5691_v16  ;;  %v6456_v28 = vsel %vm6196_vm1, %v5692_v55, -inf  ;;  %v6463_v60 = vsel %vm6196_vm1, %v5691_v16, -inf }
 0x306   : > { %v7158_v27 = vsel %vm7093_vm4, %v6518_v48, -inf  ;;  %v15902_v5 = vsel %vm7632_vm8, %v7583_v8, %v7647_v42  ;;  %v6531_v19 = vrot.slane %v6530_v13, 1  ;;  %v6451_v38 = vmax.f32 %v6449_v25, %v6450_v53 }
 0x307   : > { %v6457_v59 = vrot.slane %v6456_v28, 4  ;;  %v6464_v40 = vrot.slane %v6463_v60, 4  ;;  %v6470_v45 = vsel %vm6196_vm1, %v5693_v62, -inf  ;;  %v13024_v1 = vadd.f32 %v15698_v39, %v15562_v58 }
 0x308   : > { %v13025_v33 = vadd.f32 %v15702_v21, %v15564_v34  ;;  %v13026_v7 = vadd.f32 %v15711_v11, %v15566_v15  ;;  %v6532_v0 = vmax.f32 %v6530_v13, %v6531_v19  ;;  %v6452_v46 = vrot.slane %v6451_v38, 2 }
 0x309   : > { %v6458_v23 = vmax.f32 %v6456_v28, %v6457_v59  ;;  %v6465_v43 = vmax.f32 %v6463_v60, %v6464_v40  ;;  %v6471_v17 = vrot.slane %v6470_v45, 4  ;;  %v5442_v24 = vadd.f32 %v15914_v10, %v13024_v1 }
 0x30a   : > { %v5440_v58 = vadd.f32 %v15914_v10, %v13025_v33  ;;  %v5443_v39 = vadd.f32 %v15914_v10, %v13026_v7  ;;  %v7164_v34 = vsel %vm7093_vm4, %v6532_v0, -inf  ;;  %v6453_v21 = vmax.f32 %v6451_v38, %v6452_v46  ;;  %v15934_v46 = vpop.f32.mrb[24].mxu0 }
 0x30b   : > { %v6459_v15 = vrot.slane %v6458_v23, 2  ;;  %v6466_v11 = vrot.slane %v6465_v43, 2  ;;  %v6472_v50 = vmax.f32 %v6470_v45, %v6471_v17  ;;  %v5474_v51 = vmax.f32 %v5442_v24, 0.0 }
 0x30c   : > { %v5472_v61 = vmax.f32 %v5440_v58, 0.0  ;;  %v15920_v29 = vmax.f32 %v5443_v39, 0.0  ;;  %v6454_v57 = vrot.slane %v6453_v21, 1  ;;  %v15924_v2 = vadd.f32 %v15727_v31, %v15568_v26 }
 0x30d   : > { %v6460_v42 = vmax.f32 %v6458_v23, %v6459_v15  ;;  %v6467_v18 = vmax.f32 %v6465_v43, %v6466_v11  ;;  %v6473_v4 = vrot.slane %v6472_v50, 2  ;;  %v5762_v8 = vcombine.high %v5474_v51, %v5474_v51 }
 0x30e   : > { %v5769_v54 = vrot.slane %v5474_v51, %v15653_v63  ;;  %v5728_v20 = vcombine.high %v5472_v61, %v5472_v61  ;;  %v6455_v16 = vmax.f32 %v6453_v21, %v6454_v57  ;;  %v5735_v25 = vrot.slane %v5472_v61, %v15653_v63 }
 0x30f   : > { %v6461_v48 = vrot.slane %v6460_v42, 1  ;;  %v6468_v55 = vrot.slane %v6467_v18, 1  ;;  %v6474_v13 = vmax.f32 %v6472_v50, %v6473_v4  ;;  %v5776_v62 = vrot.slane %v5762_v8, %v15653_v63  ;;  %v15940_v4 = vpop.f32.mrb[25].mxu0 }
 0x310   : > { %v5777_v53 = vcombine.high %v5769_v54, %v5769_v54  ;;  %v6589_v28 = vsel %vm6196_vm1, %v5769_v54, -inf  ;;  %v7154_v26 = vsel %vm7093_vm4, %v6455_v16, -inf  ;;  %v7734_v54 = vld [vmem:[#allocation3 + $0x1c] sm:$0x1] }
 0x311   : > { %v6462_v60 = vmax.f32 %v6460_v42, %v6461_v48  ;;  %v6469_v19 = vmax.f32 %v6467_v18, %v6468_v55  ;;  %v6590_v31 = vrot.slane %v6589_v28, 4  ;;  %v6475_v38 = vrot.slane %v6474_v13, 1 }
 0x312   : > { %v7156_v59 = vmax.f32 %v7154_v26, %v7155_v37  ;;  %v5778_v40 = vcombine.high %v5776_v62, %v5776_v62  ;;  %v6596_v45 = vsel %vm6196_vm1, %v5777_v53, -inf  ;;  %v6603_v37 = vsel %vm6196_vm1, %v5776_v62, -inf  ;;  %v7731_v26 = vld [vmem:[#allocation3 + $0x18] sm:$0xf] }
 0x313   : > { %v7157_v1 = vsel %vm7093_vm4, %v6462_v60, -inf  ;;  %v7160_v33 = vsel %vm7093_vm4, %v6469_v19, -inf  ;;  %v6591_v7 = vmax.f32 %v6589_v28, %v6590_v31  ;;  %v6597_v0 = vrot.slane %v6596_v45, 4 }
 0x314   : > { %v6476_v23 = vmax.f32 %v6474_v13, %v6475_v38  ;;  %v7159_v43 = vmax.f32 %v7157_v1, %v7158_v27  ;;  %v7162_v17 = vmax.f32 %v7160_v33, %v15896_v9  ;;  %v12257_v24 = vpack.c.bf16 %v7156_v59, %v7156_v59 }
 0x315   : > { %v6592_v58 = vrot.slane %v6591_v7, 2  ;;  %v6598_v39 = vmax.f32 %v6596_v45, %v6597_v0  ;;  %v6610_v21 = vsel %vm6196_vm1, %v5778_v40, -inf  ;;  %v6604_v18 = vrot.slane %v6603_v37, 4 }
 0x316   : > { %v7163_v15 = vsel %vm7093_vm4, %v6476_v23, -inf  ;;  %v12258_v11 = vpack.c.bf16 %v7159_v43, %v7159_v43  ;;  %v12259_v50 = vpack.c.bf16 %v7162_v17, %v7162_v17  ;;  %v7584_v51 = vunpack.c.l.b16 %v12257_v24 }
 0x317   : > { %v7165_v61 = vmax.f32 %v7163_v15, %v7164_v34  ;;  %v6593_v57 = vmax.f32 %v6591_v7, %v6592_v58  ;;  %v6599_v42 = vrot.slane %v6598_v39, 2  ;;  %v6611_v16 = vrot.slane %v6610_v21, 4 }
 0x318   : > { %v7585_v27 = vunpack.c.l.b16 %v12258_v11  ;;  %v7586_v9 = vunpack.c.l.b16 %v12259_v50  ;;  %v7649_v8 = vsel %vm7634_vm10, %v7584_v51, %v15902_v5  ;;  %v6605_v62 = vmax.f32 %v6603_v37, %v6604_v18 }
 0x319   : > { %v12303_v48 = vpack.c.bf16 %v7165_v61, %v7165_v61  ;;  %v6594_v55 = vrot.slane %v6593_v57, 1  ;;  %v6600_v13 = vmax.f32 %v6598_v39, %v6599_v42  ;;  %v6612_v28 = vmax.f32 %v6610_v21, %v6611_v16 }
 0x31a   : > { %v7650_v53 = vsel %vm7636_vm11, %v7585_v27, %v7649_v8  ;;  %v5742_v34 = vrot.slane %v5728_v20, %v15653_v63  ;;  %v5743_v60 = vcombine.high %v5735_v25, %v5735_v25  ;;  %v6606_v40 = vrot.slane %v6605_v62, 2 }
 0x31b   : > { %v7651_v19 = vsel %vm7638_vm12, %v7586_v9, %v7650_v53  ;;  %v7735_v31 = vsel %vm15763_vm13, %v12303_v48, %v7734_v54  ;;  %v6595_v38 = vmax.f32 %v6593_v57, %v6594_v55  ;;  %v6601_v5 = vrot.slane %v6600_v13, 1 }
 0x31c   : > { %v7686_v59 = vpack.c.b16 %v7651_v19, %v7651_v19  ;;  %7736 = vst [vmem:[#allocation3 + $0x1c] sm:$0x1] %v7735_v31  ;;  %v6613_v45 = vrot.slane %v6612_v28, 2  ;;  %v5744_v1 = vcombine.high %v5742_v34, %v5742_v34  ;;  %v6533_v0 = vsel %vm6196_vm1, %v5735_v25, -inf }
 0x31d   : > { %v6602_v33 = vmax.f32 %v6600_v13, %v6601_v5  ;;  %v7167_v7 = vsel %vm7093_vm4, %v6595_v38, -inf  ;;  %v6540_v20 = vsel %vm6196_vm1, %v5743_v60, -inf  ;;  %v6607_v43 = vmax.f32 %v6605_v62, %v6606_v40 }
 0x31e   : > { %v7732_v23 = vsel %vm15781_vm6, %v7686_v59, %v7731_v26  ;;  %v6614_v17 = vmax.f32 %v6612_v28, %v6613_v45  ;;  %v6534_v24 = vrot.slane %v6533_v0, 4  ;;  %v6541_v39 = vrot.slane %v6540_v20, 4 }
 0x31f   : > { %7733 = vst [vmem:[#allocation3 + $0x18] sm:$0xf] %v7732_v23  ;;  %v7170_v58 = vsel %vm7093_vm4, %v6602_v33, -inf  ;;  %v6547_v37 = vsel %vm6196_vm1, %v5742_v34, -inf  ;;  %v6554_v21 = vsel %vm6196_vm1, %v5744_v1, -inf  ;;  %v6608_v15 = vrot.slane %v6607_v43, 1 }
 0x320   : > { %v6615_v11 = vrot.slane %v6614_v17, 1  ;;  %v6535_v50 = vmax.f32 %v6533_v0, %v6534_v24  ;;  %v6548_v25 = vrot.slane %v6547_v37, 4  ;;  %v6542_v51 = vmax.f32 %v6540_v20, %v6541_v39  ;;  %v15967_v33 = vpop.f32.mrb[26].mxu0 }
 0x321   : > { %v6555_v61 = vrot.slane %v6554_v21, 4  ;;  %v5779_v57 = vcombine.high %v15920_v29, %v15920_v29  ;;  %v5786_v42 = vrot.slane %v15920_v29, %v15653_v63  ;;  %v6609_v18 = vmax.f32 %v6607_v43, %v6608_v15 }
 0x322   : > { %v6616_v27 = vmax.f32 %v6614_v17, %v6615_v11  ;;  %v6536_v9 = vrot.slane %v6535_v50, 2  ;;  %v6549_v8 = vmax.f32 %v6547_v37, %v6548_v25  ;;  %v6543_v54 = vrot.slane %v6542_v51, 2 }
 0x323   : > { %v6556_v16 = vmax.f32 %v6554_v21, %v6555_v61  ;;  %v5793_v48 = vrot.slane %v5779_v57, %v15653_v63  ;;  %v5794_v55 = vcombine.high %v5786_v42, %v5786_v42  ;;  %v7173_v13 = vsel %vm7093_vm4, %v6609_v18, -inf }
 0x324   : > { %v7176_v62 = vsel %vm7093_vm4, %v6616_v27, -inf  ;;  %v6537_v53 = vmax.f32 %v6535_v50, %v6536_v9  ;;  %v6550_v28 = vrot.slane %v6549_v8, 2  ;;  %v6544_v34 = vmax.f32 %v6542_v51, %v6543_v54 }
 0x325   : > { %v6557_v60 = vrot.slane %v6556_v16, 2  ;;  %v5795_v19 = vcombine.high %v5793_v48, %v5793_v48  ;;  %v6617_v29 = vsel %vm6196_vm1, %v5786_v42, -inf  ;;  %v6624_v5 = vsel %vm6196_vm1, %v5794_v55, -inf }
 0x326   : > { %v6538_v26 = vrot.slane %v6537_v53, 1  ;;  %v6551_v31 = vmax.f32 %v6549_v8, %v6550_v28  ;;  %v6618_v38 = vrot.slane %v6617_v29, 4  ;;  %v6545_v59 = vrot.slane %v6544_v34, 1 }
 0x327   : > { %v6558_v40 = vmax.f32 %v6556_v16, %v6557_v60  ;;  %v6625_v45 = vrot.slane %v6624_v5, 4  ;;  %v6631_v1 = vsel %vm6196_vm1, %v5793_v48, -inf  ;;  %v6638_v37 = vsel %vm6196_vm1, %v5795_v19, -inf }
 0x328   : > { %v6539_v0 = vmax.f32 %v6537_v53, %v6538_v26  ;;  %v6552_v20 = vrot.slane %v6551_v31, 1  ;;  %v6619_v23 = vmax.f32 %v6617_v29, %v6618_v38  ;;  %v6632_v43 = vrot.slane %v6631_v1, 4  ;;  %v15974_v26 = vpop.f32.mrb[27].mxu0 }
 0x329   : > { %v6546_v17 = vmax.f32 %v6544_v34, %v6545_v59  ;;  %v6559_v24 = vrot.slane %v6558_v40, 1  ;;  %v6626_v39 = vmax.f32 %v6624_v5, %v6625_v45  ;;  %v6639_v29 = vrot.slane %v6638_v37, 4 }
 0x32a   : > { %v6553_v21 = vmax.f32 %v6551_v31, %v6552_v20  ;;  %v7166_v15 = vsel %vm7093_vm4, %v6539_v0, -inf  ;;  %v6620_v11 = vrot.slane %v6619_v23, 2  ;;  %v6633_v50 = vmax.f32 %v6631_v1, %v6632_v43 }
 0x32b   : > { %v6560_v25 = vmax.f32 %v6558_v40, %v6559_v24  ;;  %v7168_v51 = vmax.f32 %v7166_v15, %v7167_v7  ;;  %v7169_v61 = vsel %vm7093_vm4, %v6546_v17, -inf  ;;  %v6627_v57 = vrot.slane %v6626_v39, 2 }
 0x32c   : > { %v7171_v42 = vmax.f32 %v7169_v61, %v7170_v58  ;;  %v7172_v18 = vsel %vm7093_vm4, %v6553_v21, -inf  ;;  %v6621_v27 = vmax.f32 %v6619_v23, %v6620_v11  ;;  %v6634_v9 = vrot.slane %v6633_v50, 2 }
 0x32d   : > { %v7174_v8 = vmax.f32 %v7172_v18, %v7173_v13  ;;  %v7175_v54 = vsel %vm7093_vm4, %v6560_v25, -inf  ;;  %v12261_v16 = vpack.c.bf16 %v7168_v51, %v7168_v51  ;;  %v6628_v48 = vmax.f32 %v6626_v39, %v6627_v57 }
 0x32e   : > { %v7177_v55 = vmax.f32 %v7175_v54, %v7176_v62  ;;  %v12262_v53 = vpack.c.bf16 %v7171_v42, %v7171_v42  ;;  %v6622_v28 = vrot.slane %v6621_v27, 1  ;;  %v6635_v34 = vmax.f32 %v6633_v50, %v6634_v9 }
 0x32f   : > { %v12263_v60 = vpack.c.bf16 %v7174_v8, %v7174_v8  ;;  %v7588_v19 = vunpack.c.l.b16 %v12261_v16  ;;  %v6629_v7 = vrot.slane %v6628_v48, 1  ;;  %v6640_v40 = vmax.f32 %v6638_v37, %v6639_v29 }
 0x330   : > { %v12264_v58 = vpack.c.bf16 %v7177_v55, %v7177_v55  ;;  %v7589_v31 = vunpack.c.l.b16 %v12262_v53  ;;  %v6623_v38 = vmax.f32 %v6621_v27, %v6622_v28  ;;  %v6636_v5 = vrot.slane %v6635_v34, 1 }
 0x331   : > { %v7590_v59 = vunpack.c.l.b16 %v12263_v60  ;;  %v6630_v13 = vmax.f32 %v6628_v48, %v6629_v7  ;;  %v5441_v45 = vadd.f32 %v15914_v10, %v15924_v2  ;;  %v6641_v43 = vrot.slane %v6640_v40, 2 }
 0x332   : > { %v7591_v62 = vunpack.c.l.b16 %v12264_v58  ;;  %v7652_v1 = vsel %vm7628_vm5, %v7589_v31, %v7588_v19  ;;  %v6637_v0 = vmax.f32 %v6635_v34, %v6636_v5  ;;  %v15980_v20 = vsel %vm7093_vm4, %v6623_v38, -inf }
 0x333   : > { %v7653_v23 = vsel %vm7630_vm7, %v7590_v59, %v7652_v1  ;;  %v15984_v17 = vsel %vm7093_vm4, %v6630_v13, -inf  ;;  %v5473_v24 = vmax.f32 %v5441_v45, 0.0  ;;  %v13028_v2 = vadd.f32 %v15759_v3, %v15610_v22 }
 0x334   : > { %v15987_v39 = vsel %vm7093_vm4, %v6637_v0, -inf  ;;  %v15990_v37 = vsel %vm7632_vm8, %v7591_v62, %v7653_v23  ;;  %v13029_v21 = vadd.f32 %v15775_v41, %v15612_v14  ;;  %v6642_v15 = vmax.f32 %v6640_v40, %v6641_v43 }
 0x335   : > { %v5745_v11 = vcombine.high %v5473_v24, %v5473_v24  ;;  %v5752_v50 = vrot.slane %v5473_v24, %v15653_v63  ;;  %v13030_v25 = vadd.f32 %v15800_v49, %v15614_v35  ;;  %v5446_v51 = vadd.f32 %v15914_v10, %v13028_v2 }
 0x336   : > { %v5444_v61 = vadd.f32 %v15914_v10, %v13029_v21  ;;  %v16003_v57 = vadd.f32 %v15813_v32, %v15616_v6  ;;  %v16007_v22 = vadd.f32 %v15845_v52, %v15618_v44  ;;  %v6643_v14 = vrot.slane %v6642_v15, 1 }
 0x337   : > { %v5759_v3 = vrot.slane %v5745_v11, %v15653_v63  ;;  %v5760_v41 = vcombine.high %v5752_v50, %v5752_v50  ;;  %v6561_v42 = vsel %vm6196_vm1, %v5752_v50, -inf  ;;  %v5478_v35 = vmax.f32 %v5446_v51, 0.0 }
 0x338   : > { %v6562_v18 = vrot.slane %v6561_v42, 4  ;;  %v16011_v49 = vmax.f32 %v5444_v61, 0.0  ;;  %v16014_v27 = vadd.f32 %v15914_v10, %v13030_v25  ;;  %v6644_v9 = vmax.f32 %v6642_v15, %v6643_v14 }
 0x339   : > { %v5761_v6 = vcombine.high %v5759_v3, %v5759_v3  ;;  %v6568_v32 = vsel %vm6196_vm1, %v5760_v41, -inf  ;;  %v6575_v44 = vsel %vm6196_vm1, %v5759_v3, -inf  ;;  %v5830_v16 = vcombine.high %v5478_v35, %v5478_v35 }
 0x33a   : > { %v6563_v52 = vmax.f32 %v6561_v42, %v6562_v18  ;;  %v6569_v8 = vrot.slane %v6568_v32, 4  ;;  %v6576_v54 = vrot.slane %v6575_v44, 4  ;;  %v7188_v48 = vsel %vm7093_vm4, %v6644_v9, -inf }
 0x33b   : > { %v6582_v55 = vsel %vm6196_vm1, %v5761_v6, -inf  ;;  %v5837_v53 = vrot.slane %v5478_v35, %v15653_v63  ;;  %v5796_v28 = vcombine.high %v16011_v49, %v16011_v49  ;;  %v5844_v29 = vrot.slane %v5830_v16, %v15653_v63 }
 0x33c   : > { %v6564_v34 = vrot.slane %v6563_v52, 2  ;;  %v6570_v60 = vmax.f32 %v6568_v32, %v6569_v8  ;;  %v6577_v19 = vmax.f32 %v6575_v44, %v6576_v54  ;;  %v6583_v7 = vrot.slane %v6582_v55, 4 }
 0x33d   : > { %v5845_v58 = vcombine.high %v5837_v53, %v5837_v53  ;;  %v6701_v31 = vsel %vm6196_vm1, %v5837_v53, -inf  ;;  %v16027_v38 = vrot.slane %v16011_v49, %v15653_v63  ;;  %v5846_v45 = vcombine.high %v5844_v29, %v5844_v29 }
 0x33e   : > { %v6565_v5 = vmax.f32 %v6563_v52, %v6564_v34  ;;  %v6571_v59 = vrot.slane %v6570_v60, 2  ;;  %v6578_v13 = vrot.slane %v6577_v19, 2  ;;  %v6584_v40 = vmax.f32 %v6582_v55, %v6583_v7 }
 0x33f   : > { %v6702_v62 = vrot.slane %v6701_v31, 4  ;;  %v6708_v1 = vsel %vm6196_vm1, %v5845_v58, -inf  ;;  %v6715_v0 = vsel %vm6196_vm1, %v5844_v29, -inf  ;;  %v6722_v50 = vsel %vm6196_vm1, %v5846_v45, -inf }
 0x340   : > { %v6566_v23 = vrot.slane %v6565_v5, 1  ;;  %v6572_v43 = vmax.f32 %v6570_v60, %v6571_v59  ;;  %v6579_v24 = vmax.f32 %v6577_v19, %v6578_v13  ;;  %v6585_v2 = vrot.slane %v6584_v40, 2 }
 0x341   : > { %v6703_v21 = vmax.f32 %v6701_v31, %v6702_v62  ;;  %v6709_v15 = vrot.slane %v6708_v1, 4  ;;  %v6716_v11 = vrot.slane %v6715_v0, 4  ;;  %v6723_v18 = vrot.slane %v6722_v50, 4  ;;  %v7740_v62 = vld [vmem:[#allocation3 + $0x24] sm:$0x1] }
 0x342   : > { %v6567_v25 = vmax.f32 %v6565_v5, %v6566_v23  ;;  %v6573_v51 = vrot.slane %v6572_v43, 1  ;;  %v6580_v61 = vrot.slane %v6579_v24, 1  ;;  %v6586_v14 = vmax.f32 %v6584_v40, %v6585_v2 }
 0x343   : > { %v6704_v3 = vrot.slane %v6703_v21, 2  ;;  %v6710_v41 = vmax.f32 %v6708_v1, %v6709_v15  ;;  %v6717_v42 = vmax.f32 %v6715_v0, %v6716_v11  ;;  %v6724_v34 = vmax.f32 %v6722_v50, %v6723_v18 }
 0x344   : > { %v6574_v35 = vmax.f32 %v6572_v43, %v6573_v51  ;;  %v6581_v9 = vmax.f32 %v6579_v24, %v6580_v61  ;;  %v6587_v6 = vrot.slane %v6586_v14, 1  ;;  %v7178_v32 = vsel %vm7093_vm4, %v6567_v25, -inf }
 0x345   : > { %v7180_v44 = vmax.f32 %v7178_v32, %v15980_v20  ;;  %v6705_v52 = vmax.f32 %v6703_v21, %v6704_v3  ;;  %v6711_v8 = vrot.slane %v6710_v41, 2  ;;  %v6718_v54 = vrot.slane %v6717_v42, 2 }
 0x346   : > { %v6588_v16 = vmax.f32 %v6586_v14, %v6587_v6  ;;  %v7181_v55 = vsel %vm7093_vm4, %v6574_v35, -inf  ;;  %v7184_v53 = vsel %vm7093_vm4, %v6581_v9, -inf  ;;  %v6725_v20 = vrot.slane %v6724_v34, 2  ;;  %v7737_v14 = vld [vmem:[#allocation3 + $0x20] sm:$0xf] }
 0x347   : > { %v7183_v60 = vmax.f32 %v7181_v55, %v15984_v17  ;;  %v7186_v19 = vmax.f32 %v7184_v53, %v15987_v39  ;;  %v12265_v7 = vpack.c.bf16 %v7180_v44, %v7180_v44  ;;  %v6706_v29 = vrot.slane %v6705_v52, 1 }
 0x348   : > { %v7187_v58 = vsel %vm7093_vm4, %v6588_v16, -inf  ;;  %v6712_v31 = vmax.f32 %v6710_v41, %v6711_v8  ;;  %v6719_v5 = vmax.f32 %v6717_v42, %v6718_v54  ;;  %v6726_v43 = vmax.f32 %v6724_v34, %v6725_v20 }
 0x349   : > { %v7189_v59 = vmax.f32 %v7187_v58, %v7188_v48  ;;  %v12266_v13 = vpack.c.bf16 %v7183_v60, %v7183_v60  ;;  %v12267_v40 = vpack.c.bf16 %v7186_v19, %v7186_v19  ;;  %v7592_v45 = vunpack.c.l.b16 %v12265_v7 }
 0x34a   : > { %v6707_v1 = vmax.f32 %v6705_v52, %v6706_v29  ;;  %v6713_v0 = vrot.slane %v6712_v31, 1  ;;  %v6720_v23 = vrot.slane %v6719_v5, 1  ;;  %v6727_v11 = vrot.slane %v6726_v43, 1  ;;  %v16065_v52 = vpop.f32.mrb[28].mxu0 }
 0x34b   : > { %v7593_v24 = vunpack.c.l.b16 %v12266_v13  ;;  %v7594_v17 = vunpack.c.l.b16 %v12267_v40  ;;  %v7655_v39 = vsel %vm7634_vm10, %v7592_v45, %v15990_v37  ;;  %v12304_v2 = vpack.c.bf16 %v7189_v59, %v7189_v59 }
 0x34c   : > { %v6714_v21 = vmax.f32 %v6712_v31, %v6713_v0  ;;  %v6721_v15 = vmax.f32 %v6719_v5, %v6720_v23  ;;  %v16042_v50 = vsel %vm7093_vm4, %v6707_v1, -inf  ;;  %v5810_v51 = vrot.slane %v5796_v28, %v15653_v63 }
 0x34d   : > { %v7656_v48 = vsel %vm7636_vm11, %v7593_v24, %v7655_v39  ;;  %v7741_v25 = vsel %vm15763_vm13, %v12304_v2, %v7740_v62  ;;  %v5811_v37 = vcombine.high %v16027_v38, %v16027_v38  ;;  %v6728_v3 = vmax.f32 %v6726_v43, %v6727_v11 }
 0x34e   : > { %v7657_v61 = vsel %vm7638_vm12, %v7594_v17, %v7656_v48  ;;  %7742 = vst [vmem:[#allocation3 + $0x24] sm:$0x1] %v7741_v25  ;;  %v7194_v41 = vsel %vm7093_vm4, %v6714_v21, -inf  ;;  %v16056_v42 = vsel %vm7093_vm4, %v6721_v15, -inf  ;;  %v5812_v35 = vcombine.high %v5810_v51, %v5810_v51 }
 0x34f   : > { %v7688_v18 = vpack.c.b16 %v7657_v61, %v7657_v61  ;;  %v6645_v9 = vsel %vm6196_vm1, %v16027_v38, -inf  ;;  %v6652_v49 = vsel %vm6196_vm1, %v5811_v37, -inf  ;;  %v16062_v28 = vsel %vm7093_vm4, %v6728_v3, -inf  ;;  %v16071_v38 = vpop.f32.mrb[29].mxu0 }
 0x350   : > { %v6646_v6 = vrot.slane %v6645_v9, 4  ;;  %v6653_v32 = vrot.slane %v6652_v49, 4  ;;  %v6659_v44 = vsel %vm6196_vm1, %v5810_v51, -inf  ;;  %v6666_v16 = vsel %vm6196_vm1, %v5812_v35, -inf }
 0x351   : > { %v7738_v8 = vsel %vm15781_vm6, %v7688_v18, %v7737_v14  ;;  %v6660_v54 = vrot.slane %v6659_v44, 4  ;;  %v5479_v55 = vmax.f32 %v16014_v27, 0.0  ;;  %v6667_v60 = vrot.slane %v6666_v16, 4 }
 0x352   : > { %7739 = vst [vmem:[#allocation3 + $0x20] sm:$0xf] %v7738_v8  ;;  %v6647_v53 = vmax.f32 %v6645_v9, %v6646_v6  ;;  %v6654_v34 = vmax.f32 %v6652_v49, %v6653_v32  ;;  %v5445_v19 = vadd.f32 %v15914_v10, %v16003_v57  ;;  %v16078_v31 = vadd.f32 %v15914_v10, %v16007_v22 }
 0x353   : > { %v6661_v7 = vmax.f32 %v6659_v44, %v6660_v54  ;;  %v5847_v29 = vcombine.high %v5479_v55, %v5479_v55  ;;  %v5854_v58 = vrot.slane %v5479_v55, %v15653_v63  ;;  %v6668_v27 = vmax.f32 %v6666_v16, %v6667_v60 }
 0x354   : > { %v6648_v5 = vrot.slane %v6647_v53, 2  ;;  %v6655_v20 = vrot.slane %v6654_v34, 2  ;;  %v16080_v59 = vmax.f32 %v5445_v19, 0.0 }
 0x355   : > { %v6662_v13 = vrot.slane %v6661_v7, 2  ;;  %v5861_v40 = vrot.slane %v5847_v29, %v15653_v63  ;;  %v5862_v45 = vcombine.high %v5854_v58, %v5854_v58  ;;  %v6729_v62 = vsel %vm6196_vm1, %v5854_v58, -inf  ;;  %v7826_v56 = vld [vmem:[#allocation3 + $0x24] sm:$0x1] }
 0x356   : > { %v6649_v57 = vmax.f32 %v6647_v53, %v6648_v5  ;;  %v6656_v1 = vmax.f32 %v6654_v34, %v6655_v20  ;;  %v6669_v0 = vrot.slane %v6668_v27, 2  ;;  %v6730_v23 = vrot.slane %v6729_v62, 4 }
 0x357   : > { %v6663_v43 = vmax.f32 %v6661_v7, %v6662_v13  ;;  %v5863_v24 = vcombine.high %v5861_v40, %v5861_v40  ;;  %v6736_v22 = vsel %vm6196_vm1, %v5862_v45, -inf  ;;  %v6743_v17 = vsel %vm6196_vm1, %v5861_v40, -inf }
 0x358   : > { %v6650_v39 = vrot.slane %v6649_v57, 1  ;;  %v6657_v2 = vrot.slane %v6656_v1, 1  ;;  %v6670_v21 = vmax.f32 %v6668_v27, %v6669_v0  ;;  %v6731_v15 = vmax.f32 %v6729_v62, %v6730_v23 }
 0x359   : > { %v6664_v11 = vrot.slane %v6663_v43, 1  ;;  %v6737_v48 = vrot.slane %v6736_v22, 4  ;;  %v6744_v25 = vrot.slane %v6743_v17, 4  ;;  %v6750_v51 = vsel %vm6196_vm1, %v5863_v24, -inf }
 0x35a   : > { %v6651_v37 = vmax.f32 %v6649_v57, %v6650_v39  ;;  %v6658_v61 = vmax.f32 %v6656_v1, %v6657_v2  ;;  %v6671_v14 = vrot.slane %v6670_v21, 1  ;;  %v6732_v3 = vrot.slane %v6731_v15, 2 }
 0x35b   : > { %v6665_v18 = vmax.f32 %v6663_v43, %v6664_v11  ;;  %v6738_v35 = vmax.f32 %v6736_v22, %v6737_v48  ;;  %v6745_v9 = vmax.f32 %v6743_v17, %v6744_v25  ;;  %v6751_v49 = vrot.slane %v6750_v51, 4 }
 0x35c   : > { %v6672_v6 = vmax.f32 %v6670_v21, %v6671_v14  ;;  %v7190_v32 = vsel %vm7093_vm4, %v6651_v37, -inf  ;;  %v7193_v44 = vsel %vm7093_vm4, %v6658_v61, -inf  ;;  %v6733_v8 = vmax.f32 %v6731_v15, %v6732_v3 }
 0x35d   : > { %v7192_v54 = vmax.f32 %v7190_v32, %v16042_v50  ;;  %v7195_v16 = vmax.f32 %v7193_v44, %v7194_v41  ;;  %v7196_v55 = vsel %vm7093_vm4, %v6665_v18, -inf  ;;  %v6739_v53 = vrot.slane %v6738_v35, 2 }
 0x35e   : > { %v7198_v34 = vmax.f32 %v7196_v55, %v16056_v42  ;;  %v7199_v60 = vsel %vm7093_vm4, %v6672_v6, -inf  ;;  %v6734_v19 = vrot.slane %v6733_v8, 1  ;;  %v6746_v7 = vrot.slane %v6745_v9, 2 }
 0x35f   : > { %v7201_v29 = vmax.f32 %v7199_v60, %v16062_v28  ;;  %v12269_v58 = vpack.c.bf16 %v7192_v54, %v7192_v54  ;;  %v12270_v5 = vpack.c.bf16 %v7195_v16, %v7195_v16  ;;  %v6740_v20 = vmax.f32 %v6738_v35, %v6739_v53 }
 0x360   : > { %v12271_v27 = vpack.c.bf16 %v7198_v34, %v7198_v34  ;;  %v6735_v13 = vmax.f32 %v6733_v8, %v6734_v19  ;;  %v6747_v40 = vmax.f32 %v6745_v9, %v6746_v7  ;;  %v6752_v45 = vmax.f32 %v6750_v51, %v6751_v49 }
 0x361   : > { %v12272_v50 = vpack.c.bf16 %v7201_v29, %v7201_v29  ;;  %v7596_v41 = vunpack.c.l.b16 %v12269_v58  ;;  %v7597_v62 = vunpack.c.l.b16 %v12270_v5  ;;  %v6741_v57 = vrot.slane %v6740_v20, 1  ;;  %v16120_v58 = vpop.f32.mrb[30].mxu0 }
 0x362   : > { %v7598_v1 = vunpack.c.l.b16 %v12271_v27  ;;  %v6748_v0 = vrot.slane %v6747_v40, 1  ;;  %v6753_v42 = vrot.slane %v6752_v45, 2  ;;  %v16095_v23 = vsel %vm7093_vm4, %v6735_v13, -inf }
 0x363   : > { %v7599_v43 = vunpack.c.l.b16 %v12272_v50  ;;  %v7658_v28 = vsel %vm7628_vm5, %v7597_v62, %v7596_v41  ;;  %v6742_v24 = vmax.f32 %v6740_v20, %v6741_v57  ;;  %v5813_v22 = vcombine.high %v16080_v59, %v16080_v59 }
 0x364   : > { %v7659_v17 = vsel %vm7630_vm7, %v7598_v1, %v7658_v28  ;;  %v6749_v39 = vmax.f32 %v6747_v40, %v6748_v0  ;;  %v6754_v2 = vmax.f32 %v6752_v45, %v6753_v42  ;;  %v5820_v21 = vrot.slane %v16080_v59, %v15653_v63  ;;  %v16123_v40 = vpop.f32.mrb[31].mxu0 }
 0x365   : > { %v16104_v15 = vsel %vm7093_vm4, %v6742_v24, -inf  ;;  %v5827_v11 = vrot.slane %v5813_v22, %v15653_v63  ;;  %v16108_v48 = vsel %vm7632_vm8, %v7599_v43, %v7659_v17  ;;  %v5482_v25 = vmax.f32 %v16078_v31, 0.0 }
 0x366   : > { %v6755_v51 = vrot.slane %v6754_v2, 1  ;;  %v7209_v37 = vsel %vm7093_vm4, %v6749_v39, -inf  ;;  %v5828_v61 = vcombine.high %v5820_v21, %v5820_v21  ;;  %v6673_v14 = vsel %vm6196_vm1, %v5820_v21, -inf }
 0x367   : > { %v5829_v3 = vcombine.high %v5827_v11, %v5827_v11  ;;  %v6674_v18 = vrot.slane %v6673_v14, 4  ;;  %v6687_v59 = vsel %vm6196_vm1, %v5827_v11, -inf  ;;  %v5898_v35 = vcombine.high %v5482_v25, %v5482_v25 }
 0x368   : > { %v6756_v9 = vmax.f32 %v6754_v2, %v6755_v51  ;;  %v6680_v49 = vsel %vm6196_vm1, %v5828_v61, -inf  ;;  %v6688_v6 = vrot.slane %v6687_v59, 4  ;;  %v5905_v32 = vrot.slane %v5482_v25, %v15653_v63 }
 0x369   : > { %v6675_v44 = vmax.f32 %v6673_v14, %v6674_v18  ;;  %v6681_v8 = vrot.slane %v6680_v49, 4  ;;  %v6694_v31 = vsel %vm6196_vm1, %v5829_v3, -inf  ;;  %v5912_v54 = vrot.slane %v5898_v35, %v15653_v63 }
 0x36a   : > { %v7212_v16 = vsel %vm7093_vm4, %v6756_v9, -inf  ;;  %v6689_v55 = vmax.f32 %v6687_v59, %v6688_v6  ;;  %v6695_v53 = vrot.slane %v6694_v31, 4  ;;  %v5913_v34 = vcombine.high %v5905_v32, %v5905_v32 }
 0x36b   : > { %v6676_v60 = vrot.slane %v6675_v44, 2  ;;  %v6682_v19 = vmax.f32 %v6680_v49, %v6681_v8  ;;  %v5914_v7 = vcombine.high %v5912_v54, %v5912_v54  ;;  %v6813_v29 = vsel %vm6196_vm1, %v5905_v32, -inf }
 0x36c   : > { %v6690_v5 = vrot.slane %v6689_v55, 2  ;;  %v6696_v20 = vmax.f32 %v6694_v31, %v6695_v53  ;;  %v6814_v27 = vrot.slane %v6813_v29, 4  ;;  %v6820_v13 = vsel %vm6196_vm1, %v5913_v34, -inf }
 0x36d   : > { %v6677_v45 = vmax.f32 %v6675_v44, %v6676_v60  ;;  %v6683_v50 = vrot.slane %v6682_v19, 2  ;;  %v6821_v41 = vrot.slane %v6820_v13, 4  ;;  %v6827_v62 = vsel %vm6196_vm1, %v5912_v54, -inf }
 0x36e   : > { %v6691_v57 = vmax.f32 %v6689_v55, %v6690_v5  ;;  %v6697_v1 = vrot.slane %v6696_v20, 2  ;;  %v6815_v0 = vmax.f32 %v6813_v29, %v6814_v27  ;;  %v6828_v42 = vrot.slane %v6827_v62, 4 }
 0x36f   : > { %v6678_v43 = vrot.slane %v6677_v45, 1  ;;  %v6684_v28 = vmax.f32 %v6682_v19, %v6683_v50  ;;  %v6822_v24 = vmax.f32 %v6820_v13, %v6821_v41  ;;  %v6834_v22 = vsel %vm6196_vm1, %v5914_v7, -inf  ;;  %v7746_v50 = vld [vmem:[#allocation3 + $0x2c] sm:$0x1] }
 0x370   : > { %v6692_v17 = vrot.slane %v6691_v57, 1  ;;  %v6698_v39 = vmax.f32 %v6696_v20, %v6697_v1  ;;  %v6816_v2 = vrot.slane %v6815_v0, 2  ;;  %v6829_v21 = vmax.f32 %v6827_v62, %v6828_v42 }
 0x371   : > { %v6679_v11 = vmax.f32 %v6677_v45, %v6678_v43  ;;  %v6685_v25 = vrot.slane %v6684_v28, 1  ;;  %v6823_v51 = vrot.slane %v6822_v24, 2  ;;  %v6835_v61 = vrot.slane %v6834_v22, 4  ;;  %v17592_v43 = vld [vmem:[#allocation12_spill] sm:$0xff] }
 0x372   : > { %v6693_v14 = vmax.f32 %v6691_v57, %v6692_v17  ;;  %v6699_v3 = vrot.slane %v6698_v39, 1  ;;  %v6817_v18 = vmax.f32 %v6815_v0, %v6816_v2  ;;  %v6830_v59 = vrot.slane %v6829_v21, 2 }
 0x373   : > { %v6686_v35 = vmax.f32 %v6684_v28, %v6685_v25  ;;  %v7202_v9 = vsel %vm7093_vm4, %v6679_v11, -inf  ;;  %v6824_v49 = vmax.f32 %v6822_v24, %v6823_v51  ;;  %v6836_v6 = vmax.f32 %v6834_v22, %v6835_v61  ;;  %v17593_v22 = vld [vmem:[#allocation13_spill] sm:$0xff]  ;;  %v17595_v25 = vld [vmem:[#allocation14_spill] sm:$0xff]  ;;  %v7743_v61 = vld [vmem:[#allocation3 + $0x28] sm:$0xf] }
 0x374   : > { %v6700_v32 = vmax.f32 %v6698_v39, %v6699_v3  ;;  %v7204_v44 = vmax.f32 %v7202_v9, %v16095_v23  ;;  %v7208_v8 = vsel %vm7093_vm4, %v6693_v14, -inf  ;;  %v6818_v31 = vrot.slane %v6817_v18, 1  ;;  %v17594_v39 = vld [vmem:[#allocation11_spill] sm:$0xff] }
 0x375   : > { %v7205_v54 = vsel %vm7093_vm4, %v6686_v35, -inf  ;;  %v7210_v55 = vmax.f32 %v7208_v8, %v7209_v37  ;;  %v6825_v53 = vrot.slane %v6824_v49, 1  ;;  %v6831_v34 = vmax.f32 %v6829_v21, %v6830_v59 }
 0x376   : > { %v7207_v60 = vmax.f32 %v7205_v54, %v16104_v15  ;;  %v7211_v19 = vsel %vm7093_vm4, %v6700_v32, -inf  ;;  %v12273_v7 = vpack.c.bf16 %v7204_v44, %v7204_v44  ;;  %v6819_v29 = vmax.f32 %v6817_v18, %v6818_v31  ;;  %v17597_v32 = vld [vmem:[#allocation16_spill] sm:$0xff] }
 0x377   : > { %v7213_v5 = vmax.f32 %v7211_v19, %v7212_v16  ;;  %v12275_v20 = vpack.c.bf16 %v7210_v55, %v7210_v55  ;;  %v6826_v27 = vmax.f32 %v6824_v49, %v6825_v53  ;;  %v6832_v13 = vrot.slane %v6831_v34, 1 }
 0x378   : > { %v12274_v45 = vpack.c.bf16 %v7207_v60, %v7207_v60  ;;  %v7600_v23 = vunpack.c.l.b16 %v12273_v7  ;;  %v6837_v41 = vrot.slane %v6836_v6, 2  ;;  %v16134_v37 = vsel %vm7093_vm4, %v6819_v29, -inf }
 0x379   : > { %v7602_v62 = vunpack.c.l.b16 %v12275_v20  ;;  %v12305_v57 = vpack.c.bf16 %v7213_v5, %v7213_v5  ;;  %v6833_v1 = vmax.f32 %v6831_v34, %v6832_v13  ;;  %v13033_v16 = vadd.f32 %v15854_v30, %v17592_v43 }
 0x37a   : > { %v7601_v0 = vunpack.c.l.b16 %v12274_v45  ;;  %v7661_v15 = vsel %vm7634_vm10, %v7600_v23, %v16108_v48  ;;  %v6838_v42 = vmax.f32 %v6836_v6, %v6837_v41  ;;  %v16143_v24 = vsel %vm7093_vm4, %v6826_v27, -inf }
 0x37b   : > { %v7747_v28 = vsel %vm15763_vm13, %v12305_v57, %v7746_v50  ;;  %v13034_v17 = vadd.f32 %v15882_v12, %v17593_v22  ;;  %v13035_v2 = vadd.f32 %v15887_v36, %v17594_v39  ;;  %v5448_v11 = vadd.f32 %v15914_v10, %v13033_v16  ;;  %v17596_v12 = vld [vmem:[#allocation15_spill] sm:$0xff] }
 0x37c   : > { %v7662_v21 = vsel %vm7636_vm11, %v7601_v0, %v7661_v15  ;;  %7748 = vst [vmem:[#allocation3 + $0x2c] sm:$0x1] %v7747_v28  ;;  %v6839_v48 = vrot.slane %v6838_v42, 1  ;;  %v13036_v30 = vadd.f32 %v15934_v46, %v17595_v25  ;;  %v13037_v18 = vadd.f32 %v15940_v4, %v17596_v12 }
 0x37d   : > { %v7663_v51 = vsel %vm7638_vm12, %v7602_v62, %v7662_v21  ;;  %v5451_v14 = vadd.f32 %v15914_v10, %v13034_v17  ;;  %v5449_v3 = vadd.f32 %v15914_v10, %v13035_v2  ;;  %v16159_v35 = vsel %vm7093_vm4, %v6833_v1, -inf }
 0x37e   : > { %v7690_v36 = vpack.c.b16 %v7663_v51, %v7663_v51  ;;  %v6840_v59 = vmax.f32 %v6838_v42, %v6839_v48  ;;  %v5480_v9 = vmax.f32 %v5448_v11, 0.0  ;;  %v16164_v46 = vadd.f32 %v15914_v10, %v13036_v30 }
 0x37f   : > { %v5483_v49 = vmax.f32 %v5451_v14, 0.0  ;;  %v16161_v6 = vmax.f32 %v5449_v3, 0.0  ;;  %v16168_v44 = vadd.f32 %v15967_v33, %v17597_v32  ;;  %v16174_v54 = vadd.f32 %v15914_v10, %v13037_v18 }
 0x380   : > { %v7744_v8 = vsel %vm15781_vm6, %v7690_v36, %v7743_v61  ;;  %v5864_v4 = vcombine.high %v5480_v9, %v5480_v9  ;;  %v5871_v31 = vrot.slane %v5480_v9, %v15653_v63  ;;  %v16177_v55 = vsel %vm7093_vm4, %v6840_v59, -inf }
 0x381   : > { %7745 = vst [vmem:[#allocation3 + $0x28] sm:$0xf] %v7744_v8  ;;  %v5915_v53 = vcombine.high %v5483_v49, %v5483_v49  ;;  %v5922_v34 = vrot.slane %v5483_v49, %v15653_v63  ;;  %v5881_v33 = vcombine.high %v16161_v6, %v16161_v6  ;;  %v16186_v29 = vrot.slane %v16161_v6, %v15653_v63 }
 0x382   : > { %v5878_v60 = vrot.slane %v5864_v4, %v15653_v63  ;;  %v5879_v19 = vcombine.high %v5871_v31, %v5871_v31  ;;  %v6757_v7 = vsel %vm6196_vm1, %v5871_v31, -inf }
 0x383   : > { %v6758_v10 = vrot.slane %v6757_v7, 4  ;;  %v5929_v5 = vrot.slane %v5915_v53, %v15653_v63  ;;  %v5930_v20 = vcombine.high %v5922_v34, %v5922_v34  ;;  %v6841_v27 = vsel %vm6196_vm1, %v5922_v34, -inf }
 0x384   : > { %v5880_v13 = vcombine.high %v5878_v60, %v5878_v60  ;;  %v6764_v45 = vsel %vm6196_vm1, %v5879_v19, -inf  ;;  %v6771_v23 = vsel %vm6196_vm1, %v5878_v60, -inf  ;;  %v6842_v50 = vrot.slane %v6841_v27, 4 }
 0x385   : > { %v6759_v41 = vmax.f32 %v6757_v7, %v6758_v10  ;;  %v6765_v62 = vrot.slane %v6764_v45, 4  ;;  %v6772_v57 = vrot.slane %v6771_v23, 4  ;;  %v5931_v1 = vcombine.high %v5929_v5, %v5929_v5 }
 0x386   : > { %v6778_v0 = vsel %vm6196_vm1, %v5880_v13, -inf  ;;  %v6843_v15 = vmax.f32 %v6841_v27, %v6842_v50  ;;  %v6848_v42 = vsel %vm6196_vm1, %v5930_v20, -inf  ;;  %v6855_v43 = vsel %vm6196_vm1, %v5929_v5, -inf }
 0x387   : > { %v6760_v16 = vrot.slane %v6759_v41, 2  ;;  %v6766_v28 = vmax.f32 %v6764_v45, %v6765_v62  ;;  %v6773_v22 = vmax.f32 %v6771_v23, %v6772_v57  ;;  %v6779_v17 = vrot.slane %v6778_v0, 4 }
 0x388   : > { %v6844_v39 = vrot.slane %v6843_v15, 2  ;;  %v6849_v2 = vrot.slane %v6848_v42, 4  ;;  %v6856_v21 = vrot.slane %v6855_v43, 4  ;;  %v6862_v48 = vsel %vm6196_vm1, %v5931_v1, -inf }
 0x389   : > { %v6761_v11 = vmax.f32 %v6759_v41, %v6760_v16  ;;  %v6767_v25 = vrot.slane %v6766_v28, 2  ;;  %v6774_v30 = vrot.slane %v6773_v22, 2  ;;  %v6780_v51 = vmax.f32 %v6778_v0, %v6779_v17 }
 0x38a   : > { %v6845_v61 = vmax.f32 %v6843_v15, %v6844_v39  ;;  %v6850_v14 = vmax.f32 %v6848_v42, %v6849_v2  ;;  %v6857_v3 = vmax.f32 %v6855_v43, %v6856_v21  ;;  %v6863_v12 = vrot.slane %v6862_v48, 4 }
 0x38b   : > { %v6762_v18 = vrot.slane %v6761_v11, 1  ;;  %v6768_v36 = vmax.f32 %v6766_v28, %v6767_v25  ;;  %v6775_v59 = vmax.f32 %v6773_v22, %v6774_v30  ;;  %v6781_v9 = vrot.slane %v6780_v51, 2 }
 0x38c   : > { %v6846_v49 = vrot.slane %v6845_v61, 1  ;;  %v6851_v32 = vrot.slane %v6850_v14, 2  ;;  %v6858_v8 = vrot.slane %v6857_v3, 2  ;;  %v6864_v4 = vmax.f32 %v6862_v48, %v6863_v12 }
 0x38d   : > { %v6763_v31 = vmax.f32 %v6761_v11, %v6762_v18  ;;  %v6769_v53 = vrot.slane %v6768_v36, 1  ;;  %v6776_v34 = vrot.slane %v6775_v59, 1  ;;  %v6782_v60 = vmax.f32 %v6780_v51, %v6781_v9 }
 0x38e   : > { %v6847_v19 = vmax.f32 %v6845_v61, %v6846_v49  ;;  %v6852_v7 = vmax.f32 %v6850_v14, %v6851_v32  ;;  %v6859_v10 = vmax.f32 %v6857_v3, %v6858_v8  ;;  %v6865_v5 = vrot.slane %v6864_v4, 2 }
 0x38f   : > { %v6770_v20 = vmax.f32 %v6768_v36, %v6769_v53  ;;  %v6777_v27 = vmax.f32 %v6775_v59, %v6776_v34  ;;  %v6783_v13 = vrot.slane %v6782_v60, 1  ;;  %v7214_v45 = vsel %vm7093_vm4, %v6763_v31, -inf }
 0x390   : > { %v7216_v23 = vmax.f32 %v7214_v45, %v16134_v37  ;;  %v6853_v50 = vrot.slane %v6852_v7, 1  ;;  %v6860_v41 = vrot.slane %v6859_v10, 1  ;;  %v6866_v62 = vmax.f32 %v6864_v4, %v6865_v5 }
 0x391   : > { %v6784_v57 = vmax.f32 %v6782_v60, %v6783_v13  ;;  %v7217_v1 = vsel %vm7093_vm4, %v6770_v20, -inf  ;;  %v7220_v0 = vsel %vm7093_vm4, %v6777_v27, -inf  ;;  %v5486_v15 = vmax.f32 %v16164_v46, 0.0 }
 0x392   : > { %v7219_v42 = vmax.f32 %v7217_v1, %v16143_v24  ;;  %v7222_v43 = vmax.f32 %v7220_v0, %v16159_v35  ;;  %v12277_v16 = vpack.c.bf16 %v7216_v23, %v7216_v23  ;;  %v6854_v28 = vmax.f32 %v6852_v7, %v6853_v50 }
 0x393   : > { %v7223_v22 = vsel %vm7093_vm4, %v6784_v57, -inf  ;;  %v6861_v17 = vmax.f32 %v6859_v10, %v6860_v41  ;;  %v6867_v37 = vrot.slane %v6866_v62, 1  ;;  %v5895_v39 = vrot.slane %v5881_v33, %v15653_v63 }
 0x394   : > { %v7225_v2 = vmax.f32 %v7223_v22, %v16177_v55  ;;  %v12278_v21 = vpack.c.bf16 %v7219_v42, %v7219_v42  ;;  %v12279_v48 = vpack.c.bf16 %v7222_v43, %v7222_v43  ;;  %v16210_v46 = vsel %vm7093_vm4, %v6847_v19, -inf }
 0x395   : > { %v7604_v24 = vunpack.c.l.b16 %v12277_v16  ;;  %v6868_v35 = vmax.f32 %v6866_v62, %v6867_v37  ;;  %v16213_v11 = vsel %vm7093_vm4, %v6854_v28, -inf  ;;  %v5896_v25 = vcombine.high %v16186_v29, %v16186_v29 }
 0x396   : > { %v12280_v30 = vpack.c.bf16 %v7225_v2, %v7225_v2  ;;  %v7605_v51 = vunpack.c.l.b16 %v12278_v21  ;;  %v7606_v61 = vunpack.c.l.b16 %v12279_v48  ;;  %v5897_v6 = vcombine.high %v5895_v39, %v5895_v39 }
 0x397   : > { %v7233_v33 = vsel %vm7093_vm4, %v6861_v17, -inf  ;;  %v6785_v55 = vsel %vm6196_vm1, %v16186_v29, -inf  ;;  %v6792_v14 = vsel %vm6196_vm1, %v5896_v25, -inf  ;;  %v6799_v3 = vsel %vm6196_vm1, %v5895_v39, -inf }
 0x398   : > { %v7607_v12 = vunpack.c.l.b16 %v12280_v30  ;;  %v7664_v18 = vsel %vm7628_vm5, %v7605_v51, %v7604_v24  ;;  %v6786_v36 = vrot.slane %v6785_v55, 4  ;;  %v6793_v59 = vrot.slane %v6792_v14, 4 }
 0x399   : > { %v7665_v9 = vsel %vm7630_vm7, %v7606_v61, %v7664_v18  ;;  %v6800_v49 = vrot.slane %v6799_v3, 4  ;;  %v6806_v32 = vsel %vm6196_vm1, %v5897_v6, -inf  ;;  %v5966_v8 = vcombine.high %v5486_v15, %v5486_v15 }
 0x39a   : > { %v6787_v4 = vmax.f32 %v6785_v55, %v6786_v36  ;;  %v6794_v31 = vmax.f32 %v6792_v14, %v6793_v59  ;;  %v6807_v53 = vrot.slane %v6806_v32, 4  ;;  %v16226_v29 = vsel %vm7632_vm8, %v7607_v12, %v7665_v9 }
 0x39b   : > { %v7236_v34 = vsel %vm7093_vm4, %v6868_v35, -inf  ;;  %v6801_v60 = vmax.f32 %v6799_v3, %v6800_v49  ;;  %v5973_v19 = vrot.slane %v5486_v15, %v15653_v63  ;;  %v5980_v7 = vrot.slane %v5966_v8, %v15653_v63 }
 0x39c   : > { %v6788_v10 = vrot.slane %v6787_v4, 2  ;;  %v6795_v5 = vrot.slane %v6794_v31, 2  ;;  %v6808_v20 = vmax.f32 %v6806_v32, %v6807_v53  ;;  %v16232_v27 = vmax.f32 %v16174_v54, 0.0 }
 0x39d   : > { %v6802_v13 = vrot.slane %v6801_v60, 2  ;;  %v5981_v45 = vcombine.high %v5973_v19, %v5973_v19  ;;  %v5982_v23 = vcombine.high %v5980_v7, %v5980_v7  ;;  %v6925_v50 = vsel %vm6196_vm1, %v5973_v19, -inf }
 0x39e   : > { %v6789_v41 = vmax.f32 %v6787_v4, %v6788_v10  ;;  %v6796_v62 = vmax.f32 %v6794_v31, %v6795_v5  ;;  %v6809_v57 = vrot.slane %v6808_v20, 2  ;;  %v6926_v1 = vrot.slane %v6925_v50, 4 }
 0x39f   : > { %v6803_v0 = vmax.f32 %v6801_v60, %v6802_v13  ;;  %v6932_v15 = vsel %vm6196_vm1, %v5981_v45, -inf  ;;  %v6939_v42 = vsel %vm6196_vm1, %v5980_v7, -inf  ;;  %v6946_v43 = vsel %vm6196_vm1, %v5982_v23, -inf  ;;  %v7752_v7 = vld [vmem:[#allocation3 + $0x34] sm:$0x1] }
 0x3a0   : > { %v6790_v16 = vrot.slane %v6789_v41, 1  ;;  %v6797_v28 = vrot.slane %v6796_v62, 1  ;;  %v6810_v54 = vmax.f32 %v6808_v20, %v6809_v57  ;;  %v6927_v22 = vmax.f32 %v6925_v50, %v6926_v1 }
 0x3a1   : > { %v6804_v17 = vrot.slane %v6803_v0, 1  ;;  %v6933_v37 = vrot.slane %v6932_v15, 4  ;;  %v6940_v39 = vrot.slane %v6939_v42, 4  ;;  %v6947_v2 = vrot.slane %v6946_v43, 4 }
 0x3a2   : > { %v6791_v21 = vmax.f32 %v6789_v41, %v6790_v16  ;;  %v6798_v48 = vmax.f32 %v6796_v62, %v6797_v28  ;;  %v6811_v24 = vrot.slane %v6810_v54, 1  ;;  %v6928_v35 = vrot.slane %v6927_v22, 2  ;;  %v7749_v28 = vld [vmem:[#allocation3 + $0x30] sm:$0xf] }
 0x3a3   : > { %v6805_v25 = vmax.f32 %v6803_v0, %v6804_v17  ;;  %v6934_v30 = vmax.f32 %v6932_v15, %v6933_v37  ;;  %v6941_v51 = vmax.f32 %v6939_v42, %v6940_v39  ;;  %v6948_v61 = vmax.f32 %v6946_v43, %v6947_v2 }
 0x3a4   : > { %v6812_v6 = vmax.f32 %v6810_v54, %v6811_v24  ;;  %v7226_v55 = vsel %vm7093_vm4, %v6791_v21, -inf  ;;  %v7229_v14 = vsel %vm7093_vm4, %v6798_v48, -inf  ;;  %v6929_v3 = vmax.f32 %v6927_v22, %v6928_v35 }
 0x3a5   : > { %v7228_v12 = vmax.f32 %v7226_v55, %v16210_v46  ;;  %v7231_v18 = vmax.f32 %v7229_v14, %v16213_v11  ;;  %v7232_v36 = vsel %vm7093_vm4, %v6805_v25, -inf  ;;  %v6935_v59 = vrot.slane %v6934_v30, 2  ;;  %v16247_v46 = vld [vmem:[%s17452_s2] ss:$0 sm:$0xff] }
 0x3a6   : > { %v7234_v9 = vmax.f32 %v7232_v36, %v7233_v33  ;;  %v7235_v49 = vsel %vm7093_vm4, %v6812_v6, -inf  ;;  %v6930_v32 = vrot.slane %v6929_v3, 1  ;;  %v6942_v8 = vrot.slane %v6941_v51, 2  ;;  %v17598_v36 = vld [vmem:[#allocation17_spill] sm:$0xff] }
 0x3a7   : > { %v7237_v4 = vmax.f32 %v7235_v49, %v7236_v34  ;;  %v12281_v31 = vpack.c.bf16 %v7228_v12, %v7228_v12  ;;  %v12282_v53 = vpack.c.bf16 %v7231_v18, %v7231_v18  ;;  %v6936_v60 = vmax.f32 %v6934_v30, %v6935_v59 }
 0x3a8   : > { %v12283_v19 = vpack.c.bf16 %v7234_v9, %v7234_v9  ;;  %v6943_v10 = vmax.f32 %v6941_v51, %v6942_v8  ;;  %v6949_v5 = vrot.slane %v6948_v61, 2  ;;  %v5455_v11 = vadd.f32 %v16247_v46, %v16168_v44 }
 0x3a9   : > { %v7608_v33 = vunpack.c.l.b16 %v12281_v31  ;;  %v12306_v20 = vpack.c.bf16 %v7237_v4, %v7237_v4  ;;  %v6931_v13 = vmax.f32 %v6929_v3, %v6930_v32  ;;  %v6937_v45 = vrot.slane %v6936_v60, 1 }
 0x3aa   : > { %v7609_v34 = vunpack.c.l.b16 %v12282_v53  ;;  %v7610_v23 = vunpack.c.l.b16 %v12283_v19  ;;  %v6944_v50 = vrot.slane %v6943_v10, 1  ;;  %v6950_v41 = vmax.f32 %v6948_v61, %v6949_v5 }
 0x3ab   : > { %v7667_v62 = vsel %vm7634_vm10, %v7608_v33, %v16226_v29  ;;  %v7753_v57 = vsel %vm15763_vm13, %v12306_v20, %v7752_v7  ;;  %v6938_v1 = vmax.f32 %v6936_v60, %v6937_v45  ;;  %v5932_v0 = vcombine.high %v16232_v27, %v16232_v27 }
 0x3ac   : > { %v7668_v44 = vsel %vm7636_vm11, %v7609_v34, %v7667_v62  ;;  %7754 = vst [vmem:[#allocation3 + $0x34] sm:$0x1] %v7753_v57  ;;  %v6945_v15 = vmax.f32 %v6943_v10, %v6944_v50  ;;  %v6951_v42 = vrot.slane %v6950_v41, 1  ;;  %v5939_v43 = vrot.slane %v16232_v27, %v15653_v63 }
 0x3ad   : > { %v7669_v16 = vsel %vm7638_vm12, %v7610_v23, %v7668_v44  ;;  %v16262_v29 = vsel %vm7093_vm4, %v6931_v13, -inf  ;;  %v5946_v54 = vrot.slane %v5932_v0, %v15653_v63  ;;  %v5487_v22 = vmax.f32 %v5455_v11, 0.0 }
 0x3ae   : > { %v7692_v17 = vpack.c.b16 %v7669_v16, %v7669_v16  ;;  %v6952_v37 = vmax.f32 %v6950_v41, %v6951_v42  ;;  %v16266_v39 = vsel %vm7093_vm4, %v6938_v1, -inf  ;;  %v5947_v2 = vcombine.high %v5939_v43, %v5939_v43 }
 0x3af   : > { %v5948_v21 = vcombine.high %v5946_v54, %v5946_v54  ;;  %v6869_v48 = vsel %vm6196_vm1, %v5939_v43, -inf  ;;  %v6883_v27 = vsel %vm6196_vm1, %v5946_v54, -inf  ;;  %v5983_v24 = vcombine.high %v5487_v22, %v5487_v22 }
 0x3b0   : > { %v7750_v35 = vsel %vm15781_vm6, %v7692_v17, %v7749_v28  ;;  %v7245_v25 = vsel %vm7093_vm4, %v6945_v15, -inf  ;;  %v6870_v30 = vrot.slane %v6869_v48, 4  ;;  %v6876_v51 = vsel %vm6196_vm1, %v5947_v2, -inf }
 0x3b1   : > { %7751 = vst [vmem:[#allocation3 + $0x30] sm:$0xf] %v7750_v35  ;;  %v6877_v61 = vrot.slane %v6876_v51, 4  ;;  %v6884_v6 = vrot.slane %v6883_v27, 4  ;;  %v6890_v55 = vsel %vm6196_vm1, %v5948_v21, -inf  ;;  %v5990_v14 = vrot.slane %v5487_v22, %v15653_v63 }
 0x3b2   : > { %v6871_v3 = vmax.f32 %v6869_v48, %v6870_v30  ;;  %v6891_v12 = vrot.slane %v6890_v55, 4  ;;  %v5997_v18 = vrot.slane %v5983_v24, %v15653_v63  ;;  %v16279_v59 = vadd.f32 %v15974_v26, %v17598_v36  ;;  %v7791_v36 = vld [vmem:[#allocation3 + $0x8] sm:$0xf] }
 0x3b3   : > { %v6878_v9 = vmax.f32 %v6876_v51, %v6877_v61  ;;  %v6885_v49 = vmax.f32 %v6883_v27, %v6884_v6  ;;  %v5998_v32 = vcombine.high %v5990_v14, %v5990_v14  ;;  %v6953_v8 = vsel %vm6196_vm1, %v5990_v14, -inf }
 0x3b4   : > { %v6872_v4 = vrot.slane %v6871_v3, 2  ;;  %v6892_v31 = vmax.f32 %v6890_v55, %v6891_v12  ;;  %v5999_v53 = vcombine.high %v5997_v18, %v5997_v18  ;;  %v6954_v60 = vrot.slane %v6953_v8, 4 }
 0x3b5   : > { %v6879_v19 = vrot.slane %v6878_v9, 2  ;;  %v6886_v7 = vrot.slane %v6885_v49, 2  ;;  %v6960_v10 = vsel %vm6196_vm1, %v5998_v32, -inf  ;;  %v6967_v5 = vsel %vm6196_vm1, %v5997_v18, -inf }
 0x3b6   : > { %v6873_v11 = vmax.f32 %v6871_v3, %v6872_v4  ;;  %v6893_v33 = vrot.slane %v6892_v31, 2  ;;  %v6955_v20 = vmax.f32 %v6953_v8, %v6954_v60  ;;  %v6961_v26 = vrot.slane %v6960_v10, 4 }
 0x3b7   : > { %v6880_v13 = vmax.f32 %v6878_v9, %v6879_v19  ;;  %v6887_v45 = vmax.f32 %v6885_v49, %v6886_v7  ;;  %v6968_v34 = vrot.slane %v6967_v5, 4  ;;  %v6974_v23 = vsel %vm6196_vm1, %v5999_v53, -inf }
 0x3b8   : > { %v6874_v50 = vrot.slane %v6873_v11, 1  ;;  %v6894_v41 = vmax.f32 %v6892_v31, %v6893_v33  ;;  %v6956_v62 = vrot.slane %v6955_v20, 2  ;;  %v6962_v57 = vmax.f32 %v6960_v10, %v6961_v26  ;;  %v7767_v10 = vld [vmem:[#allocation3] sm:$0xf] }
 0x3b9   : > { %v6881_v1 = vrot.slane %v6880_v13, 1  ;;  %v6888_v0 = vrot.slane %v6887_v45, 1  ;;  %v6969_v44 = vmax.f32 %v6967_v5, %v6968_v34  ;;  %v6975_v15 = vrot.slane %v6974_v23, 4  ;;  %v7775_v5 = vld [vmem:[#allocation3 + $0x4] sm:$0x1] }
 0x3ba   : > { %v7248_v42 = vsel %vm7093_vm4, %v6952_v37, -inf  ;;  %v6875_v43 = vmax.f32 %v6873_v11, %v6874_v50  ;;  %v6895_v16 = vrot.slane %v6894_v41, 1  ;;  %v6963_v28 = vrot.slane %v6962_v57, 2 }
 0x3bb   : > { %v6882_v54 = vmax.f32 %v6880_v13, %v6881_v1  ;;  %v6889_v22 = vmax.f32 %v6887_v45, %v6888_v0  ;;  %v6957_v17 = vmax.f32 %v6955_v20, %v6956_v62  ;;  %v6970_v2 = vrot.slane %v6969_v44, 2  ;;  %v13401_v13 = vld [vmem:[%s17453_s3 + $0x8] sm:$0xff]  }
 0x3bc   : > { %v6896_v21 = vmax.f32 %v6894_v41, %v6895_v16  ;;  %v7238_v48 = vsel %vm7093_vm4, %v6875_v43, -inf  ;;  %v6964_v27 = vmax.f32 %v6962_v57, %v6963_v28  ;;  %v6976_v24 = vmax.f32 %v6974_v23, %v6975_v15  ;;  %v17599_v57 = vld [vmem:[#allocation18_spill] sm:$0xff]  ;;  %v17600_v0 = vld [vmem:[#allocation20_spill] sm:$0xff] }
 0x3bd   : > { %v7240_v35 = vmax.f32 %v7238_v48, %v16262_v29  ;;  %v7241_v30 = vsel %vm7093_vm4, %v6882_v54, -inf  ;;  %v7244_v51 = vsel %vm7093_vm4, %v6889_v22, -inf  ;;  %v6971_v61 = vmax.f32 %v6969_v44, %v6970_v2  ;;  %v13398_v29 = vld [vmem:[%s17453_s3 + $0x40] sm:$0xff]   ;;  %v13404_v48 = vld [vmem:[%s17453_s3 + $0x58] sm:$0xff]  }
 0x3be   : > { %v7243_v37 = vmax.f32 %v7241_v30, %v16266_v39  ;;  %v7246_v6 = vmax.f32 %v7244_v51, %v7245_v25  ;;  %v7247_v55 = vsel %vm7093_vm4, %v6896_v21, -inf  ;;  %v6958_v12 = vrot.slane %v6957_v17, 1  ;;  %v13399_v39 = vld [vmem:[%s17453_s3] sm:$0xff]   ;;  %v13400_v25 = vld [vmem:[%s17453_s3 + $0x48] sm:$0xff]   ;;  %12478 = vmatprep.subr.bf16.mxu1 %v13398_v29 }
 0x3bf   : > { %v7249_v14 = vmax.f32 %v7247_v55, %v7248_v42  ;;  %v12285_v3 = vpack.c.bf16 %v7240_v35, %v7240_v35  ;;  %v6965_v18 = vrot.slane %v6964_v27, 1  ;;  %v6972_v32 = vrot.slane %v6971_v61, 1  ;;  %12479 = vmatpush3.bf16.msra.mxu1 %v13399_v39 }
 0x3c0   : > { %v12286_v9 = vpack.c.bf16 %v7243_v37, %v7243_v37  ;;  %v12287_v49 = vpack.c.bf16 %v7246_v6, %v7246_v6  ;;  %v6977_v8 = vrot.slane %v6976_v24, 2  ;;  %v5453_v7 = vadd.f32 %v16247_v46, %v16279_v59  ;;  %12480 = vmatprep.subr.bf16.mxu1 %v13400_v25  ;;  %v13402_v59 = vld [vmem:[%s17453_s3 + $0x50] sm:$0xff]  }
 0x3c1   : > { %v12288_v4 = vpack.c.bf16 %v7249_v14, %v7249_v14  ;;  %v7612_v31 = vunpack.c.l.b16 %v12285_v3  ;;  %v6959_v33 = vmax.f32 %v6957_v17, %v6958_v12  ;;  %v6966_v20 = vmax.f32 %v6964_v27, %v6965_v18  ;;  %v13405_v18 = vld [vmem:[%s17453_s3 + $0x18] sm:$0xff]  }
 0x3c2   : > { %v7613_v53 = vunpack.c.l.b16 %v12286_v9  ;;  %v7614_v60 = vunpack.c.l.b16 %v12287_v49  ;;  %v6978_v19 = vmax.f32 %v6976_v24, %v6977_v8  ;;  %v11992_v26 = vcombine.low %v7791_v36, %v7791_v36  ;;  %v13406_v8 = vld [vmem:[%s17453_s3 + $0x60] sm:$0xff]  }
 0x3c3   : > { %v7615_v11 = vunpack.c.l.b16 %v12288_v4  ;;  %v6973_v34 = vmax.f32 %v6971_v61, %v6972_v32  ;;  %v5485_v50 = vmax.f32 %v5453_v7, 0.0  ;;  %v11976_v62 = vcombine.low %v7767_v10, %v7775_v5  ;;  %12481 = vmatpush3.bf16.msra.mxu1 %v13401_v13 }
 0x3c4   : > { %v7670_v45 = vsel %vm7628_vm5, %v7613_v53, %v7612_v31  ;;  %v6979_v23 = vrot.slane %v6978_v19, 1  ;;  %8008 = vrot.lane.b32.xlu0 %v11992_v26, %s13684_s24  ;;  %v13040_v1 = vadd.f32 %v16065_v52, %v17599_v57  ;;  %v13041_v44 = vadd.f32 %v16071_v38, %v17600_v0  ;;  %v13403_v52 = vld [vmem:[%s17453_s3 + $0x10] sm:$0xff]   ;;  %12482 = vmatprep.subr.bf16.mxu1 %v13402_v59 }
 0x3c5   : > { %v7671_v41 = vsel %vm7630_vm7, %v7614_v60, %v7670_v45  ;;  %v5949_v15 = vcombine.high %v5485_v50, %v5485_v50  ;;  %v5956_v42 = vrot.slane %v5485_v50, %v15653_v63  ;;  %v16321_v16 = vsel %vm7093_vm4, %v6959_v33, -inf  ;;  %v13407_v33 = vld [vmem:[%s17453_s3 + $0x20] sm:$0xff]  }
 0x3c6   : > { %v16318_v43 = vsel %vm7632_vm8, %v7615_v11, %v7671_v41  ;;  %v16324_v28 = vsel %vm7093_vm4, %v6966_v20, -inf  ;;  %v7881_v54 = vshrl.u32 %v11976_v62, 16  ;;  %v7883_v22 = vshll.u32 %v11976_v62, 16 }
 0x3c7   : > { %v6980_v38 = vmax.f32 %v6978_v19, %v6979_v23  ;;  %v5963_v17 = vrot.slane %v5949_v15, %v15653_v63  ;;  %v5964_v2 = vcombine.high %v5956_v42, %v5956_v42  ;;  %v6897_v21 = vsel %vm6196_vm1, %v5956_v42, -inf  ;;  %12483 = vmatpush3.bf16.msra.mxu1 %v13403_v52 }
 0x3c8   : > { %v16335_v27 = vsel %vm7093_vm4, %v6973_v34, -inf  ;;  %v6898_v24 = vrot.slane %v6897_v21, 4  ;;  %v7885_v35 = vrot.slane %v7883_v22, 1  ;;  %v5458_v30 = vadd.f32 %v16247_v46, %v13040_v1  ;;  %12484 = vmatprep.subr.bf16.mxu1 %v13404_v48  ;;  %v13409_v34 = vld [vmem:[%s17453_s3 + $0x68] sm:$0xff]  }
 0x3c9   : > { %v5965_v51 = vcombine.high %v5963_v17, %v5963_v17  ;;  %v6904_v61 = vsel %vm6196_vm1, %v5964_v2, -inf  ;;  %v6911_v37 = vsel %vm6196_vm1, %v5963_v17, -inf  ;;  %v5456_v6 = vadd.f32 %v16247_v46, %v13041_v44  ;;  %v13410_v22 = vld [vmem:[%s17453_s3 + $0x28] sm:$0xff]  }
 0x3ca   : > { %v6899_v55 = vmax.f32 %v6897_v21, %v6898_v24  ;;  %v6905_v14 = vrot.slane %v6904_v61, 4  ;;  %v6912_v3 = vrot.slane %v6911_v37, 4  ;;  %v7886_v12 = vor.u32 %v7885_v35, %v7881_v54  ;;  %v13411_v21 = vld [vmem:[%s17453_s3 + $0x70] sm:$0xff]  }
 0x3cb   : > { %v16345_v36 = vsel %vm7093_vm4, %v6980_v38, -inf  ;;  %v6918_v9 = vsel %vm6196_vm1, %v5965_v51, -inf  ;;  %v5490_v49 = vmax.f32 %v5458_v30, 0.0  ;;  %v5488_v32 = vmax.f32 %v5456_v6, 0.0  ;;  %12485 = vmatpush3.bf16.msra.mxu1 %v13405_v18  ;;  %v13412_v18 = vld [vmem:[%s17453_s3 + $0x30] sm:$0xff]  }
 0x3cc   : > { %v6900_v29 = vrot.slane %v6899_v55, 2  ;;  %v6906_v39 = vmax.f32 %v6904_v61, %v6905_v14  ;;  %v6913_v25 = vmax.f32 %v6911_v37, %v6912_v3  ;;  %v6919_v4 = vrot.slane %v6918_v9, 4  ;;  %7936 = vrot.lane.b32.xlu1 %v7886_v12, %s13684_s24  ;;  %12486 = vmatprep.subr.bf16.mxu1 %v13406_v8 }
 0x3cd   : > { %v6034_v31 = vcombine.high %v5490_v49, %v5490_v49  ;;  %v6041_v53 = vrot.slane %v5490_v49, %v15653_v63  ;;  %v6000_v60 = vcombine.high %v5488_v32, %v5488_v32  ;;  %v16354_v19 = vrot.slane %v5488_v32, %v15653_v63 }
 0x3ce   : > { %v6901_v7 = vmax.f32 %v6899_v55, %v6900_v29  ;;  %v6907_v10 = vrot.slane %v6906_v39, 2  ;;  %v6914_v5 = vrot.slane %v6913_v25, 2  ;;  %v6920_v11 = vmax.f32 %v6918_v9, %v6919_v4 }
 0x3cf   : > { %v6048_v20 = vrot.slane %v6034_v31, %v15653_v63  ;;  %v6049_v26 = vcombine.high %v6041_v53, %v6041_v53  ;;  %v7037_v13 = vsel %vm6196_vm1, %v6041_v53, -inf  ;;  %v16362_v45 = vrot.slane %v6000_v60, %v15653_v63  ;;  %12487 = vmatpush3.bf16.msra.mxu1 %v13407_v33 }
 0x3d0   : > { %v6902_v23 = vrot.slane %v6901_v7, 1  ;;  %v6908_v50 = vmax.f32 %v6906_v39, %v6907_v10  ;;  %v6915_v59 = vmax.f32 %v6913_v25, %v6914_v5  ;;  %v6921_v41 = vrot.slane %v6920_v11, 2  ;;  %12488 = vmatprep.subr.bf16.mxu1 %v13409_v34 }
 0x3d1   : > { %v6050_v62 = vcombine.high %v6048_v20, %v6048_v20  ;;  %v7038_v57 = vrot.slane %v7037_v13, 4  ;;  %v7044_v1 = vsel %vm6196_vm1, %v6049_v26, -inf  ;;  %v7051_v0 = vsel %vm6196_vm1, %v6048_v20, -inf }
 0x3d2   : > { %v6903_v44 = vmax.f32 %v6901_v7, %v6902_v23  ;;  %v6909_v15 = vrot.slane %v6908_v50, 1  ;;  %v6916_v42 = vrot.slane %v6915_v59, 1  ;;  %v6922_v54 = vmax.f32 %v6920_v11, %v6921_v41  ;;  %v7758_v7 = vld [vmem:[#allocation3 + $0x3c] sm:$0x1] }
 0x3d3   : > { %v7039_v52 = vmax.f32 %v7037_v13, %v7038_v57  ;;  %v7045_v38 = vrot.slane %v7044_v1, 4  ;;  %v7052_v17 = vrot.slane %v7051_v0, 4  ;;  %v7058_v2 = vsel %vm6196_vm1, %v6050_v62, -inf  ;;  %12489 = vmatpush3.bf16.msra.mxu1 %v13410_v22  ;;  %v16405_v22 = vld [vmem:[#allocation3 + $0xc] sm:$0x1] }
 0x3d4   : > { %v6910_v48 = vmax.f32 %v6908_v50, %v6909_v15  ;;  %v6917_v24 = vmax.f32 %v6915_v59, %v6916_v42  ;;  %v6923_v35 = vrot.slane %v6922_v54, 1  ;;  %v7250_v30 = vsel %vm7093_vm4, %v6903_v44, -inf  ;;  %12490 = vmatprep.subr.bf16.mxu1 %v13411_v21  ;;  %v7755_v44 = vld [vmem:[#allocation3 + $0x38] sm:$0xf] }
 0x3d5   : > { %v7252_v51 = vmax.f32 %v7250_v30, %v16321_v16  ;;  %v7040_v61 = vrot.slane %v7039_v52, 2  ;;  %v7046_v37 = vmax.f32 %v7044_v1, %v7045_v38  ;;  %v7053_v6 = vmax.f32 %v7051_v0, %v7052_v17  ;;  %v13415_v1 = vld [vmem:[%s17453_s3 + $0x38] sm:$0xff]  }
 0x3d6   : > { %v6924_v55 = vmax.f32 %v6922_v54, %v6923_v35  ;;  %v7253_v14 = vsel %vm7093_vm4, %v6910_v48, -inf  ;;  %v7256_v3 = vsel %vm7093_vm4, %v6917_v24, -inf  ;;  %v7059_v12 = vrot.slane %v7058_v2, 4 }
 0x3d7   : > { %v7255_v9 = vmax.f32 %v7253_v14, %v16324_v28  ;;  %v7258_v49 = vmax.f32 %v7256_v3, %v16335_v27  ;;  %v12289_v32 = vpack.c.bf16 %v7252_v51, %v7252_v51  ;;  %v7041_v16 = vmax.f32 %v7039_v52, %v7040_v61  ;;  %12491 = vmatpush3.bf16.msra.mxu1 %v13412_v18  ;;  %v16420_v3 = vld [vmem:[#allocation3 + $0x10] sm:$0xf] }
 0x3d8   : > { %v7259_v8 = vsel %vm7093_vm4, %v6924_v55, -inf  ;;  %v7047_v29 = vrot.slane %v7046_v37, 2  ;;  %v7054_v39 = vrot.slane %v7053_v6, 2  ;;  %v7060_v25 = vmax.f32 %v7058_v2, %v7059_v12 }
 0x3d9   : > { %v7261_v4 = vmax.f32 %v7259_v8, %v16345_v36  ;;  %v12290_v31 = vpack.c.bf16 %v7255_v9, %v7255_v9  ;;  %v12291_v53 = vpack.c.bf16 %v7258_v49, %v7258_v49  ;;  %v7616_v60 = vunpack.c.l.b16 %v12289_v32  ;;  %v16389_v36 = vld [vmem:[#allocation3 + $0x8] sm:$0xf] }
 0x3da   : > { %v7042_v10 = vrot.slane %v7041_v16, 1  ;;  %v7048_v5 = vmax.f32 %v7046_v37, %v7047_v29  ;;  %v7055_v11 = vmax.f32 %v7053_v6, %v7054_v39  ;;  %v7061_v28 = vrot.slane %v7060_v25, 2  ;;  %v17601_v49 = vld [vmem:[#allocation19_spill] sm:$0xff] }
 0x3db   : > { %v7617_v27 = vunpack.c.l.b16 %v12290_v31  ;;  %v7618_v33 = vunpack.c.l.b16 %v12291_v53  ;;  %v7673_v20 = vsel %vm7634_vm10, %v7616_v60, %v16318_v43  ;;  %v12307_v26 = vpack.c.bf16 %v7261_v4, %v7261_v4  ;;  %v13414_v43 = vld [vmem:[%s17453_s3 + $0x78] sm:$0xff]  }
 0x3dc   : > { %v7043_v13 = vmax.f32 %v7041_v16, %v7042_v10  ;;  %v7049_v34 = vrot.slane %v7048_v5, 1  ;;  %v7056_v23 = vrot.slane %v7055_v11, 1  ;;  %v7062_v50 = vmax.f32 %v7060_v25, %v7061_v28  ;;  %12492 = vmatprep.subr.bf16.mxu1 %v13414_v43  ;;  %v16426_v25 = vld [vmem:[#allocation3 + $0x18] sm:$0xf] }
 0x3dd   : > { %v7674_v59 = vsel %vm7636_vm11, %v7617_v27, %v7673_v20  ;;  %v7759_v41 = vsel %vm15763_vm13, %v12307_v26, %v7758_v7  ;;  %v6015_v62 = vcombine.high %v16354_v19, %v16354_v19  ;;  %v6016_v57 = vcombine.high %v16362_v45, %v16362_v45  ;;  %12493 = vmatpush3.bf16.msra.mxu1 %v13415_v1 }
 0x3de   : > { %v7675_v0 = vsel %vm7638_vm12, %v7618_v33, %v7674_v59  ;;  %7760 = vst [vmem:[#allocation3 + $0x3c] sm:$0x1] %v7759_v41  ;;  %v7050_v15 = vmax.f32 %v7048_v5, %v7049_v34  ;;  %v7057_v42 = vmax.f32 %v7055_v11, %v7056_v23  ;;  %v7063_v54 = vrot.slane %v7062_v50, 1 }
 0x3df   : > { %v7694_v52 = vpack.c.b16 %v7675_v0, %v7675_v0  ;;  %v6981_v38 = vsel %vm6196_vm1, %v16354_v19, -inf  ;;  %v6988_v17 = vsel %vm6196_vm1, %v6015_v62, -inf  ;;  %v11977_v2 = vcombine.low %v16389_v36, %v16405_v22 }
 0x3e0   : > { %v7064_v21 = vmax.f32 %v7062_v50, %v7063_v54  ;;  %v7263_v48 = vsel %vm7093_vm4, %v7043_v13, -inf  ;;  %v7266_v24 = vsel %vm7093_vm4, %v7050_v15, -inf  ;;  %v6982_v35 = vrot.slane %v6981_v38, 4 }
 0x3e1   : > { %v7756_v30 = vsel %vm15781_vm6, %v7694_v52, %v7755_v44  ;;  %v6989_v51 = vrot.slane %v6988_v17, 4  ;;  %v6995_v19 = vsel %vm6196_vm1, %v16362_v45, -inf  ;;  %v7002_v61 = vsel %vm6196_vm1, %v6016_v57, -inf  ;;  %v17602_v45 = vld [vmem:[#allocation21_spill] sm:$0xff] }
 0x3e2   : > { %7757 = vst [vmem:[#allocation3 + $0x38] sm:$0xf] %v7756_v30  ;;  %v7269_v37 = vsel %vm7093_vm4, %v7057_v42, -inf  ;;  %v6983_v6 = vmax.f32 %v6981_v38, %v6982_v35  ;;  %v6996_v55 = vrot.slane %v6995_v19, 4  ;;  %v7003_v14 = vrot.slane %v7002_v61, 4 }
 0x3e3   : > { %v6990_v12 = vmax.f32 %v6988_v17, %v6989_v51  ;;  %v7888_v18 = vshrl.u32 %v11977_v2, 16  ;;  %v7890_v9 = vshll.u32 %v11977_v2, 16  ;;  %v13042_v32 = vadd.f32 %v16120_v58, %v17601_v49  ;;  %v16448_v49 = vld [vmem:[#allocation3 + $0x10] sm:$0xf] }
 0x3e4   : > { %v6984_v16 = vrot.slane %v6983_v6, 2  ;;  %v6997_v8 = vmax.f32 %v6995_v19, %v6996_v55  ;;  %v7004_v29 = vmax.f32 %v7002_v61, %v7003_v14  ;;  %v13043_v39 = vadd.f32 %v16123_v40, %v17602_v45 }
 0x3e5   : > { %v6991_v4 = vrot.slane %v6990_v12, 2  ;;  %v7892_v31 = vrot.slane %v7890_v9, 1  ;;  %v5459_v53 = vadd.f32 %v16247_v46, %v13042_v32  ;;  %v11993_v60 = vcombine.low %v16420_v3, %v16420_v3 }
 0x3e6   : > { %v6985_v7 = vmax.f32 %v6983_v6, %v6984_v16  ;;  %v6998_v10 = vrot.slane %v6997_v8, 2  ;;  %v7005_v5 = vrot.slane %v7004_v29, 2  ;;  %v5457_v58 = vadd.f32 %v16247_v46, %v13043_v39 }
 0x3e7   : > { %v6992_v11 = vmax.f32 %v6990_v12, %v6991_v4  ;;  %v7893_v28 = vor.u32 %v7892_v31, %v7888_v18  ;;  %v5491_v27 = vmax.f32 %v5459_v53, 0.0  ;;  %8010 = vrot.lane.b32.xlu0 %v11993_v60, %s13684_s24  ;;  %v11994_v40 = vcombine.low %v16426_v25, %v16426_v25 }
 0x3e8   : > { %v6986_v33 = vrot.slane %v6985_v7, 1  ;;  %v6999_v20 = vmax.f32 %v6997_v8, %v6998_v10  ;;  %v7006_v26 = vmax.f32 %v7004_v29, %v7005_v5  ;;  %v5489_v13 = vmax.f32 %v5457_v58, 0.0 }
 0x3e9   : > { %v7272_v34 = vsel %vm7093_vm4, %v7064_v21, -inf  ;;  %v6993_v23 = vrot.slane %v6992_v11, 1  ;;  %7938 = vrot.lane.b32.xlu1 %v7893_v28, %s13684_s24  ;;  %v6051_v50 = vcombine.high %v5491_v27, %v5491_v27  ;;  %v6058_v46 = vrot.slane %v5491_v27, %v15653_v63 }
 0x3ea   : > { %v6987_v59 = vmax.f32 %v6985_v7, %v6986_v33  ;;  %v7000_v41 = vrot.slane %v6999_v20, 1  ;;  %v7007_v62 = vrot.slane %v7006_v26, 1  ;;  %v6017_v57 = vcombine.high %v5489_v13, %v5489_v13 }
 0x3eb   : > { %v6994_v43 = vmax.f32 %v6992_v11, %v6993_v23  ;;  %v6065_v1 = vrot.slane %v6051_v50, %v15653_v63  ;;  %v6066_v0 = vcombine.high %v6058_v46, %v6058_v46  ;;  %v7065_v44 = vsel %vm6196_vm1, %v6058_v46, -inf  ;;  %8012 = vrot.lane.b32.xlu0 %v11994_v40, %s13684_s24 }
 0x3ec   : > { %v7001_v15 = vmax.f32 %v6999_v20, %v7000_v41  ;;  %v7008_v42 = vmax.f32 %v7006_v26, %v7007_v62  ;;  %v7262_v54 = vsel %vm7093_vm4, %v6987_v59, -inf  ;;  %v7066_v52 = vrot.slane %v7065_v44, 4 }
 0x3ed   : > { %v7264_v38 = vmax.f32 %v7262_v54, %v7263_v48  ;;  %v7265_v17 = vsel %vm7093_vm4, %v6994_v43, -inf  ;;  %v6067_v2 = vcombine.high %v6065_v1, %v6065_v1  ;;  %v7072_v21 = vsel %vm6196_vm1, %v6066_v0, -inf }
 0x3ee   : > { %v7267_v35 = vmax.f32 %v7265_v17, %v7266_v24  ;;  %v7268_v30 = vsel %vm7093_vm4, %v7001_v15, -inf  ;;  %v7271_v51 = vsel %vm7093_vm4, %v7008_v42, -inf  ;;  %v7067_v19 = vmax.f32 %v7065_v44, %v7066_v52 }
 0x3ef   : > { %v7270_v61 = vmax.f32 %v7268_v30, %v7269_v37  ;;  %v7273_v6 = vmax.f32 %v7271_v51, %v7272_v34  ;;  %v12293_v55 = vpack.c.bf16 %v7264_v38, %v7264_v38  ;;  %v7073_v14 = vrot.slane %v7072_v21, 4  ;;  %v16450_v37 = vld [vmem:[#allocation3 + $0x14] sm:$0x1] }
 0x3f0   : > { %v12294_v12 = vpack.c.bf16 %v7267_v35, %v7267_v35  ;;  %v7068_v18 = vrot.slane %v7067_v19, 2  ;;  %v7079_v9 = vsel %vm6196_vm1, %v6065_v1, -inf  ;;  %v7086_v48 = vsel %vm6196_vm1, %v6067_v2, -inf }
 0x3f1   : > { %v12295_v32 = vpack.c.bf16 %v7270_v61, %v7270_v61  ;;  %v12296_v16 = vpack.c.bf16 %v7273_v6, %v7273_v6  ;;  %v7620_v24 = vunpack.c.l.b16 %v12293_v55  ;;  %v7074_v8 = vmax.f32 %v7072_v21, %v7073_v14  ;;  %v16468_v61 = vld [vmem:[#allocation3 + $0x20] sm:$0xf] }
 0x3f2   : > { %v7621_v29 = vunpack.c.l.b16 %v12294_v12  ;;  %v7069_v45 = vmax.f32 %v7067_v19, %v7068_v18  ;;  %v7080_v39 = vrot.slane %v7079_v9, 4  ;;  %v7087_v4 = vrot.slane %v7086_v48, 4  ;;  %v16472_v18 = vld [vmem:[#allocation3 + $0x18] sm:$0xf] }
 0x3f3   : > { %v7622_v31 = vunpack.c.l.b16 %v12295_v32  ;;  %v7075_v53 = vrot.slane %v7074_v8, 2  ;;  %v6024_v60 = vrot.slane %v5489_v13, %v15653_v63  ;;  %v16455_v7 = vcombine.low %v16448_v49, %v16450_v37 }
 0x3f4   : > { %v7676_v10 = vsel %vm7628_vm5, %v7621_v29, %v7620_v24  ;;  %v7070_v5 = vrot.slane %v7069_v45, 1  ;;  %v7081_v58 = vmax.f32 %v7079_v9, %v7080_v39  ;;  %v7088_v11 = vmax.f32 %v7086_v48, %v7087_v4  ;;  %v16474_v9 = vld [vmem:[#allocation3 + $0x1c] sm:$0x1]  ;;  %v13419_v29 = vld [vmem:[%s17453_s3 + $0xc0] sm:$0xff]  }
 0x3f5   : > { %v7677_v28 = vsel %vm7630_vm7, %v7622_v31, %v7676_v10  ;;  %v7076_v27 = vmax.f32 %v7074_v8, %v7075_v53  ;;  %v6031_v40 = vrot.slane %v6017_v57, %v15653_v63  ;;  %v6032_v33 = vcombine.high %v6024_v60, %v6024_v60  ;;  %v16477_v8 = vld [vmem:[#allocation3 + $0x20] sm:$0xf]  ;;  %v16484_v53 = vld [vmem:[#allocation3 + $0x28] sm:$0xf]  ;;  %12518 = vmatprep.subr.bf16.mxu1 %v13419_v29  ;;  %v7831_v63 = vld [vmem:[#allocation3 + $0x4c] sm:$0x1] }
 0x3f6   : > { %v7623_v20 = vunpack.c.l.b16 %v12296_v16  ;;  %v7082_v26 = vrot.slane %v7081_v58, 2  ;;  %v7089_v34 = vrot.slane %v7088_v11, 2  ;;  %v7009_v13 = vsel %vm6196_vm1, %v6024_v60, -inf }
 0x3f7   : > { %v7077_v23 = vrot.slane %v7076_v27, 1  ;;  %v6033_v50 = vcombine.high %v6031_v40, %v6031_v40  ;;  %v7010_v46 = vrot.slane %v7009_v13, 4  ;;  %v7016_v59 = vsel %vm6196_vm1, %v6032_v33, -inf }
 0x3f8   : > { %v7071_v41 = vmax.f32 %v7069_v45, %v7070_v5  ;;  %v7083_v62 = vmax.f32 %v7081_v58, %v7082_v26  ;;  %v7090_v43 = vmax.f32 %v7088_v11, %v7089_v34  ;;  %v7017_v1 = vrot.slane %v7016_v59, 4  ;;  %v16489_v58 = vld [vmem:[#allocation3 + $0x24] sm:$0x1] }
 0x3f9   : > { %v7078_v0 = vmax.f32 %v7076_v27, %v7077_v23  ;;  %v7011_v44 = vmax.f32 %v7009_v13, %v7010_v46  ;;  %v7023_v15 = vsel %vm6196_vm1, %v6031_v40, -inf  ;;  %v7030_v57 = vsel %vm6196_vm1, %v6033_v50, -inf }
 0x3fa   : > { %v7084_v42 = vrot.slane %v7083_v62, 1  ;;  %v7091_v54 = vrot.slane %v7090_v43, 1  ;;  %v7018_v52 = vmax.f32 %v7016_v59, %v7017_v1  ;;  %v7024_v38 = vrot.slane %v7023_v15, 4  ;;  %v16498_v59 = vld [vmem:[#allocation3 + $0x28] sm:$0xf] }
 0x3fb   : > { %v7012_v17 = vrot.slane %v7011_v44, 2  ;;  %v7031_v2 = vrot.slane %v7030_v57, 4  ;;  %v16465_v21 = vsel %vm7632_vm8, %v7623_v20, %v7677_v28  ;;  %v7275_v30 = vsel %vm7093_vm4, %v7071_v41, -inf }
 0x3fc   : > { %v7085_v35 = vmax.f32 %v7083_v62, %v7084_v42  ;;  %v7019_v51 = vrot.slane %v7018_v52, 2  ;;  %v7025_v19 = vmax.f32 %v7023_v15, %v7024_v38  ;;  %v7278_v6 = vsel %vm7093_vm4, %v7078_v0, -inf  ;;  %v16502_v42 = vld [vmem:[#allocation3 + $0x30] sm:$0xf] }
 0x3fd   : > { %v7013_v55 = vmax.f32 %v7011_v44, %v7012_v17  ;;  %v7032_v14 = vmax.f32 %v7030_v57, %v7031_v2  ;;  %v7897_v12 = vshll.u32 %v16455_v7, 16  ;;  %v7092_v48 = vmax.f32 %v7090_v43, %v7091_v54  ;;  %v16504_v54 = vld [vmem:[#allocation3 + $0x2c] sm:$0x1] }
 0x3fe   : > { %v7020_v32 = vmax.f32 %v7018_v52, %v7019_v51  ;;  %v7026_v16 = vrot.slane %v7025_v19, 2  ;;  %v7895_v24 = vshrl.u32 %v16455_v7, 16  ;;  %v11995_v31 = vcombine.low %v16468_v61, %v16468_v61 }
 0x3ff   : > { %v7014_v45 = vrot.slane %v7013_v55, 1  ;;  %v7033_v39 = vrot.slane %v7032_v14, 2  ;;  %v7899_v4 = vrot.slane %v7897_v12, 1  ;;  %v7281_v60 = vsel %vm7093_vm4, %v7085_v35, -inf  ;;  %v16509_v35 = vld [vmem:[#allocation3 + $0x30] sm:$0xf] }
 0x400   : > { %v7021_v10 = vrot.slane %v7020_v32, 1  ;;  %v7027_v5 = vmax.f32 %v7025_v19, %v7026_v16  ;;  %v11979_v7 = vcombine.low %v16472_v18, %v16474_v9  ;;  %8014 = vrot.lane.b32.xlu1 %v11995_v31, %s13684_s24  ;;  %v11980_v40 = vcombine.low %v16477_v8, %v16489_v58  ;;  %v16518_v16 = vld [vmem:[#allocation3 + $0x38] sm:$0xf] }
 0x401   : > { %v7015_v11 = vmax.f32 %v7013_v55, %v7014_v45  ;;  %v7034_v28 = vmax.f32 %v7032_v14, %v7033_v39  ;;  %v7900_v27 = vor.u32 %v7899_v4, %v7895_v24  ;;  %v11996_v34 = vcombine.low %v16484_v53, %v16484_v53  ;;  %v16513_v55 = vld [vmem:[#allocation3 + $0x10] sm:$0xf]  ;;  %v16520_v24 = vld [vmem:[#allocation3 + $0x34] sm:$0x1]  ;;  %v7764_v39 = vld [vmem:[#allocation3 + $0x44] sm:$0x1] }
 0x402   : > { %v7022_v33 = vmax.f32 %v7020_v32, %v7021_v10  ;;  %v7028_v20 = vrot.slane %v7027_v5, 1  ;;  %v7904_v26 = vshll.u32 %v11979_v7, 16  ;;  %v7902_v50 = vshrl.u32 %v11979_v7, 16 }
 0x403   : > { %v7035_v13 = vrot.slane %v7034_v28, 1  ;;  %v7274_v23 = vsel %vm7093_vm4, %v7015_v11, -inf  ;;  %7940 = vrot.lane.b32.xlu0 %v7900_v27, %s13684_s24  ;;  %v7911_v46 = vshll.u32 %v11980_v40, 16  ;;  %v7284_v0 = vsel %vm7093_vm4, %v7092_v48, -inf }
 0x404   : > { %v7029_v41 = vmax.f32 %v7027_v5, %v7028_v20  ;;  %v7276_v62 = vmax.f32 %v7274_v23, %v7275_v30  ;;  %v7277_v43 = vsel %vm7093_vm4, %v7022_v33, -inf  ;;  %v7906_v1 = vrot.slane %v7904_v26, 1  ;;  %v7761_v20 = vld [vmem:[#allocation3 + $0x40] sm:$0xf] }
 0x405   : > { %v7036_v44 = vmax.f32 %v7034_v28, %v7035_v13  ;;  %v7279_v15 = vmax.f32 %v7277_v43, %v7278_v6  ;;  %v7913_v57 = vrot.slane %v7911_v46, 1  ;;  %v11981_v2 = vcombine.low %v16498_v59, %v16504_v54  ;;  %v16540_v46 = vld [vmem:[#allocation3 + $0x20] sm:$0xf] }
 0x406   : > { %v7280_v52 = vsel %vm7093_vm4, %v7029_v41, -inf  ;;  %v12297_v38 = vpack.c.bf16 %v7276_v62, %v7276_v62  ;;  %v7907_v17 = vor.u32 %v7906_v1, %v7902_v50  ;;  %v7909_v6 = vshrl.u32 %v11980_v40, 16  ;;  %v16538_v50 = vld [vmem:[#allocation3 + $0x38] sm:$0xf]  ;;  %v16543_v1 = vld [vmem:[#allocation3 + $0x3c] sm:$0x1] }
 0x407   : > { %v7282_v30 = vmax.f32 %v7280_v52, %v7281_v60  ;;  %v7283_v51 = vsel %vm7093_vm4, %v7036_v44, -inf  ;;  %v12298_v19 = vpack.c.bf16 %v7279_v15, %v7279_v15  ;;  %8016 = vrot.lane.b32.xlu0 %v11996_v34, %s13684_s24  ;;  %v11997_v48 = vcombine.low %v16502_v42, %v16502_v42  ;;  %v16524_v60 = vld [vmem:[#allocation3 + $0x14] sm:$0x1] }
 0x408   : > { %v7285_v14 = vmax.f32 %v7283_v51, %v7284_v0  ;;  %v7624_v12 = vunpack.c.l.b16 %v12297_v38  ;;  %7942 = vrot.lane.b32.xlu1 %v7907_v17, %s13684_s24  ;;  %v7918_v32 = vshll.u32 %v11981_v2, 16  ;;  %v7914_v4 = vor.u32 %v7913_v57, %v7909_v6  ;;  %v16551_v57 = vld [vmem:[#allocation3 + $0x1c] sm:$0x1]  ;;  %v7834_v17 = vld [vmem:[#allocation3 + $0x20] sm:$0xe] }
 0x409   : > { %v12299_v29 = vpack.c.bf16 %v7282_v30, %v7282_v30  ;;  %v7625_v45 = vunpack.c.l.b16 %v12298_v19  ;;  %v11982_v31 = vcombine.low %v16509_v35, %v16520_v24  ;;  %v12016_v11 = vcombine.low %v16513_v55, %v16524_v60  ;;  %v16557_v30 = vld [vmem:[#allocation3 + $0x14] sm:$0x1]  ;;  %v16559_v51 = vld [vmem:[#allocation3 + $0x18] sm:$0xf]  ;;  %v7835_v6 = vld [vmem:[#allocation3 + $0x28] sm:$0xe] }
 0x40a   : > { %v7679_v10 = vsel %vm7634_vm10, %v7624_v12, %v16465_v21  ;;  %v12308_v5 = vpack.c.bf16 %v7285_v14, %v7285_v14  ;;  %v7920_v7 = vrot.slane %v7918_v32, 1  ;;  %v11998_v40 = vcombine.low %v16518_v16, %v16518_v16  ;;  %v16565_v14 = vld [vmem:[#allocation3 + $0xc] sm:$0x1] }
 0x40b   : > { %v7626_v28 = vunpack.c.l.b16 %v12299_v29  ;;  %v7680_v27 = vsel %vm7636_vm11, %v7625_v45, %v7679_v10  ;;  %7944 = vrot.lane.b32.xlu0 %v7914_v4, %s13684_s24  ;;  %v7925_v33 = vshll.u32 %v11982_v31, 16  ;;  %v7916_v21 = vshrl.u32 %v11981_v2, 16  ;;  %v7827_v45 = vld [vmem:[#allocation3 + $0x2c] sm:$0x1] }
 0x40c   : > { %v7765_v26 = vsel %vm15763_vm13, %v12308_v5, %v7764_v39  ;;  %8018 = vrot.lane.b32.xlu1 %v11997_v48, %s13684_s24  ;;  %v8195_v23 = vshll.u32 %v12016_v11, 16  ;;  %v7923_v43 = vshrl.u32 %v11982_v31, 16  ;;  %v11983_v44 = vcombine.low %v16538_v50, %v16543_v1  ;;  %v16573_v10 = vld [vmem:[#allocation3 + $0x2c] sm:$0x1]  ;;  %v16575_v5 = vld [vmem:[#allocation3 + $0x24] sm:$0x1] }
 0x40d   : > { %v7681_v34 = vsel %vm7638_vm12, %v7626_v28, %v7680_v27  ;;  %7766 = vst [vmem:[#allocation3 + $0x44] sm:$0x1] %v7765_v26  ;;  %v7927_v13 = vrot.slane %v7925_v33, 1  ;;  %v7921_v62 = vor.u32 %v7920_v7, %v7916_v21  ;;  %v12018_v15 = vcombine.low %v16540_v46, %v7826_v56  ;;  %v16577_v7 = vld [vmem:[#allocation3 + $0x30] sm:$0xf] }
 0x40e   : > { %v7696_v41 = vpack.c.b16 %v7681_v34, %v7681_v34  ;;  %v8197_v38 = vrot.slane %v8195_v23, 1  ;;  %v16555_v2 = vcombine.low %v16426_v25, %v16551_v57  ;;  %v16563_v19 = vcombine.low %v16420_v3, %v16557_v30  ;;  %v16568_v25 = vld [vmem:[#allocation3 + $0x1c] sm:$0x1]  ;;  %v16588_v27 = vld [vmem:[#allocation3 + $0x34] sm:$0x1] }
 0x40f   : > { %8020 = vrot.lane.b32.xlu0 %v11998_v40, %s13684_s24  ;;  %v7928_v52 = vor.u32 %v7927_v13, %v7923_v43  ;;  %v8193_v12 = vshrl.u32 %v12016_v11, 16  ;;  %v7932_v48 = vshll.u32 %v11983_v44, 16  ;;  %v8209_v32 = vshll.u32 %v12018_v15, 16  ;;  %v16596_v43 = vld [vmem:[#allocation3 + $0x28] sm:$0xf] }
 0x410   : > { %v7762_v0 = vsel %vm15781_vm6, %v7696_v41, %v7761_v20  ;;  %7946 = vrot.lane.b32.xlu1 %v7921_v62, %s13684_s24  ;;  %v12026_v29 = vcombine.low %v7834_v17, %v7826_v56  ;;  %v12008_v4 = vcombine.low %v7807_v47, %v16565_v14  ;;  %v12017_v31 = vcombine.low %v16559_v51, %v16568_v25 }
 0x411   : > { %7763 = vst [vmem:[#allocation3 + $0x40] sm:$0xf] %v7762_v0  ;;  %v8198_v39 = vor.u32 %v8197_v38, %v8193_v12  ;;  %v12027_v3 = vcombine.low %v7835_v6, %v7827_v45  ;;  %v16581_v11 = vcombine.low %v16484_v53, %v16573_v10  ;;  %v16585_v28 = vcombine.low %v16468_v61, %v16575_v5  ;;  %v7809_v53 = vld [vmem:[#allocation3 + $0x18] sm:$0xe]  ;;  %v16600_v0 = vld [vmem:[#allocation3 + $0x34] sm:$0x1] }
 0x412   : > { %v7934_v33 = vrot.slane %v7932_v48, 1  ;;  %v8211_v20 = vrot.slane %v8209_v32, 1  ;;  %v16590_v26 = vrot.slane %v12026_v29, 1  ;;  %v8128_v13 = vrot.slane %v12008_v4, 1  ;;  %v7808_v6 = vld [vmem:[#allocation3 + $0x10] sm:$0xe] }
 0x413   : > { %7948 = vrot.lane.b32.xlu0 %v7928_v52, %s13684_s24  ;;  %v16592_v21 = vrot.slane %v12027_v3, 1  ;;  %v8202_v23 = vshll.u32 %v12017_v31, 16  ;;  %v12020_v41 = vcombine.low %v16577_v7, %v16588_v27  ;;  %v7930_v61 = vshrl.u32 %v11983_v44, 16 }
 0x414   : > { %17603 = vst [vmem:[#allocation24_spill] sm:$0xff] %v16590_v26  ;;  %v8207_v62 = vshrl.u32 %v12018_v15, 16  ;;  %v16606_v52 = vcombine.low %v16502_v42, %v16600_v0  ;;  %v12010_v44 = vcombine.low %v7809_v53, %v16551_v57  ;;  %v16609_v15 = vld [vmem:[#allocation3 + $0x3c] sm:$0x1]  ;;  %v12019_v48 = vcombine.low %v16596_v43, %v7827_v45  ;;  %v7830_v45 = vld [vmem:[#allocation3 + $0x44] sm:$0x1] }
 0x415   : > { %17604 = vst [vmem:[#allocation25_spill] sm:$0xff] %v16592_v21  ;;  %v7935_v38 = vor.u32 %v7934_v33, %v7930_v61  ;;  %v8204_v47 = vrot.slane %v8202_v23, 1  ;;  %v8223_v12 = vshll.u32 %v12020_v41, 16  ;;  %v16614_v32 = vcombine.low %v16518_v16, %v16609_v15  ;;  %v7811_v23 = vld [vmem:[#allocation3 + $0x28] sm:$0xe] }
 0x416   : > { %v8212_v17 = vor.u32 %v8211_v20, %v8207_v62  ;;  %v8200_v42 = vshrl.u32 %v12017_v31, 16  ;;  %v8130_v4 = vrot.slane %v12010_v44, 1  ;;  %v12009_v3 = vcombine.low %v7808_v6, %v16557_v30  ;;  %v7810_v53 = vld [vmem:[#allocation3 + $0x20] sm:$0xe]  ;;  %v7832_v6 = vld [vmem:[#allocation3 + $0x10] sm:$0xe] }
 0x417   : > { %8248 = vrot.lane.b32.xlu0 %v8198_v39, %s13684_s24  ;;  %v16618_v39 = vld [vmem:[#allocation3 + $0x44] sm:$0x1]  ;;  %v8225_v20 = vrot.slane %v8223_v12, 1  ;;  %v8216_v16 = vshll.u32 %v12019_v48, 16  ;;  %v8221_v31 = vshrl.u32 %v12020_v41, 16  ;;  %v8214_v12 = vshrl.u32 %v12019_v48, 16 }
 0x418   : > { %v7798_v40 = vld [vmem:[#allocation3 + $0x40] sm:$0xf]  ;;  %v8205_v33 = vor.u32 %v8204_v47, %v8200_v42  ;;  %v8129_v61 = vrot.slane %v12009_v3, 1  ;;  %v12011_v47 = vcombine.low %v7810_v53, %v16575_v5  ;;  %v16636_v42 = vld [vmem:[#allocation3 + $0x48] sm:$0xf]  ;;  %v12024_v5 = vcombine.low %v7832_v6, %v16524_v60 }
 0x419   : > { %v11999_v34 = vcombine.low %v7798_v40, %v7798_v40  ;;  %v16616_v29 = vld [vmem:[#allocation3 + $0x40] sm:$0xf]  ;;  %v16623_v57 = vcombine.low %v7798_v40, %v16618_v39  ;;  %v7829_v40 = vld [vmem:[#allocation3 + $0x3c] sm:$0x1]  ;;  %v8226_v30 = vor.u32 %v8225_v20, %v8221_v31  ;;  %17605 = vst [vmem:[#allocation26_spill] sm:$0xff] %v16636_v42 }
 0x41a   : > { %v7833_v41 = vld [vmem:[#allocation3 + $0x18] sm:$0xe]  ;;  %v7839_v53 = vld [vmem:[#allocation3 + $0x48] sm:$0xe]  ;;  %v16645_v26 = vrot.slane %v12024_v5, 1 }
 0x41b   : > { %8022 = vrot.lane.b32.xlu1 %v11999_v34, %s13684_s24  ;;  %8136 = vrot.lane.b32.xlu0 %v8128_v13, %s13684_s24  ;;  %v16626_v34 = vld [vmem:[#allocation3 + $0x38] sm:$0xf]  ;;  %v12022_v13 = vcombine.low %v16616_v29, %v7830_v45  ;;  %v7812_v6 = vld [vmem:[#allocation3 + $0x30] sm:$0xe]  ;;  %v7784_v5 = vld [vmem:[#allocation3 + $0x8] sm:$0xe] }
 0x41c   : > { %v12021_v62 = vcombine.low %v16626_v34, %v7829_v40  ;;  %v7813_v3 = vld [vmem:[#allocation3 + $0x38] sm:$0xe] }
 0x41d   : > { %v8237_v44 = vshll.u32 %v12022_v13, 16  ;;  %v7837_v31 = vld [vmem:[#allocation3 + $0x38] sm:$0xe]  ;;  %v8235_v48 = vshrl.u32 %v12022_v13, 16 }
 0x41f   : > { %7950 = vrot.lane.b32.xlu1 %v7935_v38, %s13684_s24  ;;  %8252 = vrot.lane.b32.xlu0 %v8212_v17, %s13684_s24  ;;  %v8218_v38 = vrot.slane %v8216_v16, 1  ;;  %v12012_v17 = vcombine.low %v7811_v23, %v16573_v10  ;;  %v8239_v16 = vrot.slane %v8237_v44, 1  ;;  %v7838_v10 = vld [vmem:[#allocation3 + $0x40] sm:$0xe]  ;;  %v8131_v23 = vrot.slane %v12011_v47, 1 }
 0x420   : > { %v12014_v44 = vcombine.low %v7813_v3, %v16609_v15  ;;  %v12030_v47 = vcombine.low %v7838_v10, %v7830_v45 }
 0x421   : > { %v8219_v56 = vor.u32 %v8218_v38, %v8214_v12  ;;  %v8132_v20 = vrot.slane %v12012_v17, 1  ;;  %v12029_v12 = vcombine.low %v7837_v31, %v7829_v40  ;;  %v8240_v21 = vor.u32 %v8239_v16, %v8235_v48  ;;  %v7814_v16 = vld [vmem:[#allocation3 + $0x40] sm:$0xe] }
 0x422   : > { %v12015_v10 = vcombine.low %v7814_v16, %v16618_v39  ;;  %v13428_v16 = vld [vmem:[%s17453_s3 + $0x98] sm:$0xff]  }
 0x423   : > { %8250 = vrot.lane.b32.xlu1 %v8205_v33, %s13684_s24  ;;  %8140 = vrot.lane.b32.xlu0 %v8130_v4, %s13684_s24  ;;  %v8230_v4 = vshll.u32 %v12021_v62, 16  ;;  %v7836_v33 = vld [vmem:[#allocation3 + $0x30] sm:$0xe]  ;;  %v16651_v13 = vrot.slane %v12029_v12, 1 }
 0x424   : > { %v12028_v38 = vcombine.low %v7836_v33, %v16588_v27 }
 0x425   : > { %v8232_v17 = vrot.slane %v8230_v4, 1  ;;  %v8134_v4 = vrot.slane %v12014_v44, 1 }
 0x427   : > { %8138 = vrot.lane.b32.xlu1 %v8129_v61, %s13684_s24  ;;  %8256 = vrot.lane.b32.xlu0 %v8226_v30, %s13684_s24  ;;  %v12023_v61 = vcombine.low %v16636_v42, %v7831_v63  ;;  %v12025_v30 = vcombine.low %v7833_v41, %v16568_v25  ;;  %v16653_v42 = vrot.slane %v12030_v47, 1  ;;  %v8228_v25 = vshrl.u32 %v12021_v62, 16 }
 0x428   : > { %v12013_v41 = vcombine.low %v7812_v6, %v16600_v0  ;;  %v8135_v0 = vrot.slane %v12015_v10, 1  ;;  %v7785_v10 = vld [vmem:[#allocation3 + $0x10] sm:$0xe] }
 0x429   : > { %v16647_v60 = vrot.slane %v12025_v30, 1  ;;  %v8244_v27 = vshll.u32 %v12023_v61, 16  ;;  %v8233_v40 = vor.u32 %v8232_v17, %v8228_v25  ;;  %v11985_v30 = vcombine.low %v7784_v5, %v16405_v22  ;;  %v13420_v22 = vld [vmem:[%s17453_s3 + $0x80] sm:$0xff]   ;;  %v13432_v5 = vld [vmem:[%s17453_s3 + $0xe8] sm:$0xff]  }
 0x42a   : > { %v8133_v33 = vrot.slane %v12013_v41, 1 }
 0x42b   : > { %8254 = vrot.lane.b32.xlu1 %v8219_v56, %s13684_s24  ;;  %8144 = vrot.lane.b32.xlu0 %v8132_v20, %s13684_s24  ;;  %v12031_v56 = vcombine.low %v7839_v53, %v7831_v63  ;;  %v16649_v20 = vrot.slane %v12028_v38, 1  ;;  %v12037_v15 = vcombine.low %v16645_v26, %v16647_v60  ;;  %v8246_v62 = vrot.slane %v8244_v27, 1  ;;  %v13614_v53 = vld [vmem:[#allocation3 + $0x4] sm:$0x1] }
 0x42c   : > { %v7977_v44 = vrot.slane %v11985_v30, 1 }
 0x42d   : > { %v16659_v45 = vrot.slane %v12031_v56, 1  ;;  %v12047_v63 = vcombine.low %v16649_v20, %v16651_v13  ;;  %v13615_v56 = vld [vmem:[#allocation3] sm:$0xf] }
 0x42f   : > { %8142 = vrot.lane.b32.xlu1 %v8131_v23, %s13684_s24  ;;  %8260 = vrot.lane.b32.xlu0 %v8240_v21, %s13684_s24  ;;  %v12052_v3 = vcombine.low %v16653_v42, %v16659_v45  ;;  %v8242_v21 = vshrl.u32 %v12023_v61, 16  ;;  %v7783_v23 = vld [vmem:[#allocation3] sm:$0xe] }
 0x430   : > { %v11984_v48 = vcombine.low %v7783_v23, %v13614_v53  ;;  %v13430_v23 = vld [vmem:[%s17453_s3 + $0xa0] sm:$0xff]   ;;  %v11986_v53 = vcombine.low %v7785_v10, %v16450_v37 }
 0x431   : > { %v8247_v31 = vor.u32 %v8246_v62, %v8242_v21  ;;  %v13423_v21 = vld [vmem:[%s17453_s3 + $0x88] sm:$0xff]   ;;  %v13425_v62 = vld [vmem:[%s17453_s3 + $0x90] sm:$0xff]  }
 0x432   : > { %v7976_v17 = vrot.slane %v11984_v48, 1 }
 0x433   : > { %8258 = vrot.lane.b32.xlu1 %v8233_v40, %s13684_s24  ;;  %8148 = vrot.lane.b32.xlu0 %v8134_v4, %s13684_s24  ;;  %v13422_v4 = vld [vmem:[%s17453_s3 + $0xc8] sm:$0xff]  }
 0x436   : > { %v8009_v61 = vpop.permute.xlu0 %8008 }
 0x437   : > { %8146 = vrot.lane.b32.xlu1 %v8133_v33, %s13684_s24  ;;  %v8322_v47 = vsel %vm7093_vm4, %v7976_v17, %v8009_v61  ;;  %v13427_v33 = vld [vmem:[%s17453_s3 + $0xd8] sm:$0xff]   ;;  %v13433_v61 = vld [vmem:[%s17453_s3 + $0xa8] sm:$0xff]   ;;  %v7978_v17 = vrot.slane %v11986_v53, 1 }
 0x43b   : > { %8262 = vrot.lane.b32.xlu1 %v8247_v31, %s13684_s24  ;;  %v13429_v31 = vld [vmem:[%s17453_s3 + $0xe0] sm:$0xff]  }
 0x43e   : > { %v7937_v38 = vpop.permute.xlu1 %7936 }
 0x43f   : > { %8150 = vrot.lane.b32.xlu1 %v8135_v0, %s13684_s24  ;;  %v8298_v39 = vsel %vm7093_vm4, %v13615_v56, %v7937_v38  ;;  %v7786_v0 = vld [vmem:[#allocation3 + $0x18] sm:$0xe] }
 0x440   : > { %v11987_v48 = vcombine.low %v7786_v0, %v16474_v9  ;;  %v13434_v38 = vld [vmem:[%s17453_s3 + $0xf0] sm:$0xff]  }
 0x441   : > { %v13435_v9 = vld [vmem:[%s17453_s3 + $0xb0] sm:$0xff]  }
 0x459   : > { %v8011_v12 = vpop.permute.xlu0 %8010 }
 0x45a   : > { %v8325_v6 = vsel %vm7093_vm4, %v7977_v44, %v8011_v12  ;;  %v7979_v44 = vrot.slane %v11987_v48, 1 }
 0x45b   : > { %v7939_v25 = vpop.permute.xlu1 %7938  ;;  %v12034_v27 = vcombine.low %v8322_v47, %v8325_v6  ;;  %v13436_v6 = vld [vmem:[%s17453_s3 + $0xf8] sm:$0xff]  }
 0x45c   : > { %v8301_v40 = vsel %vm7093_vm4, %v16389_v36, %v7939_v25  ;;  %v13424_v36 = vld [vmem:[%s17453_s3 + $0xd0] sm:$0xff]   ;;  %v7787_v25 = vld [vmem:[#allocation3 + $0x20] sm:$0xe] }
 0x45d   : > { %v12033_v41 = vcombine.low %v8298_v39, %v8301_v40  ;;  %8839 = vmatprep.mubr.bf16.mxu1 %v12034_v27  ;;  %v8013_v30 = vpop.permute.xlu0 %8012  ;;  %v7788_v27 = vld [vmem:[#allocation3 + $0x28] sm:$0xe]  ;;  %v13437_v40 = vld [vmem:[%s17453_s3 + $0xb8] sm:$0xff]  }
 0x45e   : > { %v8328_v47 = vsel %vm7093_vm4, %v7978_v17, %v8013_v30  ;;  %v7790_v17 = vld [vmem:[#allocation3 + $0x38] sm:$0xe] }
 0x45f   : > { %8840 = vmatmul.mubr.bf16.vlgmr.msra.gmra.mrb[32].mxu1 %v12033_v41 }
 0x460   : > { %12519 = vmatpush3.bf16.msra.mxu1 %v13420_v22  ;;  %v11988_v22 = vcombine.low %v7787_v25, %v16489_v58 }
 0x461   : > { %12520 = vmatprep.subr.bf16.mxu1 %v13422_v4  ;;  %v11989_v4 = vcombine.low %v7788_v27, %v16504_v54 }
 0x463   : > { %v7981_v10 = vrot.slane %v11989_v4, 1 }
 0x464   : > { %12521 = vmatpush3.bf16.msra.mxu1 %v13423_v21  ;;  %v16732_v21 = vld [vmem:[%s17453_s3 + $0x100] sm:$0xff]  }
 0x465   : > { %12522 = vmatprep.subr.bf16.mxu1 %v13424_v36 }
 0x468   : > { %12523 = vmatpush3.bf16.msra.mxu1 %v13425_v62 }
 0x469   : > { %12524 = vmatprep.subr.bf16.mxu1 %v13427_v33 }
 0x46c   : > { %12525 = vmatpush3.bf16.msra.mxu1 %v13428_v16 }
 0x46d   : > { %12526 = vmatprep.subr.bf16.mxu1 %v13429_v31  ;;  %v7980_v31 = vrot.slane %v11988_v22, 1  ;;  %v8058_v22 = vshll.u32 %v16563_v19, 16 }
 0x470   : > { %12527 = vmatpush3.bf16.msra.mxu1 %v13430_v23 }
 0x471   : > { %12528 = vmatprep.subr.bf16.mxu1 %v13432_v5 }
 0x472   : > { %v8015_v12 = vpop.permute.xlu1 %8014 }
 0x473   : > { %v8331_v37 = vsel %vm7093_vm4, %v7979_v44, %v8015_v12  ;;  %v11991_v12 = vcombine.low %v7790_v17, %v16543_v1  ;;  %v8063_v17 = vshrl.u32 %v16555_v2, 16 }
 0x474   : > { %12529 = vmatpush3.bf16.msra.mxu1 %v13433_v61  ;;  %v12039_v39 = vcombine.low %v8328_v47, %v8331_v37  ;;  %v7789_v61 = vld [vmem:[#allocation3 + $0x30] sm:$0xe]  ;;  %v13616_v37 = vld [vmem:[#allocation3 + $0x8] sm:$0xf] }
 0x475   : > { %v7941_v56 = vpop.permute.xlu0 %7940  ;;  %12530 = vmatprep.subr.bf16.mxu1 %v13434_v38  ;;  %v11990_v44 = vcombine.low %v7789_v61, %v16520_v24 }
 0x476   : > { %8847 = vmatprep.mubr.bf16.mxu1 %v12039_v39  ;;  %v8304_v62 = vsel %vm7093_vm4, %v16448_v49, %v7941_v56  ;;  %v7983_v39 = vrot.slane %v11991_v12, 1  ;;  %v8070_v12 = vshrl.u32 %v16585_v28, 16 }
 0x477   : > { %v7982_v56 = vrot.slane %v11990_v44, 1 }
 0x478   : > { %12531 = vmatpush3.bf16.msra.mxu1 %v13435_v9  ;;  %v12000_v9 = vcombine.low %v13616_v37, %v16565_v14  ;;  %v13440_v37 = vld [vmem:[%s17453_s3 + $0x110] sm:$0xff]  }
 0x479   : > { %v8017_v41 = vpop.permute.xlu0 %8016  ;;  %12532 = vmatprep.subr.bf16.mxu1 %v13436_v6 }
 0x47a   : > { %v7943_v36 = vpop.permute.xlu1 %7942  ;;  %v8334_v0 = vsel %vm7093_vm4, %v7980_v31, %v8017_v41 }
 0x47b   : > { %v8307_v33 = vsel %vm7093_vm4, %v16472_v18, %v7943_v36 }
 0x47c   : > { %v12038_v16 = vcombine.low %v8304_v62, %v8307_v33  ;;  %12533 = vmatpush3.bf16.msra.mxu1 %v13437_v40  ;;  %v8051_v40 = vshll.u32 %v12000_v9, 16  ;;  %v8060_v62 = vrot.slane %v8058_v22, 1  ;;  %v8077_v22 = vshrl.u32 %v16581_v11, 16 }
 0x47d   : > { %v7945_v58 = vpop.permute.xlu0 %7944  ;;  %12970 = vmatprep.subr.bf16.mxu1 %v16732_v21 }
 0x47e   : > { %8848 = vmatmul.mubr.bf16.gmra.mrb[36].mxu1 %v12038_v16  ;;  %v8019_v54 = vpop.permute.xlu1 %8018  ;;  %v8310_v18 = vsel %vm7093_vm4, %v16477_v8, %v7945_v58  ;;  %v8053_v36 = vrot.slane %v8051_v40, 1  ;;  %v8049_v16 = vshrl.u32 %v12000_v9, 16  ;;  %v8079_v9 = vshll.u32 %v16581_v11, 16 }
 0x47f   : > { %v8337_v23 = vsel %vm7093_vm4, %v7981_v10, %v8019_v54  ;;  %v8056_v10 = vshrl.u32 %v16563_v19, 16 }
 0x480   : > { %v12044_v5 = vcombine.low %v8334_v0, %v8337_v23  ;;  %v8054_v23 = vor.u32 %v8053_v36, %v8049_v16 }
 0x481   : > { %v8021_v53 = vpop.permute.xlu0 %8020 }
 0x482   : > { %8855 = vmatprep.mubr.bf16.mxu1 %v12044_v5  ;;  %v7947_v49 = vpop.permute.xlu1 %7946  ;;  %v8340_v25 = vsel %vm7093_vm4, %v7982_v56, %v8021_v53  ;;  %v8061_v5 = vor.u32 %v8060_v62, %v8056_v10  ;;  %v8086_v56 = vshll.u32 %v16606_v52, 16 }
 0x483   : > { %v8313_v48 = vsel %vm7093_vm4, %v16498_v59, %v7947_v49 }
 0x484   : > { %v12043_v30 = vcombine.low %v8310_v18, %v8313_v48 }
 0x485   : > { %v7949_v38 = vpop.permute.xlu0 %7948 }
 0x486   : > { %8856 = vmatmul.mubr.bf16.gmra.mrb[40].mxu1 %v12043_v30  ;;  %v8316_v1 = vsel %vm7093_vm4, %v16509_v35, %v7949_v38  ;;  %v8065_v35 = vshll.u32 %v16555_v2, 16 }
 0x488   : > { %v8067_v19 = vrot.slane %v8065_v35, 1 }
 0x489   : > { %v8249_v47 = vpop.permute.xlu0 %8248 }
 0x48a   : > { %v8370_v31 = vsel %vm7093_vm4, %v16513_v55, %v8249_v47 }
 0x48d   : > { %v8023_v6 = vpop.permute.xlu1 %8022  ;;  %v8137_v8 = vpop.permute.xlu0 %8136 }
 0x48e   : > { %v8343_v59 = vsel %vm7093_vm4, %v7983_v39, %v8023_v6  ;;  %v8346_v49 = vsel %vm7093_vm4, %v8054_v23, %v8137_v8  ;;  %v13441_v8 = vld [vmem:[%s17453_s3 + $0x118] sm:$0xff]  }
 0x48f   : > { %v12049_v27 = vcombine.low %v8340_v25, %v8343_v59  ;;  %v8081_v25 = vrot.slane %v8079_v9, 1  ;;  %v8088_v59 = vrot.slane %v8086_v56, 1 }
 0x491   : > { %8863 = vmatprep.mubr.bf16.mxu1 %v12049_v27  ;;  %v7951_v24 = vpop.permute.xlu1 %7950  ;;  %v8253_v41 = vpop.permute.xlu0 %8252  ;;  %v8082_v36 = vor.u32 %v8081_v25, %v8077_v22 }
 0x492   : > { %v8319_v14 = vsel %vm7093_vm4, %v16538_v50, %v7951_v24  ;;  %v8072_v50 = vshll.u32 %v16585_v28, 16  ;;  %v8376_v38 = vsel %vm7093_vm4, %v16540_v46, %v8253_v41  ;;  %v8068_v46 = vor.u32 %v8067_v19, %v8063_v17 }
 0x493   : > { %v12048_v4 = vcombine.low %v8316_v1, %v8319_v14  ;;  %v8084_v41 = vshrl.u32 %v16606_v52, 16  ;;  %v8093_v14 = vshll.u32 %v16614_v32, 16 }
 0x494   : > { %v8074_v48 = vrot.slane %v8072_v50, 1  ;;  %v8098_v50 = vshrl.u32 %v16623_v57, 16 }
 0x495   : > { %8864 = vmatmul.mubr.bf16.gmra.mrb[44].mxu1 %v12048_v4  ;;  %v8251_v33 = vpop.permute.xlu1 %8250  ;;  %v8141_v0 = vpop.permute.xlu0 %8140  ;;  %v8100_v4 = vshll.u32 %v16623_v57, 16  ;;  %v8089_v62 = vor.u32 %v8088_v59, %v8084_v41 }
 0x496   : > { %v8373_v58 = vsel %vm7093_vm4, %v16559_v51, %v8251_v33  ;;  %v13439_v51 = vld [vmem:[%s17453_s3 + $0x108] sm:$0xff]   ;;  %v8075_v39 = vor.u32 %v8074_v48, %v8070_v12 }
 0x497   : > { %v12036_v54 = vcombine.low %v8370_v31, %v8373_v58  ;;  %v8095_v31 = vrot.slane %v8093_v14, 1  ;;  %v8102_v52 = vrot.slane %v8100_v4, 1 }
 0x499   : > { %8904 = vmatprep.mubr.bf16.mxu1 %v12036_v54  ;;  %v8139_v53 = vpop.permute.xlu1 %8138  ;;  %v8257_v30 = vpop.permute.xlu0 %8256  ;;  %v8091_v54 = vshrl.u32 %v16614_v32, 16  ;;  %v17607_v32 = vld [vmem:[#allocation24_spill] sm:$0xff] }
 0x49a   : > { %v8349_v18 = vsel %vm7093_vm4, %v8061_v5, %v8139_v53  ;;  %v8382_v40 = vsel %vm7093_vm4, %v16577_v7, %v8257_v30 }
 0x49b   : > { %v12035_v55 = vcombine.low %v8346_v49, %v8349_v18  ;;  %v8096_v53 = vor.u32 %v8095_v31, %v8091_v54  ;;  %v8103_v49 = vor.u32 %v8102_v52, %v8098_v50 }
 0x49d   : > { %8905 = vmatmul.mubr.bf16.vlgmr.msra.gmra.mrb[48].mxu1 %v12035_v55  ;;  %v8255_v61 = vpop.permute.xlu1 %8254  ;;  %v8145_v28 = vpop.permute.xlu0 %8144 }
 0x49e   : > { %12971 = vmatpush3.bf16.msra.mxu1 %v16732_v21  ;;  %v8379_v44 = vsel %vm7093_vm4, %v16596_v43, %v8255_v61  ;;  %v8352_v21 = vsel %vm7093_vm4, %v8068_v46, %v8141_v0  ;;  %v8358_v7 = vsel %vm7093_vm4, %v8082_v36, %v8145_v28  ;;  %v17606_v0 = vld [vmem:[#allocation26_spill] sm:$0xff]  ;;  %v12032_v28 = vld [vmem:[%s17454_s4] ss:$0 sm:$0xff] }
 0x49f   : > { %v12041_v47 = vcombine.low %v8376_v38, %v8379_v44  ;;  %12972 = vmatprep.subr.bf16.mxu1 %v13439_v51  ;;  %v17610_v38 = vmov 0  }
 0x4a0   : > { %9461 = vst.msk [vmem:[#allocation4 + $0x8] sm:$0x7] %vm9458_vm9, %v17610_v38  ;;  %9459 = vst.msk [vmem:[#allocation4] sm:$0x7] %vm9458_vm9, %v17610_v38 }
 0x4a1   : > { %8912 = vmatprep.mubr.bf16.mxu1 %v12041_v47  ;;  %v8143_v2 = vpop.permute.xlu1 %8142  ;;  %v8261_v33 = vpop.permute.xlu0 %8260  ;;  %9460 = vst.msk [vmem:[#allocation4 + $0x4] sm:$0x7] %vm9458_vm9, %v17610_v38  ;;  %9462 = vst.msk [vmem:[#allocation4 + $0xc] sm:$0x7] %vm9458_vm9, %v17610_v38 }
 0x4a2   : > { %v8355_v43 = vsel %vm7093_vm4, %v8075_v39, %v8143_v2  ;;  %12973 = vmatpush3.bf16.msra.mxu1 %v13439_v51  ;;  %v8388_v10 = vsel %vm7093_vm4, %v16616_v29, %v8261_v33  ;;  %v17608_v29 = vld [vmem:[#allocation25_spill] sm:$0xff]  ;;  %9463 = vst.msk [vmem:[#allocation4 + $0x10] sm:$0x7] %vm9458_vm9, %v17610_v38  ;;  %9464 = vst.msk [vmem:[#allocation4 + $0x14] sm:$0x7] %vm9458_vm9, %v17610_v38 }
 0x4a3   : > { %v12040_v6 = vcombine.low %v8352_v21, %v8355_v43  ;;  %12974 = vmatprep.subr.bf16.mxu1 %v13440_v37  ;;  %v17609_v57 = vcombine.low %v17607_v32, %v17608_v29 }
 0x4a5   : > { %8913 = vmatmul.mubr.bf16.gmra.mrb[52].mxu1 %v12040_v6  ;;  %v8259_v27 = vpop.permute.xlu1 %8258  ;;  %v8149_v23 = vpop.permute.xlu0 %8148 }
 0x4a6   : > { %v8385_v24 = vsel %vm7093_vm4, %v16626_v34, %v8259_v27  ;;  %12975 = vmatpush3.bf16.msra.mxu1 %v13440_v37  ;;  %v8364_v55 = vsel %vm7093_vm4, %v8096_v53, %v8149_v23 }
 0x4a7   : > { %v12046_v1 = vcombine.low %v8382_v40, %v8385_v24  ;;  %12976 = vmatprep.subr.bf16.mxu1 %v13441_v8 }
 0x4a9   : > { %8920 = vmatprep.mubr.bf16.mxu1 %v12046_v1  ;;  %v8147_v16 = vpop.permute.xlu1 %8146  ;;  %v13448_v1 = vld [vmem:[#allocation4] ss:$0 sps:$4 sm:$0x77]  }
 0x4aa   : > { %v8361_v11 = vsel %vm7093_vm4, %v8089_v62, %v8147_v16  ;;  %12977 = vmatpush3.bf16.msra.mxu1 %v13441_v8  ;;  %v9633_v4 = vshll.u32 %v13448_v1, 16  ;;  %v9631_v62 = vshrl.u32 %v13448_v1, 16 }
 0x4ab   : > { %v12045_v34 = vcombine.low %v8358_v7, %v8361_v11 }
 0x4ac   : > { %v9635_v33 = vrot.slane %v9633_v4, 1 }
 0x4ad   : > { %8921 = vmatmul.mubr.bf16.gmra.mrb[56].mxu1 %v12045_v34  ;;  %v8263_v58 = vpop.permute.xlu1 %8262 }
 0x4ae   : > { %v8391_v35 = vsel %vm7093_vm4, %v17606_v0, %v8263_v58  ;;  %v9636_v31 = vor.u32 %v9635_v33, %v9631_v62 }
 0x4af   : > { %v12051_v5 = vcombine.low %v8388_v10, %v8391_v35 }
 0x4b0   : > { %9658 = vrot.lane.b32.xlu0 %v9636_v31, %s13684_s24 }
 0x4b1   : > { %8928 = vmatprep.mubr.bf16.mxu1 %v12051_v5  ;;  %v8151_v18 = vpop.permute.xlu1 %8150 }
 0x4b2   : > { %v8367_v51 = vsel %vm7093_vm4, %v8103_v49, %v8151_v18 }
 0x4b3   : > { %v12050_v19 = vcombine.low %v8364_v55, %v8367_v51 }
 0x4b5   : > { %8929 = vmatmul.mubr.bf16.gmra.mrb[60].mxu1 %v12050_v19 }
 0x4b6   : > { %12978 = vmatprep.mubr.msk.bf16.mxu1 %vm7093_vm4, %v12037_v15 }
 0x4bd   : > { %12979 = vmatmul.mubr.msk.bf16.vlgmr.msra.gmra.mrb[64].mxu1 %vm7093_vm4, %v17609_v57 }
 0x4be   : > { %12982 = vmatprep.mubr.msk.bf16.mxu1 %vm7093_vm4, %v12047_v63 }
 0x4c5   : > { %12983 = vmatmul.mubr.msk.bf16.gmra.mrb[68].mxu1 %vm7093_vm4, %v12052_v3 }
 0x532   : > { %v12494_v48 = vpop.f32.mrb[32].mxu1 }
 0x533   : > { %v12495_v30 = vpop.f32.mrb[33].mxu1 }
 0x534   : > { %v12496_v26 = vadd.f32 %v12495_v30, %v12494_v48  ;;  %v12497_v60 = vpop.f32.mrb[34].mxu1 }
 0x535   : > { %v12498_v15 = vpop.f32.mrb[35].mxu1 }
 0x536   : > { %v12499_v61 = vadd.f32 %v12498_v15, %v12497_v60  ;;  %v8842_v25 = vadd.f32 %v12496_v26, %v12032_v28 }
 0x538   : > { %v8845_v22 = vadd.f32 %v12499_v61, %v12032_v28 }
 0x551   : > { %v12500_v42 = vpop.f32.mrb[36].mxu1 }
 0x552   : > { %v12501_v20 = vpop.f32.mrb[37].mxu1 }
 0x553   : > { %v12502_v13 = vadd.f32 %v12501_v20, %v12500_v42  ;;  %v12503_v45 = vpop.f32.mrb[38].mxu1 }
 0x554   : > { %v12504_v63 = vpop.f32.mrb[39].mxu1 }
 0x555   : > { %v12505_v3 = vadd.f32 %v12504_v63, %v12503_v45  ;;  %v8850_v7 = vadd.f32 %v12502_v13, %v12032_v28 }
 0x557   : > { %v8853_v58 = vadd.f32 %v12505_v3, %v12032_v28 }
 0x559   : > { %v12506_v17 = vpop.f32.mrb[40].mxu1 }
 0x55a   : > { %v12507_v44 = vpop.f32.mrb[41].mxu1 }
 0x55b   : > { %v12508_v12 = vadd.f32 %v12507_v44, %v12506_v17  ;;  %v12509_v47 = vpop.f32.mrb[42].mxu1 }
 0x55c   : > { %v12510_v37 = vpop.f32.mrb[43].mxu1 }
 0x55d   : > { %v12511_v9 = vadd.f32 %v12510_v37, %v12509_v47  ;;  %v8858_v23 = vadd.f32 %v12508_v12, %v12032_v28 }
 0x55f   : > { %v8861_v18 = vadd.f32 %v12511_v9, %v12032_v28  ;;  %v17611_v9 = vld [vmem:[#allocation23_spill] sm:$0xff] }
 0x568   : > { %v12512_v56 = vpop.f32.mrb[44].mxu1 }
 0x569   : > { %v12513_v46 = vpop.f32.mrb[45].mxu1 }
 0x56a   : > { %v12514_v39 = vadd.f32 %v12513_v46, %v12512_v56  ;;  %v12515_v2 = vpop.f32.mrb[46].mxu1 }
 0x56b   : > { %v12516_v21 = vpop.f32.mrb[47].mxu1 }
 0x56c   : > { %v12517_v43 = vadd.f32 %v12516_v21, %v12515_v2  ;;  %v8866_v57 = vadd.f32 %v12514_v39, %v12032_v28 }
 0x56e   : > { %v8869_v60 = vadd.f32 %v12517_v43, %v12032_v28 }
 0x570   : > { %v12534_v6 = vpop.f32.mrb[48].mxu1 }
 0x571   : > { %v12535_v8 = vpop.f32.mrb[49].mxu1 }
 0x572   : > { %v12536_v59 = vadd.f32 %v12535_v8, %v12534_v6  ;;  %v12537_v27 = vpop.f32.mrb[50].mxu1 }
 0x573   : > { %v12538_v40 = vpop.f32.mrb[51].mxu1 }
 0x574   : > { %v12539_v24 = vadd.f32 %v12538_v40, %v12537_v27  ;;  %v8907_v41 = vadd.f32 %v12536_v59, %v8842_v25 }
 0x576   : > { %v8910_v14 = vadd.f32 %v12539_v24, %v8845_v22 }
 0x578   : > { %v12540_v36 = vpop.f32.mrb[52].mxu1 }
 0x579   : > { %v12541_v16 = vpop.f32.mrb[53].mxu1 }
 0x57a   : > { %v12542_v11 = vadd.f32 %v12541_v16, %v12540_v36  ;;  %v12543_v34 = vpop.f32.mrb[54].mxu1 }
 0x57b   : > { %v12544_v52 = vpop.f32.mrb[55].mxu1 }
 0x57c   : > { %v12545_v10 = vadd.f32 %v12544_v52, %v12543_v34  ;;  %v8915_v54 = vadd.f32 %v12542_v11, %v8850_v7 }
 0x57e   : > { %v8918_v0 = vadd.f32 %v12545_v10, %v8853_v58 }
 0x580   : > { %v12546_v35 = vpop.f32.mrb[56].mxu1 }
 0x581   : > { %v12547_v50 = vpop.f32.mrb[57].mxu1 }
 0x582   : > { %v12548_v5 = vadd.f32 %v12547_v50, %v12546_v35  ;;  %v12549_v53 = vpop.f32.mrb[58].mxu1 }
 0x583   : > { %v12550_v49 = vpop.f32.mrb[59].mxu1 }
 0x584   : > { %v12551_v55 = vadd.f32 %v12550_v49, %v12549_v53  ;;  %v16834_v51 = vadd.f32 %v12548_v5, %v8858_v23 }
 0x586   : > { %v16836_v19 = vadd.f32 %v12551_v55, %v8861_v18 }
 0x588   : > { %v12552_v32 = vpop.f32.mrb[60].mxu1 }
 0x589   : > { %v12553_v29 = vpop.f32.mrb[61].mxu1 }
 0x58a   : > { %v12554_v48 = vadd.f32 %v12553_v29, %v12552_v32  ;;  %v12555_v30 = vpop.f32.mrb[62].mxu1 }
 0x58b   : > { %v12556_v26 = vpop.f32.mrb[63].mxu1 }
 0x58c   : > { %v12557_v15 = vadd.f32 %v12556_v26, %v12555_v30  ;;  %v16838_v61 = vadd.f32 %v12554_v48, %v8866_v57 }
 0x58e   : > { %v16840_v38 = vadd.f32 %v12557_v15, %v8869_v60 }
 0x590   : > { %v12980_v42 = vpop.f32.mrb[64].mxu1 }
 0x591   : > { %v8980_v20 = vadd.f32 %v12980_v42, %v8915_v54  ;;  %v8971_v13 = vpop.f32.mrb[65].mxu1 }
 0x592   : > { %v8972_v45 = vadd.f32 %v8971_v13, %v8907_v41  ;;  %v12981_v63 = vpop.f32.mrb[66].mxu1 }
 0x593   : > { %v9004_v3 = vmax.f32 %v8980_v20, 0.0  ;;  %v8983_v17 = vadd.f32 %v12981_v63, %v8918_v0  ;;  %v8974_v44 = vpop.f32.mrb[67].mxu1 }
 0x594   : > { %v9002_v12 = vmax.f32 %v8972_v45, 0.0  ;;  %v8975_v47 = vadd.f32 %v8974_v44, %v8910_v14 }
 0x595   : > { %v9052_v37 = vcombine.high %v9004_v3, %v9004_v3  ;;  %v9059_v56 = vrot.slane %v9004_v3, %v17611_v9  ;;  %v16843_v46 = vmax.f32 %v8983_v17, 0.0 }
 0x596   : > { %v9018_v39 = vcombine.high %v9002_v12, %v9002_v12  ;;  %v9025_v2 = vrot.slane %v9002_v12, %v17611_v9  ;;  %v16846_v21 = vmax.f32 %v8975_v47, 0.0 }
 0x597   : > { %v9066_v43 = vrot.slane %v9052_v37, %v17611_v9  ;;  %v9067_v28 = vcombine.high %v9059_v56, %v9059_v56  ;;  %v9242_v6 = vsel %vm6196_vm1, %v9059_v56, -inf  ;;  %v9069_v8 = vcombine.high %v16843_v46, %v16843_v46 }
 0x598   : > { %v9243_v25 = vrot.slane %v9242_v6, 4  ;;  %v9032_v59 = vrot.slane %v9018_v39, %v17611_v9  ;;  %v9033_v27 = vcombine.high %v9025_v2, %v9025_v2  ;;  %v9186_v40 = vsel %vm6196_vm1, %v9025_v2, -inf  ;;  %v16854_v22 = vpop.f32.mrb[68].mxu1  ;;  %v13464_v2 = vld [vmem:[%s17455_s5 + $0x40] sm:$0xff]  }
 0x599   : > { %v9068_v24 = vcombine.high %v9066_v43, %v9066_v43  ;;  %v9249_v41 = vsel %vm6196_vm1, %v9067_v28, -inf  ;;  %v9256_v1 = vsel %vm6196_vm1, %v9066_v43, -inf  ;;  %v9187_v14 = vrot.slane %v9186_v40, 4  ;;  %v16858_v4 = vpop.f32.mrb[69].mxu1  ;;  %v13465_v43 = vld [vmem:[%s17455_s5] sm:$0xff]   ;;  %12566 = vmatprep.subr.bf16.mxu1 %v13464_v2 }
 0x59a   : > { %v9244_v36 = vmax.f32 %v9242_v6, %v9243_v25  ;;  %v9250_v62 = vrot.slane %v9249_v41, 4  ;;  %v9257_v33 = vrot.slane %v9256_v1, 4  ;;  %v9034_v16 = vcombine.high %v9032_v59, %v9032_v59  ;;  %v16860_v7 = vpop.f32.mrb[70].mxu1  ;;  %12567 = vmatpush3.bf16.msra.mxu1 %v13465_v43 }
 0x59b   : > { %v9263_v11 = vsel %vm6196_vm1, %v9068_v24, -inf  ;;  %v9188_v34 = vmax.f32 %v9186_v40, %v9187_v14  ;;  %v9193_v31 = vsel %vm6196_vm1, %v9033_v27, -inf  ;;  %v9200_v52 = vsel %vm6196_vm1, %v9032_v59, -inf  ;;  %v16865_v58 = vpop.f32.mrb[71].mxu1 }
 0x59c   : > { %v9245_v10 = vrot.slane %v9244_v36, 2  ;;  %v9251_v54 = vmax.f32 %v9249_v41, %v9250_v62  ;;  %v9258_v0 = vmax.f32 %v9256_v1, %v9257_v33  ;;  %v9264_v35 = vrot.slane %v9263_v11, 4 }
 0x59d   : > { %v9189_v50 = vrot.slane %v9188_v34, 2  ;;  %v9194_v23 = vrot.slane %v9193_v31, 4  ;;  %v9201_v5 = vrot.slane %v9200_v52, 4  ;;  %v9207_v53 = vsel %vm6196_vm1, %v9034_v16, -inf }
 0x59e   : > { %v9246_v49 = vmax.f32 %v9244_v36, %v9245_v10  ;;  %v9252_v18 = vrot.slane %v9251_v54, 2  ;;  %v9259_v55 = vrot.slane %v9258_v0, 2  ;;  %v9265_v32 = vmax.f32 %v9263_v11, %v9264_v35 }
 0x59f   : > { %v9190_v29 = vmax.f32 %v9188_v34, %v9189_v50  ;;  %v9195_v57 = vmax.f32 %v9193_v31, %v9194_v23  ;;  %v9202_v48 = vmax.f32 %v9200_v52, %v9201_v5  ;;  %v9208_v30 = vrot.slane %v9207_v53, 4 }
 0x5a0   : > { %v9247_v26 = vrot.slane %v9246_v49, 1  ;;  %v9253_v60 = vmax.f32 %v9251_v54, %v9252_v18  ;;  %v9260_v15 = vmax.f32 %v9258_v0, %v9259_v55  ;;  %v9266_v42 = vrot.slane %v9265_v32, 2 }
 0x5a1   : > { %v9191_v20 = vrot.slane %v9190_v29, 1  ;;  %v9196_v13 = vrot.slane %v9195_v57, 2  ;;  %v9203_v45 = vrot.slane %v9202_v48, 2  ;;  %v9209_v63 = vmax.f32 %v9207_v53, %v9208_v30 }
 0x5a2   : > { %v9248_v3 = vmax.f32 %v9246_v49, %v9247_v26  ;;  %v9254_v17 = vrot.slane %v9253_v60, 1  ;;  %v9261_v44 = vrot.slane %v9260_v15, 1  ;;  %v9267_v12 = vmax.f32 %v9265_v32, %v9266_v42 }
 0x5a3   : > { %v9192_v47 = vmax.f32 %v9190_v29, %v9191_v20  ;;  %v9197_v37 = vmax.f32 %v9195_v57, %v9196_v13  ;;  %v9204_v56 = vmax.f32 %v9202_v48, %v9203_v45  ;;  %v9210_v39 = vrot.slane %v9209_v63, 2 }
 0x5a4   : > { %v9255_v28 = vmax.f32 %v9253_v60, %v9254_v17  ;;  %v9262_v6 = vmax.f32 %v9260_v15, %v9261_v44  ;;  %v9268_v25 = vrot.slane %v9267_v12, 1  ;;  %v16875_v59 = vsel %vm7093_vm4, %v9248_v3, -inf }
 0x5a5   : > { %v9198_v27 = vrot.slane %v9197_v37, 1  ;;  %v9205_v40 = vrot.slane %v9204_v56, 1  ;;  %v9211_v24 = vmax.f32 %v9209_v63, %v9210_v39  ;;  %v16878_v41 = vsel %vm7093_vm4, %v9192_v47, -inf }
 0x5a6   : > { %v9269_v1 = vmax.f32 %v9267_v12, %v9268_v25  ;;  %v16881_v14 = vsel %vm7093_vm4, %v9255_v28, -inf  ;;  %v16884_v36 = vsel %vm7093_vm4, %v9262_v6, -inf  ;;  %v9076_v62 = vrot.slane %v16843_v46, %v17611_v9 }
 0x5a7   : > { %v9199_v33 = vmax.f32 %v9197_v37, %v9198_v27  ;;  %v9206_v16 = vmax.f32 %v9204_v56, %v9205_v40  ;;  %v9212_v11 = vrot.slane %v9211_v24, 1  ;;  %v9083_v34 = vrot.slane %v9069_v8, %v17611_v9 }
 0x5a8   : > { %v16893_v31 = vsel %vm7093_vm4, %v9269_v1, -inf  ;;  %v9084_v52 = vcombine.high %v9076_v62, %v9076_v62  ;;  %v9270_v10 = vsel %vm6196_vm1, %v9076_v62, -inf  ;;  %v9035_v54 = vcombine.high %v16846_v21, %v16846_v21 }
 0x5a9   : > { %v9213_v0 = vmax.f32 %v9211_v24, %v9212_v11  ;;  %v16899_v35 = vsel %vm7093_vm4, %v9199_v33, -inf  ;;  %v16902_v50 = vsel %vm7093_vm4, %v9206_v16, -inf  ;;  %v9085_v23 = vcombine.high %v9083_v34, %v9083_v34 }
 0x5aa   : > { %v9271_v5 = vrot.slane %v9270_v10, 4  ;;  %v9277_v46 = vsel %vm6196_vm1, %v9084_v52, -inf  ;;  %v9284_v8 = vsel %vm6196_vm1, %v9083_v34, -inf  ;;  %v9042_v53 = vrot.slane %v16846_v21, %v17611_v9 }
 0x5ab   : > { %v16909_v49 = vsel %vm7093_vm4, %v9213_v0, -inf  ;;  %v9278_v18 = vrot.slane %v9277_v46, 4  ;;  %v9285_v55 = vrot.slane %v9284_v8, 4  ;;  %v9291_v32 = vsel %vm6196_vm1, %v9085_v23, -inf }
 0x5ac   : > { %v9272_v29 = vmax.f32 %v9270_v10, %v9271_v5  ;;  %v9292_v57 = vrot.slane %v9291_v32, 4  ;;  %v9049_v48 = vrot.slane %v9035_v54, %v17611_v9  ;;  %v9050_v30 = vcombine.high %v9042_v53, %v9042_v53 }
 0x5ad   : > { %v9279_v26 = vmax.f32 %v9277_v46, %v9278_v18  ;;  %v9286_v60 = vmax.f32 %v9284_v8, %v9285_v55  ;;  %v9214_v15 = vsel %vm6196_vm1, %v9042_v53, -inf  ;;  %v16916_v42 = vadd.f32 %v16854_v22, %v16838_v61 }
 0x5ae   : > { %v9273_v21 = vrot.slane %v9272_v29, 2  ;;  %v9293_v20 = vmax.f32 %v9291_v32, %v9292_v57  ;;  %v9051_v13 = vcombine.high %v9049_v48, %v9049_v48  ;;  %v9215_v45 = vrot.slane %v9214_v15, 4 }
 0x5af   : > { %v9280_v63 = vrot.slane %v9279_v26, 2  ;;  %v9287_v3 = vrot.slane %v9286_v60, 2  ;;  %v9221_v17 = vsel %vm6196_vm1, %v9050_v30, -inf  ;;  %v9228_v44 = vsel %vm6196_vm1, %v9049_v48, -inf }
 0x5b0   : > { %v9274_v12 = vmax.f32 %v9272_v29, %v9273_v21  ;;  %v9294_v47 = vrot.slane %v9293_v20, 2  ;;  %v9216_v37 = vmax.f32 %v9214_v15, %v9215_v45  ;;  %v9222_v56 = vrot.slane %v9221_v17, 4 }
 0x5b1   : > { %v9281_v39 = vmax.f32 %v9279_v26, %v9280_v63  ;;  %v9288_v2 = vmax.f32 %v9286_v60, %v9287_v3  ;;  %v9229_v43 = vrot.slane %v9228_v44, 4  ;;  %v9235_v61 = vsel %vm6196_vm1, %v9051_v13, -inf }
 0x5b2   : > { %v9275_v22 = vrot.slane %v9274_v12, 1  ;;  %v9295_v28 = vmax.f32 %v9293_v20, %v9294_v47  ;;  %v9217_v6 = vrot.slane %v9216_v37, 2  ;;  %v9223_v25 = vmax.f32 %v9221_v17, %v9222_v56 }
 0x5b3   : > { %v9282_v27 = vrot.slane %v9281_v39, 1  ;;  %v9289_v40 = vrot.slane %v9288_v2, 1  ;;  %v9230_v24 = vmax.f32 %v9228_v44, %v9229_v43  ;;  %v9236_v1 = vrot.slane %v9235_v61, 4 }
 0x5b4   : > { %v9276_v62 = vmax.f32 %v9274_v12, %v9275_v22  ;;  %v9296_v33 = vrot.slane %v9295_v28, 1  ;;  %v9218_v16 = vmax.f32 %v9216_v37, %v9217_v6  ;;  %v9224_v11 = vrot.slane %v9223_v25, 2 }
 0x5b5   : > { %v9283_v34 = vmax.f32 %v9281_v39, %v9282_v27  ;;  %v9290_v52 = vmax.f32 %v9288_v2, %v9289_v40  ;;  %v9231_v10 = vrot.slane %v9230_v24, 2  ;;  %v9237_v54 = vmax.f32 %v9235_v61, %v9236_v1  ;;  %v13477_v27 = vld [vmem:[%s17455_s5 + $0x20] sm:$0xff]  }
 0x5b6   : > { %v9297_v0 = vmax.f32 %v9295_v28, %v9296_v33  ;;  %v9423_v23 = vsel %vm7093_vm4, %v9276_v62, -inf  ;;  %v9219_v5 = vrot.slane %v9218_v16, 1  ;;  %v9225_v46 = vmax.f32 %v9223_v25, %v9224_v11 }
 0x5b7   : > { %v9424_v8 = vmax.f32 %v16875_v59, %v9423_v23  ;;  %v9426_v53 = vsel %vm7093_vm4, %v9283_v34, -inf  ;;  %v9429_v18 = vsel %vm7093_vm4, %v9290_v52, -inf  ;;  %v9232_v55 = vmax.f32 %v9230_v24, %v9231_v10 }
 0x5b8   : > { %v9427_v32 = vmax.f32 %v16881_v14, %v9426_v53  ;;  %v9430_v29 = vmax.f32 %v16884_v36, %v9429_v18  ;;  %v9432_v57 = vsel %vm7093_vm4, %v9297_v0, -inf  ;;  %v9220_v48 = vmax.f32 %v9218_v16, %v9219_v5 }
 0x5b9   : > { %v9433_v30 = vmax.f32 %v16893_v31, %v9432_v57  ;;  %v12313_v26 = vpack.c.bf16 %v9424_v8, %v9424_v8  ;;  %v9226_v60 = vrot.slane %v9225_v46, 1  ;;  %v9233_v15 = vrot.slane %v9232_v55, 1 }
 0x5ba   : > { %v12314_v21 = vpack.c.bf16 %v9427_v32, %v9427_v32  ;;  %v12315_v20 = vpack.c.bf16 %v9430_v29, %v9430_v29  ;;  %v9238_v59 = vrot.slane %v9237_v54, 2  ;;  %v9411_v13 = vsel %vm7093_vm4, %v9220_v48, -inf }
 0x5bb   : > { %v12316_v45 = vpack.c.bf16 %v9433_v30, %v9433_v30  ;;  %v9533_v63 = vunpack.c.l.b16 %v12313_v26  ;;  %v9227_v3 = vmax.f32 %v9225_v46, %v9226_v60  ;;  %v9234_v17 = vmax.f32 %v9232_v55, %v9233_v15 }
 0x5bc   : > { %v9534_v14 = vunpack.c.l.b16 %v12314_v21  ;;  %v9535_v44 = vunpack.c.l.b16 %v12315_v20  ;;  %v9239_v36 = vmax.f32 %v9237_v54, %v9238_v59  ;;  %v9412_v12 = vmax.f32 %v16878_v41, %v9411_v13  ;;  %v9569_v13 = vld [vmem:[#allocation4 + $0x4] sm:$0x7] }
 0x5bd   : > { %v9536_v47 = vunpack.c.l.b16 %v12316_v45  ;;  %v9414_v31 = vsel %vm7093_vm4, %v9227_v3, -inf  ;;  %v9417_v37 = vsel %vm7093_vm4, %v9234_v17, -inf  ;;  %v9008_v56 = vmax.f32 %v16916_v42, 0.0  ;;  %v9572_v42 = vld [vmem:[#allocation4 + $0x8] sm:$0x7] }
 0x5be   : > { %v9548_v39 = vsel %vm7628_vm5, %v9534_v14, %v9533_v63  ;;  %v9240_v2 = vrot.slane %v9239_v36, 1  ;;  %v9415_v43 = vmax.f32 %v16899_v35, %v9414_v31  ;;  %v9418_v61 = vmax.f32 %v16902_v50, %v9417_v37 }
 0x5bf   : > { %v9549_v22 = vsel %vm7630_vm7, %v9535_v44, %v9548_v39  ;;  %v12309_v28 = vpack.c.bf16 %v9412_v12, %v9412_v12  ;;  %v9120_v6 = vcombine.high %v9008_v56, %v9008_v56  ;;  %v9127_v41 = vrot.slane %v9008_v56, %v17611_v9 }
 0x5c0   : > { %v9550_v25 = vsel %vm7632_vm8, %v9536_v47, %v9549_v22  ;;  %v9241_v40 = vmax.f32 %v9239_v36, %v9240_v2  ;;  %v12310_v24 = vpack.c.bf16 %v9415_v43, %v9415_v43  ;;  %v12311_v35 = vpack.c.bf16 %v9418_v61, %v9418_v61 }
 0x5c1   : > { %v9558_v1 = vpack.c.b16 %v9550_v25, %v9550_v25  ;;  %v9529_v50 = vunpack.c.l.b16 %v12309_v28  ;;  %v9134_v62 = vrot.slane %v9120_v6, %v17611_v9  ;;  %v9135_v33 = vcombine.high %v9127_v41, %v9127_v41  ;;  %v13468_v6 = vld [vmem:[%s17455_s5 + $0x48] sm:$0xff]  }
 0x5c2   : > { %v9420_v16 = vsel %vm7093_vm4, %v9241_v40, -inf  ;;  %v9530_v11 = vunpack.c.l.b16 %v12310_v24  ;;  %v9531_v34 = vunpack.c.l.b16 %v12311_v35  ;;  %v9354_v52 = vsel %vm6196_vm1, %v9127_v41, -inf  ;;  %v13469_v24 = vld [vmem:[%s17455_s5 + $0x8] sm:$0xff]   ;;  %12568 = vmatprep.subr.bf16.mxu1 %v13468_v6 }
 0x5c3   : > { %v9573_v10 = vsel %vm16942_vm15, %v9558_v1, %v9572_v42  ;;  %v9421_v54 = vmax.f32 %v16909_v49, %v9420_v16  ;;  %v9136_v0 = vcombine.high %v9134_v62, %v9134_v62  ;;  %v9355_v23 = vrot.slane %v9354_v52, 4  ;;  %12569 = vmatpush3.bf16.msra.mxu1 %v13469_v24 }
 0x5c4   : > { %9574 = vst [vmem:[#allocation4 + $0x8] sm:$0x7] %v9573_v10  ;;  %v9545_v5 = vsel %vm7628_vm5, %v9530_v11, %v9529_v50  ;;  %v9361_v46 = vsel %vm6196_vm1, %v9135_v33, -inf  ;;  %v9368_v8 = vsel %vm6196_vm1, %v9134_v62, -inf  ;;  %v8988_v53 = vadd.f32 %v16858_v4, %v16834_v51 }
 0x5c5   : > { %v12312_v18 = vpack.c.bf16 %v9421_v54, %v9421_v54  ;;  %v9546_v55 = vsel %vm7630_vm7, %v9531_v34, %v9545_v5  ;;  %v9356_v32 = vmax.f32 %v9354_v52, %v9355_v23  ;;  %v9362_v29 = vrot.slane %v9361_v46, 4 }
 0x5c6   : > { %v9369_v57 = vrot.slane %v9368_v8, 4  ;;  %v9375_v49 = vsel %vm6196_vm1, %v9136_v0, -inf  ;;  %v9006_v48 = vmax.f32 %v8988_v53, 0.0  ;;  %v8999_v30 = vadd.f32 %v16860_v7, %v16840_v38 }
 0x5c7   : > { %v9532_v26 = vunpack.c.l.b16 %v12312_v18  ;;  %v9357_v60 = vrot.slane %v9356_v32, 2  ;;  %v9363_v15 = vmax.f32 %v9361_v46, %v9362_v29  ;;  %v9376_v21 = vrot.slane %v9375_v49, 4 }
 0x5c8   : > { %v9370_v20 = vmax.f32 %v9368_v8, %v9369_v57  ;;  %v9086_v59 = vcombine.high %v9006_v48, %v9006_v48  ;;  %v9093_v51 = vrot.slane %v9006_v48, %v17611_v9  ;;  %v9009_v47 = vmax.f32 %v8999_v30, 0.0 }
 0x5c9   : > { %v9547_v4 = vsel %vm7632_vm8, %v9532_v26, %v9546_v55  ;;  %v9358_v45 = vmax.f32 %v9356_v32, %v9357_v60  ;;  %v9364_v63 = vrot.slane %v9363_v15, 2  ;;  %v9377_v3 = vmax.f32 %v9375_v49, %v9376_v21 }
 0x5ca   : > { %v9557_v17 = vpack.c.b16 %v9547_v4, %v9547_v4  ;;  %v9371_v14 = vrot.slane %v9370_v20, 2  ;;  %v9100_v44 = vrot.slane %v9086_v59, %v17611_v9  ;;  %v9101_v36 = vcombine.high %v9093_v51, %v9093_v51 }
 0x5cb   : > { %v9365_v38 = vmax.f32 %v9363_v15, %v9364_v63  ;;  %v9378_v7 = vrot.slane %v9377_v3, 2  ;;  %v9298_v12 = vsel %vm6196_vm1, %v9093_v51, -inf  ;;  %v13449_v2 = vld [vmem:[#allocation4 + $0x8] ss:$0 sps:$4 sm:$0x33]   ;;  %v9359_v43 = vrot.slane %v9358_v45, 1 }
 0x5cc   : > { %v9570_v31 = vsel %vm16942_vm15, %v9557_v17, %v9569_v13  ;;  %v9372_v37 = vmax.f32 %v9370_v20, %v9371_v14  ;;  %v9102_v56 = vcombine.high %v9100_v44, %v9100_v44  ;;  %v9299_v39 = vrot.slane %v9298_v12, 4  ;;  %9696 = vrot.lane.b32.xlu1 %v13449_v2, %s13684_s24 }
 0x5cd   : > { %9571 = vst [vmem:[#allocation4 + $0x4] sm:$0x7] %v9570_v31  ;;  %v9366_v61 = vrot.slane %v9365_v38, 1  ;;  %v9379_v22 = vmax.f32 %v9377_v3, %v9378_v7  ;;  %v9305_v28 = vsel %vm6196_vm1, %v9101_v36, -inf  ;;  %v9312_v40 = vsel %vm6196_vm1, %v9100_v44, -inf }
 0x5ce   : > { %v9373_v41 = vrot.slane %v9372_v37, 1  ;;  %v9300_v25 = vmax.f32 %v9298_v12, %v9299_v39  ;;  %v9306_v42 = vrot.slane %v9305_v28, 4  ;;  %v9313_v1 = vrot.slane %v9312_v40, 4 }
 0x5cf   : > { %v9380_v35 = vrot.slane %v9379_v22, 1  ;;  %v9319_v33 = vsel %vm6196_vm1, %v9102_v56, -inf  ;;  %v9360_v16 = vmax.f32 %v9358_v45, %v9359_v43  ;;  %v9367_v11 = vmax.f32 %v9365_v38, %v9366_v61 }
 0x5d0   : > { %v9301_v50 = vrot.slane %v9300_v25, 2  ;;  %v9307_v62 = vmax.f32 %v9305_v28, %v9306_v42  ;;  %v9314_v34 = vmax.f32 %v9312_v40, %v9313_v1  ;;  %v9320_v52 = vrot.slane %v9319_v33, 4 }
 0x5d1   : > { %v9374_v10 = vmax.f32 %v9372_v37, %v9373_v41  ;;  %v9137_v23 = vcombine.high %v9009_v47, %v9009_v47  ;;  %v9381_v5 = vmax.f32 %v9379_v22, %v9380_v35  ;;  %v9144_v53 = vrot.slane %v9009_v47, %v17611_v9 }
 0x5d2   : > { %v9302_v54 = vmax.f32 %v9300_v25, %v9301_v50  ;;  %v9308_v0 = vrot.slane %v9307_v62, 2  ;;  %v9315_v46 = vrot.slane %v9314_v34, 2  ;;  %v9321_v8 = vmax.f32 %v9319_v33, %v9320_v52 }
 0x5d3   : > { %v9151_v32 = vrot.slane %v9137_v23, %v17611_v9  ;;  %v8991_v29 = vadd.f32 %v16865_v58, %v16836_v19  ;;  %v9152_v30 = vcombine.high %v9144_v53, %v9144_v53  ;;  %v9382_v26 = vsel %vm6196_vm1, %v9144_v53, -inf  ;;  %v16986_v19 = vld [vmem:[#allocation4 + $0x8] ss:$0 sps:$4 sm:$0x77]  }
 0x5d4   : > { %v9303_v18 = vrot.slane %v9302_v54, 1  ;;  %v9309_v55 = vmax.f32 %v9307_v62, %v9308_v0  ;;  %v13450_v57 = vld [vmem:[#allocation4 + $0x4] ss:$0 sps:$4 sm:$0x33]   ;;  %v9316_v49 = vmax.f32 %v9314_v34, %v9315_v46  ;;  %v9322_v48 = vrot.slane %v9321_v8, 2 }
 0x5d5   : > { %v9446_v60 = vsel %vm7093_vm4, %v9360_v16, -inf  ;;  %v9153_v21 = vcombine.high %v9151_v32, %v9151_v32  ;;  %v9383_v20 = vrot.slane %v9382_v26, 4  ;;  %9694 = vrot.lane.b32.xlu0 %v13450_v57, %s13684_s24  ;;  %v9389_v4 = vsel %vm6196_vm1, %v9152_v30, -inf }
 0x5d6   : > { %v9310_v15 = vrot.slane %v9309_v55, 1  ;;  %v9304_v59 = vmax.f32 %v9302_v54, %v9303_v18  ;;  %v9317_v51 = vrot.slane %v9316_v49, 1  ;;  %v9396_v13 = vsel %vm6196_vm1, %v9151_v32, -inf }
 0x5d7   : > { %v9449_v58 = vsel %vm7093_vm4, %v9367_v11, -inf  ;;  %v16989_v45 = vmax.f32 %v9321_v8, %v9322_v48  ;;  %v9384_v63 = vmax.f32 %v9382_v26, %v9383_v20  ;;  %v9390_v3 = vrot.slane %v9389_v4, 4 }
 0x5d8   : > { %v9452_v17 = vsel %vm7093_vm4, %v9374_v10, -inf  ;;  %v9455_v14 = vsel %vm7093_vm4, %v9381_v5, -inf  ;;  %v9397_v44 = vrot.slane %v9396_v13, 4  ;;  %v9403_v36 = vsel %vm6196_vm1, %v9153_v21, -inf  ;;  %v13470_v10 = vld [vmem:[%s17455_s5 + $0x50] sm:$0xff]  }
 0x5d9   : > { %v16994_v38 = vmax.f32 %v9309_v55, %v9310_v15  ;;  %v9385_v7 = vrot.slane %v9384_v63, 2  ;;  %v9391_v12 = vmax.f32 %v9389_v4, %v9390_v3  ;;  %v9404_v47 = vrot.slane %v9403_v36, 4  ;;  %12570 = vmatprep.subr.bf16.mxu1 %v13470_v10 }
 0x5da   : > { %v16996_v31 = vmax.f32 %v9316_v49, %v9317_v51  ;;  %v16999_v37 = vsel %vm7093_vm4, %v9304_v59, -inf  ;;  %v9398_v56 = vmax.f32 %v9396_v13, %v9397_v44  ;;  %v9007_v39 = vmax.f32 %v8991_v29, 0.0 }
 0x5db   : > { %v9324_v2 = vrot.slane %v16989_v45, 1  ;;  %v9386_v43 = vmax.f32 %v9384_v63, %v9385_v7  ;;  %v9392_v61 = vrot.slane %v9391_v12, 2  ;;  %v9405_v22 = vmax.f32 %v9403_v36, %v9404_v47 }
 0x5dc   : > { %v9399_v28 = vrot.slane %v9398_v56, 2  ;;  %v9103_v6 = vcombine.high %v9007_v39, %v9007_v39  ;;  %v9110_v41 = vrot.slane %v9007_v39, %v17611_v9  ;;  %v9645_v25 = vshrl.u32 %v16986_v19, 16 }
 0x5dd   : > { %v9387_v42 = vrot.slane %v9386_v43, 1  ;;  %v9393_v40 = vmax.f32 %v9391_v12, %v9392_v61  ;;  %v9406_v24 = vrot.slane %v9405_v22, 2  ;;  %v9647_v35 = vshll.u32 %v16986_v19, 16 }
 0x5de   : > { %v9400_v1 = vmax.f32 %v9398_v56, %v9399_v28  ;;  %v9117_v50 = vrot.slane %v9103_v6, %v17611_v9  ;;  %v9118_v62 = vcombine.high %v9110_v41, %v9110_v41  ;;  %v9326_v33 = vsel %vm6196_vm1, %v9110_v41, -inf  ;;  %v13452_v6 = vld [vmem:[#allocation4 + $0x4] ss:$0 sps:$4 sm:$0x77]  }
 0x5df   : > { %v9388_v16 = vmax.f32 %v9386_v43, %v9387_v42  ;;  %v9394_v11 = vrot.slane %v9393_v40, 1  ;;  %v9407_v34 = vmax.f32 %v9405_v22, %v9406_v24  ;;  %v9327_v52 = vrot.slane %v9326_v33, 4 }
 0x5e0   : > { %v9401_v54 = vrot.slane %v9400_v1, 1  ;;  %v9119_v0 = vcombine.high %v9117_v50, %v9117_v50  ;;  %v9333_v23 = vsel %vm6196_vm1, %v9118_v62, -inf  ;;  %v9340_v5 = vsel %vm6196_vm1, %v9117_v50, -inf }
 0x5e1   : > { %v9395_v46 = vmax.f32 %v9393_v40, %v9394_v11  ;;  %v9408_v8 = vrot.slane %v9407_v34, 1  ;;  %v9447_v53 = vsel %vm7093_vm4, %v9388_v16, -inf  ;;  %v9328_v18 = vmax.f32 %v9326_v33, %v9327_v52  ;;  %v9578_v16 = vld [vmem:[#allocation4 + $0x10] sm:$0x7] }
 0x5e2   : > { %v9402_v55 = vmax.f32 %v9400_v1, %v9401_v54  ;;  %v9448_v32 = vmax.f32 %v9446_v60, %v9447_v53  ;;  %v9334_v29 = vrot.slane %v9333_v23, 4  ;;  %v9341_v57 = vrot.slane %v9340_v5, 4 }
 0x5e3   : > { %v9409_v49 = vmax.f32 %v9407_v34, %v9408_v8  ;;  %v9450_v48 = vsel %vm7093_vm4, %v9395_v46, -inf  ;;  %v9329_v30 = vrot.slane %v9328_v18, 2  ;;  %v9347_v26 = vsel %vm6196_vm1, %v9119_v0, -inf }
 0x5e4   : > { %v9451_v15 = vmax.f32 %v9449_v58, %v9450_v48  ;;  %v9453_v21 = vsel %vm7093_vm4, %v9402_v55, -inf  ;;  %v12321_v20 = vpack.c.bf16 %v9448_v32, %v9448_v32  ;;  %v9335_v59 = vmax.f32 %v9333_v23, %v9334_v29 }
 0x5e5   : > { %v9454_v51 = vmax.f32 %v9452_v17, %v9453_v21  ;;  %v9456_v4 = vsel %vm7093_vm4, %v9409_v49, -inf  ;;  %v9330_v13 = vmax.f32 %v9328_v18, %v9329_v30  ;;  %v9342_v19 = vmax.f32 %v9340_v5, %v9341_v57 }
 0x5e6   : > { %v9457_v63 = vmax.f32 %v9455_v14, %v9456_v4  ;;  %v12322_v60 = vpack.c.bf16 %v9451_v15, %v9451_v15  ;;  %v9541_v3 = vunpack.c.l.b16 %v12321_v20  ;;  %v9336_v44 = vrot.slane %v9335_v59, 2 }
 0x5e7   : > { %v12323_v36 = vpack.c.bf16 %v9454_v51, %v9454_v51  ;;  %v9331_v7 = vrot.slane %v9330_v13, 1  ;;  %v9343_v12 = vrot.slane %v9342_v19, 2  ;;  %v9348_v47 = vrot.slane %v9347_v26, 4 }
 0x5e8   : > { %v12324_v56 = vpack.c.bf16 %v9457_v63, %v9457_v63  ;;  %v9542_v39 = vunpack.c.l.b16 %v12322_v60  ;;  %v9337_v58 = vmax.f32 %v9335_v59, %v9336_v44  ;;  %v9649_v43 = vrot.slane %v9647_v35, 1  ;;  %v13474_v44 = vld [vmem:[%s17455_s5 + $0x18] sm:$0xff]  }
 0x5e9   : > { %v9543_v61 = vunpack.c.l.b16 %v12323_v36  ;;  %v9332_v22 = vmax.f32 %v9330_v13, %v9331_v7  ;;  %v9344_v28 = vmax.f32 %v9342_v19, %v9343_v12  ;;  %v9349_v17 = vmax.f32 %v9347_v26, %v9348_v47  ;;  %v9575_v19 = vld [vmem:[#allocation4 + $0xc] sm:$0x7]  ;;  %v13476_v36 = vld [vmem:[%s17455_s5 + $0x60] sm:$0xff]   ;;  %v13479_v7 = vld [vmem:[%s17455_s5 + $0x68] sm:$0xff]  }
 0x5ea   : > { %v9544_v41 = vunpack.c.l.b16 %v12324_v56  ;;  %v9554_v42 = vsel %vm7628_vm5, %v9542_v39, %v9541_v3  ;;  %v9338_v14 = vrot.slane %v9337_v58, 1  ;;  %v9650_v40 = vor.u32 %v9649_v43, %v9645_v25  ;;  %v13471_v25 = vld [vmem:[%s17455_s5 + $0x10] sm:$0xff]   ;;  %v13473_v3 = vld [vmem:[%s17455_s5 + $0x58] sm:$0xff]   ;;  %v13454_v12 = vld [vmem:[#allocation4 + $0x4] ss:$0 sps:$4 sm:$0x66]  }
 0x5eb   : > { %v9555_v24 = vsel %vm7630_vm7, %v9543_v61, %v9554_v42  ;;  %v9345_v1 = vrot.slane %v9344_v28, 1  ;;  %v9350_v50 = vrot.slane %v9349_v17, 2  ;;  %v9435_v62 = vsel %vm7093_vm4, %v9332_v22, -inf  ;;  %12571 = vmatpush3.bf16.msra.mxu1 %v13471_v25  ;;  %v13458_v47 = vld [vmem:[#allocation4 + $0x8] ss:$0 sps:$4 sm:$0x77]  }
 0x5ec   : > { %v9437_v33 = vsel %vm7093_vm4, %v16994_v38, -inf  ;;  %v9556_v35 = vsel %vm7632_vm8, %v9544_v41, %v9555_v24  ;;  %v9339_v11 = vmax.f32 %v9337_v58, %v9338_v14  ;;  %v9436_v34 = vmax.f32 %v16999_v37, %v9435_v62  ;;  %9662 = vrot.lane.b32.xlu0 %v9650_v40, %s13684_s24  ;;  %12572 = vmatprep.subr.bf16.mxu1 %v13473_v3  ;;  %v13481_v41 = vld [vmem:[%s17455_s5 + $0x28] sm:$0xff]   ;;  %v13482_v14 = vld [vmem:[%s17455_s5 + $0x70] sm:$0xff]   ;;  %v13485_v62 = vld [vmem:[%s17455_s5 + $0x78] sm:$0xff]  }
 0x5ed   : > { %v9560_v52 = vpack.c.b16 %v9556_v35, %v9556_v35  ;;  %v9346_v10 = vmax.f32 %v9344_v28, %v9345_v1  ;;  %v9351_v54 = vmax.f32 %v9349_v17, %v9350_v50  ;;  %v9640_v0 = vshll.u32 %v13452_v6, 16  ;;  %v13484_v50 = vld [vmem:[%s17455_s5 + $0x30] sm:$0xff]  }
 0x5ee   : > { %v9325_v38 = vmax.f32 %v16989_v45, %v9324_v2  ;;  %v9440_v23 = vsel %vm7093_vm4, %v16996_v31, -inf  ;;  %v9438_v5 = vsel %vm7093_vm4, %v9339_v11, -inf  ;;  %v12317_v37 = vpack.c.bf16 %v9436_v34, %v9436_v34  ;;  %v13459_v35 = vld [vmem:[#allocation4 + $0x8] ss:$0 sps:$4 sm:$0x66]  }
 0x5ef   : > { %v9579_v46 = vsel %vm16942_vm15, %v9560_v52, %v9578_v16  ;;  %v9352_v8 = vrot.slane %v9351_v54, 1  ;;  %v9439_v53 = vmax.f32 %v9437_v33, %v9438_v5  ;;  %v9441_v18 = vsel %vm7093_vm4, %v9346_v10, -inf  ;;  %12573 = vmatpush3.bf16.msra.mxu1 %v13474_v44  ;;  %v13487_v52 = vld [vmem:[%s17455_s5 + $0x38] sm:$0xff]  }
 0x5f0   : > { %9580 = vst [vmem:[#allocation4 + $0x10] sm:$0x7] %v9579_v46  ;;  %v9442_v55 = vmax.f32 %v9440_v23, %v9441_v18  ;;  %v9638_v32 = vshrl.u32 %v13452_v6, 16  ;;  %v9642_v29 = vrot.slane %v9640_v0, 1  ;;  %v9443_v31 = vsel %vm7093_vm4, %v9325_v38, -inf  ;;  %12574 = vmatprep.subr.bf16.mxu1 %v13476_v36 }
 0x5f1   : > { %v9353_v57 = vmax.f32 %v9351_v54, %v9352_v8  ;;  %v12318_v45 = vpack.c.bf16 %v9439_v53, %v9439_v53  ;;  %v9537_v30 = vunpack.c.l.b16 %v12317_v37  ;;  %v9754_v58 = vrot.slane %v13454_v12, 1  ;;  %v13463_v10 = vld [vmem:[#allocation4 + $0x14] ss:$0 sps:$4 sm:$0x77]   ;;  %v13488_v54 = vld [vmem:[%s17455_s5 + $0xc0] sm:$0xff]  }
 0x5f2   : > { %v12319_v2 = vpack.c.bf16 %v9442_v55, %v9442_v55  ;;  %v9643_v49 = vor.u32 %v9642_v29, %v9638_v32  ;;  %v9781_v28 = vshll.u32 %v13458_v47, 16  ;;  %v9779_v33 = vshrl.u32 %v13458_v47, 16 }
 0x5f3   : > { %v9444_v48 = vsel %vm7093_vm4, %v9353_v57, -inf  ;;  %v9538_v26 = vunpack.c.l.b16 %v12318_v45  ;;  %12575 = vmatpush3.bf16.msra.mxu1 %v13477_v27  ;;  %v9755_v38 = vrot.slane %v13459_v35, 1  ;;  %v9802_v46 = vshll.u32 %v13463_v10, 16  ;;  %v9659_v45 = vpop.permute.xlu0 %9658 }
 0x5f4   : > { %v9445_v15 = vmax.f32 %v9443_v31, %v9444_v48  ;;  %v9539_v21 = vunpack.c.l.b16 %v12319_v2  ;;  %9660 = vrot.lane.b32.xlu1 %v9643_v49, %s13684_s24  ;;  %12576 = vmatprep.subr.bf16.mxu1 %v13479_v7  ;;  %v9783_v24 = vrot.slane %v9781_v28, 1  ;;  %v9800_v55 = vshrl.u32 %v13463_v10, 16  ;;  %v13467_v48 = vld [vmem:[#allocation4] ss:$0 sps:$4 sm:$0x66]  }
 0x5f5   : > { %v9551_v20 = vsel %vm7628_vm5, %v9538_v26, %v9537_v30  ;;  %v9804_v32 = vrot.slane %v9802_v46, 1  ;;  %v13466_v30 = vld [vmem:[#allocation4 + $0x4] ss:$0 sps:$4 sm:$0x66]  }
 0x5f6   : > { %v12320_v59 = vpack.c.bf16 %v9445_v15, %v9445_v15  ;;  %v9552_v51 = vsel %vm7630_vm7, %v9539_v21, %v9551_v20  ;;  %v9784_v34 = vor.u32 %v9783_v24, %v9779_v33  ;;  %v9678_v21 = vrot.slane %v13467_v48, 1  ;;  %v13472_v20 = vld [vmem:[#allocation4 + $0x8] ss:$0 sps:$4 sm:$0x66]   ;;  %vm17224_vm7 = vmand %vm6196_vm1, %vm10680_vm3 }
 0x5f7   : > { %v13460_v61 = vld [vmem:[#allocation4 + $0x10] ss:$0 sps:$4 sm:$0x77]   ;;  %12577 = vmatpush3.bf16.msra.mxu1 %v13481_v41  ;;  %v9805_v57 = vor.u32 %v9804_v32, %v9800_v55  ;;  %v9680_v44 = vrot.slane %v13472_v20, 1  ;;  %v9606_v55 = vld [vmem:[#allocation4 + $0x8] sm:$0x3] }
 0x5f8   : > { %v9540_v4 = vunpack.c.l.b16 %v12320_v59  ;;  %v9795_v1 = vshll.u32 %v13460_v61, 16  ;;  %12578 = vmatprep.subr.bf16.mxu1 %v13482_v14  ;;  %v13457_v16 = vld [vmem:[#allocation4 + $0x10] ss:$0 sps:$4 sm:$0x33]   ;;  %v9793_v0 = vshrl.u32 %v13460_v61, 16 }
 0x5f9   : > { %v13461_v23 = vld [vmem:[#allocation4 + $0x10] ss:$0 sps:$4 sm:$0x66]   ;;  %v9581_v59 = vld [vmem:[#allocation4] sm:$0x3] }
 0x5fa   : > { %v9553_v13 = vsel %vm7632_vm8, %v9540_v4, %v9552_v51  ;;  %v9797_v25 = vrot.slane %v9795_v1, 1  ;;  %v9757_v8 = vrot.slane %v13461_v23, 1  ;;  %v9582_v51 = vld [vmem:[#allocation4 + $0x4] sm:$0x3]  ;;  %v9679_v4 = vrot.slane %v13466_v30, 1 }
 0x5fb   : > { %v9559_v63 = vpack.c.b16 %v9553_v13, %v9553_v13  ;;  %12579 = vmatpush3.bf16.msra.mxu1 %v13484_v50  ;;  %v13486_v33 = vld [vmem:[#allocation4 + $0x10] ss:$0 sps:$4 sm:$0x77]   ;;  %v13490_v30 = vld [vmem:[%s17455_s5 + $0xc8] sm:$0xff]  }
 0x5fc   : > { %12580 = vmatprep.subr.bf16.mxu1 %v13485_v62  ;;  %v9798_v37 = vor.u32 %v9797_v25, %v9793_v0 }
 0x5fd   : > { %v9576_v60 = vsel %vm16942_vm15, %v9559_v63, %v9575_v19  ;;  %v9832_v63 = vsel %vm7093_vm4, %v9581_v59, %v9659_v45  ;;  %v13489_v45 = vld [vmem:[%s17455_s5 + $0x80] sm:$0xff]  }
 0x5fe   : > { %9577 = vst [vmem:[#allocation4 + $0xc] sm:$0x7] %v9576_v60 }
 0x5ff   : > { %12581 = vmatpush3.bf16.msra.mxu1 %v13487_v52 }
 0x600   : > { %12588 = vmatprep.subr.bf16.mxu1 %v13488_v54 }
 0x605   : > { %v13453_v56 = vld [vmem:[#allocation4 + $0xc] ss:$0 sps:$4 sm:$0x33]  }
 0x606   : > { %v13455_v39 = vld [vmem:[#allocation4 + $0xc] ss:$0 sps:$4 sm:$0x77]   ;;  %9698 = vrot.lane.b32.xlu0 %v13453_v56, %s13684_s24  ;;  %v9583_v56 = vld [vmem:[#allocation4 + $0x8] sm:$0x3] }
 0x607   : > { %v9654_v43 = vshll.u32 %v13455_v39, 16  ;;  %v13456_v22 = vld [vmem:[#allocation4 + $0xc] ss:$0 sps:$4 sm:$0x66]   ;;  %v9652_v17 = vshrl.u32 %v13455_v39, 16 }
 0x608   : > { %v9756_v40 = vrot.slane %v13456_v22, 1  ;;  %v13462_v11 = vld [vmem:[#allocation4 + $0xc] ss:$0 sps:$4 sm:$0x77]  }
 0x609   : > { %v9656_v6 = vrot.slane %v9654_v43, 1  ;;  %v9788_v5 = vshll.u32 %v13462_v11, 16  ;;  %v9786_v18 = vshrl.u32 %v13462_v11, 16  ;;  %v13480_v36 = vld [vmem:[#allocation4 + $0xc] ss:$0 sps:$4 sm:$0x66]  }
 0x60a   : > { %9758 = vrot.lane.b32.xlu0 %v9754_v58, %s13684_s24  ;;  %v13475_v39 = vld [vmem:[#allocation4 + $0x4] ss:$0 sps:$4 sm:$0x77]   ;;  %v9681_v61 = vrot.slane %v13480_v36, 1  ;;  %v9607_v20 = vld [vmem:[#allocation4 + $0xc] sm:$0x3] }
 0x60b   : > { %v9657_v42 = vor.u32 %v9656_v6, %v9652_v17  ;;  %v9790_v53 = vrot.slane %v9788_v5, 1  ;;  %v13483_v22 = vld [vmem:[#allocation4 + $0x8] ss:$0 sps:$4 sm:$0x77]   ;;  %v9584_v6 = vld [vmem:[#allocation4 + $0xc] sm:$0x3] }
 0x60c   : > { %v13478_v41 = vld [vmem:[#allocation4 + $0xc] ss:$0 sps:$4 sm:$0x77]   ;;  %v9717_v50 = vshll.u32 %v13475_v39, 16  ;;  %v9724_v62 = vshll.u32 %v13483_v22, 16  ;;  %v13491_v36 = vld [vmem:[%s17455_s5 + $0x88] sm:$0xff]  }
 0x60d   : > { %9664 = vrot.lane.b32.xlu1 %v9657_v42, %s13684_s24  ;;  %v9791_v29 = vor.u32 %v9790_v53, %v9786_v18  ;;  %v9731_v11 = vshll.u32 %v13478_v41, 16  ;;  %v9722_v53 = vshrl.u32 %v13483_v22, 16  ;;  %v9729_v18 = vshrl.u32 %v13478_v41, 16 }
 0x60e   : > { %9762 = vrot.lane.b32.xlu0 %v9756_v40, %s13684_s24  ;;  %v9719_v54 = vrot.slane %v9717_v50, 1  ;;  %v9726_v0 = vrot.slane %v9724_v62, 1  ;;  %v13497_v62 = vld [vmem:[%s17455_s5 + $0xa0] sm:$0xff]  }
 0x60f   : > { %v9733_v23 = vrot.slane %v9731_v11, 1  ;;  %v13501_v11 = vld [vmem:[%s17455_s5 + $0xb0] sm:$0xff]  }
 0x611   : > { %9700 = vrot.lane.b32.xlu1 %v13457_v16, %s13684_s24 }
 0x612   : > { %9806 = vrot.lane.b32.xlu0 %v9784_v34, %s13684_s24 }
 0x615   : > { %9760 = vrot.lane.b32.xlu1 %v9755_v38, %s13684_s24  ;;  %v9738_v38 = vshll.u32 %v13486_v33, 16 }
 0x616   : > { %9810 = vrot.lane.b32.xlu0 %v9798_v37, %s13684_s24 }
 0x617   : > { %v9740_v48 = vrot.slane %v9738_v38, 1  ;;  %v13504_v38 = vld [vmem:[%s17455_s5 + $0x100] sm:$0xff]  }
 0x619   : > { %9764 = vrot.lane.b32.xlu1 %v9757_v8, %s13684_s24  ;;  %v9715_v8 = vshrl.u32 %v13475_v39, 16 }
 0x61d   : > { %9808 = vrot.lane.b32.xlu1 %v9791_v29, %s13684_s24 }
 0x621   : > { %9812 = vrot.lane.b32.xlu1 %v9805_v57, %s13684_s24 }
 0x63e   : > { %v9697_v31 = vpop.permute.xlu1 %9696 }
 0x63f   : > { %v9847_v60 = vsel %vm7093_vm4, %v9679_v4, %v9697_v31  ;;  %v9727_v31 = vor.u32 %v9726_v0, %v9722_v53  ;;  %v13508_v0 = vld [vmem:[#allocation4 + $0x8] ss:$0 sps:$4 sm:$0x66]  }
 0x640   : > { %v9826_v53 = vrot.slane %v13508_v0, 1 }
 0x647   : > { %v9695_v2 = vpop.permute.xlu0 %9694 }
 0x648   : > { %v9844_v3 = vsel %vm7093_vm4, %v9678_v21, %v9695_v2  ;;  %v9720_v2 = vor.u32 %v9719_v54, %v9715_v8  ;;  %v9736_v21 = vshrl.u32 %v13486_v33, 16  ;;  %v13498_v33 = vld [vmem:[%s17455_s5 + $0xe8] sm:$0xff]   ;;  %v13510_v54 = vld [vmem:[#allocation4 + $0x10] ss:$0 sps:$4 sm:$0x66]  }
 0x649   : > { %v9894_v47 = vcombine.low %v9832_v63, %v9844_v3  ;;  %v9828_v8 = vrot.slane %v13510_v54, 1 }
 0x64b   : > { %v9902_v24 = vrot.slane %v9894_v47, %v17611_v9 }
 0x65e   : > { %v9663_v49 = vpop.permute.xlu0 %9662 }
 0x65f   : > { %v9838_v43 = vsel %vm7093_vm4, %v9583_v56, %v9663_v49 }
 0x666   : > { %v9661_v15 = vpop.permute.xlu1 %9660 }
 0x667   : > { %v9835_v13 = vsel %vm7093_vm4, %v9582_v51, %v9661_v15  ;;  %v9608_v15 = vld [vmem:[#allocation4 + $0x10] sm:$0x3] }
 0x668   : > { %v9918_v27 = vcombine.low %v9835_v13, %v9847_v60 }
 0x66a   : > { %v9926_v28 = vrot.slane %v9918_v27, %v17611_v9 }
 0x66c   : > { %v12138_v35 = vcombine.low %v9902_v24, %v9926_v28  ;;  %v13494_v28 = vld [vmem:[%s17455_s5 + $0xd8] sm:$0xff]  }
 0x66e   : > { %v10079_v37 = vrot.slane %v12138_v35, %v17611_v9  ;;  %v13499_v35 = vld [vmem:[%s17455_s5 + $0xa8] sm:$0xff]  }
 0x678   : > { %v9699_v26 = vpop.permute.xlu0 %9698 }
 0x679   : > { %v9850_v12 = vsel %vm7093_vm4, %v9680_v44, %v9699_v26  ;;  %v9734_v26 = vor.u32 %v9733_v23, %v9729_v18  ;;  %v9609_v44 = vld [vmem:[#allocation4 + $0x14] sm:$0x3]  ;;  %v13505_v18 = vld [vmem:[%s17455_s5 + $0x108] sm:$0xff]  }
 0x67a   : > { %v9942_v17 = vcombine.low %v9838_v43, %v9850_v12 }
 0x67c   : > { %v9759_v19 = vpop.permute.xlu0 %9758  ;;  %v9950_v16 = vrot.slane %v9942_v17, %v17611_v9 }
 0x67d   : > { %v9856_v51 = vsel %vm7093_vm4, %v9720_v2, %v9759_v19  ;;  %v13492_v19 = vld [vmem:[%s17455_s5 + $0xd0] sm:$0xff]  }
 0x67f   : > { %v9665_v7 = vpop.permute.xlu1 %9664 }
 0x680   : > { %v9763_v58 = vpop.permute.xlu0 %9762  ;;  %v9841_v14 = vsel %vm7093_vm4, %v9584_v6, %v9665_v7  ;;  %v9741_v7 = vor.u32 %v9740_v48, %v9736_v21 }
 0x681   : > { %v9862_v27 = vsel %vm7093_vm4, %v9734_v26, %v9763_v58  ;;  %v13493_v58 = vld [vmem:[%s17455_s5 + $0x90] sm:$0xff]  }
 0x683   : > { %v9701_v42 = vpop.permute.xlu1 %9700 }
 0x684   : > { %v9853_v40 = vsel %vm7093_vm4, %v9681_v61, %v9701_v42  ;;  %v9807_v25 = vpop.permute.xlu0 %9806 }
 0x685   : > { %v9966_v1 = vcombine.low %v9841_v14, %v9853_v40  ;;  %v9868_v49 = vsel %vm7093_vm4, %v9606_v55, %v9807_v25  ;;  %v13495_v14 = vld [vmem:[%s17455_s5 + $0x98] sm:$0xff]   ;;  %v13496_v40 = vld [vmem:[%s17455_s5 + $0xe0] sm:$0xff]  }
 0x686   : > { %v9895_v60 = vcombine.low %v9856_v51, %v9868_v49  ;;  %v13503_v25 = vld [vmem:[%s17455_s5 + $0xb8] sm:$0xff]  }
 0x687   : > { %v9974_v34 = vrot.slane %v9966_v1, %v17611_v9  ;;  %v9761_v52 = vpop.permute.xlu1 %9760 }
 0x688   : > { %v9811_v32 = vpop.permute.xlu0 %9810  ;;  %v9859_v4 = vsel %vm7093_vm4, %v9727_v31, %v9761_v52  ;;  %v9909_v61 = vrot.slane %v9895_v60, %v17611_v9  ;;  %v13511_v52 = vld [vmem:[#allocation4 + $0x14] ss:$0 sps:$4 sm:$0x66]  }
 0x689   : > { %v12140_v10 = vcombine.low %v9950_v16, %v9974_v34  ;;  %v9874_v13 = vsel %vm7093_vm4, %v9608_v15, %v9811_v32  ;;  %v13500_v16 = vld [vmem:[%s17455_s5 + $0xf0] sm:$0xff]   ;;  %v13502_v34 = vld [vmem:[%s17455_s5 + $0xf8] sm:$0xff]   ;;  %v9829_v23 = vrot.slane %v13511_v52, 1  ;;  %v9965_v32 = vrot.slane %v9828_v8, %v17611_v9 }
 0x68a   : > { %v9943_v12 = vcombine.low %v9862_v27, %v9874_v13  ;;  %v13507_v31 = vld [vmem:[%s17455_s5 + $0x118] sm:$0xff]   ;;  %v12179_v15 = vld.sshfl [vmem:[#allocation5] sm:$0x3 pattern:$0x76325410] }
 0x68b   : > { %v9765_v5 = vpop.permute.xlu1 %9764  ;;  %v10093_v46 = vrot.slane %v12140_v10, %v17611_v9  ;;  %v13509_v10 = vld [vmem:[#allocation4 + $0xc] ss:$0 sps:$4 sm:$0x66]   ;;  %v10724_v21 = vshrl.u32 %v12179_v15, 16  ;;  %v12137_v27 = vld [vmem:[%s17456_s6] ss:$0 sm:$0xff] }
 0x68c   : > { %v9865_v39 = vsel %vm7093_vm4, %v9741_v7, %v9765_v5  ;;  %v9957_v17 = vrot.slane %v9943_v12, %v17611_v9 }
 0x68d   : > { %v10101_v29 = vcombine.low %v10079_v37, %v10093_v46  ;;  %v10102_v57 = vcombine.high %v10079_v37, %v10093_v46  ;;  %v13685_v37 = vmov 0.0   ;;  %v9827_v46 = vrot.slane %v13509_v10, 1 }
 0x68f   : > { %10377 = vmatprep.mubr.bf16.mxu1 %v10102_v57  ;;  %v9809_v59 = vpop.permute.xlu1 %9808  ;;  %v9941_v55 = vrot.slane %v9827_v46, %v17611_v9  ;;  %v9917_v57 = vrot.slane %v9826_v53, %v17611_v9 }
 0x690   : > { %v9871_v63 = vsel %vm7093_vm4, %v9607_v20, %v9809_v59  ;;  %10378 = vmatmul.mubr.bf16.vlgmr.msra.gmra.mrb[72].mxu1 %v10101_v29  ;;  %v9989_v29 = vrot.slane %v9829_v23, %v17611_v9  ;;  %v10726_v20 = vshll.u32 %v12179_v15, 16 }
 0x691   : > { %v9919_v3 = vcombine.low %v9859_v4, %v9871_v63  ;;  %12589 = vmatpush3.bf16.msra.mxu1 %v13489_v45  ;;  %v13506_v45 = vld [vmem:[%s17455_s5 + $0x110] sm:$0xff]   ;;  %v10105_v2 = vcombine.low %v9917_v57, %v9941_v55  ;;  %v13512_v4 = vld [vmem:[%s17457_s7 + $0x40] sm:$0xff]  }
 0x692   : > { %12590 = vmatprep.subr.bf16.mxu1 %v13490_v30  ;;  %v10106_v49 = vcombine.low %v9965_v32, %v9989_v29  ;;  %v10728_v59 = vrot.slane %v10726_v20, 1 }
 0x693   : > { %v9933_v47 = vrot.slane %v9919_v3, %v17611_v9  ;;  %v9813_v56 = vpop.permute.xlu1 %9812  ;;  %v10113_v48 = vrot.slane %v10105_v2, %v17611_v9 }
 0x694   : > { %v9877_v43 = vsel %vm7093_vm4, %v9609_v44, %v9813_v56  ;;  %v10120_v30 = vrot.slane %v10106_v49, %v17611_v9  ;;  %v10729_v51 = vor.u32 %v10728_v59, %v10724_v21 }
 0x695   : > { %v9967_v22 = vcombine.low %v9865_v39, %v9877_v43  ;;  %12591 = vmatpush3.bf16.msra.mxu1 %v13491_v36  ;;  %v12139_v6 = vcombine.low %v9909_v61, %v9933_v47 }
 0x696   : > { %12592 = vmatprep.subr.bf16.mxu1 %v13492_v19  ;;  %v10121_v26 = vcombine.low %v10113_v48, %v10120_v30  ;;  %10737 = vrot.lane.b32.xlu0 %v10729_v51, %s13684_s24 }
 0x697   : > { %v9981_v41 = vrot.slane %v9967_v22, %v17611_v9  ;;  %v10086_v24 = vrot.slane %v12139_v6, %v17611_v9 }
 0x699   : > { %v12141_v42 = vcombine.low %v9957_v17, %v9981_v41  ;;  %12593 = vmatpush3.bf16.msra.mxu1 %v13493_v58 }
 0x69a   : > { %12594 = vmatprep.subr.bf16.mxu1 %v13494_v28 }
 0x69b   : > { %v10100_v1 = vrot.slane %v12141_v42, %v17611_v9 }
 0x69d   : > { %12595 = vmatpush3.bf16.msra.mxu1 %v13495_v14  ;;  %v10104_v50 = vcombine.high %v10086_v24, %v10100_v1  ;;  %v10103_v5 = vcombine.low %v10086_v24, %v10100_v1 }
 0x69e   : > { %12596 = vmatprep.subr.bf16.mxu1 %v13496_v40 }
 0x69f   : > { %10418 = vmatprep.mubr.bf16.mxu1 %v10104_v50 }
 0x6a1   : > { %12597 = vmatpush3.bf16.msra.mxu1 %v13497_v62 }
 0x6a2   : > { %12598 = vmatprep.subr.bf16.mxu1 %v13498_v33 }
 0x6a5   : > { %12599 = vmatpush3.bf16.msra.mxu1 %v13499_v35 }
 0x6a6   : > { %12600 = vmatprep.subr.bf16.mxu1 %v13500_v16 }
 0x6a9   : > { %12601 = vmatpush3.bf16.msra.mxu1 %v13501_v11 }
 0x6aa   : > { %12602 = vmatprep.subr.bf16.mxu1 %v13502_v34 }
 0x6ad   : > { %12603 = vmatpush3.bf16.msra.mxu1 %v13503_v25 }
 0x6ae   : > { %12986 = vmatprep.subr.bf16.mxu1 %v13685_v37 }
 0x6b0   : > { %10419 = vmatmul.mubr.bf16.vlgmr.msra.gmra.mrb[76].mxu1 %v10103_v5 }
 0x6b1   : > { %12987 = vmatpush3.bf16.msra.mxu1 %v13504_v38  ;;  %12994 = vmatprep.mubr.msk.bf16.mxu1 %vm13686_vm0, %v13685_v37 }
 0x6b2   : > { %12988 = vmatprep.subr.bf16.mxu1 %v13685_v37 }
 0x6b5   : > { %12989 = vmatpush3.bf16.msra.mxu1 %v13505_v18 }
 0x6b6   : > { %12990 = vmatprep.subr.bf16.mxu1 %v13685_v37 }
 0x6b9   : > { %12991 = vmatpush3.bf16.msra.mxu1 %v13506_v45 }
 0x6ba   : > { %12992 = vmatprep.subr.bf16.mxu1 %v13685_v37 }
 0x6bd   : > { %12993 = vmatpush3.bf16.msra.mxu1 %v13507_v31 }
 0x6be   : > { %12615 = vmatprep.subr.bf16.mxu1 %v13512_v4 }
 0x6c0   : > { %12995 = vmatmul.mubr.msk.bf16.vlgmr.msra.gmra.mrb[80].mxu1 %vm7093_vm4, %v10121_v26 }
 0x763   : > { %v12582_v13 = vpop.f32.mrb[72].mxu1 }
 0x764   : > { %v12583_v63 = vpop.f32.mrb[73].mxu1 }
 0x765   : > { %v12584_v60 = vadd.f32 %v12583_v63, %v12582_v13  ;;  %v12585_v3 = vpop.f32.mrb[74].mxu1 }
 0x766   : > { %v12586_v44 = vpop.f32.mrb[75].mxu1 }
 0x767   : > { %v12587_v36 = vadd.f32 %v12586_v44, %v12585_v3  ;;  %v10380_v12 = vadd.f32 %v12584_v60, %v12137_v27 }
 0x769   : > { %v10383_v43 = vadd.f32 %v12587_v36, %v12137_v27 }
 0x783   : > { %v12604_v7 = vpop.f32.mrb[76].mxu1 }
 0x784   : > { %v12605_v19 = vpop.f32.mrb[77].mxu1 }
 0x785   : > { %v12606_v47 = vadd.f32 %v12605_v19, %v12604_v7  ;;  %v12607_v56 = vpop.f32.mrb[78].mxu1 }
 0x786   : > { %v12608_v39 = vpop.f32.mrb[79].mxu1 }
 0x787   : > { %v12609_v61 = vadd.f32 %v12608_v39, %v12607_v56  ;;  %v10421_v22 = vadd.f32 %v12606_v47, %v10380_v12 }
 0x789   : > { %v10424_v58 = vadd.f32 %v12609_v61, %v10383_v43 }
 0x793   : > { %v10461_v28 = vpop.f32.mrb[80].mxu1 }
 0x794   : > { %v10462_v17 = vadd.f32 %v10461_v28, %v10421_v22  ;;  %v12996_v6 = vpop.f32.mrb[81].mxu1 }
 0x795   : > { %v10464_v41 = vpop.f32.mrb[82].mxu1 }
 0x796   : > { %v10468_v42 = vmax.f32 %v10462_v17, 0.0  ;;  %v10465_v14 = vadd.f32 %v10464_v41, %v10424_v58  ;;  %v12997_v40 = vpop.f32.mrb[83].mxu1 }
 0x798   : > { %v10472_v24 = vcombine.high %v10468_v42, %v10468_v42  ;;  %v10479_v1 = vrot.slane %v10468_v42, %v17611_v9  ;;  %v10469_v50 = vmax.f32 %v10465_v14, 0.0 }
 0x79a   : > { %v10486_v62 = vrot.slane %v10472_v24, %v17611_v9  ;;  %v10487_v33 = vcombine.high %v10479_v1, %v10479_v1  ;;  %v10514_v35 = vsel %vm6196_vm1, %v10479_v1, -inf  ;;  %v10489_v16 = vcombine.high %v10469_v50, %v10469_v50 }
 0x79b   : > { %v10515_v11 = vrot.slane %v10514_v35, 4  ;;  %v10496_v34 = vrot.slane %v10469_v50, %v17611_v9 }
 0x79c   : > { %v10488_v25 = vcombine.high %v10486_v62, %v10486_v62  ;;  %v10521_v52 = vsel %vm6196_vm1, %v10487_v33, -inf  ;;  %v10528_v10 = vsel %vm6196_vm1, %v10486_v62, -inf  ;;  %v10503_v54 = vrot.slane %v10489_v16, %v17611_v9 }
 0x79d   : > { %v10516_v0 = vmax.f32 %v10514_v35, %v10515_v11  ;;  %v10522_v38 = vrot.slane %v10521_v52, 4  ;;  %v10529_v23 = vrot.slane %v10528_v10, 4  ;;  %v10504_v5 = vcombine.high %v10496_v34, %v10496_v34 }
 0x79e   : > { %v10535_v46 = vsel %vm6196_vm1, %v10488_v25, -inf  ;;  %v10505_v8 = vcombine.high %v10503_v54, %v10503_v54  ;;  %v10542_v53 = vsel %vm6196_vm1, %v10496_v34, -inf  ;;  %v10556_v18 = vsel %vm6196_vm1, %v10503_v54, -inf }
 0x79f   : > { %v10517_v55 = vrot.slane %v10516_v0, 2  ;;  %v10523_v32 = vmax.f32 %v10521_v52, %v10522_v38  ;;  %v10530_v29 = vmax.f32 %v10528_v10, %v10529_v23  ;;  %v10536_v57 = vrot.slane %v10535_v46, 4 }
 0x7a0   : > { %v10543_v45 = vrot.slane %v10542_v53, 4  ;;  %v10549_v2 = vsel %vm6196_vm1, %v10504_v5, -inf  ;;  %v10557_v49 = vrot.slane %v10556_v18, 4  ;;  %v10563_v31 = vsel %vm6196_vm1, %v10505_v8, -inf }
 0x7a1   : > { %v10518_v48 = vmax.f32 %v10516_v0, %v10517_v55  ;;  %v10524_v30 = vrot.slane %v10523_v32, 2  ;;  %v10531_v26 = vrot.slane %v10530_v29, 2  ;;  %v10537_v15 = vmax.f32 %v10535_v46, %v10536_v57 }
 0x7a2   : > { %v10544_v21 = vmax.f32 %v10542_v53, %v10543_v45  ;;  %v10550_v20 = vrot.slane %v10549_v2, 4  ;;  %v10558_v59 = vmax.f32 %v10556_v18, %v10557_v49  ;;  %v10564_v51 = vrot.slane %v10563_v31, 4 }
 0x7a3   : > { %v10519_v4 = vrot.slane %v10518_v48, 1  ;;  %v10525_v13 = vmax.f32 %v10523_v32, %v10524_v30  ;;  %v10532_v63 = vmax.f32 %v10530_v29, %v10531_v26  ;;  %v10538_v60 = vrot.slane %v10537_v15, 2 }
 0x7a4   : > { %v10545_v3 = vrot.slane %v10544_v21, 2  ;;  %v10551_v44 = vmax.f32 %v10549_v2, %v10550_v20  ;;  %v10559_v36 = vrot.slane %v10558_v59, 2  ;;  %v10565_v27 = vmax.f32 %v10563_v31, %v10564_v51 }
 0x7a5   : > { %v10520_v7 = vmax.f32 %v10518_v48, %v10519_v4  ;;  %v10526_v19 = vrot.slane %v10525_v13, 1  ;;  %v10533_v12 = vrot.slane %v10532_v63, 1  ;;  %v10539_v47 = vmax.f32 %v10537_v15, %v10538_v60 }
 0x7a6   : > { %v10546_v56 = vmax.f32 %v10544_v21, %v10545_v3  ;;  %v10552_v39 = vrot.slane %v10551_v44, 2  ;;  %v10560_v43 = vmax.f32 %v10558_v59, %v10559_v36  ;;  %v10566_v61 = vrot.slane %v10565_v27, 2  ;;  %v13513_v36 = vld [vmem:[%s17457_s7] sm:$0xff]  }
 0x7a7   : > { %v10527_v22 = vmax.f32 %v10525_v13, %v10526_v19  ;;  %v10534_v58 = vmax.f32 %v10532_v63, %v10533_v12  ;;  %v10540_v28 = vrot.slane %v10539_v47, 1  ;;  %v10570_v40 = vsel %vm7093_vm4, %v10520_v7, -inf  ;;  %v10682_v13 = vld [vmem:[#allocation5 + $0x2] sm:$0x3]  ;;  %v13514_v19 = vld [vmem:[%s17457_s7 + $0x48] sm:$0xff]   ;;  %12616 = vmatpush3.bf16.msra.mxu1 %v13513_v36  ;;  %v17616_v36 = vld [vmem:[#allocation22_spill] sm:$0xff] }
 0x7a8   : > { %v10547_v17 = vrot.slane %v10546_v56, 1  ;;  %v10553_v6 = vmax.f32 %v10551_v44, %v10552_v39  ;;  %v10561_v41 = vrot.slane %v10560_v43, 1  ;;  %v10567_v42 = vmax.f32 %v10565_v27, %v10566_v61  ;;  %v10685_v12 = vld [vmem:[#allocation5 + $0x4] sm:$0x3]  ;;  %12617 = vmatprep.subr.bf16.mxu1 %v13514_v19 }
 0x7a9   : > { %v10541_v14 = vmax.f32 %v10539_v47, %v10540_v28  ;;  %v10571_v24 = vsel %vm7093_vm4, %v10534_v58, -inf  ;;  %v10573_v35 = vsel %vm7093_vm4, %v10527_v22, -inf  ;;  %v13515_v47 = vld [vmem:[%s17457_s7 + $0x8] sm:$0xff]   ;;  %v13517_v28 = vld [vmem:[%s17457_s7 + $0x10] sm:$0xff]  }
 0x7aa   : > { %v10572_v1 = vmax.f32 %v10570_v40, %v10571_v24  ;;  %v10548_v50 = vmax.f32 %v10546_v56, %v10547_v17  ;;  %v10554_v62 = vrot.slane %v10553_v6, 1  ;;  %v10562_v33 = vmax.f32 %v10560_v43, %v10561_v41  ;;  %v13516_v43 = vld [vmem:[%s17457_s7 + $0x50] sm:$0xff]   ;;  %v12190_v22 = vld.sshfl [vmem:[#allocation5 + $0x6] sm:$0x3 pattern:$0x76325410] }
 0x7ab   : > { %v10574_v16 = vsel %vm7093_vm4, %v10541_v14, -inf  ;;  %v10568_v11 = vrot.slane %v10567_v42, 1  ;;  %12618 = vmatpush3.bf16.msra.mxu1 %v13515_v47  ;;  %v10857_v40 = vshll.u32 %v12190_v22, 16  ;;  %v13518_v24 = vld [vmem:[%s17457_s7 + $0x58] sm:$0xff]  }
 0x7ac   : > { %v10575_v34 = vmax.f32 %v10573_v35, %v10574_v16  ;;  %v10586_v25 = vpack.c.bf16 %v10572_v1, %v10572_v1  ;;  %v10555_v52 = vmax.f32 %v10553_v6, %v10554_v62  ;;  %v10576_v54 = vsel %vm7093_vm4, %v10548_v50, -inf  ;;  %12619 = vmatprep.subr.bf16.mxu1 %v13516_v43  ;;  %v13519_v50 = vld [vmem:[%s17457_s7 + $0x18] sm:$0xff]  }
 0x7ad   : > { %v10569_v10 = vmax.f32 %v10567_v42, %v10568_v11  ;;  %v10577_v0 = vsel %vm7093_vm4, %v10562_v33, -inf  ;;  %v10855_v16 = vshrl.u32 %v12190_v22, 16  ;;  %v13520_v11 = vld [vmem:[%s17457_s7 + $0x60] sm:$0xff]  }
 0x7ae   : > { %v10587_v38 = vpack.c.bf16 %v10575_v34, %v10575_v34  ;;  %v10600_v23 = vrot.slane %v10586_v25, %v17611_v9  ;;  %v10578_v5 = vmax.f32 %v10576_v54, %v10577_v0  ;;  %v10579_v46 = vsel %vm7093_vm4, %v10555_v52, -inf  ;;  %v13521_v54 = vld [vmem:[%s17457_s7 + $0x20] sm:$0xff]  }
 0x7af   : > { %v10580_v8 = vsel %vm7093_vm4, %v10569_v10, -inf  ;;  %12620 = vmatpush3.bf16.msra.mxu1 %v13517_v28  ;;  %v10859_v10 = vrot.slane %v10857_v40, 1 }
 0x7b0   : > { %v10607_v53 = vrot.slane %v10587_v38, %v17611_v9  ;;  %v10628_v18 = vrot.slane %v10600_v23, %v17611_v9  ;;  %v10581_v55 = vmax.f32 %v10579_v46, %v10580_v8  ;;  %v10588_v32 = vpack.c.bf16 %v10578_v5, %v10578_v5  ;;  %12621 = vmatprep.subr.bf16.mxu1 %v13518_v24  ;;  %v13522_v23 = vld [vmem:[%s17457_s7 + $0x68] sm:$0xff]   ;;  %v13524_v8 = vld [vmem:[%s17457_s7 + $0x70] sm:$0xff]  }
 0x7b1   : > { %v13523_v5 = vld [vmem:[%s17457_s7 + $0x28] sm:$0xff]   ;;  %v10860_v46 = vor.u32 %v10859_v10, %v10855_v16  ;;  %v13529_v16 = vld [vmem:[%s17457_s7 + $0x80] sm:$0xff]   ;;  %v13532_v10 = vld [vmem:[%s17457_s7 + $0xd0] sm:$0xff]  }
 0x7b2   : > { %v10635_v29 = vrot.slane %v10607_v53, %v17611_v9  ;;  %v10650_v57 = vunpack.c.l.b16 %v10628_v18  ;;  %v10589_v45 = vpack.c.bf16 %v10581_v55, %v10581_v55  ;;  %v10614_v2 = vrot.slane %v10588_v32, %v17611_v9  ;;  %v13525_v53 = vld [vmem:[%s17457_s7 + $0x30] sm:$0xff]   ;;  %v13526_v18 = vld [vmem:[%s17457_s7 + $0x78] sm:$0xff]   ;;  %v13528_v32 = vld [vmem:[%s17457_s7 + $0xc0] sm:$0xff]  }
 0x7b3   : > { %12622 = vmatpush3.bf16.msra.mxu1 %v13519_v50  ;;  %v13527_v55 = vld [vmem:[%s17457_s7 + $0x38] sm:$0xff]  }
 0x7b4   : > { %v10651_v49 = vunpack.c.l.b16 %v10635_v29  ;;  %v10621_v31 = vrot.slane %v10589_v45, %v17611_v9  ;;  %v10642_v48 = vrot.slane %v10614_v2, %v17611_v9  ;;  %v10654_v30 = vrot.slane %v10650_v57, 7  ;;  %12623 = vmatprep.subr.bf16.mxu1 %v13520_v11  ;;  %v10738_v29 = vpop.permute.xlu0 %10737  ;;  %v12181_v45 = vld.sshfl [vmem:[#allocation5] sm:$0x2 pattern:$0x76325410] }
 0x7b6   : > { %v10655_v26 = vrot.slane %v10651_v49, 6  ;;  %v10649_v15 = vrot.slane %v10621_v31, %v17611_v9  ;;  %v10652_v21 = vunpack.c.l.b16 %v10642_v48  ;;  %v13687_v49 = vmov 1966171168  }
 0x7b7   : > { %12624 = vmatpush3.bf16.msra.mxu1 %v13521_v54  ;;  %v10918_v31 = vunpack.c.l.s4 %v13687_v49  ;;  %v13533_v54 = vld [vmem:[%s17457_s7 + $0x90] sm:$0xff]  }
 0x7b8   : > { %v10656_v20 = vsel %vm7628_vm5, %v10655_v26, %v10654_v30  ;;  %v10653_v59 = vunpack.c.l.b16 %v10649_v15  ;;  %v10657_v63 = vrot.slane %v10652_v21, 7  ;;  %12625 = vmatprep.subr.bf16.mxu1 %v13522_v23  ;;  %v10757_v30 = vrot.slane %v12181_v45, 1  ;;  %v10688_v26 = vld [vmem:[#allocation5] sm:$0x1] }
 0x7b9   : > { %v10660_v51 = vpack.c.b16 %v10656_v20, %v10656_v20  ;;  %v10919_v21 = vunpack.c.0.s8 %v10918_v31  ;;  %v10885_v20 = vsel %vm7093_vm4, %v10688_v26, %v10738_v29  ;;  %v13536_v23 = vld [vmem:[%s17457_s7 + $0xe0] sm:$0xff]   ;;  %v13543_v29 = vld [vmem:[%s17457_s7 + $0xb8] sm:$0xff]  }
 0x7ba   : > { %v10658_v60 = vrot.slane %v10653_v59, 6  ;;  %v13544_v45 = vld [vmem:[%s17457_s7 + $0x100] sm:$0xff]  }
 0x7bb   : > { %v10668_v3 = vrot.slane %v10660_v51, %v17611_v9  ;;  %12626 = vmatpush3.bf16.msra.mxu1 %v13523_v5  ;;  %v13537_v5 = vld [vmem:[%s17457_s7 + $0xa0] sm:$0xff]  }
 0x7bc   : > { %v10659_v44 = vsel %vm7628_vm5, %v10658_v60, %v10657_v63  ;;  %12627 = vmatprep.subr.bf16.mxu1 %v13524_v8  ;;  %v13539_v8 = vld [vmem:[%s17457_s7 + $0xa8] sm:$0xff]  }
 0x7bd   : > { %v10683_v27 = vsel %vm17224_vm7, %v10668_v3, %v10682_v13  ;;  %v10661_v7 = vpack.c.b16 %v10659_v44, %v10659_v44 }
 0x7be   : > { %10684 = vst [vmem:[#allocation5 + $0x2] sm:$0x3] %v10683_v27  ;;  %v17306_v27 = vsub.s32 %v10919_v21, %v17616_v36 }
 0x7bf   : > { %v10675_v56 = vrot.slane %v10661_v7, %v17611_v9  ;;  %12628 = vmatpush3.bf16.msra.mxu1 %v13525_v53  ;;  %v13540_v53 = vld [vmem:[%s17457_s7 + $0xf0] sm:$0xff]  }
 0x7c0   : > { %12629 = vmatprep.subr.bf16.mxu1 %v13526_v18  ;;  %v13541_v18 = vld [vmem:[%s17457_s7 + $0xb0] sm:$0xff]  }
 0x7c1   : > { %v10686_v39 = vsel %vm17224_vm7, %v10675_v56, %v10685_v12  ;;  %v10702_v12 = vld [vmem:[#allocation5 + $0x6] sm:$0x1] }
 0x7c2   : > { %10687 = vst [vmem:[#allocation5 + $0x4] sm:$0x3] %v10686_v39 }
 0x7c3   : > { %12630 = vmatpush3.bf16.msra.mxu1 %v13527_v55  ;;  %v13542_v55 = vld [vmem:[%s17457_s7 + $0xf8] sm:$0xff]  }
 0x7c4   : > { %12637 = vmatprep.subr.bf16.mxu1 %v13528_v32  ;;  %v12192_v32 = vld.sshfl [vmem:[#allocation5 + $0x6] sm:$0x2 pattern:$0x76325410] }
 0x7c5   : > { %v12183_v61 = vld.sshfl [vmem:[#allocation5 + $0x2] sm:$0x1 pattern:$0x76325410] }
 0x7c6   : > { %10775 = vrot.lane.b32.xlu0 %v12183_v61, %s13684_s24  ;;  %v17248_v58 = vld.sshfl [vmem:[#allocation5 + $0x2] sm:$0x2 pattern:$0x76325410]  ;;  %v10689_v63 = vld [vmem:[#allocation5 + $0x2] sm:$0x1] }
 0x7c7   : > { %v12180_v17 = vld.sshfl [vmem:[#allocation5 + $0x2] sm:$0x3 pattern:$0x76325410]  ;;  %v10825_v6 = vrot.slane %v17248_v58, 1 }
 0x7c8   : > { %v10733_v41 = vshll.u32 %v12180_v17, 16  ;;  %v10731_v52 = vshrl.u32 %v12180_v17, 16 }
 0x7c9   : > { %v12184_v42 = vld.sshfl [vmem:[#allocation5 + $0x4] sm:$0x1 pattern:$0x76325410] }
 0x7ca   : > { %10777 = vrot.lane.b32.xlu1 %v12184_v42, %s13684_s24  ;;  %10827 = vrot.lane.b32.xlu0 %v10825_v6, %s13684_s24  ;;  %v17258_v14 = vld.sshfl [vmem:[#allocation5 + $0x4] sm:$0x2 pattern:$0x76325410]  ;;  %v10735_v35 = vrot.slane %v10733_v41, 1 }
 0x7cb   : > { %v12189_v1 = vld.sshfl [vmem:[#allocation5 + $0x4] sm:$0x3 pattern:$0x76325410]  ;;  %v10826_v62 = vrot.slane %v17258_v14, 1  ;;  %v13546_v14 = vld [vmem:[%s17457_s7 + $0x110] sm:$0xff]  }
 0x7cc   : > { %v10850_v33 = vshll.u32 %v12189_v1, 16  ;;  %v10848_v34 = vshrl.u32 %v12189_v1, 16  ;;  %v10736_v38 = vor.u32 %v10735_v35, %v10731_v52  ;;  %v10701_v51 = vld [vmem:[#allocation5 + $0x4] sm:$0x1]  ;;  %v13531_v52 = vld [vmem:[%s17457_s7 + $0x88] sm:$0xff]  }
 0x7cd   : > { %v10937_v49 = vrot.slane %v10826_v62, %v17306_v27 }
 0x7ce   : > { %10829 = vrot.lane.b32.xlu1 %v10826_v62, %s13684_s24  ;;  %v10852_v25 = vrot.slane %v10850_v33, 1 }
 0x7d0   : > { %v10853_v0 = vor.u32 %v10852_v25, %v10848_v34  ;;  %v13530_v34 = vld [vmem:[%s17457_s7 + $0xc8] sm:$0xff]  }
 0x7d2   : > { %10861 = vrot.lane.b32.xlu0 %v10853_v0, %s13684_s24  ;;  %10739 = vrot.lane.b32.xlu1 %v10736_v38, %s13684_s24 }
 0x7d6   : > { %10863 = vrot.lane.b32.xlu1 %v10860_v46, %s13684_s24  ;;  %v13538_v46 = vld [vmem:[%s17457_s7 + $0xe8] sm:$0xff]   ;;  %s13688_s24 = smov [#allocation6]  }
 0x7d7   : > { %s13621_s17 = sshll.u32 %s13688_s24, 4  ;;  %s13622_s17 = int_to_ptr.vmem [resolvable:$false] %s13621_s17 }
 0x7d8   : > { %s13623_s21 = scalar_lea.vmem %s13622_s17, 32  ;;  %p13624_p0 = scmp.lt.s32.totalorder %s17409_s27, %s13622_s17 }
 0x7d9   : > { %p13625_p1 = scmp.lt.s32.totalorder %s13623_s21, %s13617_s16 }
 0x7db   : > { %p13626_p2 = por %p13625_p1, %p13624_p0 }
 0x7dd   : > { %p13627_p3 = pnand %p13626_p2, %p13620_p13 }
 0x838   : > { %v10776_v57 = vpop.permute.xlu0 %10775 }
 0x839   : > { %v10891_v59 = vsel %vm7093_vm4, %v10757_v30, %v10776_v57  ;;  %v10882_v57 = vrot.slane %v12192_v32, 1  ;;  %v10952_v30 = vrot.slane %v10937_v49, %v17306_v27 }
 0x83a   : > { %v10915_v7 = vcombine.low %v10885_v20, %v10891_v59 }
 0x83b   : > { %v10976_v31 = vrot.slane %v10882_v57, %v17306_v27 }
 0x83c   : > { %v10778_v2 = vpop.permute.xlu1 %10777  ;;  %v10828_v48 = vpop.permute.xlu0 %10827  ;;  %v10923_v28 = vrot.slane %v10915_v7, %v17306_v27 }
 0x83d   : > { %v10897_v60 = vsel %vm7093_vm4, %v10736_v38, %v10828_v48  ;;  %v10894_v47 = vsel %vm7093_vm4, %v10825_v6, %v10778_v2  ;;  %v13535_v38 = vld [vmem:[%s17457_s7 + $0x98] sm:$0xff]   ;;  %v13545_v48 = vld [vmem:[%s17457_s7 + $0x108] sm:$0xff]   ;;  %v10991_v26 = vrot.slane %v10976_v31, %v17306_v27 }
 0x83f   : > { %v12195_v62 = vcombine.low %v10952_v30, %v10991_v26 }
 0x840   : > { %v10830_v15 = vpop.permute.xlu1 %10829 }
 0x841   : > { %v10900_v61 = vsel %vm7093_vm4, %v10853_v0, %v10830_v15  ;;  %v13534_v0 = vld [vmem:[%s17457_s7 + $0xd8] sm:$0xff]   ;;  %v11087_v21 = vrot.slane %v12195_v62, %v17306_v27 }
 0x842   : > { %v13547_v15 = vld [vmem:[%s17457_s7 + $0x118] sm:$0xff]  }
 0x843   : > { %v11102_v20 = vrot.slane %v11087_v21, %v17306_v27 }
 0x844   : > { %v10862_v4 = vpop.permute.xlu0 %10861  ;;  %v10740_v13 = vpop.permute.xlu1 %10739 }
 0x845   : > { %v10903_v3 = vsel %vm7093_vm4, %v10701_v51, %v10862_v4  ;;  %v10888_v44 = vsel %vm7093_vm4, %v10689_v63, %v10740_v13 }
 0x846   : > { %v10916_v19 = vcombine.low %v10897_v60, %v10903_v3  ;;  %v10954_v39 = vcombine.low %v10888_v44, %v10894_v47  ;;  %v12193_v60 = vld [vmem:[%s17458_s8] ss:$0 sm:$0xff] }
 0x848   : > { %v10930_v56 = vrot.slane %v10916_v19, %v17306_v27  ;;  %v10864_v43 = vpop.permute.xlu1 %10863  ;;  %v10962_v42 = vrot.slane %v10954_v39, %v17306_v27 }
 0x849   : > { %v10906_v22 = vsel %vm7093_vm4, %v10702_v12, %v10864_v43 }
 0x84a   : > { %v10955_v17 = vcombine.low %v10900_v61, %v10906_v22  ;;  %v10938_v41 = vcombine.low %v10923_v28, %v10930_v56 }
 0x84c   : > { %v10969_v40 = vrot.slane %v10955_v17, %v17306_v27  ;;  %v10945_v58 = vrot.slane %v10938_v41, %v17306_v27 }
 0x84e   : > { %v10977_v24 = vcombine.low %v10962_v42, %v10969_v40 }
 0x850   : > { %v10984_v6 = vrot.slane %v10977_v24, %v17306_v27 }
 0x852   : > { %v12194_v1 = vcombine.low %v10945_v58, %v10984_v6 }
 0x854   : > { %v11080_v50 = vrot.slane %v12194_v1, %v17306_v27 }
 0x856   : > { %v11088_v33 = vcombine.high %v11080_v50, %v11080_v50  ;;  %v11095_v11 = vrot.slane %v11080_v50, %v17306_v27 }
 0x858   : > { %v11109_v35 = vrot.slane %v11088_v33, %v17306_v27  ;;  %v11110_v2 = vcombine.high %v11095_v11, %v11095_v11 }
 0x85a   : > { %11367 = vmatprep.mubr.bf16.mxu1 %v11109_v35  ;;  %v11111_v25 = vcombine.high %v11109_v35, %v11109_v35 }
 0x85b   : > { %11368 = vmatmul.mubr.bf16.vlgmr.msra.gmra.mrb[84].mxu1 %v11095_v11 }
 0x85c   : > { %12638 = vmatpush3.bf16.msra.mxu1 %v13529_v16  ;;  %11407 = vmatprep.mubr.bf16.mxu1 %v11111_v25 }
 0x85d   : > { %12639 = vmatprep.subr.bf16.mxu1 %v13530_v34 }
 0x860   : > { %12640 = vmatpush3.bf16.msra.mxu1 %v13531_v52 }
 0x861   : > { %12641 = vmatprep.subr.bf16.mxu1 %v13532_v10 }
 0x864   : > { %12642 = vmatpush3.bf16.msra.mxu1 %v13533_v54 }
 0x865   : > { %12643 = vmatprep.subr.bf16.mxu1 %v13534_v0 }
 0x868   : > { %12644 = vmatpush3.bf16.msra.mxu1 %v13535_v38 }
 0x869   : > { %12645 = vmatprep.subr.bf16.mxu1 %v13536_v23 }
 0x86c   : > { %12646 = vmatpush3.bf16.msra.mxu1 %v13537_v5 }
 0x86d   : > { %12647 = vmatprep.subr.bf16.mxu1 %v13538_v46 }
 0x870   : > { %12648 = vmatpush3.bf16.msra.mxu1 %v13539_v8 }
 0x871   : > { %12649 = vmatprep.subr.bf16.mxu1 %v13540_v53 }
 0x874   : > { %12650 = vmatpush3.bf16.msra.mxu1 %v13541_v18 }
 0x875   : > { %12651 = vmatprep.subr.bf16.mxu1 %v13542_v55 }
 0x878   : > { %12652 = vmatpush3.bf16.msra.mxu1 %v13543_v29 }
 0x879   : > { %12998 = vmatprep.subr.bf16.mxu1 %v13685_v37 }
 0x87b   : > { %11408 = vmatmul.mubr.bf16.vlgmr.msra.gmra.mrb[88].mxu1 %v11110_v2 }
 0x87c   : > { %12999 = vmatpush3.bf16.msra.mxu1 %v13544_v45  ;;  %13006 = vmatprep.mubr.msk.bf16.mxu1 %vm13686_vm0, %v13685_v37 }
 0x87d   : > { %13000 = vmatprep.subr.bf16.mxu1 %v13685_v37 }
 0x880   : > { %13001 = vmatpush3.bf16.msra.mxu1 %v13545_v48 }
 0x881   : > { %13002 = vmatprep.subr.bf16.mxu1 %v13685_v37 }
 0x884   : > { %13003 = vmatpush3.bf16.msra.mxu1 %v13546_v14 }
 0x885   : > { %13004 = vmatprep.subr.bf16.mxu1 %v13685_v37 }
 0x888   : > { %13005 = vmatpush3.bf16.msra.mxu1 %v13547_v15 }
 0x88b   : > { %13007 = vmatmul.mubr.msk.bf16.vlgmr.msra.gmra.mrb[92].mxu1 %vm7093_vm4, %v11102_v20 }
 0x92e   : > { %v12631_v59 = vpop.f32.mrb[84].mxu1 }
 0x92f   : > { %v12632_v51 = vpop.f32.mrb[85].mxu1 }
 0x930   : > { %v12633_v4 = vadd.f32 %v12632_v51, %v12631_v59  ;;  %v12634_v13 = vpop.f32.mrb[86].mxu1 }
 0x931   : > { %v12635_v63 = vpop.f32.mrb[87].mxu1 }
 0x932   : > { %v11370_v36 = vadd.f32 %v12633_v4, %v12193_v60 }
 0x94e   : > { %v12653_v3 = vpop.f32.mrb[88].mxu1 }
 0x94f   : > { %v12654_v44 = vpop.f32.mrb[89].mxu1 }
 0x950   : > { %v12655_v37 = vadd.f32 %v12654_v44, %v12653_v3  ;;  %v12656_v7 = vpop.f32.mrb[90].mxu1 }
 0x951   : > { %v12657_v19 = vpop.f32.mrb[91].mxu1 }
 0x952   : > { %v11410_v12 = vadd.f32 %v12655_v37, %v11370_v36 }
 0x95e   : > { %v11449_v47 = vpop.f32.mrb[92].mxu1 }
 0x95f   : > { %v11450_v27 = vadd.f32 %v11449_v47, %v11410_v12  ;;  %v13008_v56 = vpop.f32.mrb[93].mxu1 }
 0x960   : > { %v11452_v39 = vpop.f32.mrb[94].mxu1 }
 0x961   : > { %v11455_v43 = vmax.f32 %v11450_v27, 0.0  ;;  %v13009_v61 = vpop.f32.mrb[95].mxu1 }
 0x963   : > { %v11463_v22 = vrot.slane %v11455_v43, %v17611_v9 }
 0x965   : > { %v11464_v28 = vcombine.high %v11463_v22, %v11463_v22  ;;  %v11467_v17 = vsel %vm6196_vm1, %v11463_v22, -inf }
 0x966   : > { %v11468_v41 = vrot.slane %v11467_v17, 4 }
 0x967   : > { %v11474_v42 = vsel %vm6196_vm1, %v11464_v28, -inf }
 0x968   : > { %v11469_v40 = vmax.f32 %v11467_v17, %v11468_v41  ;;  %v11475_v24 = vrot.slane %v11474_v42, 4 }
 0x96a   : > { %v11470_v58 = vrot.slane %v11469_v40, 2  ;;  %v11476_v6 = vmax.f32 %v11474_v42, %v11475_v24 }
 0x96c   : > { %v11471_v1 = vmax.f32 %v11469_v40, %v11470_v58  ;;  %v11477_v50 = vrot.slane %v11476_v6, 2 }
 0x96e   : > { %v11472_v33 = vrot.slane %v11471_v1, 1  ;;  %v11478_v35 = vmax.f32 %v11476_v6, %v11477_v50 }
 0x970   : > { %v11473_v16 = vmax.f32 %v11471_v1, %v11472_v33  ;;  %v11479_v11 = vrot.slane %v11478_v35, 1 }
 0x972   : > { %v11480_v9 = vmax.f32 %v11478_v35, %v11479_v11  ;;  %v11481_v34 = vsel %vm7093_vm4, %v11473_v16, -inf }
 0x974   : > { %v11482_v25 = vsel %vm7093_vm4, %v11480_v9, -inf }
 0x975   : > { %v11483_v52 = vmax.f32 %v11481_v34, %v11482_v25 }
 0x977   : > { %11484 = vst.msk [vmem:[%s324_s26] sm:$0x1] %vm7288_vm2, %v11483_v52 }
 0x978   : > { %13630 = shalt.err (!%p13627_p3)
}
 0x979   : > { %s13631_s22 = scalar_lea.hbm %s17407_s14, 16  ;;  %s13635_s26 = scalar_lea.hbm %s17459_s9, 32 }
 0x97a   : > { %p13632_p4 = scmp.ne.s32.totalorder %s17407_s14, %s13631_s22  ;;  %p13636_p9 = scmp.lt.u32.totalorder %s17407_s14, %s17459_s9 }
 0x97b   : > { %p13637_p10 = scmp.lt.u32.totalorder %s13635_s26, %s13631_s22  ;;  %p13639_p12 = scmp.lt.u32.totalorder %s13631_s22, %s17407_s14 }
 0x97c   : > { %p13633_p7 = pnand %p13632_p4, %p13777_p5 }
 0x97d   : > { %p13638_p11 = por %p13637_p10, %p13636_p9 }
 0x97e   : > { %p13634_p8 = pneg %p13633_p7 }
 0x97f   : > { %p13640_p13 = por %p13639_p12, %p13638_p11 }
 0x981   : > { %p13641_p0 = pnand %p13640_p13, %p13634_p8 }
 0x983   : > { %13644 = shalt.err (!%p13641_p0)
}
 0x984   : > { %13268 = dma.vmem_to_hbm [thread:$0]  (%p13777_p5), %s17409_s27, 16, %s17407_s14, %s11486_s13  }
 0x985 PF: > { %p13274_p1 = scmp.ge.s32.totalorder %s13679_s12, 2  ;;  %s11510_s16 = sand.u32 1, %s13667_s30  }
 0x986   : > { %s11511_s24 = scalar_lea.sflag [#allocation7], %s11510_s16 }
 0x987   : > { %p13271_p2 = pnand %p13274_p1, %p13781_p6 }
 0x989   : > { %13662 = dma.done.wait (!%p13271_p2), %s11511_s24, 16  }
 0x98a   : > { %13664 = vsyncadd (!%p13271_p2), %s11511_s24, 4294967280  ;;  %p19_p3 = scmp.ge.s32.totalorder %s13764_s15, 4   ;;  %s17617_s30 = smov %s13671_s10 }
 0x98b   : > { %s17618_s10 = smov %s13675_s11  ;;  %s17619_s11 = smov %s13775_s18 }
 0x98c   : > { %s17620_s12 = smov %s13764_s15  ;;  %21 = sbr.rel (!%p19_p3) target bundleno = 3 (0x3), region = 107 }
 0x993   :  { %11515 = vsyncpa [#allocation7], 1 }
 0x994   :  { %11517 = vsyncpa [#allocation7 + $0x1], 1 }

</bundles_post_ra>
